<compile_context>
chip_gen: v5e
topology: v5e:2x2
jax: 0.10.0
libtpu: 0.0.40
codegen_flags: <defaults>
</compile_context>

<pallas_src>
import jax
import jax.numpy as jnp
from jax import lax
from jax.experimental import pallas as pl
from jax.experimental.pallas import tpu as pltpu


def resblock_kernel(x_ref, top_ref, bot_ref, w1_ref, b1_ref, w2_ref, b2_ref, o_ref):
    """Computes TH output rows of one image.

    x_ref  : (TH, W, C) bf16  input row tile  (image rows [t*TH, t*TH+TH))
    top_ref: (2, W, C)  bf16  image rows t*TH-2, t*TH-1   (zeros outside the image)
    bot_ref: (2, W, C)  bf16  image rows t*TH+TH, t*TH+TH+1 (zeros outside the image)
    w1_ref : (9*C, C)   bf16  conv1 weights, rows ordered (ky, kx, cin)
    b1_ref : (1, C)     f32
    w2_ref : (9*C, C)   bf16  conv2 weights
    b2_ref : (1, C)     f32
    o_ref  : (TH, W, C) f32   output row tile
    """
    TH, W, C = x_ref.shape
    Wp = W + 2                               # one zero column each side
    t = pl.program_id(1)
    H = TH * pl.num_programs(1)
    bf16 = jnp.bfloat16

    # ---- assemble padded conv1 input tile as a value (no scratch, no full zero-fill).
    # Rows: [zero guard | 2 halo rows above | TH tile rows | 2 halo rows below | guard].
    # Guard rows only keep the flattened tap slices in-bounds; halo zeros at the image
    # border come pre-filled from the wrapper-side halo arrays.
    zrow = jnp.zeros((1, W, C), bf16)
    rows = jnp.concatenate([zrow, top_ref[...], x_ref[...], bot_ref[...], zrow], axis=0)
    R1 = TH + 6
    zcol = jnp.zeros((R1, 1, C), bf16)
    xpad = jnp.concatenate([zcol, rows, zcol], axis=1)          # (R1, Wp, C)
    xflat = xpad.reshape(R1 * Wp, C)

    def conv3x3(flat, w_ref, out_rows):
        # Fused-tap 3x3 conv: 9 contiguous slices of the flattened padded tile are
        # concatenated on the lane axis -> ONE MXU matmul with contraction K = 9*C,
        # accumulated in f32.  First output row lives at padded-row index 2.
        L = out_rows * Wp
        taps = [flat[(ky + 1) * Wp + (kx - 1):(ky + 1) * Wp + (kx - 1) + L, :]
                for ky in range(3) for kx in range(3)]
        slab = jnp.concatenate(taps, axis=-1)                   # (L, 9*C) bf16
        return jnp.dot(slab, w_ref[...], preferred_element_type=jnp.float32)

    # ---- conv1 (+ bias, ReLU) over TH+2 rows (output rows plus one halo row each side)
    h1 = conv3x3(xflat, w1_ref, TH + 2)                         # ((TH+2)*Wp, C) f32
    h1 = jnp.maximum(h1 + b1_ref[...], 0.0)
    h1 = h1.reshape(TH + 2, Wp, C)

    # Mask the pad columns (they hold row-wrapped garbage) and, at the image
    # top/bottom, the out-of-range halo rows (this IS conv2's zero padding).
    row_ids = lax.broadcasted_iota(jnp.int32, (TH + 2, Wp, 1), 0)
    col_ids = lax.broadcasted_iota(jnp.int32, (TH + 2, Wp, 1), 1)
    g = t * TH - 1 + row_ids                                    # global image row
    valid = (g >= 0) & (g < H) & (col_ids >= 1) & (col_ids <= W)
    h1 = jnp.where(valid, h1, 0.0).astype(bf16)

    # ---- conv2 input: add zero guard rows, flatten, fused-tap matmul
    zrow2 = jnp.zeros((1, Wp, C), bf16)
    h1v = jnp.concatenate([zrow2, h1, zrow2], axis=0)           # (TH+4, Wp, C)
    h1f = h1v.reshape((TH + 4) * Wp, C)

    h2 = conv3x3(h1f, w2_ref, TH)                               # (TH*Wp, C) f32
    h2 = h2.reshape(TH, Wp, C)[:, 1:W + 1, :]                   # drop pad columns

    # ---- bias + residual in f32, single store of the output tile
    o_ref[...] = (h2 + b2_ref[...] + x_ref[...].astype(jnp.float32)).astype(o_ref.dtype)


def _pick_row_tile(H):
    for cand in (32, 16, 8, 4, 2):
        if cand <= H and H % cand == 0:
            return cand
    return H


def resblock_forward(x_nchw, w1, b1, w2, b2, row_tile=None):
    """ResBlock forward. x_nchw: (N, C, H, W) f32; w*: (3,3,C,C) HWIO; b*: (C,)."""
    N, C, H, W = x_nchw.shape
    assert H >= 2, "need at least 2 image rows"
    TH = row_tile if row_tile is not None else _pick_row_tile(H)
    assert TH >= 2 and H % TH == 0, "row_tile must divide H and be >= 2"
    nT = H // TH

    # NHWC, bf16 for MXU / HBM traffic; accumulation stays f32 in-kernel.
    x = jnp.transpose(x_nchw, (0, 2, 3, 1)).astype(jnp.bfloat16)      # (N, H, W, C)

    # Tiny per-tile halo side arrays (2 rows above / below each row tile, zeros at the
    # image border) — replaces the full-image jnp.pad HBM pass of v1.
    xr = x.reshape(N, nT, TH, W, C)
    zhalo = jnp.zeros((N, 1, 2, W, C), x.dtype)
    top2 = jnp.concatenate([zhalo, xr[:, :nT - 1, TH - 2:TH]], axis=1)   # (N,nT,2,W,C)
    bot2 = jnp.concatenate([xr[:, 1:, 0:2], zhalo], axis=1)              # (N,nT,2,W,C)

    # Conv weights as (9*C, C) bf16, rows ordered (ky, kx, cin); biases f32.
    w1r = w1.reshape(9 * C, C).astype(jnp.bfloat16)
    w2r = w2.reshape(9 * C, C).astype(jnp.bfloat16)
    b1_2d = b1.reshape(1, C).astype(jnp.float32)
    b2_2d = b2.reshape(1, C).astype(jnp.float32)

    out_nhwc = pl.pallas_call(
        resblock_kernel,
        out_shape=jax.ShapeDtypeStruct((N, H, W, C), jnp.float32),
        grid=(N, nT),
        in_specs=[
            pl.BlockSpec((None, TH, W, C), lambda n, t: (n, t, 0, 0)),           # x tile
            pl.BlockSpec((None, None, 2, W, C), lambda n, t: (n, t, 0, 0, 0)),   # top halo
            pl.BlockSpec((None, None, 2, W, C), lambda n, t: (n, t, 0, 0, 0)),   # bot halo
            pl.BlockSpec((9 * C, C), lambda n, t: (0, 0)),                       # w1
            pl.BlockSpec((1, C), lambda n, t: (0, 0)),                           # b1
            pl.BlockSpec((9 * C, C), lambda n, t: (0, 0)),                       # w2
            pl.BlockSpec((1, C), lambda n, t: (0, 0)),                           # b2
        ],
        out_specs=pl.BlockSpec((None, TH, W, C), lambda n, t: (n, t, 0, 0)),
        compiler_params=pltpu.CompilerParams(
            dimension_semantics=("parallel", "parallel"),
            vmem_limit_bytes=64 * 1024 * 1024),
    )(x, top2, bot2, w1r, b1_2d, w2r, b2_2d)

    return jnp.transpose(out_nhwc, (0, 3, 1, 2))                         # back to NCHW


def resblock_reference(x_nchw, w1, b1, w2, b2):
    """Pure-JAX f32 reference (NHWC conv) for correctness checking."""
    x = jnp.transpose(x_nchw, (0, 2, 3, 1)).astype(jnp.float32)
    dn = ('NHWC', 'HWIO', 'NHWC')
    h = lax.conv_general_dilated(x, w1, (1, 1), 'SAME', dimension_numbers=dn) + b1
    h = jnp.maximum(h, 0.0)
    h = lax.conv_general_dilated(h, w2, (1, 1), 'SAME', dimension_numbers=dn) + b2
    return jnp.transpose(x + h, (0, 3, 1, 2))


if __name__ == "__main__":
    # Small shapes consistent with ResBlock(in_channels == out_channels).
    N, C, H, W = 2, 4, 16, 16
    key = jax.random.PRNGKey(0)
    kx_, kw1, kb1, kw2, kb2 = jax.random.split(key, 5)

    x = jax.random.normal(kx_, (N, C, H, W), dtype=jnp.float32)
    # Deterministic synthetic parameters (Conv2d(C, C, 3, bias=True) x 2), stored HWIO.
    w1 = 0.1 * jax.random.normal(kw1, (3, 3, C, C), dtype=jnp.float32)
    b1 = 0.1 * jax.random.normal(kb1, (C,), dtype=jnp.float32)
    w2 = 0.1 * jax.random.normal(kw2, (3, 3, C, C), dtype=jnp.float32)
    b2 = 0.1 * jax.random.normal(kb2, (C,), dtype=jnp.float32)

    y_ref = resblock_reference(x, w1, b1, w2, b2)

    # Multi-tile path (exercises the 2-row halo handling): H=16, row_tile=8 -> 2 tiles.
    y = jax.block_until_ready(resblock_forward(x, w1, b1, w2, b2, row_tile=8))
    assert y.shape == (N, C, H, W)
    err = float(jnp.max(jnp.abs(y - y_ref)))
    assert jnp.allclose(y, y_ref, atol=5e-2, rtol=5e-2), f"tiled mismatch, max|d|={err}"

    # Single-tile path.
    y1 = jax.block_until_ready(resblock_forward(x, w1, b1, w2, b2, row_tile=16))
    err1 = float(jnp.max(jnp.abs(y1 - y_ref)))
    assert jnp.allclose(y1, y_ref, atol=5e-2, rtol=5e-2), f"single-tile mismatch, max|d|={err1}"

    print("KERNEL_OK")
</pallas_src>

<mosaic_0001>
module attributes {stable_mosaic.version = 11 : i64} {
  func.func @resblock_kernel(%arg0: i32, %arg1: i32, %arg2: memref<1x8x16x4xbf16, #tpu.memory_space<vmem>>, %arg3: memref<1x1x2x16x4xbf16, #tpu.memory_space<vmem>>, %arg4: memref<1x1x2x16x4xbf16, #tpu.memory_space<vmem>>, %arg5: memref<36x4xbf16, #tpu.memory_space<vmem>>, %arg6: memref<1x4xf32, #tpu.memory_space<vmem>>, %arg7: memref<36x4xbf16, #tpu.memory_space<vmem>>, %arg8: memref<1x4xf32, #tpu.memory_space<vmem>>, %arg9: memref<1x8x16x4xf32, #tpu.memory_space<vmem>>) attributes {dimension_semantics = [#tpu.dimension_semantics<parallel>, #tpu.dimension_semantics<parallel>], iteration_bounds = array<i64: 2, 2>, scalar_prefetch = 0 : i64, scratch_operands = 0 : i64, tpu.core_type = #tpu.core_type<tc>, window_params = [{transform_indices = @transform_0, window_bounds = array<i64: 1, 8, 16, 4>}, {transform_indices = @transform_1, window_bounds = array<i64: 1, 1, 2, 16, 4>}, {transform_indices = @transform_2, window_bounds = array<i64: 1, 1, 2, 16, 4>}, {pipeline_mode = #tpu.pipeline_mode<synchronous>, transform_indices = @transform_3, window_bounds = array<i64: 36, 4>}, {pipeline_mode = #tpu.pipeline_mode<synchronous>, transform_indices = @transform_4, window_bounds = array<i64: 1, 4>}, {pipeline_mode = #tpu.pipeline_mode<synchronous>, transform_indices = @transform_5, window_bounds = array<i64: 36, 4>}, {pipeline_mode = #tpu.pipeline_mode<synchronous>, transform_indices = @transform_6, window_bounds = array<i64: 1, 4>}, {transform_indices = @transform_7, window_bounds = array<i64: 1, 8, 16, 4>}]} {
    %cst = arith.constant 0.000000e+00 : bf16
    %0 = vector.broadcast %cst : bf16 to vector<1x16x4xbf16>
    %c0 = arith.constant 0 : index
    %c0_0 = arith.constant 0 : index
    %c0_1 = arith.constant 0 : index
    %c0_2 = arith.constant 0 : index
    %c0_3 = arith.constant 0 : index
    %1 = vector.load %arg3[%c0, %c0_0, %c0_1, %c0_2, %c0_3] : memref<1x1x2x16x4xbf16, #tpu.memory_space<vmem>>, vector<1x1x2x16x4xbf16>
    %2 = vector.shape_cast %1 : vector<1x1x2x16x4xbf16> to vector<2x16x4xbf16>
    %c0_4 = arith.constant 0 : index
    %c0_5 = arith.constant 0 : index
    %c0_6 = arith.constant 0 : index
    %c0_7 = arith.constant 0 : index
    %3 = vector.load %arg2[%c0_4, %c0_5, %c0_6, %c0_7] : memref<1x8x16x4xbf16, #tpu.memory_space<vmem>>, vector<1x8x16x4xbf16>
    %4 = vector.shape_cast %3 : vector<1x8x16x4xbf16> to vector<8x16x4xbf16>
    %c0_8 = arith.constant 0 : index
    %c0_9 = arith.constant 0 : index
    %c0_10 = arith.constant 0 : index
    %c0_11 = arith.constant 0 : index
    %c0_12 = arith.constant 0 : index
    %5 = vector.load %arg4[%c0_8, %c0_9, %c0_10, %c0_11, %c0_12] : memref<1x1x2x16x4xbf16, #tpu.memory_space<vmem>>, vector<1x1x2x16x4xbf16>
    %6 = vector.shape_cast %5 : vector<1x1x2x16x4xbf16> to vector<2x16x4xbf16>
    %7 = tpu.concatenate %0, %2, %4, %6, %0 in 0 : vector<1x16x4xbf16>, vector<2x16x4xbf16>, vector<8x16x4xbf16>, vector<2x16x4xbf16>, vector<1x16x4xbf16> -> vector<14x16x4xbf16>
    %cst_13 = arith.constant 0.000000e+00 : bf16
    %8 = vector.broadcast %cst_13 : bf16 to vector<14x1x4xbf16>
    %9 = tpu.concatenate %8, %7, %8 in 1 : vector<14x1x4xbf16>, vector<14x16x4xbf16>, vector<14x1x4xbf16> -> vector<14x18x4xbf16>
    %10 = vector.shape_cast %9 : vector<14x18x4xbf16> to vector<252x4xbf16>
    %11 = vector.extract_strided_slice %10 {offsets = [17, 0], sizes = [180, 4], strides = [1, 1]} : vector<252x4xbf16> to vector<180x4xbf16>
    %12 = vector.extract_strided_slice %10 {offsets = [18, 0], sizes = [180, 4], strides = [1, 1]} : vector<252x4xbf16> to vector<180x4xbf16>
    %13 = vector.extract_strided_slice %10 {offsets = [19, 0], sizes = [180, 4], strides = [1, 1]} : vector<252x4xbf16> to vector<180x4xbf16>
    %14 = vector.extract_strided_slice %10 {offsets = [35, 0], sizes = [180, 4], strides = [1, 1]} : vector<252x4xbf16> to vector<180x4xbf16>
    %15 = vector.extract_strided_slice %10 {offsets = [36, 0], sizes = [180, 4], strides = [1, 1]} : vector<252x4xbf16> to vector<180x4xbf16>
    %16 = vector.extract_strided_slice %10 {offsets = [37, 0], sizes = [180, 4], strides = [1, 1]} : vector<252x4xbf16> to vector<180x4xbf16>
    %17 = vector.extract_strided_slice %10 {offsets = [53, 0], sizes = [180, 4], strides = [1, 1]} : vector<252x4xbf16> to vector<180x4xbf16>
    %18 = vector.extract_strided_slice %10 {offsets = [54, 0], sizes = [180, 4], strides = [1, 1]} : vector<252x4xbf16> to vector<180x4xbf16>
    %19 = vector.extract_strided_slice %10 {offsets = [55, 0], sizes = [180, 4], strides = [1, 1]} : vector<252x4xbf16> to vector<180x4xbf16>
    %20 = tpu.concatenate %11, %12, %13, %14, %15, %16, %17, %18, %19 in 1 : vector<180x4xbf16>, vector<180x4xbf16>, vector<180x4xbf16>, vector<180x4xbf16>, vector<180x4xbf16>, vector<180x4xbf16>, vector<180x4xbf16>, vector<180x4xbf16>, vector<180x4xbf16> -> vector<180x36xbf16>
    %c0_14 = arith.constant 0 : index
    %c0_15 = arith.constant 0 : index
    %21 = vector.load %arg5[%c0_14, %c0_15] : memref<36x4xbf16, #tpu.memory_space<vmem>>, vector<36x4xbf16>
    %cst_16 = arith.constant dense<0.000000e+00> : vector<180x4xf32>
    %22 = tpu.matmul %20, %21, %cst_16 {dimension_numbers = #tpu.dot_dimension_numbers<[1], [0], [0], [1], [0, 0, 1, 1], [], []>} : vector<180x36xbf16>, vector<36x4xbf16>, vector<180x4xf32> -> vector<180x4xf32>
    %c0_17 = arith.constant 0 : index
    %c0_18 = arith.constant 0 : index
    %23 = vector.load %arg6[%c0_17, %c0_18] : memref<1x4xf32, #tpu.memory_space<vmem>>, vector<1x4xf32>
    %24 = vector.broadcast %23 : vector<1x4xf32> to vector<180x4xf32>
    %25 = arith.addf %22, %24 : vector<180x4xf32>
    %cst_19 = arith.constant 0.000000e+00 : f32
    %26 = vector.broadcast %cst_19 : f32 to vector<180x4xf32>
    %27 = arith.maximumf %25, %26 : vector<180x4xf32>
    %28 = vector.shape_cast %27 : vector<180x4xf32> to vector<10x18x4xf32>
    %29 = tpu.iota {dimensions = array<i32: 0>} : vector<10x18x1xi32>
    %30 = tpu.iota {dimensions = array<i32: 1>} : vector<10x18x1xi32>
    %c8_i32 = arith.constant 8 : i32
    %31 = arith.muli %arg1, %c8_i32 : i32
    %c1_i32 = arith.constant 1 : i32
    %32 = arith.subi %31, %c1_i32 : i32
    %33 = vector.broadcast %32 : i32 to vector<10x18x1xi32>
    %34 = arith.addi %33, %29 : vector<10x18x1xi32>
    %c0_i32 = arith.constant 0 : i32
    %35 = vector.broadcast %c0_i32 : i32 to vector<10x18x1xi32>
    %36 = arith.cmpi sge, %34, %35 : vector<10x18x1xi32>
    %c16_i32 = arith.constant 16 : i32
    %37 = vector.broadcast %c16_i32 : i32 to vector<10x18x1xi32>
    %38 = arith.cmpi slt, %34, %37 : vector<10x18x1xi32>
    %39 = arith.andi %36, %38 : vector<10x18x1xi1>
    %c1_i32_20 = arith.constant 1 : i32
    %40 = vector.broadcast %c1_i32_20 : i32 to vector<10x18x1xi32>
    %41 = arith.cmpi sge, %30, %40 : vector<10x18x1xi32>
    %42 = arith.andi %39, %41 : vector<10x18x1xi1>
    %c16_i32_21 = arith.constant 16 : i32
    %43 = vector.broadcast %c16_i32_21 : i32 to vector<10x18x1xi32>
    %44 = arith.cmpi sle, %30, %43 : vector<10x18x1xi32>
    %45 = arith.andi %42, %44 : vector<10x18x1xi1>
    %cst_22 = arith.constant 0.000000e+00 : f32
    %46 = vector.shape_cast %45 : vector<10x18x1xi1> to vector<10x18x1xi1>
    %47 = vector.broadcast %46 : vector<10x18x1xi1> to vector<10x18x4xi1>
    %48 = vector.broadcast %cst_22 : f32 to vector<10x18x4xf32>
    %49 = arith.select %47, %28, %48 : vector<10x18x4xi1>, vector<10x18x4xf32>
    %50 = arith.truncf %49 : vector<10x18x4xf32> to vector<10x18x4xbf16>
    %cst_23 = arith.constant 0.000000e+00 : bf16
    %51 = vector.broadcast %cst_23 : bf16 to vector<1x18x4xbf16>
    %52 = tpu.concatenate %51, %50, %51 in 0 : vector<1x18x4xbf16>, vector<10x18x4xbf16>, vector<1x18x4xbf16> -> vector<12x18x4xbf16>
    %53 = vector.shape_cast %52 : vector<12x18x4xbf16> to vector<216x4xbf16>
    %54 = vector.extract_strided_slice %53 {offsets = [17, 0], sizes = [144, 4], strides = [1, 1]} : vector<216x4xbf16> to vector<144x4xbf16>
    %55 = vector.extract_strided_slice %53 {offsets = [18, 0], sizes = [144, 4], strides = [1, 1]} : vector<216x4xbf16> to vector<144x4xbf16>
    %56 = vector.extract_strided_slice %53 {offsets = [19, 0], sizes = [144, 4], strides = [1, 1]} : vector<216x4xbf16> to vector<144x4xbf16>
    %57 = vector.extract_strided_slice %53 {offsets = [35, 0], sizes = [144, 4], strides = [1, 1]} : vector<216x4xbf16> to vector<144x4xbf16>
    %58 = vector.extract_strided_slice %53 {offsets = [36, 0], sizes = [144, 4], strides = [1, 1]} : vector<216x4xbf16> to vector<144x4xbf16>
    %59 = vector.extract_strided_slice %53 {offsets = [37, 0], sizes = [144, 4], strides = [1, 1]} : vector<216x4xbf16> to vector<144x4xbf16>
    %60 = vector.extract_strided_slice %53 {offsets = [53, 0], sizes = [144, 4], strides = [1, 1]} : vector<216x4xbf16> to vector<144x4xbf16>
    %61 = vector.extract_strided_slice %53 {offsets = [54, 0], sizes = [144, 4], strides = [1, 1]} : vector<216x4xbf16> to vector<144x4xbf16>
    %62 = vector.extract_strided_slice %53 {offsets = [55, 0], sizes = [144, 4], strides = [1, 1]} : vector<216x4xbf16> to vector<144x4xbf16>
    %63 = tpu.concatenate %54, %55, %56, %57, %58, %59, %60, %61, %62 in 1 : vector<144x4xbf16>, vector<144x4xbf16>, vector<144x4xbf16>, vector<144x4xbf16>, vector<144x4xbf16>, vector<144x4xbf16>, vector<144x4xbf16>, vector<144x4xbf16>, vector<144x4xbf16> -> vector<144x36xbf16>
    %c0_24 = arith.constant 0 : index
    %c0_25 = arith.constant 0 : index
    %64 = vector.load %arg7[%c0_24, %c0_25] : memref<36x4xbf16, #tpu.memory_space<vmem>>, vector<36x4xbf16>
    %cst_26 = arith.constant dense<0.000000e+00> : vector<144x4xf32>
    %65 = tpu.matmul %63, %64, %cst_26 {dimension_numbers = #tpu.dot_dimension_numbers<[1], [0], [0], [1], [0, 0, 1, 1], [], []>} : vector<144x36xbf16>, vector<36x4xbf16>, vector<144x4xf32> -> vector<144x4xf32>
    %66 = vector.shape_cast %65 : vector<144x4xf32> to vector<8x18x4xf32>
    %67 = vector.extract_strided_slice %66 {offsets = [0, 1, 0], sizes = [8, 16, 4], strides = [1, 1, 1]} : vector<8x18x4xf32> to vector<8x16x4xf32>
    %c0_27 = arith.constant 0 : index
    %c0_28 = arith.constant 0 : index
    %68 = vector.load %arg8[%c0_27, %c0_28] : memref<1x4xf32, #tpu.memory_space<vmem>>, vector<1x4xf32>
    %69 = vector.shape_cast %68 : vector<1x4xf32> to vector<1x1x4xf32>
    %70 = vector.broadcast %69 : vector<1x1x4xf32> to vector<8x16x4xf32>
    %71 = arith.addf %67, %70 : vector<8x16x4xf32>
    %c0_29 = arith.constant 0 : index
    %c0_30 = arith.constant 0 : index
    %c0_31 = arith.constant 0 : index
    %c0_32 = arith.constant 0 : index
    %72 = vector.load %arg2[%c0_29, %c0_30, %c0_31, %c0_32] : memref<1x8x16x4xbf16, #tpu.memory_space<vmem>>, vector<1x8x16x4xbf16>
    %73 = vector.shape_cast %72 : vector<1x8x16x4xbf16> to vector<8x16x4xbf16>
    %74 = arith.extf %73 : vector<8x16x4xbf16> to vector<8x16x4xf32>
    %75 = arith.addf %71, %74 : vector<8x16x4xf32>
    %c0_33 = arith.constant 0 : index
    %c0_34 = arith.constant 0 : index
    %c0_35 = arith.constant 0 : index
    %c0_36 = arith.constant 0 : index
    %76 = vector.load %arg9[%c0_33, %c0_34, %c0_35, %c0_36] : memref<1x8x16x4xf32, #tpu.memory_space<vmem>>, vector<1x8x16x4xf32>
    %77 = vector.shape_cast %76 : vector<1x8x16x4xf32> to vector<8x16x4xf32>
    %78 = vector.shape_cast %75 : vector<8x16x4xf32> to vector<1x8x16x4xf32>
    tpu.vector_store %arg9[%c0_33, %c0_34, %c0_35, %c0_36], %78 {strides = array<i32>} : memref<1x8x16x4xf32, #tpu.memory_space<vmem>>, vector<1x8x16x4xf32>,
    return
  }
  func.func @transform_0(%arg0: i32, %arg1: i32) -> (i32, i32, i32, i32) {
    %c0_i32 = arith.constant 0 : i32
    %c0_i32_0 = arith.constant 0 : i32
    %c0_i32_1 = arith.constant 0 : i32
    return %arg0, %arg1, %c0_i32, %c0_i32_0 : i32, i32, i32, i32
  }
  func.func @transform_1(%arg0: i32, %arg1: i32) -> (i32, i32, i32, i32, i32) {
    %c0_i32 = arith.constant 0 : i32
    %c0_i32_0 = arith.constant 0 : i32
    %c0_i32_1 = arith.constant 0 : i32
    %c0_i32_2 = arith.constant 0 : i32
    return %arg0, %arg1, %c0_i32, %c0_i32_0, %c0_i32_1 : i32, i32, i32, i32, i32
  }
  func.func @transform_2(%arg0: i32, %arg1: i32) -> (i32, i32, i32, i32, i32) {
    %c0_i32 = arith.constant 0 : i32
    %c0_i32_0 = arith.constant 0 : i32
    %c0_i32_1 = arith.constant 0 : i32
    %c0_i32_2 = arith.constant 0 : i32
    return %arg0, %arg1, %c0_i32, %c0_i32_0, %c0_i32_1 : i32, i32, i32, i32, i32
  }
  func.func @transform_3(%arg0: i32, %arg1: i32) -> (i32, i32) {
    %c0_i32 = arith.constant 0 : i32
    %c0_i32_0 = arith.constant 0 : i32
    %c0_i32_1 = arith.constant 0 : i32
    return %c0_i32, %c0_i32_0 : i32, i32
  }
  func.func @transform_4(%arg0: i32, %arg1: i32) -> (i32, i32) {
    %c0_i32 = arith.constant 0 : i32
    %c0_i32_0 = arith.constant 0 : i32
    %c0_i32_1 = arith.constant 0 : i32
    return %c0_i32, %c0_i32_0 : i32, i32
  }
  func.func @transform_5(%arg0: i32, %arg1: i32) -> (i32, i32) {
    %c0_i32 = arith.constant 0 : i32
    %c0_i32_0 = arith.constant 0 : i32
    %c0_i32_1 = arith.constant 0 : i32
    return %c0_i32, %c0_i32_0 : i32, i32
  }
  func.func @transform_6(%arg0: i32, %arg1: i32) -> (i32, i32) {
    %c0_i32 = arith.constant 0 : i32
    %c0_i32_0 = arith.constant 0 : i32
    %c0_i32_1 = arith.constant 0 : i32
    return %c0_i32, %c0_i32_0 : i32, i32
  }
  func.func @transform_7(%arg0: i32, %arg1: i32) -> (i32, i32, i32, i32) {
    %c0_i32 = arith.constant 0 : i32
    %c0_i32_0 = arith.constant 0 : i32
    %c0_i32_1 = arith.constant 0 : i32
    return %arg0, %arg1, %c0_i32, %c0_i32_0 : i32, i32, i32, i32
  }
}

</mosaic_0001>

<bundles_post_ra>
// kernel: tpu_custom_call.1
= control target key start
LH: loop header
LB: loop body
LE: loop exit
PB: predicated region body
PF: predicated region fallthrough
CT: control target
= control target key end

     0   :  { %s6278_s24 = smov 0   ;;  %s6280_s25 = smov 0   ;;  %s10230_s0 = inlined_call_operand.vmem [shape: bf16[2,16,16,4], index: 0, kind: input, shape index: {}]   ;;  %s10231_s1 = inlined_call_operand.vmem [shape: bf16[2,2,2,16,4], index: 1, kind: input, shape index: {}]   ;;  %s10232_s2 = inlined_call_operand.vmem [shape: bf16[2,2,2,16,4], index: 2, kind: input, shape index: {}]   ;;  %s10233_s3 = inlined_call_operand.vmem [shape: bf16[36,4], index: 3, kind: input, shape index: {}]   ;;  %s10234_s4 = inlined_call_operand.vmem [shape: f32[1,4], index: 4, kind: input, shape index: {}]   ;;  %s10235_s5 = inlined_call_operand.vmem [shape: bf16[36,4], index: 5, kind: input, shape index: {}]   ;;  %s10236_s6 = inlined_call_operand.vmem [shape: f32[1,4], index: 6, kind: input, shape index: {}]   ;;  %s10237_s7 = inlined_call_operand.vmem [shape: f32[2,16,16,4], index: 7, kind: output, shape index: {}]  }
   0x1   :  { %s6282_s26 = smov 0   ;;  %s6284_s27 = smov 0  }
   0x2   :  { %s6286_s28 = smov 0  }
   0x3 LB: > { %s26_s29 = sadd.s32 1, %s6219_s26  ;;  %s29_s30 = sadd.s32 1, %s6223_s27  ;;  %s6227_s28 = sphi %s6286_s28, %s17_s28   ;;  %s6223_s27 = sphi %s6284_s27, %s11521_s27   ;;  %s6219_s26 = sphi %s6282_s26, %s11520_s26   ;;  %s6215_s25 = sphi %s6280_s25, %s11519_s25   ;;  %s6211_s24 = sphi %s6278_s24, %s11518_s24  }
   0x4   : > { %p27_p0 = scmp.ge.s32.totalorder %s26_s29, 2  ;;  %p6012_p1 = scmp.ge.s32.totalorder %s6227_s28, 1 }
   0x5   : > { %p291_p2 = scmp.lt.s32.totalorder %s6227_s28, 5 }
   0x6   : > { %s11523_s29 = smov (%p27_p0, %s26_s29), 0  ;;  %s11525_s30 = smov (!%p27_p0, %s29_s30), %s6223_s27 }
   0x7   : > { %p292_p3 = pnand %p6012_p1, %p291_p2  ;;  %p31_p4 = scmp.ge.s32.totalorder %s11525_s30, 2 }
   0x9   : > { %s11527_s30 = smov (%p31_p4, %s11525_s30), 0  ;;  %295 = sbr.rel (%p292_p3) target bundleno = 3553 (0xde1), region = 48 }
   0xe   : > { %p352_p5 = scmp.lt.s32.totalorder %s6215_s25, 1  ;;  %vm10499_vm0 = vcmask 1040384   ;;  %vm594_vm1 = vsmask.f32 256  ;;  %v10238_v0 = vmov 0   ;;  %v10649_v2 = vmov 0 }
   0xf   : > { %v6311_v1 = vrot.slane %v10238_v0, 7  ;;  %vm6315_vm2 = vmand %vm10499_vm0, %vm594_vm1  ;;  %p364_p6 = scmp.lt.s32.totalorder %s6211_s24, 1  ;;  %s6328_s13 = sshll.u32 %s6211_s24, 3  ;;  %vm2316_vm3 = vcmask 31744   ;;  %vm2341_vm4 = vcmask 64512   ;;  %vm2366_vm5 = vcmask 97280  }
  0x10   : > { %v10650_v2 = vsel %vm6315_vm2, 4294967295, %v10649_v2  ;;  %s11529_s25 = smov (!%p352_p5, %s6215_s25), 1  ;;  %p354_p7 = scmp.lt.s32.totalorder %s6328_s13, 15  ;;  %vm2391_vm6 = vcmask 130048   ;;  %vm2416_vm7 = vcmask 162816   ;;  %vm2441_vm8 = vcmask 195584  }
  0x11   : > { %10648 = vst [vmem:[#allocation2_spill] sm:$0xff] %v6311_v1  ;;  %v609_v3 = vsel %vm6315_vm2, %v6311_v1, 0  ;;  %s6018_s8 = sshll.u32 %s11529_s25, 3  ;;  %s6015_s19 = sshll.u32 %s11529_s25, 5  ;;  %vm10511_vm9 = vcmask 228352   ;;  %vm10502_vm10 = vcmask 261120  }
  0x12   : > { %10651 = vst [vmem:[#allocation3_spill] sm:$0xff] %v10650_v2  ;;  %s365_s9 = scalar_select %p364_p6, %s6211_s24, 1  ;;  %vm2661_vm11 = vcmask 1041408   ;;  %vm10501_vm12 = vsmask.f32 7424  ;;  %vm10500_vm13 = vcmask 293888  }
  0x13   : > { %719 = vst [vmem:[#allocation1] ss:$9 sm:$0xff] %v609_v3  ;;  %s355_s17 = scalar_select %p354_p7, %s6328_s13, 15 }
  0x14   : > { %s6017_s10 = sshll.u32 %s365_s9, 2  ;;  %s6230_s25 = smov 4  }
  0x15   : > { %s6324_s11 = sadd.s32 %s6018_s8, %s6017_s10  ;;  %s6014_s18 = sshll.u32 %s355_s17, 1 }
  0x16   : > { %s6019_s12 = sshll.u32 %s6324_s11, 2  ;;  %s6354_s20 = sadd.s32 %s6015_s19, %s6014_s18 }
  0x17   : > { %s370_s16 = scalar_lea.vmem %s10231_s1, %s6019_s12  ;;  %s6016_s21 = sshll.u32 %s6354_s20, 2 }
  0x18   : > { %v6116_v4 = vld [vmem:[%s370_s16] sm:$0xff]  ;;  %v6117_v8 = vld [vmem:[%s370_s16 + $0x8] sm:$0xff]  ;;  %s6372_s24 = scalar_lea.vmem %s10230_s0, %s6016_s21  ;;  %s6231_s8 = smov 8  }
  0x19   : > { %v481_v5 = vshrl.u32 %v6116_v4, 16  ;;  %v484_v6 = vshll.u32 %v6116_v4, 16  ;;  %v488_v11 = vshrl.u32 %v6117_v8, 16  ;;  %v491_v18 = vshll.u32 %v6117_v8, 16  ;;  %v6118_v21 = vld [vmem:[%s6372_s24] sm:$0xff]  ;;  %v6119_v36 = vld [vmem:[%s6372_s24 + $0x8] sm:$0xff]  ;;  %s6976_s14 = scalar_lea.vmem %s10232_s2, %s6019_s12 }
  0x1a   : > { %v495_v27 = vshrl.u32 %v6118_v21, 16  ;;  %v498_v33 = vshll.u32 %v6118_v21, 16  ;;  %v502_v42 = vshrl.u32 %v6119_v36, 16  ;;  %v505_v47 = vshll.u32 %v6119_v36, 16  ;;  %v6120_v51 = vld [vmem:[%s6372_s24 + $0x10] sm:$0xff]  ;;  %s6232_s11 = smov 12  }
  0x1b   : > { %v483_v7 = vrot.slane %v481_v5, 7  ;;  %v490_v17 = vrot.slane %v488_v11, 7  ;;  %v509_v57 = vshrl.u32 %v6120_v51, 16  ;;  %v512_v61 = vshll.u32 %v6120_v51, 16  ;;  %v6121_v5 = vld [vmem:[%s6372_s24 + $0x18] sm:$0xff]  ;;  %v6122_v51 = vld [vmem:[%s6372_s24 + $0x20] sm:$0xff] }
  0x1c   : > { %v497_v32 = vrot.slane %v495_v27, 7  ;;  %v504_v46 = vrot.slane %v502_v42, 7  ;;  %v519_v21 = vshll.u32 %v6121_v5, 16  ;;  %s6233_s12 = smov 16   ;;  %s6234_s15 = smov 20  }
  0x1d   : > { %v486_v9 = vor.u32 %v484_v6, %v483_v7  ;;  %v493_v20 = vor.u32 %v491_v18, %v490_v17  ;;  %v6384_v24 = vsel %vm6315_vm2, %v483_v7, 0  ;;  %v6424_v39 = vsel %vm6315_vm2, %v490_v17, 0  ;;  %s6235_s16 = smov 24   ;;  %s6236_s17 = smov 28  }
  0x1e   : > { %10654 = vst [vmem:[#allocation6_spill] sm:$0xff] %v6384_v24  ;;  %v500_v34 = vor.u32 %v498_v33, %v497_v32  ;;  %v507_v48 = vor.u32 %v505_v47, %v504_v46  ;;  %v6466_v55 = vsel %vm6315_vm2, %v497_v32, 0  ;;  %v511_v60 = vrot.slane %v509_v57, 7  ;;  %s6237_s18 = smov 32   ;;  %s6096_s21 = sadd.s32 4294967295, %s6328_s13 }
  0x1f   : > { %v6339_v10 = vsel %vm6315_vm2, 0, %v486_v9  ;;  %v6377_v22 = vsel %vm6315_vm2, 0, %v493_v20  ;;  %10665 = vst [vmem:[#allocation17_spill] sm:$0xff] %v6466_v55  ;;  %v6507_v9 = vsel %vm6315_vm2, %v504_v46, 0  ;;  %v516_v17 = vshrl.u32 %v6121_v5, 16 }
  0x20   : > { %722 = vst [vmem:[#allocation1 + $0x1] ss:$9 sm:$0xff] %v6339_v10  ;;  %v6343_v12 = vrot.slane %v6339_v10, 1  ;;  %v6346_v13 = vrot.slane %v6339_v10, 2  ;;  %v6349_v14 = vrot.slane %v6339_v10, 3  ;;  %v6352_v15 = vrot.slane %v6339_v10, 4 }
  0x21   : > { %v6357_v16 = vrot.slane %v6339_v10, 5  ;;  %v6361_v19 = vrot.slane %v6339_v10, 6  ;;  %10653 = vst [vmem:[#allocation5_spill] sm:$0xff] %v6377_v22  ;;  %v6380_v23 = vrot.slane %v6339_v10, 7  ;;  %v6387_v25 = vrot.slane %v6377_v22, 1 }
  0x22   : > { %10652 = vst [vmem:[#allocation4_spill] sm:$0xff] %v6349_v14  ;;  %v6392_v28 = vrot.slane %v6377_v22, 2  ;;  %v6396_v29 = vrot.slane %v6377_v22, 3  ;;  %v6400_v30 = vrot.slane %v6377_v22, 4  ;;  %v6404_v31 = vrot.slane %v6377_v22, 5 }
  0x23   : > { %725 = vst [vmem:[#allocation1 + $0x2] ss:$9 sm:$0xff] %v6343_v12  ;;  %v6412_v35 = vrot.slane %v6377_v22, 6  ;;  %v6417_v37 = vsel %vm6315_vm2, 0, %v500_v34  ;;  %v6420_v38 = vrot.slane %v6377_v22, 7  ;;  %v6457_v52 = vsel %vm6315_vm2, 0, %v507_v48 }
  0x24   : > { %728 = vst [vmem:[#allocation1 + $0x3] ss:$9 sm:$0xff] %v6346_v13  ;;  %v6429_v41 = vrot.slane %v6417_v37, 1  ;;  %v6433_v43 = vrot.slane %v6417_v37, 2  ;;  %v6437_v44 = vrot.slane %v6417_v37, 3  ;;  %v6441_v45 = vrot.slane %v6417_v37, 4 }
  0x25   : > { %731 = vst [vmem:[#allocation1 + $0x4] ss:$9 sm:$0xff] %v6349_v14  ;;  %v6449_v49 = vrot.slane %v6417_v37, 5  ;;  %v6452_v50 = vrot.slane %v6417_v37, 6  ;;  %v6460_v53 = vrot.slane %v6417_v37, 7  ;;  %v6470_v56 = vrot.slane %v6457_v52, 1 }
  0x26   : > { %734 = vst [vmem:[#allocation1 + $0x5] ss:$9 sm:$0xff] %v6352_v15  ;;  %v6474_v58 = vrot.slane %v6457_v52, 2  ;;  %v6478_v59 = vrot.slane %v6457_v52, 3  ;;  %v514_v62 = vor.u32 %v512_v61, %v511_v60  ;;  %v6486_v63 = vrot.slane %v6457_v52, 4 }
  0x27   : > { %737 = vst [vmem:[#allocation1 + $0x6] ss:$9 sm:$0xff] %v6357_v16  ;;  %v6489_v3 = vrot.slane %v6457_v52, 5  ;;  %v6492_v4 = vrot.slane %v6457_v52, 6  ;;  %v6500_v7 = vrot.slane %v6457_v52, 7  ;;  %v518_v20 = vrot.slane %v516_v17, 7 }
  0x28   : > { %740 = vst [vmem:[#allocation1 + $0x7] ss:$9 sm:$0xff] %v6361_v19  ;;  %v6497_v6 = vsel %vm6315_vm2, 0, %v514_v62  ;;  %v6547_v48 = vsel %vm6315_vm2, %v511_v60, 0  ;;  %v523_v61 = vshrl.u32 %v6122_v51, 16  ;;  %v526_v60 = vshll.u32 %v6122_v51, 16 }
  0x29   : > { %10656 = vst [vmem:[#allocation8_spill] sm:$0xff] %v6417_v37  ;;  %v6511_v11 = vrot.slane %v6497_v6, 1  ;;  %v6515_v18 = vrot.slane %v6497_v6, 2  ;;  %v521_v27 = vor.u32 %v519_v21, %v518_v20  ;;  %v6523_v32 = vrot.slane %v6497_v6, 3 }
  0x2a   : > { %10658 = vst [vmem:[#allocation10_spill] sm:$0xff] %v6437_v44  ;;  %v6526_v33 = vrot.slane %v6497_v6, 4  ;;  %v6529_v34 = vrot.slane %v6497_v6, 5  ;;  %v6532_v36 = vrot.slane %v6497_v6, 6  ;;  %v6541_v47 = vrot.slane %v6497_v6, 7 }
  0x2b   : > { %10659 = vst [vmem:[#allocation11_spill] sm:$0xff] %v6441_v45  ;;  %v6538_v46 = vsel %vm6315_vm2, 0, %v521_v27  ;;  %v525_v62 = vrot.slane %v523_v61, 7  ;;  %v6584_v61 = vsel %vm6315_vm2, %v518_v20, 0 }
  0x2c   : > { %10660 = vst [vmem:[#allocation12_spill] sm:$0xff] %v6449_v49  ;;  %v6552_v57 = vrot.slane %v6538_v46, 1  ;;  %v6560_v5 = vrot.slane %v6538_v46, 2  ;;  %v6563_v17 = vrot.slane %v6538_v46, 3  ;;  %v6566_v21 = vrot.slane %v6538_v46, 4 }
  0x2d   : > { %10661 = vst [vmem:[#allocation13_spill] sm:$0xff] %v6452_v50  ;;  %v6569_v27 = vrot.slane %v6538_v46, 5  ;;  %v528_v1 = vor.u32 %v526_v60, %v525_v62  ;;  %v6578_v51 = vrot.slane %v6538_v46, 7 }
  0x2e   : > { %10662 = vst [vmem:[#allocation14_spill] sm:$0xff] %v6457_v52 }
  0x2f   : > { %v6389_v26 = vld [vmem:[#allocation1] sm:$0xff]  ;;  %10663 = vst [vmem:[#allocation15_spill] sm:$0xff] %v6460_v53  ;;  %v6589_v60 = vsel %vm6315_vm2, 0, %v528_v1 }
  0x30   : > { %10655 = vst [vmem:[#allocation7_spill] sm:$0xff] %v6389_v26  ;;  %v6603_v26 = vrot.slane %v6589_v60, 3  ;;  %v6606_v1 = vrot.slane %v6589_v60, 4 }
  0x31   : > { %743 = vst [vmem:[#allocation1] ss:$9 sm:$0xff] %v6380_v23 }
  0x32   : > { %745 = vst [vmem:[#allocation1 + $0x1] ss:$9 sm:$0xff] %v6384_v24 }
  0x33   : > { %747 = vst [vmem:[#allocation1 + $0x2] ss:$9 sm:$0xff] %v6377_v22 }
  0x34   : > { %749 = vst [vmem:[#allocation1 + $0x3] ss:$9 sm:$0xff] %v6387_v25 }
  0x35   : > { %751 = vst [vmem:[#allocation1 + $0x4] ss:$9 sm:$0xff] %v6392_v28 }
  0x36   : > { %753 = vst [vmem:[#allocation1 + $0x5] ss:$9 sm:$0xff] %v6396_v29 }
  0x37   : > { %755 = vst [vmem:[#allocation1 + $0x6] ss:$9 sm:$0xff] %v6400_v30 }
  0x38   : > { %757 = vst [vmem:[#allocation1 + $0x7] ss:$9 sm:$0xff] %v6404_v31 }
  0x39   : > { %10666 = vst [vmem:[#allocation18_spill] sm:$0xff] %v6470_v56 }
  0x3a   : > { %10667 = vst [vmem:[#allocation19_spill] sm:$0xff] %v6474_v58 }
  0x3b   : > { %10668 = vst [vmem:[#allocation20_spill] sm:$0xff] %v6478_v59 }
  0x3c   : > { %10669 = vst [vmem:[#allocation21_spill] sm:$0xff] %v6486_v63 }
  0x3d   : > { %10670 = vst [vmem:[#allocation22_spill] sm:$0xff] %v6489_v3 }
  0x3e   : > { %10671 = vst [vmem:[#allocation23_spill] sm:$0xff] %v6492_v4 }
  0x3f   : > { %v6426_v40 = vld [vmem:[#allocation1] sm:$0xff]  ;;  %10672 = vst [vmem:[#allocation24_spill] sm:$0xff] %v6497_v6 }
  0x40   : > { %10657 = vst [vmem:[#allocation9_spill] sm:$0xff] %v6426_v40  ;;  %v6600_v40 = vrot.slane %v6589_v60, 2 }
  0x41   : > { %760 = vst [vmem:[#allocation1] ss:$9 sm:$0xff] %v6412_v35 }
  0x42   : > { %762 = vst [vmem:[#allocation1 + $0x1] ss:$9 sm:$0xff] %v6420_v38 }
  0x43   : > { %764 = vst [vmem:[#allocation1 + $0x2] ss:$9 sm:$0xff] %v6424_v39 }
  0x44   : > { %766 = vst [vmem:[#allocation1 + $0x3] ss:$9 sm:$0xff] %v6417_v37 }
  0x45   : > { %768 = vst [vmem:[#allocation1 + $0x4] ss:$9 sm:$0xff] %v6429_v41 }
  0x46   : > { %770 = vst [vmem:[#allocation1 + $0x5] ss:$9 sm:$0xff] %v6433_v43 }
  0x47   : > { %772 = vst [vmem:[#allocation1 + $0x6] ss:$9 sm:$0xff] %v6437_v44 }
  0x48   : > { %774 = vst [vmem:[#allocation1 + $0x7] ss:$9 sm:$0xff] %v6441_v45 }
  0x49   : > { %10673 = vst [vmem:[#allocation25_spill] sm:$0xff] %v6500_v7 }
  0x4a   : > { %10675 = vst [vmem:[#allocation27_spill] sm:$0xff] %v6507_v9 }
  0x4b   : > { %10676 = vst [vmem:[#allocation28_spill] sm:$0xff] %v6511_v11 }
  0x4c   : > { %10677 = vst [vmem:[#allocation29_spill] sm:$0xff] %v6515_v18 }
  0x4d   : > { %10678 = vst [vmem:[#allocation30_spill] sm:$0xff] %v6523_v32 }
  0x4e   : > { %10679 = vst [vmem:[#allocation31_spill] sm:$0xff] %v6526_v33 }
  0x4f   : > { %v6462_v54 = vld [vmem:[#allocation1] sm:$0xff]  ;;  %10680 = vst [vmem:[#allocation32_spill] sm:$0xff] %v6529_v34 }
  0x50   : > { %10664 = vst [vmem:[#allocation16_spill] sm:$0xff] %v6462_v54  ;;  %v6597_v54 = vrot.slane %v6589_v60, 1 }
  0x51   : > { %777 = vst [vmem:[#allocation1] ss:$9 sm:$0xff] %v6449_v49 }
  0x52   : > { %779 = vst [vmem:[#allocation1 + $0x1] ss:$9 sm:$0xff] %v6452_v50 }
  0x53   : > { %781 = vst [vmem:[#allocation1 + $0x2] ss:$9 sm:$0xff] %v6460_v53 }
  0x54   : > { %783 = vst [vmem:[#allocation1 + $0x3] ss:$9 sm:$0xff] %v6466_v55 }
  0x55   : > { %785 = vst [vmem:[#allocation1 + $0x4] ss:$9 sm:$0xff] %v6457_v52 }
  0x56   : > { %787 = vst [vmem:[#allocation1 + $0x5] ss:$9 sm:$0xff] %v6470_v56 }
  0x57   : > { %789 = vst [vmem:[#allocation1 + $0x6] ss:$9 sm:$0xff] %v6474_v58 }
  0x58   : > { %791 = vst [vmem:[#allocation1 + $0x7] ss:$9 sm:$0xff] %v6478_v59 }
  0x59   : > { %10681 = vst [vmem:[#allocation33_spill] sm:$0xff] %v6532_v36 }
  0x5a   : > { %10683 = vst [vmem:[#allocation35_spill] sm:$0xff] %v6538_v46 }
  0x5b   : > { %10684 = vst [vmem:[#allocation36_spill] sm:$0xff] %v6541_v47 }
  0x5c   : > { %10685 = vst [vmem:[#allocation37_spill] sm:$0xff] %v6547_v48 }
  0x5d   : > { %10686 = vst [vmem:[#allocation38_spill] sm:$0xff] %v6552_v57 }
  0x5e   : > { %10687 = vst [vmem:[#allocation39_spill] sm:$0xff] %v6560_v5 }
  0x5f   : > { %v6502_v8 = vld [vmem:[#allocation1] sm:$0xff]  ;;  %10688 = vst [vmem:[#allocation40_spill] sm:$0xff] %v6563_v17 }
  0x60   : > { %10674 = vst [vmem:[#allocation26_spill] sm:$0xff] %v6502_v8  ;;  %v6574_v8 = vrot.slane %v6538_v46, 6 }
  0x61   : > { %794 = vst [vmem:[#allocation1] ss:$9 sm:$0xff] %v6486_v63 }
  0x62   : > { %796 = vst [vmem:[#allocation1 + $0x1] ss:$9 sm:$0xff] %v6489_v3 }
  0x63   : > { %798 = vst [vmem:[#allocation1 + $0x2] ss:$9 sm:$0xff] %v6492_v4 }
  0x64   : > { %800 = vst [vmem:[#allocation1 + $0x3] ss:$9 sm:$0xff] %v6500_v7 }
  0x65   : > { %802 = vst [vmem:[#allocation1 + $0x4] ss:$9 sm:$0xff] %v6507_v9 }
  0x66   : > { %804 = vst [vmem:[#allocation1 + $0x5] ss:$9 sm:$0xff] %v6497_v6 }
  0x67   : > { %806 = vst [vmem:[#allocation1 + $0x6] ss:$9 sm:$0xff] %v6511_v11 }
  0x68   : > { %808 = vst [vmem:[#allocation1 + $0x7] ss:$9 sm:$0xff] %v6515_v18 }
  0x69   : > { %10689 = vst [vmem:[#allocation41_spill] sm:$0xff] %v6566_v21 }
  0x6a   : > { %10690 = vst [vmem:[#allocation42_spill] sm:$0xff] %v6569_v27 }
  0x6b   : > { %10692 = vst [vmem:[#allocation44_spill] sm:$0xff] %v6574_v8 }
  0x6c   : > { %10693 = vst [vmem:[#allocation45_spill] sm:$0xff] %v6578_v51 }
  0x6d   : > { %10694 = vst [vmem:[#allocation46_spill] sm:$0xff] %v6584_v61 }
  0x6e   : > { %10695 = vst [vmem:[#allocation47_spill] sm:$0xff] %v6589_v60 }
  0x6f   : > { %v6534_v42 = vld [vmem:[#allocation1] sm:$0xff]  ;;  %10696 = vst [vmem:[#allocation48_spill] sm:$0xff] %v6597_v54 }
  0x70   : > { %10682 = vst [vmem:[#allocation34_spill] sm:$0xff] %v6534_v42 }
  0x71   : > { %811 = vst [vmem:[#allocation1] ss:$9 sm:$0xff] %v6523_v32 }
  0x72   : > { %813 = vst [vmem:[#allocation1 + $0x1] ss:$9 sm:$0xff] %v6526_v33 }
  0x73   : > { %815 = vst [vmem:[#allocation1 + $0x2] ss:$9 sm:$0xff] %v6529_v34 }
  0x74   : > { %817 = vst [vmem:[#allocation1 + $0x3] ss:$9 sm:$0xff] %v6532_v36 }
  0x75   : > { %819 = vst [vmem:[#allocation1 + $0x4] ss:$9 sm:$0xff] %v6541_v47 }
  0x76   : > { %821 = vst [vmem:[#allocation1 + $0x5] ss:$9 sm:$0xff] %v6547_v48 }
  0x77   : > { %823 = vst [vmem:[#allocation1 + $0x6] ss:$9 sm:$0xff] %v6538_v46 }
  0x78   : > { %825 = vst [vmem:[#allocation1 + $0x7] ss:$9 sm:$0xff] %v6552_v57 }
  0x79   : > { %10697 = vst [vmem:[#allocation49_spill] sm:$0xff] %v6600_v40 }
  0x7a   : > { %10698 = vst [vmem:[#allocation50_spill] sm:$0xff] %v6603_v26 }
  0x7b   : > { %10699 = vst [vmem:[#allocation51_spill] sm:$0xff] %v6606_v1 }
  0x7f   : > { %v6571_v0 = vld [vmem:[#allocation1] sm:$0xff] }
  0x80   : > { %10691 = vst [vmem:[#allocation43_spill] sm:$0xff] %v6571_v0  ;;  %v6123_v0 = vld [vmem:[%s6372_s24 + $0x28] sm:$0xff] }
  0x81   : > { %828 = vst [vmem:[#allocation1] ss:$9 sm:$0xff] %v6560_v5  ;;  %v530_v20 = vshrl.u32 %v6123_v0, 16 }
  0x82   : > { %830 = vst [vmem:[#allocation1 + $0x1] ss:$9 sm:$0xff] %v6563_v17 }
  0x83   : > { %832 = vst [vmem:[#allocation1 + $0x2] ss:$9 sm:$0xff] %v6566_v21  ;;  %v6619_v21 = vrot.slane %v6589_v60, 7 }
  0x84   : > { %834 = vst [vmem:[#allocation1 + $0x3] ss:$9 sm:$0xff] %v6569_v27  ;;  %v6615_v27 = vrot.slane %v6589_v60, 6 }
  0x85   : > { %836 = vst [vmem:[#allocation1 + $0x4] ss:$9 sm:$0xff] %v6574_v8  ;;  %v533_v8 = vshll.u32 %v6123_v0, 16  ;;  %v6124_v0 = vld [vmem:[%s6372_s24 + $0x30] sm:$0xff] }
  0x86   : > { %838 = vst [vmem:[#allocation1 + $0x5] ss:$9 sm:$0xff] %v6578_v51  ;;  %v532_v51 = vrot.slane %v530_v20, 7 }
  0x87   : > { %840 = vst [vmem:[#allocation1 + $0x6] ss:$9 sm:$0xff] %v6584_v61  ;;  %v6611_v61 = vrot.slane %v6589_v60, 5 }
  0x88   : > { %842 = vst [vmem:[#allocation1 + $0x7] ss:$9 sm:$0xff] %v6589_v60  ;;  %v535_v20 = vor.u32 %v533_v8, %v532_v51 }
  0x89   : > { %10701 = vst [vmem:[#allocation53_spill] sm:$0xff] %v6611_v61 }
  0x8a   : > { %10702 = vst [vmem:[#allocation54_spill] sm:$0xff] %v6615_v27 }
  0x8b   : > { %10703 = vst [vmem:[#allocation55_spill] sm:$0xff] %v6619_v21 }
  0x8f   : > { %v6608_v42 = vld [vmem:[#allocation1] sm:$0xff] }
  0x90   : > { %10700 = vst [vmem:[#allocation52_spill] sm:$0xff] %v6608_v42  ;;  %v6625_v42 = vsel %vm6315_vm2, %v525_v62, 0 }
  0x91   : > { %845 = vst [vmem:[#allocation1] ss:$9 sm:$0xff] %v6597_v54 }
  0x92   : > { %847 = vst [vmem:[#allocation1 + $0x1] ss:$9 sm:$0xff] %v6600_v40  ;;  %v6634_v40 = vsel %vm6315_vm2, 0, %v535_v20 }
  0x93   : > { %849 = vst [vmem:[#allocation1 + $0x2] ss:$9 sm:$0xff] %v6603_v26  ;;  %v537_v26 = vshrl.u32 %v6124_v0, 16  ;;  %v6640_v62 = vrot.slane %v6634_v40, 2  ;;  %v6643_v8 = vrot.slane %v6634_v40, 3  ;;  %v6652_v20 = vrot.slane %v6634_v40, 5 }
  0x94   : > { %851 = vst [vmem:[#allocation1 + $0x3] ss:$9 sm:$0xff] %v6606_v1  ;;  %v6637_v1 = vrot.slane %v6634_v40, 1  ;;  %v6656_v54 = vrot.slane %v6634_v40, 6 }
  0x95   : > { %10704 = vst [vmem:[#allocation56_spill] sm:$0xff] %v6625_v42 }
  0x96   : > { %853 = vst [vmem:[#allocation1 + $0x4] ss:$9 sm:$0xff] %v6611_v61  ;;  %v540_v61 = vshll.u32 %v6124_v0, 16 }
  0x97   : > { %855 = vst [vmem:[#allocation1 + $0x5] ss:$9 sm:$0xff] %v6615_v27 }
  0x98   : > { %857 = vst [vmem:[#allocation1 + $0x6] ss:$9 sm:$0xff] %v6619_v21  ;;  %v539_v21 = vrot.slane %v537_v26, 7  ;;  %v6125_v26 = vld [vmem:[%s6372_s24 + $0x38] sm:$0xff] }
  0x99   : > { %859 = vst [vmem:[#allocation1 + $0x7] ss:$9 sm:$0xff] %v6625_v42  ;;  %v6648_v42 = vrot.slane %v6634_v40, 4 }
  0x9a   : > { %10705 = vst [vmem:[#allocation57_spill] sm:$0xff] %v6634_v40  ;;  %v542_v60 = vor.u32 %v540_v61, %v539_v21 }
  0x9b   : > { %10706 = vst [vmem:[#allocation58_spill] sm:$0xff] %v6637_v1 }
  0x9c   : > { %10707 = vst [vmem:[#allocation59_spill] sm:$0xff] %v6640_v62  ;;  %v6670_v0 = vsel %vm6315_vm2, 0, %v542_v60 }
  0x9d   : > { %10708 = vst [vmem:[#allocation60_spill] sm:$0xff] %v6643_v8  ;;  %v6689_v60 = vrot.slane %v6670_v0, 4 }
  0x9e   : > { %10710 = vst [vmem:[#allocation62_spill] sm:$0xff] %v6648_v42 }
  0x9f   : > { %10711 = vst [vmem:[#allocation63_spill] sm:$0xff] %v6652_v20 }
  0xa0   : > { %v6645_v27 = vld [vmem:[#allocation1] sm:$0xff]  ;;  %10712 = vst [vmem:[#allocation64_spill] sm:$0xff] %v6656_v54 }
  0xa1   : > { %10709 = vst [vmem:[#allocation61_spill] sm:$0xff] %v6645_v27  ;;  %v6660_v27 = vrot.slane %v6634_v40, 7 }
  0xa2   : > { %862 = vst [vmem:[#allocation1] ss:$9 sm:$0xff] %v6634_v40  ;;  %v6697_v40 = vrot.slane %v6670_v0, 6 }
  0xa3   : > { %864 = vst [vmem:[#allocation1 + $0x1] ss:$9 sm:$0xff] %v6637_v1  ;;  %v547_v1 = vshll.u32 %v6125_v26, 16 }
  0xa4   : > { %866 = vst [vmem:[#allocation1 + $0x2] ss:$9 sm:$0xff] %v6640_v62  ;;  %v6674_v62 = vsel %vm6315_vm2, %v532_v51, 0  ;;  %v6693_v51 = vrot.slane %v6670_v0, 5 }
  0xa5   : > { %10713 = vst [vmem:[#allocation65_spill] sm:$0xff] %v6660_v27 }
  0xa6   : > { %868 = vst [vmem:[#allocation1 + $0x3] ss:$9 sm:$0xff] %v6643_v8  ;;  %v6677_v8 = vrot.slane %v6670_v0, 1 }
  0xa7   : > { %870 = vst [vmem:[#allocation1 + $0x4] ss:$9 sm:$0xff] %v6648_v42  ;;  %v544_v42 = vshrl.u32 %v6125_v26, 16  ;;  %v6713_v26 = vsel %vm6315_vm2, %v539_v21, 0 }
  0xa8   : > { %872 = vst [vmem:[#allocation1 + $0x5] ss:$9 sm:$0xff] %v6652_v20  ;;  %v6680_v20 = vrot.slane %v6670_v0, 2 }
  0xa9   : > { %874 = vst [vmem:[#allocation1 + $0x6] ss:$9 sm:$0xff] %v6656_v54  ;;  %v546_v54 = vrot.slane %v544_v42, 7  ;;  %v6709_v42 = vrot.slane %v6670_v0, 7 }
  0xaa   : > { %876 = vst [vmem:[#allocation1 + $0x7] ss:$9 sm:$0xff] %v6660_v27  ;;  %v6685_v27 = vrot.slane %v6670_v0, 3 }
  0xab   : > { %10714 = vst [vmem:[#allocation66_spill] sm:$0xff] %v6670_v0 }
  0xac   : > { %10715 = vst [vmem:[#allocation67_spill] sm:$0xff] %v6674_v62 }
  0xad   : > { %10716 = vst [vmem:[#allocation68_spill] sm:$0xff] %v6677_v8 }
  0xae   : > { %10717 = vst [vmem:[#allocation69_spill] sm:$0xff] %v6680_v20 }
  0xaf   : > { %10719 = vst [vmem:[#allocation71_spill] sm:$0xff] %v6685_v27 }
  0xb0   : > { %10720 = vst [vmem:[#allocation72_spill] sm:$0xff] %v6689_v60 }
  0xb1   : > { %v6682_v61 = vld [vmem:[#allocation1] sm:$0xff]  ;;  %10721 = vst [vmem:[#allocation73_spill] sm:$0xff] %v6693_v51 }
  0xb2   : > { %10718 = vst [vmem:[#allocation70_spill] sm:$0xff] %v6682_v61  ;;  %v549_v61 = vor.u32 %v547_v1, %v546_v54 }
  0xb3   : > { %879 = vst [vmem:[#allocation1] ss:$9 sm:$0xff] %v6674_v62 }
  0xb4   : > { %881 = vst [vmem:[#allocation1 + $0x1] ss:$9 sm:$0xff] %v6670_v0  ;;  %v6706_v62 = vsel %vm6315_vm2, 0, %v549_v61 }
  0xb5   : > { %883 = vst [vmem:[#allocation1 + $0x2] ss:$9 sm:$0xff] %v6677_v8  ;;  %v6721_v1 = vrot.slane %v6706_v62, 2  ;;  %v6725_v61 = vrot.slane %v6706_v62, 3  ;;  %v6733_v21 = vrot.slane %v6706_v62, 5 }
  0xb6   : > { %10722 = vst [vmem:[#allocation74_spill] sm:$0xff] %v6697_v40 }
  0xb7   : > { %885 = vst [vmem:[#allocation1 + $0x3] ss:$9 sm:$0xff] %v6680_v20 }
  0xb8   : > { %887 = vst [vmem:[#allocation1 + $0x4] ss:$9 sm:$0xff] %v6685_v27  ;;  %v6716_v27 = vrot.slane %v6706_v62, 1 }
  0xb9   : > { %889 = vst [vmem:[#allocation1 + $0x5] ss:$9 sm:$0xff] %v6689_v60 }
  0xba   : > { %891 = vst [vmem:[#allocation1 + $0x6] ss:$9 sm:$0xff] %v6693_v51 }
  0xbb   : > { %893 = vst [vmem:[#allocation1 + $0x7] ss:$9 sm:$0xff] %v6697_v40  ;;  %v6729_v40 = vrot.slane %v6706_v62, 4 }
  0xbc   : > { %10723 = vst [vmem:[#allocation75_spill] sm:$0xff] %v6706_v62 }
  0xbd   : > { %10724 = vst [vmem:[#allocation76_spill] sm:$0xff] %v6709_v42 }
  0xbe   : > { %10725 = vst [vmem:[#allocation77_spill] sm:$0xff] %v6713_v26 }
  0xbf   : > { %10726 = vst [vmem:[#allocation78_spill] sm:$0xff] %v6716_v27 }
  0xc0   : > { %10728 = vst [vmem:[#allocation80_spill] sm:$0xff] %v6721_v1 }
  0xc1   : > { %10729 = vst [vmem:[#allocation81_spill] sm:$0xff] %v6725_v61 }
  0xc2   : > { %v6718_v60 = vld [vmem:[#allocation1] sm:$0xff]  ;;  %10730 = vst [vmem:[#allocation82_spill] sm:$0xff] %v6729_v40 }
  0xc3   : > { %10727 = vst [vmem:[#allocation79_spill] sm:$0xff] %v6718_v60  ;;  %v6741_v60 = vrot.slane %v6706_v62, 6 }
  0xc4   : > { %896 = vst [vmem:[#allocation1] ss:$9 sm:$0xff] %v6709_v42  ;;  %v6748_v42 = vsel %vm6315_vm2, %v546_v54, 0 }
  0xc5   : > { %898 = vst [vmem:[#allocation1 + $0x1] ss:$9 sm:$0xff] %v6713_v26  ;;  %v6744_v26 = vrot.slane %v6706_v62, 7 }
  0xc6   : > { %900 = vst [vmem:[#allocation1 + $0x2] ss:$9 sm:$0xff] %v6706_v62 }
  0xc7   : > { %10731 = vst [vmem:[#allocation83_spill] sm:$0xff] %v6733_v21 }
  0xc8   : > { %902 = vst [vmem:[#allocation1 + $0x3] ss:$9 sm:$0xff] %v6716_v27 }
  0xc9   : > { %904 = vst [vmem:[#allocation1 + $0x4] ss:$9 sm:$0xff] %v6721_v1 }
  0xca   : > { %906 = vst [vmem:[#allocation1 + $0x5] ss:$9 sm:$0xff] %v6725_v61 }
  0xcb   : > { %908 = vst [vmem:[#allocation1 + $0x6] ss:$9 sm:$0xff] %v6729_v40 }
  0xcc   : > { %910 = vst [vmem:[#allocation1 + $0x7] ss:$9 sm:$0xff] %v6733_v21 }
  0xcd   : > { %10732 = vst [vmem:[#allocation84_spill] sm:$0xff] %v6741_v60 }
  0xce   : > { %10733 = vst [vmem:[#allocation85_spill] sm:$0xff] %v6744_v26 }
  0xcf   : > { %10734 = vst [vmem:[#allocation86_spill] sm:$0xff] %v6748_v42 }
  0xd3   : > { %v6750_v51 = vld [vmem:[#allocation1] sm:$0xff] }
  0xd4   : > { %10735 = vst [vmem:[#allocation87_spill] sm:$0xff] %v6750_v51 }
  0xd5   : > { %913 = vst [vmem:[#allocation1] ss:$9 sm:$0xff] %v6741_v60 }
  0xd6   : > { %915 = vst [vmem:[#allocation1 + $0x1] ss:$9 sm:$0xff] %v6744_v26 }
  0xd7   : > { %917 = vst [vmem:[#allocation1 + $0x2] ss:$9 sm:$0xff] %v6748_v42 }
  0xde   : > { %v6755_v40 = vld [vmem:[#allocation1] sm:$0xff] }
  0xdf   : > { %10736 = vst [vmem:[#allocation88_spill] sm:$0xff] %v6755_v40 }
  0xe0   : > { %919 = vst [vmem:[#allocation1] ss:$9 sm:$0xff] %v6339_v10 }
  0xe1   : > { %921 = vst [vmem:[#allocation1 + $0x1] ss:$9 sm:$0xff] %v6343_v12 }
  0xe2   : > { %923 = vst [vmem:[#allocation1 + $0x2] ss:$9 sm:$0xff] %v6346_v13 }
  0xe3   : > { %925 = vst [vmem:[#allocation1 + $0x3] ss:$9 sm:$0xff] %v6349_v14 }
  0xe4   : > { %927 = vst [vmem:[#allocation1 + $0x4] ss:$9 sm:$0xff] %v6352_v15 }
  0xe5   : > { %929 = vst [vmem:[#allocation1 + $0x5] ss:$9 sm:$0xff] %v6357_v16 }
  0xe6   : > { %931 = vst [vmem:[#allocation1 + $0x6] ss:$9 sm:$0xff] %v6361_v19 }
  0xe7   : > { %933 = vst [vmem:[#allocation1 + $0x7] ss:$9 sm:$0xff] %v6380_v23 }
  0xee   : > { %v934_v54 = vld [vmem:[#allocation1] sm:$0xff] }
  0xef   : > { %v1028_v51 = vshrl.u32 %v934_v54, 16  ;;  %v1031_v2 = vshll.u32 %v934_v54, 16  ;;  %935 = vst [vmem:[#allocation1] ss:$9 sm:$0xff] %v6384_v24 }
  0xf0   : > { %936 = vst [vmem:[#allocation1 + $0x1] ss:$9 sm:$0xff] %v6377_v22 }
  0xf1   : > { %v1030_v40 = vrot.slane %v1028_v51, 7  ;;  %937 = vst [vmem:[#allocation1 + $0x2] ss:$9 sm:$0xff] %v6387_v25 }
  0xf2   : > { %938 = vst [vmem:[#allocation1 + $0x3] ss:$9 sm:$0xff] %v6392_v28 }
  0xf3   : > { %v1033_v14 = vor.u32 %v1031_v2, %v1030_v40  ;;  %939 = vst [vmem:[#allocation1 + $0x4] ss:$9 sm:$0xff] %v6396_v29 }
  0xf4   : > { %940 = vst [vmem:[#allocation1 + $0x5] ss:$9 sm:$0xff] %v6400_v30 }
  0xf5   : > { %1111 = vrot.lane.b32.xlu0 %v1033_v14, %s6230_s25  ;;  %941 = vst [vmem:[#allocation1 + $0x6] ss:$9 sm:$0xff] %v6404_v31 }
  0xf6   : > { %942 = vst [vmem:[#allocation1 + $0x7] ss:$9 sm:$0xff] %v6412_v35 }
  0xfd   : > { %v943_v54 = vld [vmem:[#allocation1] sm:$0xff] }
  0xfe   : > { %v1034_v24 = vshrl.u32 %v943_v54, 16  ;;  %v1037_v22 = vshll.u32 %v943_v54, 16  ;;  %944 = vst [vmem:[#allocation1] ss:$9 sm:$0xff] %v6420_v38 }
  0xff   : > { %945 = vst [vmem:[#allocation1 + $0x1] ss:$9 sm:$0xff] %v6424_v39 }
 0x100   : > { %v1036_v51 = vrot.slane %v1034_v24, 7  ;;  %946 = vst [vmem:[#allocation1 + $0x2] ss:$9 sm:$0xff] %v6417_v37 }
 0x101   : > { %947 = vst [vmem:[#allocation1 + $0x3] ss:$9 sm:$0xff] %v6429_v41 }
 0x102   : > { %v1039_v2 = vor.u32 %v1037_v22, %v1036_v51  ;;  %948 = vst [vmem:[#allocation1 + $0x4] ss:$9 sm:$0xff] %v6433_v43 }
 0x103   : > { %949 = vst [vmem:[#allocation1 + $0x5] ss:$9 sm:$0xff] %v6437_v44 }
 0x104   : > { %v1040_v14 = vsel %vm594_vm1, %v1030_v40, %v1039_v2  ;;  %950 = vst [vmem:[#allocation1 + $0x6] ss:$9 sm:$0xff] %v6441_v45 }
 0x105   : > { %1113 = vrot.lane.b32.xlu1 %v1040_v14, %s6230_s25  ;;  %951 = vst [vmem:[#allocation1 + $0x7] ss:$9 sm:$0xff] %v6449_v49 }
 0x10c   : > { %v952_v54 = vld [vmem:[#allocation1] sm:$0xff] }
 0x10d   : > { %953 = vst [vmem:[#allocation1] ss:$9 sm:$0xff] %v6452_v50  ;;  %v1041_v24 = vshrl.u32 %v952_v54, 16  ;;  %v1044_v37 = vshll.u32 %v952_v54, 16 }
 0x10e   : > { %954 = vst [vmem:[#allocation1 + $0x1] ss:$9 sm:$0xff] %v6460_v53 }
 0x10f   : > { %955 = vst [vmem:[#allocation1 + $0x2] ss:$9 sm:$0xff] %v6466_v55  ;;  %v1043_v22 = vrot.slane %v1041_v24, 7 }
 0x110   : > { %956 = vst [vmem:[#allocation1 + $0x3] ss:$9 sm:$0xff] %v6457_v52 }
 0x111   : > { %957 = vst [vmem:[#allocation1 + $0x4] ss:$9 sm:$0xff] %v6470_v56  ;;  %v1046_v40 = vor.u32 %v1044_v37, %v1043_v22 }
 0x112   : > { %958 = vst [vmem:[#allocation1 + $0x5] ss:$9 sm:$0xff] %v6474_v58 }
 0x113   : > { %959 = vst [vmem:[#allocation1 + $0x6] ss:$9 sm:$0xff] %v6478_v59  ;;  %v1047_v2 = vsel %vm594_vm1, %v1036_v51, %v1046_v40 }
 0x114   : > { %960 = vst [vmem:[#allocation1 + $0x7] ss:$9 sm:$0xff] %v6486_v63  ;;  %1115 = vrot.lane.b32.xlu1 %v1047_v2, %s6230_s25 }
 0x11b   : > { %v961_v14 = vld [vmem:[#allocation1] sm:$0xff] }
 0x11c   : > { %v1048_v54 = vshrl.u32 %v961_v14, 16  ;;  %v1051_v53 = vshll.u32 %v961_v14, 16  ;;  %962 = vst [vmem:[#allocation1] ss:$9 sm:$0xff] %v6489_v3 }
 0x11d   : > { %963 = vst [vmem:[#allocation1 + $0x1] ss:$9 sm:$0xff] %v6492_v4 }
 0x11e   : > { %v1050_v24 = vrot.slane %v1048_v54, 7  ;;  %964 = vst [vmem:[#allocation1 + $0x2] ss:$9 sm:$0xff] %v6500_v7 }
 0x11f   : > { %965 = vst [vmem:[#allocation1 + $0x3] ss:$9 sm:$0xff] %v6507_v9 }
 0x120   : > { %v1053_v37 = vor.u32 %v1051_v53, %v1050_v24  ;;  %966 = vst [vmem:[#allocation1 + $0x4] ss:$9 sm:$0xff] %v6497_v6 }
 0x121   : > { %967 = vst [vmem:[#allocation1 + $0x5] ss:$9 sm:$0xff] %v6511_v11 }
 0x122   : > { %v1054_v51 = vsel %vm594_vm1, %v1043_v22, %v1053_v37  ;;  %968 = vst [vmem:[#allocation1 + $0x6] ss:$9 sm:$0xff] %v6515_v18 }
 0x123   : > { %1117 = vrot.lane.b32.xlu0 %v1054_v51, %s6230_s25  ;;  %969 = vst [vmem:[#allocation1 + $0x7] ss:$9 sm:$0xff] %v6523_v32  ;;  %v10739_v51 = vld [vmem:[#allocation41_spill] sm:$0xff] }
 0x12a   : > { %v970_v40 = vld [vmem:[#allocation1] sm:$0xff] }
 0x12b   : > { %v1055_v2 = vshrl.u32 %v970_v40, 16  ;;  %v1058_v14 = vshll.u32 %v970_v40, 16  ;;  %971 = vst [vmem:[#allocation1] ss:$9 sm:$0xff] %v6526_v33  ;;  %v10740_v40 = vld [vmem:[#allocation42_spill] sm:$0xff] }
 0x12c   : > { %972 = vst [vmem:[#allocation1 + $0x1] ss:$9 sm:$0xff] %v6529_v34 }
 0x12d   : > { %v6806_v53 = vrot.slane %v1055_v2, 7  ;;  %973 = vst [vmem:[#allocation1 + $0x2] ss:$9 sm:$0xff] %v6532_v36  ;;  %v10741_v2 = vld [vmem:[#allocation44_spill] sm:$0xff] }
 0x12e   : > { %974 = vst [vmem:[#allocation1 + $0x3] ss:$9 sm:$0xff] %v6541_v47 }
 0x12f   : > { %10737 = vst [vmem:[#allocation89_spill] sm:$0xff] %v6806_v53  ;;  %v1060_v22 = vor.u32 %v1058_v14, %v6806_v53  ;;  %v10742_v14 = vld [vmem:[#allocation45_spill] sm:$0xff]  ;;  %v10743_v53 = vld [vmem:[#allocation46_spill] sm:$0xff] }
 0x130   : > { %975 = vst [vmem:[#allocation1 + $0x4] ss:$9 sm:$0xff] %v6547_v48 }
 0x131   : > { %976 = vst [vmem:[#allocation1 + $0x5] ss:$9 sm:$0xff] %v6538_v46  ;;  %v1061_v54 = vsel %vm594_vm1, %v1050_v24, %v1060_v22  ;;  %v10744_v24 = vld [vmem:[#allocation47_spill] sm:$0xff]  ;;  %v10745_v22 = vld [vmem:[#allocation48_spill] sm:$0xff] }
 0x132   : > { %977 = vst [vmem:[#allocation1 + $0x6] ss:$9 sm:$0xff] %v6552_v57  ;;  %1119 = vrot.lane.b32.xlu2 %v1061_v54, %s6230_s25  ;;  %v10746_v57 = vld [vmem:[#allocation49_spill] sm:$0xff] }
 0x133   : > { %978 = vst [vmem:[#allocation1 + $0x7] ss:$9 sm:$0xff] %v6560_v5 }
 0x13a   : > { %v6817_v37 = vld [vmem:[#allocation1] sm:$0xff] }
 0x13b   : > { %10738 = vst [vmem:[#allocation90_spill] sm:$0xff] %v6817_v37  ;;  %v1062_v54 = vshrl.u32 %v6817_v37, 16  ;;  %v10753_v37 = vld [vmem:[#allocation56_spill] sm:$0xff] }
 0x13c   : > { %980 = vst [vmem:[#allocation1] ss:$9 sm:$0xff] %v6563_v17 }
 0x13d   : > { %981 = vst [vmem:[#allocation1 + $0x1] ss:$9 sm:$0xff] %v10739_v51  ;;  %v10747_v51 = vld [vmem:[#allocation50_spill] sm:$0xff]  ;;  %v6831_v48 = vrot.slane %v1062_v54, 7 }
 0x13e   : > { %982 = vst [vmem:[#allocation1 + $0x2] ss:$9 sm:$0xff] %v10740_v40  ;;  %v10748_v40 = vld [vmem:[#allocation51_spill] sm:$0xff] }
 0x13f   : > { %983 = vst [vmem:[#allocation1 + $0x3] ss:$9 sm:$0xff] %v10741_v2 }
 0x140   : > { %984 = vst [vmem:[#allocation1 + $0x4] ss:$9 sm:$0xff] %v10742_v14  ;;  %v10750_v14 = vld [vmem:[#allocation53_spill] sm:$0xff] }
 0x141   : > { %985 = vst [vmem:[#allocation1 + $0x5] ss:$9 sm:$0xff] %v10743_v53  ;;  %v10751_v53 = vld [vmem:[#allocation54_spill] sm:$0xff] }
 0x142   : > { %986 = vst [vmem:[#allocation1 + $0x6] ss:$9 sm:$0xff] %v10744_v24 }
 0x143   : > { %987 = vst [vmem:[#allocation1 + $0x7] ss:$9 sm:$0xff] %v10745_v22  ;;  %v10752_v22 = vld [vmem:[#allocation55_spill] sm:$0xff] }
 0x144   : > { %10749 = vst [vmem:[#allocation91_spill] sm:$0xff] %v6831_v48 }
 0x14a   : > { %v988_v5 = vld [vmem:[#allocation1] sm:$0xff] }
 0x14b   : > { %989 = vst [vmem:[#allocation1] ss:$9 sm:$0xff] %v10746_v57  ;;  %v1069_v17 = vshrl.u32 %v988_v5, 16  ;;  %v1072_v46 = vshll.u32 %v988_v5, 16  ;;  %v10754_v5 = vld [vmem:[#allocation57_spill] sm:$0xff] }
 0x14c   : > { %990 = vst [vmem:[#allocation1 + $0x1] ss:$9 sm:$0xff] %v10747_v51  ;;  %v10755_v51 = vld [vmem:[#allocation58_spill] sm:$0xff] }
 0x14d   : > { %991 = vst [vmem:[#allocation1 + $0x2] ss:$9 sm:$0xff] %v10748_v40  ;;  %v1071_v2 = vrot.slane %v1069_v17, 7 }
 0x14e   : > { %992 = vst [vmem:[#allocation1 + $0x3] ss:$9 sm:$0xff] %v10750_v14  ;;  %v10756_v14 = vld [vmem:[#allocation59_spill] sm:$0xff] }
 0x14f   : > { %993 = vst [vmem:[#allocation1 + $0x4] ss:$9 sm:$0xff] %v10751_v53  ;;  %v1074_v24 = vor.u32 %v1072_v46, %v1071_v2  ;;  %v10758_v46 = vld [vmem:[#allocation60_spill] sm:$0xff] }
 0x150   : > { %994 = vst [vmem:[#allocation1 + $0x5] ss:$9 sm:$0xff] %v10752_v22  ;;  %v10759_v22 = vld [vmem:[#allocation62_spill] sm:$0xff] }
 0x151   : > { %995 = vst [vmem:[#allocation1 + $0x6] ss:$9 sm:$0xff] %v10753_v37  ;;  %v1075_v57 = vsel %vm594_vm1, %v6831_v48, %v1074_v24  ;;  %v10760_v24 = vld [vmem:[#allocation63_spill] sm:$0xff]  ;;  %v10761_v48 = vld [vmem:[#allocation64_spill] sm:$0xff] }
 0x152   : > { %996 = vst [vmem:[#allocation1 + $0x7] ss:$9 sm:$0xff] %v10754_v5  ;;  %1123 = vrot.lane.b32.xlu1 %v1075_v57, %s6230_s25  ;;  %v10762_v5 = vld [vmem:[#allocation65_spill] sm:$0xff] }
 0x159   : > { %v997_v40 = vld [vmem:[#allocation1] sm:$0xff] }
 0x15a   : > { %v1076_v17 = vshrl.u32 %v997_v40, 16  ;;  %v1079_v54 = vshll.u32 %v997_v40, 16  ;;  %998 = vst [vmem:[#allocation1] ss:$9 sm:$0xff] %v10755_v51  ;;  %v10763_v40 = vld [vmem:[#allocation67_spill] sm:$0xff] }
 0x15b   : > { %999 = vst [vmem:[#allocation1 + $0x1] ss:$9 sm:$0xff] %v10756_v14 }
 0x15c   : > { %v6843_v53 = vrot.slane %v1076_v17, 7  ;;  %1000 = vst [vmem:[#allocation1 + $0x2] ss:$9 sm:$0xff] %v10758_v46 }
 0x15d   : > { %1001 = vst [vmem:[#allocation1 + $0x3] ss:$9 sm:$0xff] %v10759_v22 }
 0x15e   : > { %10757 = vst [vmem:[#allocation92_spill] sm:$0xff] %v6843_v53  ;;  %v1081_v37 = vor.u32 %v1079_v54, %v6843_v53  ;;  %v10765_v54 = vld [vmem:[#allocation71_spill] sm:$0xff]  ;;  %v10766_v53 = vld [vmem:[#allocation72_spill] sm:$0xff] }
 0x15f   : > { %1002 = vst [vmem:[#allocation1 + $0x4] ss:$9 sm:$0xff] %v10760_v24 }
 0x160   : > { %1003 = vst [vmem:[#allocation1 + $0x5] ss:$9 sm:$0xff] %v10761_v48  ;;  %v1082_v57 = vsel %vm594_vm1, %v1071_v2, %v1081_v37  ;;  %v10767_v48 = vld [vmem:[#allocation73_spill] sm:$0xff]  ;;  %v10768_v37 = vld [vmem:[#allocation74_spill] sm:$0xff]  ;;  %v10769_v2 = vld [vmem:[#allocation76_spill] sm:$0xff] }
 0x161   : > { %1004 = vst [vmem:[#allocation1 + $0x6] ss:$9 sm:$0xff] %v10762_v5  ;;  %1125 = vrot.lane.b32.xlu0 %v1082_v57, %s6230_s25 }
 0x162   : > { %1005 = vst [vmem:[#allocation1 + $0x7] ss:$9 sm:$0xff] %v10763_v40  ;;  %v10771_v40 = vld [vmem:[#allocation77_spill] sm:$0xff] }
 0x169   : > { %v6854_v17 = vld [vmem:[#allocation1] sm:$0xff] }
 0x16a   : > { %10764 = vst [vmem:[#allocation93_spill] sm:$0xff] %v6854_v17  ;;  %v10772_v17 = vld [vmem:[#allocation82_spill] sm:$0xff] }
 0x16b   : > { %1007 = vst [vmem:[#allocation1] ss:$9 sm:$0xff] %v6670_v0 }
 0x16c   : > { %1008 = vst [vmem:[#allocation1 + $0x1] ss:$9 sm:$0xff] %v6677_v8 }
 0x16d   : > { %1009 = vst [vmem:[#allocation1 + $0x2] ss:$9 sm:$0xff] %v6680_v20 }
 0x16e   : > { %1010 = vst [vmem:[#allocation1 + $0x3] ss:$9 sm:$0xff] %v10765_v54 }
 0x16f   : > { %1011 = vst [vmem:[#allocation1 + $0x4] ss:$9 sm:$0xff] %v10766_v53 }
 0x170   : > { %1012 = vst [vmem:[#allocation1 + $0x5] ss:$9 sm:$0xff] %v10767_v48 }
 0x171   : > { %1013 = vst [vmem:[#allocation1 + $0x6] ss:$9 sm:$0xff] %v10768_v37 }
 0x172   : > { %1014 = vst [vmem:[#allocation1 + $0x7] ss:$9 sm:$0xff] %v10769_v2 }
 0x179   : > { %v6864_v57 = vld [vmem:[#allocation1] sm:$0xff] }
 0x17a   : > { %10770 = vst [vmem:[#allocation94_spill] sm:$0xff] %v6864_v57 }
 0x17b   : > { %1016 = vst [vmem:[#allocation1] ss:$9 sm:$0xff] %v10771_v40 }
 0x17c   : > { %1017 = vst [vmem:[#allocation1 + $0x1] ss:$9 sm:$0xff] %v6706_v62 }
 0x17d   : > { %1018 = vst [vmem:[#allocation1 + $0x2] ss:$9 sm:$0xff] %v6716_v27 }
 0x17e   : > { %1019 = vst [vmem:[#allocation1 + $0x3] ss:$9 sm:$0xff] %v6721_v1 }
 0x17f   : > { %1020 = vst [vmem:[#allocation1 + $0x4] ss:$9 sm:$0xff] %v6725_v61  ;;  %v10775_v61 = vld [vmem:[#allocation4_spill] sm:$0xff] }
 0x180   : > { %1021 = vst [vmem:[#allocation1 + $0x5] ss:$9 sm:$0xff] %v10772_v17 }
 0x181   : > { %1022 = vst [vmem:[#allocation1 + $0x6] ss:$9 sm:$0xff] %v6733_v21 }
 0x182   : > { %1023 = vst [vmem:[#allocation1 + $0x7] ss:$9 sm:$0xff] %v6741_v60 }
 0x189   : > { %v6874_v37 = vld [vmem:[#allocation1] sm:$0xff] }
 0x18a   : > { %10773 = vst [vmem:[#allocation95_spill] sm:$0xff] %v6874_v37 }
 0x18b   : > { %1025 = vst [vmem:[#allocation1] ss:$9 sm:$0xff] %v6744_v26 }
 0x18c   : > { %1026 = vst [vmem:[#allocation1 + $0x1] ss:$9 sm:$0xff] %v6748_v42 }
 0x193   : > { %v6878_v57 = vld [vmem:[#allocation1] sm:$0xff] }
 0x194   : > { %10774 = vst [vmem:[#allocation96_spill] sm:$0xff] %v6878_v57  ;;  %v10776_v57 = vld [vmem:[#allocation6_spill] sm:$0xff] }
 0x195   : > { %1135 = vst [vmem:[#allocation1] ss:$9 sm:$0xff] %v6339_v10  ;;  %v10777_v10 = vld [vmem:[#allocation5_spill] sm:$0xff] }
 0x196   : > { %1137 = vst [vmem:[#allocation1 + $0x1] ss:$9 sm:$0xff] %v6343_v12 }
 0x197   : > { %1139 = vst [vmem:[#allocation1 + $0x2] ss:$9 sm:$0xff] %v6346_v13  ;;  %v10778_v13 = vld [vmem:[#allocation8_spill] sm:$0xff] }
 0x198   : > { %1141 = vst [vmem:[#allocation1 + $0x3] ss:$9 sm:$0xff] %v10775_v61  ;;  %v10780_v61 = vld [vmem:[#allocation37_spill] sm:$0xff] }
 0x199   : > { %1143 = vst [vmem:[#allocation1 + $0x4] ss:$9 sm:$0xff] %v6352_v15 }
 0x19a   : > { %1145 = vst [vmem:[#allocation1 + $0x5] ss:$9 sm:$0xff] %v6357_v16  ;;  %v10779_v16 = vld [vmem:[#allocation15_spill] sm:$0xff] }
 0x19b   : > { %1147 = vst [vmem:[#allocation1 + $0x6] ss:$9 sm:$0xff] %v6361_v19 }
 0x19c   : > { %1149 = vst [vmem:[#allocation1 + $0x7] ss:$9 sm:$0xff] %v6380_v23 }
 0x1a3   : > { %v1150_v37 = vld [vmem:[#allocation1] sm:$0xff] }
 0x1a4   : > { %1258 = vrot.lane.b32.xlu0 %v1150_v37, %s6231_s8  ;;  %1152 = vst [vmem:[#allocation1] ss:$9 sm:$0xff] %v10776_v57  ;;  %v10781_v37 = vld [vmem:[#allocation35_spill] sm:$0xff] }
 0x1a5   : > { %1153 = vst [vmem:[#allocation1 + $0x1] ss:$9 sm:$0xff] %v10777_v10 }
 0x1a6   : > { %1154 = vst [vmem:[#allocation1 + $0x2] ss:$9 sm:$0xff] %v6387_v25 }
 0x1a7   : > { %1155 = vst [vmem:[#allocation1 + $0x3] ss:$9 sm:$0xff] %v6392_v28 }
 0x1a8   : > { %1156 = vst [vmem:[#allocation1 + $0x4] ss:$9 sm:$0xff] %v6396_v29 }
 0x1a9   : > { %1157 = vst [vmem:[#allocation1 + $0x5] ss:$9 sm:$0xff] %v6400_v30 }
 0x1aa   : > { %1158 = vst [vmem:[#allocation1 + $0x6] ss:$9 sm:$0xff] %v6404_v31 }
 0x1ab   : > { %1159 = vst [vmem:[#allocation1 + $0x7] ss:$9 sm:$0xff] %v6412_v35 }
 0x1b2   : > { %v1160_v12 = vld [vmem:[#allocation1] sm:$0xff] }
 0x1b3   : > { %1260 = vrot.lane.b32.xlu2 %v1160_v12, %s6231_s8  ;;  %1162 = vst [vmem:[#allocation1] ss:$9 sm:$0xff] %v6420_v38  ;;  %v10782_v12 = vld [vmem:[#allocation38_spill] sm:$0xff] }
 0x1b4   : > { %1163 = vst [vmem:[#allocation1 + $0x1] ss:$9 sm:$0xff] %v6424_v39 }
 0x1b5   : > { %1164 = vst [vmem:[#allocation1 + $0x2] ss:$9 sm:$0xff] %v10778_v13 }
 0x1b6   : > { %1165 = vst [vmem:[#allocation1 + $0x3] ss:$9 sm:$0xff] %v6429_v41 }
 0x1b7   : > { %1166 = vst [vmem:[#allocation1 + $0x4] ss:$9 sm:$0xff] %v6433_v43 }
 0x1b8   : > { %1167 = vst [vmem:[#allocation1 + $0x5] ss:$9 sm:$0xff] %v6437_v44 }
 0x1b9   : > { %1168 = vst [vmem:[#allocation1 + $0x6] ss:$9 sm:$0xff] %v6441_v45 }
 0x1ba   : > { %1169 = vst [vmem:[#allocation1 + $0x7] ss:$9 sm:$0xff] %v6449_v49 }
 0x1c1   : > { %v1170_v15 = vld [vmem:[#allocation1] sm:$0xff] }
 0x1c2   : > { %1172 = vst [vmem:[#allocation1] ss:$9 sm:$0xff] %v6452_v50  ;;  %1262 = vrot.lane.b32.xlu2 %v1170_v15, %s6231_s8  ;;  %v10783_v15 = vld [vmem:[#allocation39_spill] sm:$0xff] }
 0x1c3   : > { %1173 = vst [vmem:[#allocation1 + $0x1] ss:$9 sm:$0xff] %v10779_v16 }
 0x1c4   : > { %1174 = vst [vmem:[#allocation1 + $0x2] ss:$9 sm:$0xff] %v6466_v55 }
 0x1c5   : > { %1175 = vst [vmem:[#allocation1 + $0x3] ss:$9 sm:$0xff] %v6457_v52 }
 0x1c6   : > { %1176 = vst [vmem:[#allocation1 + $0x4] ss:$9 sm:$0xff] %v6470_v56 }
 0x1c7   : > { %1177 = vst [vmem:[#allocation1 + $0x5] ss:$9 sm:$0xff] %v6474_v58 }
 0x1c8   : > { %1178 = vst [vmem:[#allocation1 + $0x6] ss:$9 sm:$0xff] %v6478_v59 }
 0x1c9   : > { %1179 = vst [vmem:[#allocation1 + $0x7] ss:$9 sm:$0xff] %v6486_v63 }
 0x1d0   : > { %v1180_v19 = vld [vmem:[#allocation1] sm:$0xff] }
 0x1d1   : > { %1264 = vrot.lane.b32.xlu1 %v1180_v19, %s6231_s8  ;;  %1182 = vst [vmem:[#allocation1] ss:$9 sm:$0xff] %v6489_v3 }
 0x1d2   : > { %1183 = vst [vmem:[#allocation1 + $0x1] ss:$9 sm:$0xff] %v6492_v4 }
 0x1d3   : > { %1184 = vst [vmem:[#allocation1 + $0x2] ss:$9 sm:$0xff] %v6500_v7 }
 0x1d4   : > { %1185 = vst [vmem:[#allocation1 + $0x3] ss:$9 sm:$0xff] %v6507_v9 }
 0x1d5   : > { %1186 = vst [vmem:[#allocation1 + $0x4] ss:$9 sm:$0xff] %v6497_v6 }
 0x1d6   : > { %1187 = vst [vmem:[#allocation1 + $0x5] ss:$9 sm:$0xff] %v6511_v11 }
 0x1d7   : > { %1188 = vst [vmem:[#allocation1 + $0x6] ss:$9 sm:$0xff] %v6515_v18 }
 0x1d8   : > { %1189 = vst [vmem:[#allocation1 + $0x7] ss:$9 sm:$0xff] %v6523_v32  ;;  %v10785_v32 = vld [vmem:[#allocation40_spill] sm:$0xff] }
 0x1df   : > { %v1190_v23 = vld [vmem:[#allocation1] sm:$0xff] }
 0x1e0   : > { %1266 = vrot.lane.b32.xlu0 %v1190_v23, %s6231_s8  ;;  %1192 = vst [vmem:[#allocation1] ss:$9 sm:$0xff] %v6526_v33  ;;  %v10786_v23 = vld [vmem:[#allocation41_spill] sm:$0xff]  ;;  %v10787_v33 = vld [vmem:[#allocation42_spill] sm:$0xff] }
 0x1e1   : > { %1193 = vst [vmem:[#allocation1 + $0x1] ss:$9 sm:$0xff] %v6529_v34  ;;  %v10788_v34 = vld [vmem:[#allocation44_spill] sm:$0xff] }
 0x1e2   : > { %1194 = vst [vmem:[#allocation1 + $0x2] ss:$9 sm:$0xff] %v6532_v36  ;;  %v10789_v36 = vld [vmem:[#allocation45_spill] sm:$0xff] }
 0x1e3   : > { %1195 = vst [vmem:[#allocation1 + $0x3] ss:$9 sm:$0xff] %v6541_v47  ;;  %v10790_v47 = vld [vmem:[#allocation46_spill] sm:$0xff] }
 0x1e4   : > { %1196 = vst [vmem:[#allocation1 + $0x4] ss:$9 sm:$0xff] %v10780_v61  ;;  %v10791_v61 = vld [vmem:[#allocation47_spill] sm:$0xff] }
 0x1e5   : > { %1197 = vst [vmem:[#allocation1 + $0x5] ss:$9 sm:$0xff] %v10781_v37  ;;  %v10792_v37 = vld [vmem:[#allocation48_spill] sm:$0xff] }
 0x1e6   : > { %1198 = vst [vmem:[#allocation1 + $0x6] ss:$9 sm:$0xff] %v10782_v12 }
 0x1e7   : > { %1199 = vst [vmem:[#allocation1 + $0x7] ss:$9 sm:$0xff] %v10783_v15  ;;  %v10793_v15 = vld [vmem:[#allocation49_spill] sm:$0xff] }
 0x1ee   : > { %v6933_v19 = vld [vmem:[#allocation1] sm:$0xff] }
 0x1ef   : > { %10784 = vst [vmem:[#allocation4_spill] sm:$0xff] %v6933_v19  ;;  %v10794_v19 = vld [vmem:[#allocation50_spill] sm:$0xff] }
 0x1f0   : > { %1202 = vst [vmem:[#allocation1] ss:$9 sm:$0xff] %v10785_v32 }
 0x1f1   : > { %1203 = vst [vmem:[#allocation1 + $0x1] ss:$9 sm:$0xff] %v10786_v23  ;;  %v10795_v23 = vld [vmem:[#allocation51_spill] sm:$0xff] }
 0x1f2   : > { %1204 = vst [vmem:[#allocation1 + $0x2] ss:$9 sm:$0xff] %v10787_v33  ;;  %v10796_v33 = vld [vmem:[#allocation53_spill] sm:$0xff] }
 0x1f3   : > { %1205 = vst [vmem:[#allocation1 + $0x3] ss:$9 sm:$0xff] %v10788_v34  ;;  %v10797_v34 = vld [vmem:[#allocation54_spill] sm:$0xff] }
 0x1f4   : > { %1206 = vst [vmem:[#allocation1 + $0x4] ss:$9 sm:$0xff] %v10789_v36  ;;  %v10798_v36 = vld [vmem:[#allocation55_spill] sm:$0xff] }
 0x1f5   : > { %1207 = vst [vmem:[#allocation1 + $0x5] ss:$9 sm:$0xff] %v10790_v47  ;;  %v10799_v47 = vld [vmem:[#allocation56_spill] sm:$0xff] }
 0x1f6   : > { %1208 = vst [vmem:[#allocation1 + $0x6] ss:$9 sm:$0xff] %v10791_v61  ;;  %v10800_v61 = vld [vmem:[#allocation57_spill] sm:$0xff] }
 0x1f7   : > { %1209 = vst [vmem:[#allocation1 + $0x7] ss:$9 sm:$0xff] %v10792_v37 }
 0x1fe   : > { %v1210_v12 = vld [vmem:[#allocation1] sm:$0xff] }
 0x1ff   : > { %1212 = vst [vmem:[#allocation1] ss:$9 sm:$0xff] %v10793_v15  ;;  %1270 = vrot.lane.b32.xlu2 %v1210_v12, %s6231_s8  ;;  %v10801_v12 = vld [vmem:[#allocation64_spill] sm:$0xff] }
 0x200   : > { %1213 = vst [vmem:[#allocation1 + $0x1] ss:$9 sm:$0xff] %v10794_v19 }
 0x201   : > { %1214 = vst [vmem:[#allocation1 + $0x2] ss:$9 sm:$0xff] %v10795_v23 }
 0x202   : > { %1215 = vst [vmem:[#allocation1 + $0x3] ss:$9 sm:$0xff] %v10796_v33 }
 0x203   : > { %1216 = vst [vmem:[#allocation1 + $0x4] ss:$9 sm:$0xff] %v10797_v34 }
 0x204   : > { %1217 = vst [vmem:[#allocation1 + $0x5] ss:$9 sm:$0xff] %v10798_v36 }
 0x205   : > { %1218 = vst [vmem:[#allocation1 + $0x6] ss:$9 sm:$0xff] %v10799_v47  ;;  %v10802_v47 = vld [vmem:[#allocation67_spill] sm:$0xff] }
 0x206   : > { %1219 = vst [vmem:[#allocation1 + $0x7] ss:$9 sm:$0xff] %v10800_v61 }
 0x20d   : > { %v1220_v37 = vld [vmem:[#allocation1] sm:$0xff] }
 0x20e   : > { %1222 = vst [vmem:[#allocation1] ss:$9 sm:$0xff] %v10755_v51  ;;  %1272 = vrot.lane.b32.xlu2 %v1220_v37, %s6231_s8  ;;  %v10804_v37 = vld [vmem:[#allocation74_spill] sm:$0xff] }
 0x20f   : > { %1223 = vst [vmem:[#allocation1 + $0x1] ss:$9 sm:$0xff] %v10756_v14 }
 0x210   : > { %1224 = vst [vmem:[#allocation1 + $0x2] ss:$9 sm:$0xff] %v10758_v46 }
 0x211   : > { %1225 = vst [vmem:[#allocation1 + $0x3] ss:$9 sm:$0xff] %v10759_v22 }
 0x212   : > { %1226 = vst [vmem:[#allocation1 + $0x4] ss:$9 sm:$0xff] %v10760_v24 }
 0x213   : > { %1227 = vst [vmem:[#allocation1 + $0x5] ss:$9 sm:$0xff] %v10801_v12 }
 0x214   : > { %1228 = vst [vmem:[#allocation1 + $0x6] ss:$9 sm:$0xff] %v10762_v5 }
 0x215   : > { %1229 = vst [vmem:[#allocation1 + $0x7] ss:$9 sm:$0xff] %v10802_v47 }
 0x21c   : > { %v6961_v61 = vld [vmem:[#allocation1] sm:$0xff] }
 0x21d   : > { %10803 = vst [vmem:[#allocation6_spill] sm:$0xff] %v6961_v61  ;;  %v6126_v61 = vld [vmem:[%s6976_s14] sm:$0xff] }
 0x21e   : > { %1232 = vst [vmem:[#allocation1] ss:$9 sm:$0xff] %v6670_v0 }
 0x21f   : > { %1233 = vst [vmem:[#allocation1 + $0x1] ss:$9 sm:$0xff] %v6677_v8 }
 0x220   : > { %1234 = vst [vmem:[#allocation1 + $0x2] ss:$9 sm:$0xff] %v6680_v20 }
 0x221   : > { %1235 = vst [vmem:[#allocation1 + $0x3] ss:$9 sm:$0xff] %v10765_v54 }
 0x222   : > { %1236 = vst [vmem:[#allocation1 + $0x4] ss:$9 sm:$0xff] %v10766_v53  ;;  %v551_v53 = vshrl.u32 %v6126_v61, 16 }
 0x223   : > { %1237 = vst [vmem:[#allocation1 + $0x5] ss:$9 sm:$0xff] %v10767_v48  ;;  %v554_v48 = vshll.u32 %v6126_v61, 16  ;;  %v10811_v61 = vld [vmem:[#allocation30_spill] sm:$0xff] }
 0x224   : > { %1238 = vst [vmem:[#allocation1 + $0x6] ss:$9 sm:$0xff] %v10804_v37  ;;  %v6987_v37 = vrot.slane %v551_v53, 7 }
 0x225   : > { %1239 = vst [vmem:[#allocation1 + $0x7] ss:$9 sm:$0xff] %v10769_v2  ;;  %v10806_v2 = vld [vmem:[#allocation81_spill] sm:$0xff] }
 0x22c   : > { %v6979_v8 = vld [vmem:[#allocation1] sm:$0xff] }
 0x22d   : > { %10805 = vst [vmem:[#allocation5_spill] sm:$0xff] %v6979_v8  ;;  %v556_v8 = vor.u32 %v554_v48, %v6987_v37 }
 0x22e   : > { %1242 = vst [vmem:[#allocation1] ss:$9 sm:$0xff] %v10771_v40 }
 0x22f   : > { %1243 = vst [vmem:[#allocation1 + $0x1] ss:$9 sm:$0xff] %v6706_v62  ;;  %v6994_v62 = vsel %vm6315_vm2, 0, %v556_v8 }
 0x230   : > { %1244 = vst [vmem:[#allocation1 + $0x2] ss:$9 sm:$0xff] %v6716_v27 }
 0x231   : > { %1245 = vst [vmem:[#allocation1 + $0x3] ss:$9 sm:$0xff] %v6721_v1 }
 0x232   : > { %1246 = vst [vmem:[#allocation1 + $0x4] ss:$9 sm:$0xff] %v10806_v2 }
 0x233   : > { %1247 = vst [vmem:[#allocation1 + $0x5] ss:$9 sm:$0xff] %v10772_v17 }
 0x234   : > { %1248 = vst [vmem:[#allocation1 + $0x6] ss:$9 sm:$0xff] %v6733_v21 }
 0x235   : > { %1249 = vst [vmem:[#allocation1 + $0x7] ss:$9 sm:$0xff] %v6741_v60 }
 0x236   : > { %10808 = vst [vmem:[#allocation8_spill] sm:$0xff] %v6994_v62 }
 0x23c   : > { %v6996_v27 = vld [vmem:[#allocation1] sm:$0xff] }
 0x23d   : > { %10809 = vst [vmem:[#allocation50_spill] sm:$0xff] %v6996_v27  ;;  %v10815_v27 = vld [vmem:[#allocation36_spill] sm:$0xff] }
 0x23e   : > { %1252 = vst [vmem:[#allocation1] ss:$9 sm:$0xff] %v6744_v26 }
 0x23f   : > { %1253 = vst [vmem:[#allocation1 + $0x1] ss:$9 sm:$0xff] %v6748_v42 }
 0x240   : > { %1255 = vst [vmem:[#allocation1 + $0x2] ss:$9 sm:$0xff] %v6994_v62 }
 0x247   : > { %v7001_v53 = vld [vmem:[#allocation1] sm:$0xff] }
 0x248   : > { %10810 = vst [vmem:[#allocation51_spill] sm:$0xff] %v7001_v53  ;;  %v10814_v53 = vld [vmem:[#allocation33_spill] sm:$0xff] }
 0x249   : > { %1282 = vst [vmem:[#allocation1] ss:$9 sm:$0xff] %v10776_v57 }
 0x24a   : > { %1284 = vst [vmem:[#allocation1 + $0x1] ss:$9 sm:$0xff] %v10777_v10 }
 0x24b   : > { %1286 = vst [vmem:[#allocation1 + $0x2] ss:$9 sm:$0xff] %v6387_v25 }
 0x24c   : > { %1288 = vst [vmem:[#allocation1 + $0x3] ss:$9 sm:$0xff] %v6392_v28 }
 0x24d   : > { %1290 = vst [vmem:[#allocation1 + $0x4] ss:$9 sm:$0xff] %v6396_v29 }
 0x24e   : > { %1292 = vst [vmem:[#allocation1 + $0x5] ss:$9 sm:$0xff] %v6400_v30 }
 0x24f   : > { %1294 = vst [vmem:[#allocation1 + $0x6] ss:$9 sm:$0xff] %v6404_v31 }
 0x250   : > { %1296 = vst [vmem:[#allocation1 + $0x7] ss:$9 sm:$0xff] %v6412_v35 }
 0x257   : > { %v1297_v48 = vld [vmem:[#allocation1] sm:$0xff] }
 0x258   : > { %1412 = vrot.lane.b32.xlu1 %v1297_v48, %s6232_s11  ;;  %1299 = vst [vmem:[#allocation1] ss:$9 sm:$0xff] %v6420_v38 }
 0x259   : > { %1300 = vst [vmem:[#allocation1 + $0x1] ss:$9 sm:$0xff] %v6424_v39 }
 0x25a   : > { %1301 = vst [vmem:[#allocation1 + $0x2] ss:$9 sm:$0xff] %v10778_v13 }
 0x25b   : > { %1302 = vst [vmem:[#allocation1 + $0x3] ss:$9 sm:$0xff] %v6429_v41 }
 0x25c   : > { %1303 = vst [vmem:[#allocation1 + $0x4] ss:$9 sm:$0xff] %v6433_v43 }
 0x25d   : > { %1304 = vst [vmem:[#allocation1 + $0x5] ss:$9 sm:$0xff] %v6437_v44 }
 0x25e   : > { %1305 = vst [vmem:[#allocation1 + $0x6] ss:$9 sm:$0xff] %v6441_v45 }
 0x25f   : > { %1306 = vst [vmem:[#allocation1 + $0x7] ss:$9 sm:$0xff] %v6449_v49 }
 0x266   : > { %v1307_v8 = vld [vmem:[#allocation1] sm:$0xff] }
 0x267   : > { %1414 = vrot.lane.b32.xlu0 %v1307_v8, %s6232_s11  ;;  %1309 = vst [vmem:[#allocation1] ss:$9 sm:$0xff] %v6452_v50  ;;  %v10812_v8 = vld [vmem:[#allocation31_spill] sm:$0xff] }
 0x268   : > { %1310 = vst [vmem:[#allocation1 + $0x1] ss:$9 sm:$0xff] %v10779_v16 }
 0x269   : > { %1311 = vst [vmem:[#allocation1 + $0x2] ss:$9 sm:$0xff] %v6466_v55 }
 0x26a   : > { %1312 = vst [vmem:[#allocation1 + $0x3] ss:$9 sm:$0xff] %v6457_v52 }
 0x26b   : > { %1313 = vst [vmem:[#allocation1 + $0x4] ss:$9 sm:$0xff] %v6470_v56 }
 0x26c   : > { %1314 = vst [vmem:[#allocation1 + $0x5] ss:$9 sm:$0xff] %v6474_v58 }
 0x26d   : > { %1315 = vst [vmem:[#allocation1 + $0x6] ss:$9 sm:$0xff] %v6478_v59 }
 0x26e   : > { %1316 = vst [vmem:[#allocation1 + $0x7] ss:$9 sm:$0xff] %v6486_v63 }
 0x275   : > { %v1317_v57 = vld [vmem:[#allocation1] sm:$0xff] }
 0x276   : > { %1319 = vst [vmem:[#allocation1] ss:$9 sm:$0xff] %v6489_v3  ;;  %1416 = vrot.lane.b32.xlu0 %v1317_v57, %s6232_s11  ;;  %v10813_v57 = vld [vmem:[#allocation32_spill] sm:$0xff] }
 0x277   : > { %1320 = vst [vmem:[#allocation1 + $0x1] ss:$9 sm:$0xff] %v6492_v4 }
 0x278   : > { %1321 = vst [vmem:[#allocation1 + $0x2] ss:$9 sm:$0xff] %v6500_v7 }
 0x279   : > { %1322 = vst [vmem:[#allocation1 + $0x3] ss:$9 sm:$0xff] %v6507_v9  ;;  %v10816_v9 = vld [vmem:[#allocation37_spill] sm:$0xff] }
 0x27a   : > { %1323 = vst [vmem:[#allocation1 + $0x4] ss:$9 sm:$0xff] %v6497_v6  ;;  %v10817_v6 = vld [vmem:[#allocation35_spill] sm:$0xff] }
 0x27b   : > { %1324 = vst [vmem:[#allocation1 + $0x5] ss:$9 sm:$0xff] %v6511_v11  ;;  %v10818_v11 = vld [vmem:[#allocation38_spill] sm:$0xff] }
 0x27c   : > { %1325 = vst [vmem:[#allocation1 + $0x6] ss:$9 sm:$0xff] %v6515_v18  ;;  %v10819_v18 = vld [vmem:[#allocation39_spill] sm:$0xff] }
 0x27d   : > { %1326 = vst [vmem:[#allocation1 + $0x7] ss:$9 sm:$0xff] %v10811_v61 }
 0x284   : > { %v1327_v48 = vld [vmem:[#allocation1] sm:$0xff] }
 0x285   : > { %1329 = vst [vmem:[#allocation1] ss:$9 sm:$0xff] %v10812_v8  ;;  %1418 = vrot.lane.b32.xlu2 %v1327_v48, %s6232_s11  ;;  %v10820_v48 = vld [vmem:[#allocation41_spill] sm:$0xff] }
 0x286   : > { %1330 = vst [vmem:[#allocation1 + $0x1] ss:$9 sm:$0xff] %v10813_v57  ;;  %v10821_v57 = vld [vmem:[#allocation42_spill] sm:$0xff] }
 0x287   : > { %1331 = vst [vmem:[#allocation1 + $0x2] ss:$9 sm:$0xff] %v10814_v53  ;;  %v10822_v53 = vld [vmem:[#allocation44_spill] sm:$0xff] }
 0x288   : > { %1332 = vst [vmem:[#allocation1 + $0x3] ss:$9 sm:$0xff] %v10815_v27  ;;  %v10823_v27 = vld [vmem:[#allocation45_spill] sm:$0xff] }
 0x289   : > { %1333 = vst [vmem:[#allocation1 + $0x4] ss:$9 sm:$0xff] %v10816_v9  ;;  %v10824_v9 = vld [vmem:[#allocation46_spill] sm:$0xff] }
 0x28a   : > { %1334 = vst [vmem:[#allocation1 + $0x5] ss:$9 sm:$0xff] %v10817_v6  ;;  %v10825_v6 = vld [vmem:[#allocation47_spill] sm:$0xff] }
 0x28b   : > { %1335 = vst [vmem:[#allocation1 + $0x6] ss:$9 sm:$0xff] %v10818_v11  ;;  %v10826_v11 = vld [vmem:[#allocation48_spill] sm:$0xff] }
 0x28c   : > { %1336 = vst [vmem:[#allocation1 + $0x7] ss:$9 sm:$0xff] %v10819_v18 }
 0x293   : > { %v1337_v61 = vld [vmem:[#allocation1] sm:$0xff] }
 0x294   : > { %1420 = vrot.lane.b32.xlu1 %v1337_v61, %s6232_s11  ;;  %1339 = vst [vmem:[#allocation1] ss:$9 sm:$0xff] %v10785_v32  ;;  %v10828_v61 = vld [vmem:[#allocation56_spill] sm:$0xff] }
 0x295   : > { %1340 = vst [vmem:[#allocation1 + $0x1] ss:$9 sm:$0xff] %v10820_v48 }
 0x296   : > { %1341 = vst [vmem:[#allocation1 + $0x2] ss:$9 sm:$0xff] %v10821_v57 }
 0x297   : > { %1342 = vst [vmem:[#allocation1 + $0x3] ss:$9 sm:$0xff] %v10822_v53 }
 0x298   : > { %1343 = vst [vmem:[#allocation1 + $0x4] ss:$9 sm:$0xff] %v10823_v27 }
 0x299   : > { %1344 = vst [vmem:[#allocation1 + $0x5] ss:$9 sm:$0xff] %v10824_v9  ;;  %v10829_v9 = vld [vmem:[#allocation57_spill] sm:$0xff] }
 0x29a   : > { %1345 = vst [vmem:[#allocation1 + $0x6] ss:$9 sm:$0xff] %v10825_v6 }
 0x29b   : > { %1346 = vst [vmem:[#allocation1 + $0x7] ss:$9 sm:$0xff] %v10826_v11 }
 0x2a2   : > { %v7056_v18 = vld [vmem:[#allocation1] sm:$0xff] }
 0x2a3   : > { %10827 = vst [vmem:[#allocation44_spill] sm:$0xff] %v7056_v18 }
 0x2a4   : > { %1349 = vst [vmem:[#allocation1] ss:$9 sm:$0xff] %v10793_v15 }
 0x2a5   : > { %1350 = vst [vmem:[#allocation1 + $0x1] ss:$9 sm:$0xff] %v10794_v19 }
 0x2a6   : > { %1351 = vst [vmem:[#allocation1 + $0x2] ss:$9 sm:$0xff] %v10795_v23 }
 0x2a7   : > { %1352 = vst [vmem:[#allocation1 + $0x3] ss:$9 sm:$0xff] %v10796_v33 }
 0x2a8   : > { %1353 = vst [vmem:[#allocation1 + $0x4] ss:$9 sm:$0xff] %v10797_v34 }
 0x2a9   : > { %1354 = vst [vmem:[#allocation1 + $0x5] ss:$9 sm:$0xff] %v10798_v36 }
 0x2aa   : > { %1355 = vst [vmem:[#allocation1 + $0x6] ss:$9 sm:$0xff] %v10828_v61 }
 0x2ab   : > { %1356 = vst [vmem:[#allocation1 + $0x7] ss:$9 sm:$0xff] %v10829_v9 }
 0x2b2   : > { %v1357_v6 = vld [vmem:[#allocation1] sm:$0xff] }
 0x2b3   : > { %1424 = vrot.lane.b32.xlu1 %v1357_v6, %s6232_s11  ;;  %1359 = vst [vmem:[#allocation1] ss:$9 sm:$0xff] %v10755_v51  ;;  %v10830_v6 = vld [vmem:[#allocation68_spill] sm:$0xff] }
 0x2b4   : > { %1360 = vst [vmem:[#allocation1 + $0x1] ss:$9 sm:$0xff] %v10756_v14 }
 0x2b5   : > { %1361 = vst [vmem:[#allocation1 + $0x2] ss:$9 sm:$0xff] %v10758_v46  ;;  %v10836_v46 = vld [vmem:[#allocation77_spill] sm:$0xff] }
 0x2b6   : > { %1362 = vst [vmem:[#allocation1 + $0x3] ss:$9 sm:$0xff] %v10759_v22  ;;  %v10831_v22 = vld [vmem:[#allocation72_spill] sm:$0xff] }
 0x2b7   : > { %1363 = vst [vmem:[#allocation1 + $0x4] ss:$9 sm:$0xff] %v10760_v24  ;;  %v10832_v24 = vld [vmem:[#allocation73_spill] sm:$0xff] }
 0x2b8   : > { %1364 = vst [vmem:[#allocation1 + $0x5] ss:$9 sm:$0xff] %v10801_v12  ;;  %v10833_v12 = vld [vmem:[#allocation74_spill] sm:$0xff] }
 0x2b9   : > { %1365 = vst [vmem:[#allocation1 + $0x6] ss:$9 sm:$0xff] %v10762_v5  ;;  %v10834_v5 = vld [vmem:[#allocation76_spill] sm:$0xff] }
 0x2ba   : > { %1366 = vst [vmem:[#allocation1 + $0x7] ss:$9 sm:$0xff] %v10802_v47 }
 0x2c1   : > { %v1367_v18 = vld [vmem:[#allocation1] sm:$0xff] }
 0x2c2   : > { %1369 = vst [vmem:[#allocation1] ss:$9 sm:$0xff] %v6670_v0  ;;  %1426 = vrot.lane.b32.xlu1 %v1367_v18, %s6232_s11  ;;  %v10837_v0 = vld [vmem:[#allocation75_spill] sm:$0xff]  ;;  %v10838_v18 = vld [vmem:[#allocation78_spill] sm:$0xff] }
 0x2c3   : > { %1370 = vst [vmem:[#allocation1 + $0x1] ss:$9 sm:$0xff] %v10830_v6 }
 0x2c4   : > { %1371 = vst [vmem:[#allocation1 + $0x2] ss:$9 sm:$0xff] %v6680_v20 }
 0x2c5   : > { %1372 = vst [vmem:[#allocation1 + $0x3] ss:$9 sm:$0xff] %v10765_v54 }
 0x2c6   : > { %1373 = vst [vmem:[#allocation1 + $0x4] ss:$9 sm:$0xff] %v10831_v22 }
 0x2c7   : > { %1374 = vst [vmem:[#allocation1 + $0x5] ss:$9 sm:$0xff] %v10832_v24 }
 0x2c8   : > { %1375 = vst [vmem:[#allocation1 + $0x6] ss:$9 sm:$0xff] %v10833_v12 }
 0x2c9   : > { %1376 = vst [vmem:[#allocation1 + $0x7] ss:$9 sm:$0xff] %v10834_v5  ;;  %v7095_v5 = vrot.slane %v6994_v62, 1 }
 0x2cb   : > { %10839 = vst [vmem:[#allocation97_spill] sm:$0xff] %v7095_v5 }
 0x2d0   : > { %v7084_v47 = vld [vmem:[#allocation1] sm:$0xff] }
 0x2d1   : > { %10835 = vst [vmem:[#allocation48_spill] sm:$0xff] %v7084_v47 }
 0x2d2   : > { %1379 = vst [vmem:[#allocation1] ss:$9 sm:$0xff] %v10836_v46  ;;  %v7100_v46 = vrot.slane %v6994_v62, 2 }
 0x2d3   : > { %1380 = vst [vmem:[#allocation1 + $0x1] ss:$9 sm:$0xff] %v10837_v0 }
 0x2d4   : > { %1381 = vst [vmem:[#allocation1 + $0x2] ss:$9 sm:$0xff] %v10838_v18 }
 0x2d5   : > { %1382 = vst [vmem:[#allocation1 + $0x3] ss:$9 sm:$0xff] %v6721_v1  ;;  %v7104_v1 = vrot.slane %v6994_v62, 3 }
 0x2d6   : > { %1383 = vst [vmem:[#allocation1 + $0x4] ss:$9 sm:$0xff] %v10806_v2 }
 0x2d7   : > { %1384 = vst [vmem:[#allocation1 + $0x5] ss:$9 sm:$0xff] %v10772_v17  ;;  %v7108_v17 = vrot.slane %v6994_v62, 4 }
 0x2d8   : > { %1385 = vst [vmem:[#allocation1 + $0x6] ss:$9 sm:$0xff] %v6733_v21 }
 0x2d9   : > { %1386 = vst [vmem:[#allocation1 + $0x7] ss:$9 sm:$0xff] %v6741_v60  ;;  %v7112_v60 = vrot.slane %v6994_v62, 5 }
 0x2da   : > { %10841 = vst [vmem:[#allocation99_spill] sm:$0xff] %v7100_v46 }
 0x2db   : > { %10842 = vst [vmem:[#allocation100_spill] sm:$0xff] %v7104_v1 }
 0x2dc   : > { %10843 = vst [vmem:[#allocation101_spill] sm:$0xff] %v7108_v17 }
 0x2dd   : > { %10844 = vst [vmem:[#allocation102_spill] sm:$0xff] %v7112_v60 }
 0x2e0   : > { %v7097_v47 = vld [vmem:[#allocation1] sm:$0xff] }
 0x2e1   : > { %10840 = vst [vmem:[#allocation98_spill] sm:$0xff] %v7097_v47  ;;  %v7120_v47 = vrot.slane %v6994_v62, 6 }
 0x2e2   : > { %1389 = vst [vmem:[#allocation1] ss:$9 sm:$0xff] %v6744_v26  ;;  %v7128_v26 = vsel %vm6315_vm2, %v6987_v37, 0 }
 0x2e3   : > { %1390 = vst [vmem:[#allocation1 + $0x1] ss:$9 sm:$0xff] %v6748_v42  ;;  %v7123_v42 = vrot.slane %v6994_v62, 7 }
 0x2e4   : > { %1391 = vst [vmem:[#allocation1 + $0x2] ss:$9 sm:$0xff] %v6994_v62 }
 0x2e5   : > { %1393 = vst [vmem:[#allocation1 + $0x3] ss:$9 sm:$0xff] %v7095_v5 }
 0x2e6   : > { %1395 = vst [vmem:[#allocation1 + $0x4] ss:$9 sm:$0xff] %v7100_v46 }
 0x2e7   : > { %1397 = vst [vmem:[#allocation1 + $0x5] ss:$9 sm:$0xff] %v7104_v1 }
 0x2e8   : > { %1399 = vst [vmem:[#allocation1 + $0x6] ss:$9 sm:$0xff] %v7108_v17 }
 0x2e9   : > { %1401 = vst [vmem:[#allocation1 + $0x7] ss:$9 sm:$0xff] %v7112_v60 }
 0x2ea   : > { %10845 = vst [vmem:[#allocation103_spill] sm:$0xff] %v7120_v47 }
 0x2eb   : > { %10846 = vst [vmem:[#allocation104_spill] sm:$0xff] %v7123_v42 }
 0x2ec   : > { %10847 = vst [vmem:[#allocation105_spill] sm:$0xff] %v7128_v26 }
 0x2f0   : > { %v7130_v5 = vld [vmem:[#allocation1] sm:$0xff] }
 0x2f1   : > { %10848 = vst [vmem:[#allocation106_spill] sm:$0xff] %v7130_v5 }
 0x2f2   : > { %1405 = vst [vmem:[#allocation1] ss:$9 sm:$0xff] %v7120_v47 }
 0x2f3   : > { %1407 = vst [vmem:[#allocation1 + $0x1] ss:$9 sm:$0xff] %v7123_v42 }
 0x2f4   : > { %1409 = vst [vmem:[#allocation1 + $0x2] ss:$9 sm:$0xff] %v7128_v26 }
 0x2fb   : > { %v7135_v60 = vld [vmem:[#allocation1] sm:$0xff] }
 0x2fc   : > { %10849 = vst [vmem:[#allocation107_spill] sm:$0xff] %v7135_v60 }
 0x2fd   : > { %1436 = vst [vmem:[#allocation1] ss:$9 sm:$0xff] %v10777_v10 }
 0x2fe   : > { %1438 = vst [vmem:[#allocation1 + $0x1] ss:$9 sm:$0xff] %v6387_v25 }
 0x2ff   : > { %1440 = vst [vmem:[#allocation1 + $0x2] ss:$9 sm:$0xff] %v6392_v28 }
 0x300   : > { %1442 = vst [vmem:[#allocation1 + $0x3] ss:$9 sm:$0xff] %v6396_v29 }
 0x301   : > { %1444 = vst [vmem:[#allocation1 + $0x4] ss:$9 sm:$0xff] %v6400_v30 }
 0x302   : > { %1446 = vst [vmem:[#allocation1 + $0x5] ss:$9 sm:$0xff] %v6404_v31 }
 0x303   : > { %1448 = vst [vmem:[#allocation1 + $0x6] ss:$9 sm:$0xff] %v6412_v35 }
 0x304   : > { %1450 = vst [vmem:[#allocation1 + $0x7] ss:$9 sm:$0xff] %v6420_v38 }
 0x30b   : > { %v1451_v37 = vld [vmem:[#allocation1] sm:$0xff] }
 0x30c   : > { %1452 = vst [vmem:[#allocation1] ss:$9 sm:$0xff] %v6424_v39  ;;  %v1545_v5 = vshrl.u32 %v1451_v37, 16  ;;  %v1548_v40 = vshll.u32 %v1451_v37, 16  ;;  %v10853_v37 = vld [vmem:[#allocation29_spill] sm:$0xff] }
 0x30d   : > { %1453 = vst [vmem:[#allocation1 + $0x1] ss:$9 sm:$0xff] %v10778_v13 }
 0x30e   : > { %1454 = vst [vmem:[#allocation1 + $0x2] ss:$9 sm:$0xff] %v6429_v41 }
 0x30f   : > { %1455 = vst [vmem:[#allocation1 + $0x3] ss:$9 sm:$0xff] %v6433_v43 }
 0x310   : > { %1456 = vst [vmem:[#allocation1 + $0x4] ss:$9 sm:$0xff] %v6437_v44 }
 0x311   : > { %1457 = vst [vmem:[#allocation1 + $0x5] ss:$9 sm:$0xff] %v6441_v45 }
 0x312   : > { %1458 = vst [vmem:[#allocation1 + $0x6] ss:$9 sm:$0xff] %v6449_v49 }
 0x313   : > { %1459 = vst [vmem:[#allocation1 + $0x7] ss:$9 sm:$0xff] %v6452_v50  ;;  %v1547_v50 = vrot.slane %v1545_v5, 7 }
 0x315   : > { %v1550_v49 = vor.u32 %v1548_v40, %v1547_v50 }
 0x317   : > { %1628 = vrot.lane.b32.xlu2 %v1550_v49, %s6233_s12 }
 0x31a   : > { %v1460_v60 = vld [vmem:[#allocation1] sm:$0xff] }
 0x31b   : > { %1461 = vst [vmem:[#allocation1] ss:$9 sm:$0xff] %v10779_v16 }
 0x31c   : > { %1462 = vst [vmem:[#allocation1 + $0x1] ss:$9 sm:$0xff] %v6466_v55 }
 0x31d   : > { %1463 = vst [vmem:[#allocation1 + $0x2] ss:$9 sm:$0xff] %v6457_v52  ;;  %v10855_v52 = vld [vmem:[#allocation32_spill] sm:$0xff] }
 0x31e   : > { %1464 = vst [vmem:[#allocation1 + $0x3] ss:$9 sm:$0xff] %v6470_v56  ;;  %v10850_v56 = vld [vmem:[#allocation27_spill] sm:$0xff] }
 0x31f   : > { %1465 = vst [vmem:[#allocation1 + $0x4] ss:$9 sm:$0xff] %v6474_v58  ;;  %v10851_v58 = vld [vmem:[#allocation24_spill] sm:$0xff] }
 0x320   : > { %1466 = vst [vmem:[#allocation1 + $0x5] ss:$9 sm:$0xff] %v6478_v59  ;;  %v10852_v59 = vld [vmem:[#allocation28_spill] sm:$0xff] }
 0x321   : > { %1467 = vst [vmem:[#allocation1 + $0x6] ss:$9 sm:$0xff] %v6486_v63  ;;  %v10854_v63 = vld [vmem:[#allocation30_spill] sm:$0xff] }
 0x322   : > { %1468 = vst [vmem:[#allocation1 + $0x7] ss:$9 sm:$0xff] %v6489_v3 }
 0x329   : > { %v1469_v55 = vld [vmem:[#allocation1] sm:$0xff] }
 0x32a   : > { %1470 = vst [vmem:[#allocation1] ss:$9 sm:$0xff] %v6492_v4  ;;  %v1558_v5 = vshrl.u32 %v1469_v55, 16  ;;  %v10856_v4 = vld [vmem:[#allocation33_spill] sm:$0xff] }
 0x32b   : > { %1471 = vst [vmem:[#allocation1 + $0x1] ss:$9 sm:$0xff] %v6500_v7 }
 0x32c   : > { %1472 = vst [vmem:[#allocation1 + $0x2] ss:$9 sm:$0xff] %v10850_v56  ;;  %v1560_v7 = vrot.slane %v1558_v5, 7 }
 0x32d   : > { %1473 = vst [vmem:[#allocation1 + $0x3] ss:$9 sm:$0xff] %v10851_v58  ;;  %v10857_v58 = vld [vmem:[#allocation36_spill] sm:$0xff] }
 0x32e   : > { %1474 = vst [vmem:[#allocation1 + $0x4] ss:$9 sm:$0xff] %v10852_v59  ;;  %v10858_v59 = vld [vmem:[#allocation37_spill] sm:$0xff] }
 0x32f   : > { %1475 = vst [vmem:[#allocation1 + $0x5] ss:$9 sm:$0xff] %v10853_v37 }
 0x330   : > { %1476 = vst [vmem:[#allocation1 + $0x6] ss:$9 sm:$0xff] %v10854_v63  ;;  %v10859_v63 = vld [vmem:[#allocation35_spill] sm:$0xff] }
 0x331   : > { %1477 = vst [vmem:[#allocation1 + $0x7] ss:$9 sm:$0xff] %v10812_v8  ;;  %v10860_v8 = vld [vmem:[#allocation38_spill] sm:$0xff] }
 0x338   : > { %v1478_v40 = vld [vmem:[#allocation1] sm:$0xff] }
 0x339   : > { %v1565_v49 = vshrl.u32 %v1478_v40, 16  ;;  %v1568_v3 = vshll.u32 %v1478_v40, 16  ;;  %1479 = vst [vmem:[#allocation1] ss:$9 sm:$0xff] %v10855_v52  ;;  %v10861_v40 = vld [vmem:[#allocation39_spill] sm:$0xff] }
 0x33a   : > { %1480 = vst [vmem:[#allocation1 + $0x1] ss:$9 sm:$0xff] %v10856_v4 }
 0x33b   : > { %v7172_v56 = vrot.slane %v1565_v49, 7  ;;  %1481 = vst [vmem:[#allocation1 + $0x2] ss:$9 sm:$0xff] %v10857_v58  ;;  %v10863_v49 = vld [vmem:[#allocation47_spill] sm:$0xff] }
 0x33c   : > { %1482 = vst [vmem:[#allocation1 + $0x3] ss:$9 sm:$0xff] %v10858_v59 }
 0x33d   : > { %v1570_v37 = vor.u32 %v1568_v3, %v7172_v56  ;;  %1483 = vst [vmem:[#allocation1 + $0x4] ss:$9 sm:$0xff] %v10859_v63  ;;  %v10862_v3 = vld [vmem:[#allocation46_spill] sm:$0xff] }
 0x33e   : > { %1484 = vst [vmem:[#allocation1 + $0x5] ss:$9 sm:$0xff] %v10860_v8  ;;  %v1554_v8 = vshll.u32 %v1460_v60, 16 }
 0x33f   : > { %v1571_v16 = vsel %vm594_vm1, %v1560_v7, %v1570_v37  ;;  %1485 = vst [vmem:[#allocation1 + $0x6] ss:$9 sm:$0xff] %v10861_v40  ;;  %v1551_v37 = vshrl.u32 %v1460_v60, 16  ;;  %v1561_v40 = vshll.u32 %v1469_v55, 16 }
 0x340   : > { %1634 = vrot.lane.b32.xlu0 %v1571_v16, %s6233_s12  ;;  %1486 = vst [vmem:[#allocation1 + $0x7] ss:$9 sm:$0xff] %v10785_v32 }
 0x341   : > { %v1553_v16 = vrot.slane %v1551_v37, 7  ;;  %v1563_v32 = vor.u32 %v1561_v40, %v1560_v7  ;;  %v10869_v37 = vld [vmem:[#allocation64_spill] sm:$0xff] }
 0x347   : > { %v7183_v5 = vld [vmem:[#allocation1] sm:$0xff] }
 0x348   : > { %1488 = vst [vmem:[#allocation1] ss:$9 sm:$0xff] %v10820_v48  ;;  %v1564_v48 = vsel %vm594_vm1, %v1553_v16, %v1563_v32 }
 0x349   : > { %1489 = vst [vmem:[#allocation1 + $0x1] ss:$9 sm:$0xff] %v10821_v57  ;;  %v1556_v57 = vor.u32 %v1554_v8, %v1553_v16  ;;  %1632 = vrot.lane.b32.xlu1 %v1564_v48, %s6233_s12  ;;  %v10868_v48 = vld [vmem:[#allocation63_spill] sm:$0xff]  ;;  %v10870_v16 = vld [vmem:[#allocation65_spill] sm:$0xff] }
 0x34a   : > { %1490 = vst [vmem:[#allocation1 + $0x2] ss:$9 sm:$0xff] %v10822_v53 }
 0x34b   : > { %1491 = vst [vmem:[#allocation1 + $0x3] ss:$9 sm:$0xff] %v10823_v27  ;;  %v1557_v27 = vsel %vm594_vm1, %v1547_v50, %v1556_v57  ;;  %v10867_v57 = vld [vmem:[#allocation62_spill] sm:$0xff] }
 0x34c   : > { %1492 = vst [vmem:[#allocation1 + $0x4] ss:$9 sm:$0xff] %v10862_v3  ;;  %1630 = vrot.lane.b32.xlu2 %v1557_v27, %s6233_s12  ;;  %v10865_v27 = vld [vmem:[#allocation60_spill] sm:$0xff] }
 0x34d   : > { %1493 = vst [vmem:[#allocation1 + $0x5] ss:$9 sm:$0xff] %v10863_v49 }
 0x34e   : > { %1494 = vst [vmem:[#allocation1 + $0x6] ss:$9 sm:$0xff] %v10826_v11 }
 0x34f   : > { %1495 = vst [vmem:[#allocation1 + $0x7] ss:$9 sm:$0xff] %v10793_v15 }
 0x356   : > { %v7197_v3 = vld [vmem:[#allocation1] sm:$0xff] }
 0x357   : > { %10864 = vst [vmem:[#allocation33_spill] sm:$0xff] %v7197_v3  ;;  %v1579_v50 = vshrl.u32 %v7197_v3, 16 }
 0x358   : > { %1497 = vst [vmem:[#allocation1] ss:$9 sm:$0xff] %v10794_v19 }
 0x359   : > { %1498 = vst [vmem:[#allocation1 + $0x1] ss:$9 sm:$0xff] %v10795_v23  ;;  %v7210_v60 = vrot.slane %v1579_v50, 7 }
 0x35a   : > { %1499 = vst [vmem:[#allocation1 + $0x2] ss:$9 sm:$0xff] %v10796_v33 }
 0x35b   : > { %1500 = vst [vmem:[#allocation1 + $0x3] ss:$9 sm:$0xff] %v10797_v34 }
 0x35c   : > { %1501 = vst [vmem:[#allocation1 + $0x4] ss:$9 sm:$0xff] %v10798_v36 }
 0x35d   : > { %1502 = vst [vmem:[#allocation1 + $0x5] ss:$9 sm:$0xff] %v10828_v61 }
 0x35e   : > { %1503 = vst [vmem:[#allocation1 + $0x6] ss:$9 sm:$0xff] %v10829_v9 }
 0x35f   : > { %1504 = vst [vmem:[#allocation1 + $0x7] ss:$9 sm:$0xff] %v10755_v51 }
 0x360   : > { %10866 = vst [vmem:[#allocation35_spill] sm:$0xff] %v7210_v60 }
 0x366   : > { %v1505_v55 = vld [vmem:[#allocation1] sm:$0xff] }
 0x367   : > { %v1586_v7 = vshrl.u32 %v1505_v55, 16  ;;  %v1589_v32 = vshll.u32 %v1505_v55, 16  ;;  %1506 = vst [vmem:[#allocation1] ss:$9 sm:$0xff] %v10756_v14  ;;  %v10871_v55 = vld [vmem:[#allocation67_spill] sm:$0xff] }
 0x368   : > { %1507 = vst [vmem:[#allocation1 + $0x1] ss:$9 sm:$0xff] %v10865_v27  ;;  %v10872_v27 = vld [vmem:[#allocation66_spill] sm:$0xff] }
 0x369   : > { %v1588_v8 = vrot.slane %v1586_v7, 7  ;;  %1508 = vst [vmem:[#allocation1 + $0x2] ss:$9 sm:$0xff] %v10867_v57 }
 0x36a   : > { %1509 = vst [vmem:[#allocation1 + $0x3] ss:$9 sm:$0xff] %v10868_v48 }
 0x36b   : > { %v1591_v40 = vor.u32 %v1589_v32, %v1588_v8  ;;  %1510 = vst [vmem:[#allocation1 + $0x4] ss:$9 sm:$0xff] %v10869_v37 }
 0x36c   : > { %1511 = vst [vmem:[#allocation1 + $0x5] ss:$9 sm:$0xff] %v10870_v16 }
 0x36d   : > { %v1592_v3 = vsel %vm594_vm1, %v7210_v60, %v1591_v40  ;;  %1512 = vst [vmem:[#allocation1 + $0x6] ss:$9 sm:$0xff] %v10871_v55  ;;  %v10874_v60 = vld [vmem:[#allocation76_spill] sm:$0xff] }
 0x36e   : > { %1640 = vrot.lane.b32.xlu0 %v1592_v3, %s6233_s12  ;;  %1513 = vst [vmem:[#allocation1 + $0x7] ss:$9 sm:$0xff] %v10872_v27 }
 0x375   : > { %v1514_v50 = vld [vmem:[#allocation1] sm:$0xff] }
 0x376   : > { %v1593_v7 = vshrl.u32 %v1514_v50, 16  ;;  %v1596_v14 = vshll.u32 %v1514_v50, 16  ;;  %1515 = vst [vmem:[#allocation1] ss:$9 sm:$0xff] %v10830_v6  ;;  %v10875_v50 = vld [vmem:[#allocation77_spill] sm:$0xff] }
 0x377   : > { %1516 = vst [vmem:[#allocation1 + $0x1] ss:$9 sm:$0xff] %v6680_v20 }
 0x378   : > { %v7223_v32 = vrot.slane %v1593_v7, 7  ;;  %1517 = vst [vmem:[#allocation1 + $0x2] ss:$9 sm:$0xff] %v10765_v54 }
 0x379   : > { %1518 = vst [vmem:[#allocation1 + $0x3] ss:$9 sm:$0xff] %v10831_v22  ;;  %v10877_v22 = vld [vmem:[#allocation80_spill] sm:$0xff] }
 0x37a   : > { %10873 = vst [vmem:[#allocation47_spill] sm:$0xff] %v7223_v32  ;;  %v1598_v40 = vor.u32 %v1596_v14, %v7223_v32  ;;  %v10878_v14 = vld [vmem:[#allocation82_spill] sm:$0xff] }
 0x37b   : > { %1519 = vst [vmem:[#allocation1 + $0x4] ss:$9 sm:$0xff] %v10832_v24  ;;  %v10882_v32 = vld [vmem:[#allocation86_spill] sm:$0xff] }
 0x37c   : > { %1520 = vst [vmem:[#allocation1 + $0x5] ss:$9 sm:$0xff] %v10833_v12  ;;  %v1599_v3 = vsel %vm594_vm1, %v1588_v8, %v1598_v40  ;;  %v10879_v8 = vld [vmem:[#allocation84_spill] sm:$0xff]  ;;  %v10880_v40 = vld [vmem:[#allocation85_spill] sm:$0xff] }
 0x37d   : > { %1521 = vst [vmem:[#allocation1 + $0x6] ss:$9 sm:$0xff] %v10874_v60  ;;  %1642 = vrot.lane.b32.xlu0 %v1599_v3, %s6233_s12 }
 0x37e   : > { %1522 = vst [vmem:[#allocation1 + $0x7] ss:$9 sm:$0xff] %v10875_v50 }
 0x385   : > { %v7234_v7 = vld [vmem:[#allocation1] sm:$0xff] }
 0x386   : > { %10876 = vst [vmem:[#allocation108_spill] sm:$0xff] %v7234_v7  ;;  %v10883_v7 = vld [vmem:[#allocation97_spill] sm:$0xff] }
 0x387   : > { %1524 = vst [vmem:[#allocation1] ss:$9 sm:$0xff] %v10837_v0 }
 0x388   : > { %1525 = vst [vmem:[#allocation1 + $0x1] ss:$9 sm:$0xff] %v10838_v18 }
 0x389   : > { %1526 = vst [vmem:[#allocation1 + $0x2] ss:$9 sm:$0xff] %v10877_v22 }
 0x38a   : > { %1527 = vst [vmem:[#allocation1 + $0x3] ss:$9 sm:$0xff] %v10806_v2 }
 0x38b   : > { %1528 = vst [vmem:[#allocation1 + $0x4] ss:$9 sm:$0xff] %v10878_v14  ;;  %v10884_v14 = vld [vmem:[#allocation102_spill] sm:$0xff] }
 0x38c   : > { %1529 = vst [vmem:[#allocation1 + $0x5] ss:$9 sm:$0xff] %v6733_v21 }
 0x38d   : > { %1530 = vst [vmem:[#allocation1 + $0x6] ss:$9 sm:$0xff] %v10879_v8 }
 0x38e   : > { %1531 = vst [vmem:[#allocation1 + $0x7] ss:$9 sm:$0xff] %v10880_v40 }
 0x395   : > { %v7244_v3 = vld [vmem:[#allocation1] sm:$0xff] }
 0x396   : > { %10881 = vst [vmem:[#allocation109_spill] sm:$0xff] %v7244_v3  ;;  %v1572_v3 = vshrl.u32 %v7183_v5, 16 }
 0x397   : > { %1533 = vst [vmem:[#allocation1] ss:$9 sm:$0xff] %v10882_v32  ;;  %v1575_v32 = vshll.u32 %v7183_v5, 16  ;;  %v10897_v5 = vld [vmem:[#allocation22_spill] sm:$0xff] }
 0x398   : > { %1534 = vst [vmem:[#allocation1 + $0x1] ss:$9 sm:$0xff] %v6994_v62 }
 0x399   : > { %1535 = vst [vmem:[#allocation1 + $0x2] ss:$9 sm:$0xff] %v10883_v7  ;;  %v7260_v7 = vrot.slane %v1572_v3, 7  ;;  %v10898_v3 = vld [vmem:[#allocation23_spill] sm:$0xff] }
 0x39a   : > { %1536 = vst [vmem:[#allocation1 + $0x3] ss:$9 sm:$0xff] %v7100_v46 }
 0x39b   : > { %1537 = vst [vmem:[#allocation1 + $0x4] ss:$9 sm:$0xff] %v7104_v1  ;;  %v1577_v1 = vor.u32 %v1575_v32, %v7260_v7 }
 0x39c   : > { %1538 = vst [vmem:[#allocation1 + $0x5] ss:$9 sm:$0xff] %v7108_v17 }
 0x39d   : > { %1539 = vst [vmem:[#allocation1 + $0x6] ss:$9 sm:$0xff] %v10884_v14  ;;  %v1578_v17 = vsel %vm594_vm1, %v7172_v56, %v1577_v1  ;;  %v10894_v1 = vld [vmem:[#allocation19_spill] sm:$0xff] }
 0x39e   : > { %1540 = vst [vmem:[#allocation1 + $0x7] ss:$9 sm:$0xff] %v7120_v47  ;;  %1636 = vrot.lane.b32.xlu2 %v1578_v17, %s6233_s12  ;;  %v10895_v17 = vld [vmem:[#allocation20_spill] sm:$0xff] }
 0x39f   : > { %10886 = vst [vmem:[#allocation111_spill] sm:$0xff] %v7260_v7  ;;  %v10903_v7 = vld [vmem:[#allocation29_spill] sm:$0xff] }
 0x3a5   : > { %v7254_v8 = vld [vmem:[#allocation1] sm:$0xff] }
 0x3a6   : > { %10885 = vst [vmem:[#allocation110_spill] sm:$0xff] %v7254_v8  ;;  %v10902_v8 = vld [vmem:[#allocation28_spill] sm:$0xff] }
 0x3a7   : > { %1542 = vst [vmem:[#allocation1] ss:$9 sm:$0xff] %v7123_v42 }
 0x3a8   : > { %1543 = vst [vmem:[#allocation1 + $0x1] ss:$9 sm:$0xff] %v7128_v26 }
 0x3af   : > { %v7266_v47 = vld [vmem:[#allocation1] sm:$0xff] }
 0x3b0   : > { %10887 = vst [vmem:[#allocation112_spill] sm:$0xff] %v7266_v47  ;;  %v10901_v47 = vld [vmem:[#allocation24_spill] sm:$0xff] }
 0x3b1   : > { %1652 = vst [vmem:[#allocation1] ss:$9 sm:$0xff] %v10777_v10  ;;  %v10896_v10 = vld [vmem:[#allocation21_spill] sm:$0xff] }
 0x3b2   : > { %1654 = vst [vmem:[#allocation1 + $0x1] ss:$9 sm:$0xff] %v6387_v25  ;;  %v10888_v25 = vld [vmem:[#allocation12_spill] sm:$0xff] }
 0x3b3   : > { %1656 = vst [vmem:[#allocation1 + $0x2] ss:$9 sm:$0xff] %v6392_v28  ;;  %v10889_v28 = vld [vmem:[#allocation13_spill] sm:$0xff] }
 0x3b4   : > { %1658 = vst [vmem:[#allocation1 + $0x3] ss:$9 sm:$0xff] %v6396_v29 }
 0x3b5   : > { %1660 = vst [vmem:[#allocation1 + $0x4] ss:$9 sm:$0xff] %v6400_v30  ;;  %v10890_v30 = vld [vmem:[#allocation15_spill] sm:$0xff] }
 0x3b6   : > { %1662 = vst [vmem:[#allocation1 + $0x5] ss:$9 sm:$0xff] %v6404_v31  ;;  %v10891_v31 = vld [vmem:[#allocation17_spill] sm:$0xff] }
 0x3b7   : > { %1664 = vst [vmem:[#allocation1 + $0x6] ss:$9 sm:$0xff] %v6412_v35  ;;  %v10892_v35 = vld [vmem:[#allocation14_spill] sm:$0xff] }
 0x3b8   : > { %1666 = vst [vmem:[#allocation1 + $0x7] ss:$9 sm:$0xff] %v6420_v38  ;;  %v10893_v38 = vld [vmem:[#allocation18_spill] sm:$0xff] }
 0x3bf   : > { %v1667_v56 = vld [vmem:[#allocation1] sm:$0xff] }
 0x3c0   : > { %1775 = vrot.lane.b32.xlu1 %v1667_v56, %s6234_s15  ;;  %1669 = vst [vmem:[#allocation1] ss:$9 sm:$0xff] %v6424_v39  ;;  %v10899_v56 = vld [vmem:[#allocation25_spill] sm:$0xff] }
 0x3c1   : > { %1670 = vst [vmem:[#allocation1 + $0x1] ss:$9 sm:$0xff] %v10778_v13 }
 0x3c2   : > { %1671 = vst [vmem:[#allocation1 + $0x2] ss:$9 sm:$0xff] %v6429_v41 }
 0x3c3   : > { %1672 = vst [vmem:[#allocation1 + $0x3] ss:$9 sm:$0xff] %v6433_v43 }
 0x3c4   : > { %1673 = vst [vmem:[#allocation1 + $0x4] ss:$9 sm:$0xff] %v6437_v44 }
 0x3c5   : > { %1674 = vst [vmem:[#allocation1 + $0x5] ss:$9 sm:$0xff] %v6441_v45 }
 0x3c6   : > { %1675 = vst [vmem:[#allocation1 + $0x6] ss:$9 sm:$0xff] %v10888_v25 }
 0x3c7   : > { %1676 = vst [vmem:[#allocation1 + $0x7] ss:$9 sm:$0xff] %v10889_v28 }
 0x3ce   : > { %v1677_v29 = vld [vmem:[#allocation1] sm:$0xff] }
 0x3cf   : > { %1679 = vst [vmem:[#allocation1] ss:$9 sm:$0xff] %v10890_v30  ;;  %1777 = vrot.lane.b32.xlu1 %v1677_v29, %s6234_s15  ;;  %v10900_v29 = vld [vmem:[#allocation27_spill] sm:$0xff] }
 0x3d0   : > { %1680 = vst [vmem:[#allocation1 + $0x1] ss:$9 sm:$0xff] %v10891_v31 }
 0x3d1   : > { %1681 = vst [vmem:[#allocation1 + $0x2] ss:$9 sm:$0xff] %v10892_v35 }
 0x3d2   : > { %1682 = vst [vmem:[#allocation1 + $0x3] ss:$9 sm:$0xff] %v10893_v38 }
 0x3d3   : > { %1683 = vst [vmem:[#allocation1 + $0x4] ss:$9 sm:$0xff] %v10894_v1 }
 0x3d4   : > { %1684 = vst [vmem:[#allocation1 + $0x5] ss:$9 sm:$0xff] %v10895_v17  ;;  %v10904_v17 = vld [vmem:[#allocation30_spill] sm:$0xff] }
 0x3d5   : > { %1685 = vst [vmem:[#allocation1 + $0x6] ss:$9 sm:$0xff] %v10896_v10  ;;  %v10905_v10 = vld [vmem:[#allocation31_spill] sm:$0xff] }
 0x3d6   : > { %1686 = vst [vmem:[#allocation1 + $0x7] ss:$9 sm:$0xff] %v10897_v5 }
 0x3dd   : > { %v1687_v32 = vld [vmem:[#allocation1] sm:$0xff] }
 0x3de   : > { %1689 = vst [vmem:[#allocation1] ss:$9 sm:$0xff] %v10898_v3  ;;  %1779 = vrot.lane.b32.xlu2 %v1687_v32, %s6234_s15  ;;  %v10906_v32 = vld [vmem:[#allocation38_spill] sm:$0xff] }
 0x3df   : > { %1690 = vst [vmem:[#allocation1 + $0x1] ss:$9 sm:$0xff] %v10899_v56 }
 0x3e0   : > { %1691 = vst [vmem:[#allocation1 + $0x2] ss:$9 sm:$0xff] %v10900_v29 }
 0x3e1   : > { %1692 = vst [vmem:[#allocation1 + $0x3] ss:$9 sm:$0xff] %v10901_v47 }
 0x3e2   : > { %1693 = vst [vmem:[#allocation1 + $0x4] ss:$9 sm:$0xff] %v10902_v8 }
 0x3e3   : > { %1694 = vst [vmem:[#allocation1 + $0x5] ss:$9 sm:$0xff] %v10903_v7  ;;  %v10907_v7 = vld [vmem:[#allocation39_spill] sm:$0xff] }
 0x3e4   : > { %1695 = vst [vmem:[#allocation1 + $0x6] ss:$9 sm:$0xff] %v10904_v17  ;;  %v10908_v17 = vld [vmem:[#allocation40_spill] sm:$0xff] }
 0x3e5   : > { %1696 = vst [vmem:[#allocation1 + $0x7] ss:$9 sm:$0xff] %v10905_v10 }
 0x3ec   : > { %v1697_v5 = vld [vmem:[#allocation1] sm:$0xff] }
 0x3ed   : > { %1699 = vst [vmem:[#allocation1] ss:$9 sm:$0xff] %v10855_v52  ;;  %1781 = vrot.lane.b32.xlu1 %v1697_v5, %s6234_s15  ;;  %v10909_v52 = vld [vmem:[#allocation41_spill] sm:$0xff]  ;;  %v10910_v5 = vld [vmem:[#allocation42_spill] sm:$0xff] }
 0x3ee   : > { %1700 = vst [vmem:[#allocation1 + $0x1] ss:$9 sm:$0xff] %v10856_v4 }
 0x3ef   : > { %1701 = vst [vmem:[#allocation1 + $0x2] ss:$9 sm:$0xff] %v10857_v58  ;;  %v10911_v58 = vld [vmem:[#allocation45_spill] sm:$0xff] }
 0x3f0   : > { %1702 = vst [vmem:[#allocation1 + $0x3] ss:$9 sm:$0xff] %v10858_v59  ;;  %v10912_v59 = vld [vmem:[#allocation46_spill] sm:$0xff] }
 0x3f1   : > { %1703 = vst [vmem:[#allocation1 + $0x4] ss:$9 sm:$0xff] %v10859_v63 }
 0x3f2   : > { %1704 = vst [vmem:[#allocation1 + $0x5] ss:$9 sm:$0xff] %v10906_v32 }
 0x3f3   : > { %1705 = vst [vmem:[#allocation1 + $0x6] ss:$9 sm:$0xff] %v10907_v7 }
 0x3f4   : > { %1706 = vst [vmem:[#allocation1 + $0x7] ss:$9 sm:$0xff] %v10908_v17 }
 0x3fb   : > { %v1707_v10 = vld [vmem:[#allocation1] sm:$0xff] }
 0x3fc   : > { %1783 = vrot.lane.b32.xlu0 %v1707_v10, %s6234_s15  ;;  %1709 = vst [vmem:[#allocation1] ss:$9 sm:$0xff] %v10909_v52 }
 0x3fd   : > { %1710 = vst [vmem:[#allocation1 + $0x1] ss:$9 sm:$0xff] %v10910_v5 }
 0x3fe   : > { %1711 = vst [vmem:[#allocation1 + $0x2] ss:$9 sm:$0xff] %v10822_v53 }
 0x3ff   : > { %1712 = vst [vmem:[#allocation1 + $0x3] ss:$9 sm:$0xff] %v10911_v58 }
 0x400   : > { %1713 = vst [vmem:[#allocation1 + $0x4] ss:$9 sm:$0xff] %v10912_v59 }
 0x401   : > { %1714 = vst [vmem:[#allocation1 + $0x5] ss:$9 sm:$0xff] %v10863_v49 }
 0x402   : > { %1715 = vst [vmem:[#allocation1 + $0x6] ss:$9 sm:$0xff] %v10826_v11 }
 0x403   : > { %1716 = vst [vmem:[#allocation1 + $0x7] ss:$9 sm:$0xff] %v10793_v15  ;;  %v10914_v15 = vld [vmem:[#allocation59_spill] sm:$0xff] }
 0x40a   : > { %v7321_v17 = vld [vmem:[#allocation1] sm:$0xff] }
 0x40b   : > { %10913 = vst [vmem:[#allocation13_spill] sm:$0xff] %v7321_v17  ;;  %v10915_v17 = vld [vmem:[#allocation60_spill] sm:$0xff] }
 0x40c   : > { %1719 = vst [vmem:[#allocation1] ss:$9 sm:$0xff] %v10794_v19 }
 0x40d   : > { %1720 = vst [vmem:[#allocation1 + $0x1] ss:$9 sm:$0xff] %v10795_v23 }
 0x40e   : > { %1721 = vst [vmem:[#allocation1 + $0x2] ss:$9 sm:$0xff] %v10796_v33 }
 0x40f   : > { %1722 = vst [vmem:[#allocation1 + $0x3] ss:$9 sm:$0xff] %v10797_v34 }
 0x410   : > { %1723 = vst [vmem:[#allocation1 + $0x4] ss:$9 sm:$0xff] %v10798_v36 }
 0x411   : > { %1724 = vst [vmem:[#allocation1 + $0x5] ss:$9 sm:$0xff] %v10828_v61 }
 0x412   : > { %1725 = vst [vmem:[#allocation1 + $0x6] ss:$9 sm:$0xff] %v10829_v9 }
 0x413   : > { %1726 = vst [vmem:[#allocation1 + $0x7] ss:$9 sm:$0xff] %v10755_v51 }
 0x41a   : > { %v1727_v10 = vld [vmem:[#allocation1] sm:$0xff] }
 0x41b   : > { %1729 = vst [vmem:[#allocation1] ss:$9 sm:$0xff] %v10914_v15  ;;  %1787 = vrot.lane.b32.xlu2 %v1727_v10, %s6234_s15  ;;  %v10916_v10 = vld [vmem:[#allocation72_spill] sm:$0xff] }
 0x41c   : > { %1730 = vst [vmem:[#allocation1 + $0x1] ss:$9 sm:$0xff] %v10915_v17 }
 0x41d   : > { %1731 = vst [vmem:[#allocation1 + $0x2] ss:$9 sm:$0xff] %v10867_v57 }
 0x41e   : > { %1732 = vst [vmem:[#allocation1 + $0x3] ss:$9 sm:$0xff] %v10868_v48 }
 0x41f   : > { %1733 = vst [vmem:[#allocation1 + $0x4] ss:$9 sm:$0xff] %v10869_v37 }
 0x420   : > { %1734 = vst [vmem:[#allocation1 + $0x5] ss:$9 sm:$0xff] %v10870_v16 }
 0x421   : > { %1735 = vst [vmem:[#allocation1 + $0x6] ss:$9 sm:$0xff] %v10871_v55 }
 0x422   : > { %1736 = vst [vmem:[#allocation1 + $0x7] ss:$9 sm:$0xff] %v10872_v27 }
 0x429   : > { %v1737_v51 = vld [vmem:[#allocation1] sm:$0xff] }
 0x42a   : > { %1739 = vst [vmem:[#allocation1] ss:$9 sm:$0xff] %v10830_v6  ;;  %1789 = vrot.lane.b32.xlu2 %v1737_v51, %s6234_s15  ;;  %v10918_v51 = vld [vmem:[#allocation82_spill] sm:$0xff] }
 0x42b   : > { %1740 = vst [vmem:[#allocation1 + $0x1] ss:$9 sm:$0xff] %v6680_v20 }
 0x42c   : > { %1741 = vst [vmem:[#allocation1 + $0x2] ss:$9 sm:$0xff] %v10765_v54 }
 0x42d   : > { %1742 = vst [vmem:[#allocation1 + $0x3] ss:$9 sm:$0xff] %v10916_v10 }
 0x42e   : > { %1743 = vst [vmem:[#allocation1 + $0x4] ss:$9 sm:$0xff] %v10832_v24  ;;  %v10919_v24 = vld [vmem:[#allocation84_spill] sm:$0xff] }
 0x42f   : > { %1744 = vst [vmem:[#allocation1 + $0x5] ss:$9 sm:$0xff] %v10833_v12 }
 0x430   : > { %1745 = vst [vmem:[#allocation1 + $0x6] ss:$9 sm:$0xff] %v10874_v60  ;;  %v6127_v60 = vld [vmem:[%s6976_s14 + $0x8] sm:$0xff] }
 0x431   : > { %1746 = vst [vmem:[#allocation1 + $0x7] ss:$9 sm:$0xff] %v10875_v50 }
 0x438   : > { %v7349_v27 = vld [vmem:[#allocation1] sm:$0xff] }
 0x439   : > { %10917 = vst [vmem:[#allocation18_spill] sm:$0xff] %v7349_v27  ;;  %v10921_v27 = vld [vmem:[#allocation86_spill] sm:$0xff] }
 0x43a   : > { %1749 = vst [vmem:[#allocation1] ss:$9 sm:$0xff] %v10837_v0  ;;  %v10922_v0 = vld [vmem:[#allocation97_spill] sm:$0xff] }
 0x43b   : > { %1750 = vst [vmem:[#allocation1 + $0x1] ss:$9 sm:$0xff] %v10838_v18  ;;  %v558_v18 = vshrl.u32 %v6127_v60, 16 }
 0x43c   : > { %1751 = vst [vmem:[#allocation1 + $0x2] ss:$9 sm:$0xff] %v10877_v22 }
 0x43d   : > { %1752 = vst [vmem:[#allocation1 + $0x3] ss:$9 sm:$0xff] %v10806_v2  ;;  %v10923_v2 = vld [vmem:[#allocation100_spill] sm:$0xff] }
 0x43e   : > { %1753 = vst [vmem:[#allocation1 + $0x4] ss:$9 sm:$0xff] %v10918_v51  ;;  %v10924_v51 = vld [vmem:[#allocation101_spill] sm:$0xff] }
 0x43f   : > { %1754 = vst [vmem:[#allocation1 + $0x5] ss:$9 sm:$0xff] %v6733_v21  ;;  %v7368_v21 = vrot.slane %v558_v18, 7 }
 0x440   : > { %1755 = vst [vmem:[#allocation1 + $0x6] ss:$9 sm:$0xff] %v10919_v24  ;;  %v561_v24 = vshll.u32 %v6127_v60, 16  ;;  %v10930_v60 = vld [vmem:[#allocation21_spill] sm:$0xff] }
 0x441   : > { %1756 = vst [vmem:[#allocation1 + $0x7] ss:$9 sm:$0xff] %v10880_v40  ;;  %v10925_v40 = vld [vmem:[#allocation103_spill] sm:$0xff] }
 0x448   : > { %v7360_v50 = vld [vmem:[#allocation1] sm:$0xff] }
 0x449   : > { %10920 = vst [vmem:[#allocation25_spill] sm:$0xff] %v7360_v50  ;;  %v563_v50 = vor.u32 %v561_v24, %v7368_v21 }
 0x44a   : > { %1759 = vst [vmem:[#allocation1] ss:$9 sm:$0xff] %v10921_v27 }
 0x44b   : > { %1760 = vst [vmem:[#allocation1 + $0x1] ss:$9 sm:$0xff] %v6994_v62  ;;  %v7375_v62 = vsel %vm6315_vm2, 0, %v563_v50  ;;  %v10931_v50 = vld [vmem:[#allocation22_spill] sm:$0xff] }
 0x44c   : > { %1761 = vst [vmem:[#allocation1 + $0x2] ss:$9 sm:$0xff] %v10922_v0 }
 0x44d   : > { %1762 = vst [vmem:[#allocation1 + $0x3] ss:$9 sm:$0xff] %v7100_v46 }
 0x44e   : > { %1763 = vst [vmem:[#allocation1 + $0x4] ss:$9 sm:$0xff] %v10923_v2 }
 0x44f   : > { %1764 = vst [vmem:[#allocation1 + $0x5] ss:$9 sm:$0xff] %v10924_v51 }
 0x450   : > { %1765 = vst [vmem:[#allocation1 + $0x6] ss:$9 sm:$0xff] %v10884_v14 }
 0x451   : > { %1766 = vst [vmem:[#allocation1 + $0x7] ss:$9 sm:$0xff] %v10925_v40 }
 0x458   : > { %v7377_v0 = vld [vmem:[#allocation1] sm:$0xff] }
 0x459   : > { %10927 = vst [vmem:[#allocation28_spill] sm:$0xff] %v7377_v0  ;;  %v10933_v0 = vld [vmem:[#allocation30_spill] sm:$0xff] }
 0x45a   : > { %1769 = vst [vmem:[#allocation1] ss:$9 sm:$0xff] %v7123_v42 }
 0x45b   : > { %1770 = vst [vmem:[#allocation1 + $0x1] ss:$9 sm:$0xff] %v7128_v26 }
 0x45c   : > { %1772 = vst [vmem:[#allocation1 + $0x2] ss:$9 sm:$0xff] %v7375_v62 }
 0x463   : > { %v7382_v18 = vld [vmem:[#allocation1] sm:$0xff] }
 0x464   : > { %10928 = vst [vmem:[#allocation38_spill] sm:$0xff] %v7382_v18 }
 0x465   : > { %1799 = vst [vmem:[#allocation1] ss:$9 sm:$0xff] %v6424_v39  ;;  %v10929_v39 = vld [vmem:[#allocation20_spill] sm:$0xff] }
 0x466   : > { %1801 = vst [vmem:[#allocation1 + $0x1] ss:$9 sm:$0xff] %v10778_v13 }
 0x467   : > { %1803 = vst [vmem:[#allocation1 + $0x2] ss:$9 sm:$0xff] %v6429_v41 }
 0x468   : > { %1805 = vst [vmem:[#allocation1 + $0x3] ss:$9 sm:$0xff] %v6433_v43 }
 0x469   : > { %1807 = vst [vmem:[#allocation1 + $0x4] ss:$9 sm:$0xff] %v6437_v44 }
 0x46a   : > { %1809 = vst [vmem:[#allocation1 + $0x5] ss:$9 sm:$0xff] %v6441_v45 }
 0x46b   : > { %1811 = vst [vmem:[#allocation1 + $0x6] ss:$9 sm:$0xff] %v10888_v25 }
 0x46c   : > { %1813 = vst [vmem:[#allocation1 + $0x7] ss:$9 sm:$0xff] %v10889_v28 }
 0x473   : > { %v1814_v24 = vld [vmem:[#allocation1] sm:$0xff] }
 0x474   : > { %1929 = vrot.lane.b32.xlu0 %v1814_v24, %s6235_s16  ;;  %1816 = vst [vmem:[#allocation1] ss:$9 sm:$0xff] %v10890_v30  ;;  %v10932_v24 = vld [vmem:[#allocation29_spill] sm:$0xff] }
 0x475   : > { %1817 = vst [vmem:[#allocation1 + $0x1] ss:$9 sm:$0xff] %v10891_v31 }
 0x476   : > { %1818 = vst [vmem:[#allocation1 + $0x2] ss:$9 sm:$0xff] %v10892_v35 }
 0x477   : > { %1819 = vst [vmem:[#allocation1 + $0x3] ss:$9 sm:$0xff] %v10893_v38 }
 0x478   : > { %1820 = vst [vmem:[#allocation1 + $0x4] ss:$9 sm:$0xff] %v10894_v1 }
 0x479   : > { %1821 = vst [vmem:[#allocation1 + $0x5] ss:$9 sm:$0xff] %v10929_v39  ;;  %v10935_v39 = vld [vmem:[#allocation32_spill] sm:$0xff] }
 0x47a   : > { %1822 = vst [vmem:[#allocation1 + $0x6] ss:$9 sm:$0xff] %v10930_v60  ;;  %v10934_v60 = vld [vmem:[#allocation31_spill] sm:$0xff] }
 0x47b   : > { %1823 = vst [vmem:[#allocation1 + $0x7] ss:$9 sm:$0xff] %v10931_v50 }
 0x482   : > { %v1824_v18 = vld [vmem:[#allocation1] sm:$0xff] }
 0x483   : > { %1931 = vrot.lane.b32.xlu0 %v1824_v18, %s6235_s16  ;;  %1826 = vst [vmem:[#allocation1] ss:$9 sm:$0xff] %v10898_v3  ;;  %v10936_v18 = vld [vmem:[#allocation36_spill] sm:$0xff] }
 0x484   : > { %1827 = vst [vmem:[#allocation1 + $0x1] ss:$9 sm:$0xff] %v10899_v56 }
 0x485   : > { %1828 = vst [vmem:[#allocation1 + $0x2] ss:$9 sm:$0xff] %v10900_v29  ;;  %v10937_v29 = vld [vmem:[#allocation37_spill] sm:$0xff] }
 0x486   : > { %1829 = vst [vmem:[#allocation1 + $0x3] ss:$9 sm:$0xff] %v10901_v47 }
 0x487   : > { %1830 = vst [vmem:[#allocation1 + $0x4] ss:$9 sm:$0xff] %v10902_v8 }
 0x488   : > { %1831 = vst [vmem:[#allocation1 + $0x5] ss:$9 sm:$0xff] %v10932_v24 }
 0x489   : > { %1832 = vst [vmem:[#allocation1 + $0x6] ss:$9 sm:$0xff] %v10933_v0  ;;  %v10938_v0 = vld [vmem:[#allocation40_spill] sm:$0xff] }
 0x48a   : > { %1833 = vst [vmem:[#allocation1 + $0x7] ss:$9 sm:$0xff] %v10934_v60 }
 0x491   : > { %v1834_v50 = vld [vmem:[#allocation1] sm:$0xff] }
 0x492   : > { %1836 = vst [vmem:[#allocation1] ss:$9 sm:$0xff] %v10935_v39  ;;  %1933 = vrot.lane.b32.xlu0 %v1834_v50, %s6235_s16  ;;  %v10939_v50 = vld [vmem:[#allocation49_spill] sm:$0xff] }
 0x493   : > { %1837 = vst [vmem:[#allocation1 + $0x1] ss:$9 sm:$0xff] %v10856_v4 }
 0x494   : > { %1838 = vst [vmem:[#allocation1 + $0x2] ss:$9 sm:$0xff] %v10936_v18 }
 0x495   : > { %1839 = vst [vmem:[#allocation1 + $0x3] ss:$9 sm:$0xff] %v10937_v29 }
 0x496   : > { %1840 = vst [vmem:[#allocation1 + $0x4] ss:$9 sm:$0xff] %v10859_v63 }
 0x497   : > { %1841 = vst [vmem:[#allocation1 + $0x5] ss:$9 sm:$0xff] %v10906_v32 }
 0x498   : > { %1842 = vst [vmem:[#allocation1 + $0x6] ss:$9 sm:$0xff] %v10907_v7 }
 0x499   : > { %1843 = vst [vmem:[#allocation1 + $0x7] ss:$9 sm:$0xff] %v10938_v0 }
 0x4a0   : > { %v1844_v60 = vld [vmem:[#allocation1] sm:$0xff] }
 0x4a1   : > { %1846 = vst [vmem:[#allocation1] ss:$9 sm:$0xff] %v10909_v52  ;;  %1935 = vrot.lane.b32.xlu2 %v1844_v60, %s6235_s16  ;;  %v10940_v60 = vld [vmem:[#allocation58_spill] sm:$0xff] }
 0x4a2   : > { %1847 = vst [vmem:[#allocation1 + $0x1] ss:$9 sm:$0xff] %v10910_v5 }
 0x4a3   : > { %1848 = vst [vmem:[#allocation1 + $0x2] ss:$9 sm:$0xff] %v10822_v53 }
 0x4a4   : > { %1849 = vst [vmem:[#allocation1 + $0x3] ss:$9 sm:$0xff] %v10911_v58 }
 0x4a5   : > { %1850 = vst [vmem:[#allocation1 + $0x4] ss:$9 sm:$0xff] %v10912_v59 }
 0x4a6   : > { %1851 = vst [vmem:[#allocation1 + $0x5] ss:$9 sm:$0xff] %v10863_v49 }
 0x4a7   : > { %1852 = vst [vmem:[#allocation1 + $0x6] ss:$9 sm:$0xff] %v10826_v11 }
 0x4a8   : > { %1853 = vst [vmem:[#allocation1 + $0x7] ss:$9 sm:$0xff] %v10939_v50 }
 0x4af   : > { %v1854_v0 = vld [vmem:[#allocation1] sm:$0xff] }
 0x4b0   : > { %1937 = vrot.lane.b32.xlu1 %v1854_v0, %s6235_s16  ;;  %1856 = vst [vmem:[#allocation1] ss:$9 sm:$0xff] %v10794_v19  ;;  %v10942_v0 = vld [vmem:[#allocation66_spill] sm:$0xff] }
 0x4b1   : > { %1857 = vst [vmem:[#allocation1 + $0x1] ss:$9 sm:$0xff] %v10795_v23 }
 0x4b2   : > { %1858 = vst [vmem:[#allocation1 + $0x2] ss:$9 sm:$0xff] %v10796_v33 }
 0x4b3   : > { %1859 = vst [vmem:[#allocation1 + $0x3] ss:$9 sm:$0xff] %v10797_v34 }
 0x4b4   : > { %1860 = vst [vmem:[#allocation1 + $0x4] ss:$9 sm:$0xff] %v10798_v36 }
 0x4b5   : > { %1861 = vst [vmem:[#allocation1 + $0x5] ss:$9 sm:$0xff] %v10828_v61 }
 0x4b6   : > { %1862 = vst [vmem:[#allocation1 + $0x6] ss:$9 sm:$0xff] %v10829_v9 }
 0x4b7   : > { %1863 = vst [vmem:[#allocation1 + $0x7] ss:$9 sm:$0xff] %v10940_v60 }
 0x4be   : > { %v7437_v50 = vld [vmem:[#allocation1] sm:$0xff] }
 0x4bf   : > { %10941 = vst [vmem:[#allocation41_spill] sm:$0xff] %v7437_v50  ;;  %v10943_v50 = vld [vmem:[#allocation73_spill] sm:$0xff] }
 0x4c0   : > { %1866 = vst [vmem:[#allocation1] ss:$9 sm:$0xff] %v10914_v15 }
 0x4c1   : > { %1867 = vst [vmem:[#allocation1 + $0x1] ss:$9 sm:$0xff] %v10915_v17 }
 0x4c2   : > { %1868 = vst [vmem:[#allocation1 + $0x2] ss:$9 sm:$0xff] %v10867_v57 }
 0x4c3   : > { %1869 = vst [vmem:[#allocation1 + $0x3] ss:$9 sm:$0xff] %v10868_v48 }
 0x4c4   : > { %1870 = vst [vmem:[#allocation1 + $0x4] ss:$9 sm:$0xff] %v10869_v37  ;;  %v10947_v37 = vld [vmem:[#allocation75_spill] sm:$0xff] }
 0x4c5   : > { %1871 = vst [vmem:[#allocation1 + $0x5] ss:$9 sm:$0xff] %v10870_v16  ;;  %v10944_v16 = vld [vmem:[#allocation76_spill] sm:$0xff] }
 0x4c6   : > { %1872 = vst [vmem:[#allocation1 + $0x6] ss:$9 sm:$0xff] %v10871_v55  ;;  %v10945_v55 = vld [vmem:[#allocation77_spill] sm:$0xff] }
 0x4c7   : > { %1873 = vst [vmem:[#allocation1 + $0x7] ss:$9 sm:$0xff] %v10942_v0 }
 0x4ce   : > { %v1874_v9 = vld [vmem:[#allocation1] sm:$0xff] }
 0x4cf   : > { %1941 = vrot.lane.b32.xlu1 %v1874_v9, %s6235_s16  ;;  %1876 = vst [vmem:[#allocation1] ss:$9 sm:$0xff] %v10830_v6  ;;  %v10948_v9 = vld [vmem:[#allocation78_spill] sm:$0xff] }
 0x4d0   : > { %1877 = vst [vmem:[#allocation1 + $0x1] ss:$9 sm:$0xff] %v6680_v20  ;;  %v10949_v20 = vld [vmem:[#allocation81_spill] sm:$0xff] }
 0x4d1   : > { %1878 = vst [vmem:[#allocation1 + $0x2] ss:$9 sm:$0xff] %v10765_v54  ;;  %v10950_v54 = vld [vmem:[#allocation82_spill] sm:$0xff] }
 0x4d2   : > { %1879 = vst [vmem:[#allocation1 + $0x3] ss:$9 sm:$0xff] %v10916_v10  ;;  %v10951_v10 = vld [vmem:[#allocation83_spill] sm:$0xff] }
 0x4d3   : > { %1880 = vst [vmem:[#allocation1 + $0x4] ss:$9 sm:$0xff] %v10943_v50  ;;  %v10952_v50 = vld [vmem:[#allocation84_spill] sm:$0xff] }
 0x4d4   : > { %1881 = vst [vmem:[#allocation1 + $0x5] ss:$9 sm:$0xff] %v10833_v12  ;;  %v10953_v12 = vld [vmem:[#allocation85_spill] sm:$0xff] }
 0x4d5   : > { %1882 = vst [vmem:[#allocation1 + $0x6] ss:$9 sm:$0xff] %v10944_v16 }
 0x4d6   : > { %1883 = vst [vmem:[#allocation1 + $0x7] ss:$9 sm:$0xff] %v10945_v55  ;;  %v10955_v55 = vld [vmem:[#allocation86_spill] sm:$0xff] }
 0x4dd   : > { %v7456_v0 = vld [vmem:[#allocation1] sm:$0xff] }
 0x4de   : > { %10946 = vst [vmem:[#allocation42_spill] sm:$0xff] %v7456_v0  ;;  %v10956_v0 = vld [vmem:[#allocation8_spill] sm:$0xff] }
 0x4df   : > { %1886 = vst [vmem:[#allocation1] ss:$9 sm:$0xff] %v10947_v37  ;;  %v10957_v37 = vld [vmem:[#allocation97_spill] sm:$0xff] }
 0x4e0   : > { %1887 = vst [vmem:[#allocation1 + $0x1] ss:$9 sm:$0xff] %v10948_v9 }
 0x4e1   : > { %1888 = vst [vmem:[#allocation1 + $0x2] ss:$9 sm:$0xff] %v10877_v22 }
 0x4e2   : > { %1889 = vst [vmem:[#allocation1 + $0x3] ss:$9 sm:$0xff] %v10949_v20 }
 0x4e3   : > { %1890 = vst [vmem:[#allocation1 + $0x4] ss:$9 sm:$0xff] %v10950_v54 }
 0x4e4   : > { %1891 = vst [vmem:[#allocation1 + $0x5] ss:$9 sm:$0xff] %v10951_v10 }
 0x4e5   : > { %1892 = vst [vmem:[#allocation1 + $0x6] ss:$9 sm:$0xff] %v10952_v50 }
 0x4e6   : > { %1893 = vst [vmem:[#allocation1 + $0x7] ss:$9 sm:$0xff] %v10953_v12  ;;  %v7477_v12 = vrot.slane %v7375_v62, 1 }
 0x4e8   : > { %10958 = vst [vmem:[#allocation32_spill] sm:$0xff] %v7477_v12 }
 0x4ed   : > { %v7466_v16 = vld [vmem:[#allocation1] sm:$0xff] }
 0x4ee   : > { %10954 = vst [vmem:[#allocation29_spill] sm:$0xff] %v7466_v16 }
 0x4ef   : > { %1896 = vst [vmem:[#allocation1] ss:$9 sm:$0xff] %v10955_v55  ;;  %v7482_v55 = vrot.slane %v7375_v62, 2 }
 0x4f0   : > { %1897 = vst [vmem:[#allocation1 + $0x1] ss:$9 sm:$0xff] %v10956_v0 }
 0x4f1   : > { %1898 = vst [vmem:[#allocation1 + $0x2] ss:$9 sm:$0xff] %v10957_v37 }
 0x4f2   : > { %1899 = vst [vmem:[#allocation1 + $0x3] ss:$9 sm:$0xff] %v7100_v46  ;;  %v7486_v46 = vrot.slane %v7375_v62, 3 }
 0x4f3   : > { %1900 = vst [vmem:[#allocation1 + $0x4] ss:$9 sm:$0xff] %v10923_v2 }
 0x4f4   : > { %1901 = vst [vmem:[#allocation1 + $0x5] ss:$9 sm:$0xff] %v10924_v51  ;;  %v7490_v51 = vrot.slane %v7375_v62, 4 }
 0x4f5   : > { %1902 = vst [vmem:[#allocation1 + $0x6] ss:$9 sm:$0xff] %v10884_v14 }
 0x4f6   : > { %1903 = vst [vmem:[#allocation1 + $0x7] ss:$9 sm:$0xff] %v10925_v40  ;;  %v7494_v40 = vrot.slane %v7375_v62, 5 }
 0x4f7   : > { %10960 = vst [vmem:[#allocation78_spill] sm:$0xff] %v7482_v55 }
 0x4f8   : > { %10961 = vst [vmem:[#allocation81_spill] sm:$0xff] %v7486_v46 }
 0x4f9   : > { %10962 = vst [vmem:[#allocation83_spill] sm:$0xff] %v7490_v51 }
 0x4fa   : > { %10963 = vst [vmem:[#allocation84_spill] sm:$0xff] %v7494_v40 }
 0x4fd   : > { %v7479_v16 = vld [vmem:[#allocation1] sm:$0xff] }
 0x4fe   : > { %10959 = vst [vmem:[#allocation36_spill] sm:$0xff] %v7479_v16  ;;  %v7502_v16 = vrot.slane %v7375_v62, 6 }
 0x4ff   : > { %1906 = vst [vmem:[#allocation1] ss:$9 sm:$0xff] %v7123_v42  ;;  %v7510_v42 = vsel %vm6315_vm2, %v7368_v21, 0 }
 0x500   : > { %1907 = vst [vmem:[#allocation1 + $0x1] ss:$9 sm:$0xff] %v7128_v26  ;;  %v7505_v26 = vrot.slane %v7375_v62, 7 }
 0x501   : > { %1908 = vst [vmem:[#allocation1 + $0x2] ss:$9 sm:$0xff] %v7375_v62 }
 0x502   : > { %1910 = vst [vmem:[#allocation1 + $0x3] ss:$9 sm:$0xff] %v7477_v12 }
 0x503   : > { %1912 = vst [vmem:[#allocation1 + $0x4] ss:$9 sm:$0xff] %v7482_v55 }
 0x504   : > { %1914 = vst [vmem:[#allocation1 + $0x5] ss:$9 sm:$0xff] %v7486_v46 }
 0x505   : > { %1916 = vst [vmem:[#allocation1 + $0x6] ss:$9 sm:$0xff] %v7490_v51 }
 0x506   : > { %1918 = vst [vmem:[#allocation1 + $0x7] ss:$9 sm:$0xff] %v7494_v40 }
 0x507   : > { %10964 = vst [vmem:[#allocation113_spill] sm:$0xff] %v7502_v16 }
 0x50d   : > { %v7512_v12 = vld [vmem:[#allocation1] sm:$0xff] }
 0x50e   : > { %10965 = vst [vmem:[#allocation114_spill] sm:$0xff] %v7512_v12 }
 0x50f   : > { %1922 = vst [vmem:[#allocation1] ss:$9 sm:$0xff] %v7502_v16 }
 0x510   : > { %1924 = vst [vmem:[#allocation1 + $0x1] ss:$9 sm:$0xff] %v7505_v26 }
 0x511   : > { %1926 = vst [vmem:[#allocation1 + $0x2] ss:$9 sm:$0xff] %v7510_v42 }
 0x518   : > { %v7517_v40 = vld [vmem:[#allocation1] sm:$0xff] }
 0x519   : > { %10966 = vst [vmem:[#allocation115_spill] sm:$0xff] %v7517_v40 }
 0x51a   : > { %1953 = vst [vmem:[#allocation1] ss:$9 sm:$0xff] %v10778_v13 }
 0x51b   : > { %1955 = vst [vmem:[#allocation1 + $0x1] ss:$9 sm:$0xff] %v6429_v41 }
 0x51c   : > { %1957 = vst [vmem:[#allocation1 + $0x2] ss:$9 sm:$0xff] %v6433_v43 }
 0x51d   : > { %1959 = vst [vmem:[#allocation1 + $0x3] ss:$9 sm:$0xff] %v6437_v44 }
 0x51e   : > { %1961 = vst [vmem:[#allocation1 + $0x4] ss:$9 sm:$0xff] %v6441_v45  ;;  %v10967_v45 = vld [vmem:[#allocation20_spill] sm:$0xff] }
 0x51f   : > { %1963 = vst [vmem:[#allocation1 + $0x5] ss:$9 sm:$0xff] %v10888_v25  ;;  %v10968_v25 = vld [vmem:[#allocation21_spill] sm:$0xff] }
 0x520   : > { %1965 = vst [vmem:[#allocation1 + $0x6] ss:$9 sm:$0xff] %v10889_v28 }
 0x521   : > { %1967 = vst [vmem:[#allocation1 + $0x7] ss:$9 sm:$0xff] %v10890_v30  ;;  %v10969_v30 = vld [vmem:[#allocation22_spill] sm:$0xff] }
 0x528   : > { %v1968_v21 = vld [vmem:[#allocation1] sm:$0xff] }
 0x529   : > { %v2062_v27 = vshrl.u32 %v1968_v21, 16  ;;  %v2065_v12 = vshll.u32 %v1968_v21, 16  ;;  %1969 = vst [vmem:[#allocation1] ss:$9 sm:$0xff] %v10891_v31 }
 0x52a   : > { %1970 = vst [vmem:[#allocation1 + $0x1] ss:$9 sm:$0xff] %v10892_v35 }
 0x52b   : > { %v2064_v40 = vrot.slane %v2062_v27, 7  ;;  %1971 = vst [vmem:[#allocation1 + $0x2] ss:$9 sm:$0xff] %v10893_v38  ;;  %v10970_v27 = vld [vmem:[#allocation27_spill] sm:$0xff] }
 0x52c   : > { %1972 = vst [vmem:[#allocation1 + $0x3] ss:$9 sm:$0xff] %v10894_v1 }
 0x52d   : > { %v2067_v44 = vor.u32 %v2065_v12, %v2064_v40  ;;  %1973 = vst [vmem:[#allocation1 + $0x4] ss:$9 sm:$0xff] %v10967_v45 }
 0x52e   : > { %1974 = vst [vmem:[#allocation1 + $0x5] ss:$9 sm:$0xff] %v10968_v25 }
 0x52f   : > { %2145 = vrot.lane.b32.xlu2 %v2067_v44, %s6236_s17  ;;  %1975 = vst [vmem:[#allocation1 + $0x6] ss:$9 sm:$0xff] %v10969_v30  ;;  %v10971_v44 = vld [vmem:[#allocation30_spill] sm:$0xff] }
 0x530   : > { %1976 = vst [vmem:[#allocation1 + $0x7] ss:$9 sm:$0xff] %v10898_v3  ;;  %v10972_v3 = vld [vmem:[#allocation31_spill] sm:$0xff] }
 0x537   : > { %v1977_v21 = vld [vmem:[#allocation1] sm:$0xff] }
 0x538   : > { %v2068_v31 = vshrl.u32 %v1977_v21, 16  ;;  %v2071_v35 = vshll.u32 %v1977_v21, 16  ;;  %1978 = vst [vmem:[#allocation1] ss:$9 sm:$0xff] %v10899_v56  ;;  %v7546_v21 = vpop.permute.xlu1 %1113 }
 0x539   : > { %1979 = vst [vmem:[#allocation1 + $0x1] ss:$9 sm:$0xff] %v10970_v27 }
 0x53a   : > { %v2070_v1 = vrot.slane %v2068_v31, 7  ;;  %1980 = vst [vmem:[#allocation1 + $0x2] ss:$9 sm:$0xff] %v10901_v47 }
 0x53b   : > { %1981 = vst [vmem:[#allocation1 + $0x3] ss:$9 sm:$0xff] %v10902_v8 }
 0x53c   : > { %v2073_v12 = vor.u32 %v2071_v35, %v2070_v1  ;;  %1982 = vst [vmem:[#allocation1 + $0x4] ss:$9 sm:$0xff] %v10932_v24 }
 0x53d   : > { %1983 = vst [vmem:[#allocation1 + $0x5] ss:$9 sm:$0xff] %v10971_v44 }
 0x53e   : > { %v2074_v30 = vsel %vm594_vm1, %v2064_v40, %v2073_v12  ;;  %1984 = vst [vmem:[#allocation1 + $0x6] ss:$9 sm:$0xff] %v10972_v3  ;;  %v10974_v12 = vld [vmem:[#allocation40_spill] sm:$0xff] }
 0x53f   : > { %2147 = vrot.lane.b32.xlu2 %v2074_v30, %s6236_s17  ;;  %1985 = vst [vmem:[#allocation1 + $0x7] ss:$9 sm:$0xff] %v10935_v39 }
 0x540   : > { %10973 = vst [vmem:[#allocation20_spill] sm:$0xff] %v7546_v21 }
 0x546   : > { %v1986_v31 = vld [vmem:[#allocation1] sm:$0xff] }
 0x547   : > { %v2075_v27 = vshrl.u32 %v1986_v31, 16  ;;  %v2078_v47 = vshll.u32 %v1986_v31, 16  ;;  %1987 = vst [vmem:[#allocation1] ss:$9 sm:$0xff] %v10856_v4  ;;  %v7558_v31 = vpop.permute.xlu1 %1115 }
 0x548   : > { %1988 = vst [vmem:[#allocation1 + $0x1] ss:$9 sm:$0xff] %v10936_v18 }
 0x549   : > { %v2077_v35 = vrot.slane %v2075_v27, 7  ;;  %1989 = vst [vmem:[#allocation1 + $0x2] ss:$9 sm:$0xff] %v10937_v29 }
 0x54a   : > { %1990 = vst [vmem:[#allocation1 + $0x3] ss:$9 sm:$0xff] %v10859_v63 }
 0x54b   : > { %v2080_v40 = vor.u32 %v2078_v47, %v2077_v35  ;;  %1991 = vst [vmem:[#allocation1 + $0x4] ss:$9 sm:$0xff] %v10906_v32  ;;  %v7561_v47 = vpop.permute.xlu0 %1111 }
 0x54c   : > { %1992 = vst [vmem:[#allocation1 + $0x5] ss:$9 sm:$0xff] %v10907_v7 }
 0x54d   : > { %v2081_v30 = vsel %vm594_vm1, %v2070_v1, %v2080_v40  ;;  %1993 = vst [vmem:[#allocation1 + $0x6] ss:$9 sm:$0xff] %v10974_v12 }
 0x54e   : > { %2149 = vrot.lane.b32.xlu1 %v2081_v30, %s6236_s17  ;;  %1994 = vst [vmem:[#allocation1 + $0x7] ss:$9 sm:$0xff] %v10909_v52 }
 0x54f   : > { %10975 = vst [vmem:[#allocation21_spill] sm:$0xff] %v7558_v31  ;;  %v7566_v1 = vpop.permute.xlu1 %1123 }
 0x550   : > { %10976 = vst [vmem:[#allocation30_spill] sm:$0xff] %v7561_v47 }
 0x555   : > { %v1995_v27 = vld [vmem:[#allocation1] sm:$0xff] }
 0x556   : > { %v2082_v21 = vshrl.u32 %v1995_v27, 16  ;;  %v2085_v29 = vshll.u32 %v1995_v27, 16  ;;  %1996 = vst [vmem:[#allocation1] ss:$9 sm:$0xff] %v10910_v5  ;;  %v10977_v27 = vld [vmem:[#allocation49_spill] sm:$0xff] }
 0x557   : > { %1997 = vst [vmem:[#allocation1 + $0x1] ss:$9 sm:$0xff] %v10822_v53  ;;  %v7576_v31 = vpop.permute.xlu1 %1264 }
 0x558   : > { %v2084_v7 = vrot.slane %v2082_v21, 7  ;;  %1998 = vst [vmem:[#allocation1 + $0x2] ss:$9 sm:$0xff] %v10911_v58  ;;  %v7574_v21 = vpop.permute.xlu0 %1117 }
 0x559   : > { %1999 = vst [vmem:[#allocation1 + $0x3] ss:$9 sm:$0xff] %v10912_v59 }
 0x55a   : > { %v2087_v40 = vor.u32 %v2085_v29, %v2084_v7  ;;  %2000 = vst [vmem:[#allocation1 + $0x4] ss:$9 sm:$0xff] %v10863_v49  ;;  %v7579_v29 = vpop.permute.xlu2 %1119 }
 0x55b   : > { %2001 = vst [vmem:[#allocation1 + $0x5] ss:$9 sm:$0xff] %v10826_v11 }
 0x55c   : > { %v2088_v30 = vsel %vm594_vm1, %v2077_v35, %v2087_v40  ;;  %2002 = vst [vmem:[#allocation1 + $0x6] ss:$9 sm:$0xff] %v10977_v27 }
 0x55d   : > { %2151 = vrot.lane.b32.xlu0 %v2088_v30, %s6236_s17  ;;  %2003 = vst [vmem:[#allocation1 + $0x7] ss:$9 sm:$0xff] %v10794_v19  ;;  %v10980_v30 = vld [vmem:[#allocation57_spill] sm:$0xff] }
 0x55e   : > { %10978 = vst [vmem:[#allocation31_spill] sm:$0xff] %v7574_v21 }
 0x55f   : > { %10979 = vst [vmem:[#allocation40_spill] sm:$0xff] %v7576_v31 }
 0x560   : > { %v7589_v31 = vpop.permute.xlu0 %1125 }
 0x561   : > { %10981 = vst [vmem:[#allocation49_spill] sm:$0xff] %v7589_v31 }
 0x562   : > { %v7597_v21 = vpop.permute.xlu2 %1260 }
 0x563   : > { %10983 = vst [vmem:[#allocation117_spill] sm:$0xff] %v7597_v21  ;;  %v10988_v21 = vld [vmem:[#allocation67_spill] sm:$0xff] }
 0x564   : > { %v2004_v47 = vld [vmem:[#allocation1] sm:$0xff] }
 0x565   : > { %v2089_v59 = vshrl.u32 %v2004_v47, 16  ;;  %v2092_v58 = vshll.u32 %v2004_v47, 16  ;;  %2005 = vst [vmem:[#allocation1] ss:$9 sm:$0xff] %v10795_v23 }
 0x566   : > { %2006 = vst [vmem:[#allocation1 + $0x1] ss:$9 sm:$0xff] %v10796_v33  ;;  %v10996_v33 = vld [vmem:[#allocation76_spill] sm:$0xff] }
 0x567   : > { %v7582_v35 = vrot.slane %v2089_v59, 7  ;;  %2007 = vst [vmem:[#allocation1 + $0x2] ss:$9 sm:$0xff] %v10797_v34  ;;  %v7595_v59 = vpop.permute.xlu1 %1412  ;;  %v10995_v34 = vld [vmem:[#allocation74_spill] sm:$0xff] }
 0x568   : > { %2008 = vst [vmem:[#allocation1 + $0x3] ss:$9 sm:$0xff] %v10798_v36  ;;  %v7604_v31 = vpop.permute.xlu0 %1258 }
 0x569   : > { %v2094_v40 = vor.u32 %v2092_v58, %v7582_v35  ;;  %2009 = vst [vmem:[#allocation1 + $0x4] ss:$9 sm:$0xff] %v10828_v61  ;;  %v10984_v58 = vld [vmem:[#allocation4_spill] sm:$0xff] }
 0x56a   : > { %2010 = vst [vmem:[#allocation1 + $0x5] ss:$9 sm:$0xff] %v10980_v30 }
 0x56b   : > { %v2095_v47 = vsel %vm594_vm1, %v2084_v7, %v2094_v40  ;;  %2011 = vst [vmem:[#allocation1 + $0x6] ss:$9 sm:$0xff] %v10940_v60  ;;  %v10986_v7 = vld [vmem:[#allocation64_spill] sm:$0xff]  ;;  %v10991_v60 = vld [vmem:[#allocation69_spill] sm:$0xff] }
 0x56c   : > { %2153 = vrot.lane.b32.xlu2 %v2095_v47, %s6236_s17  ;;  %2012 = vst [vmem:[#allocation1 + $0x7] ss:$9 sm:$0xff] %v10914_v15  ;;  %v10987_v47 = vld [vmem:[#allocation65_spill] sm:$0xff] }
 0x56d   : > { %10982 = vst [vmem:[#allocation116_spill] sm:$0xff] %v7595_v59  ;;  %v7613_v59 = vpop.permute.xlu2 %1262 }
 0x56e   : > { %10985 = vst [vmem:[#allocation4_spill] sm:$0xff] %v7604_v31 }
 0x56f   : > { %v7609_v40 = vpop.permute.xlu1 %1420  ;;  %10989 = vst [vmem:[#allocation118_spill] sm:$0xff] %v7613_v59 }
 0x573   : > { %v7599_v36 = vld [vmem:[#allocation1] sm:$0xff] }
 0x574   : > { %2014 = vst [vmem:[#allocation1] ss:$9 sm:$0xff] %v10915_v17  ;;  %1268 = vrot.lane.b32.xlu2 %v10984_v58, %s6231_s8  ;;  %v10990_v17 = vld [vmem:[#allocation66_spill] sm:$0xff]  ;;  %v1267_v58 = vpop.permute.xlu0 %1266  ;;  %v2096_v31 = vshrl.u32 %v7599_v36, 16 }
 0x575   : > { %2015 = vst [vmem:[#allocation1 + $0x1] ss:$9 sm:$0xff] %v10867_v57  ;;  %v7621_v30 = vpop.permute.xlu2 %1270 }
 0x576   : > { %2016 = vst [vmem:[#allocation1 + $0x2] ss:$9 sm:$0xff] %v10868_v48 }
 0x577   : > { %2017 = vst [vmem:[#allocation1 + $0x3] ss:$9 sm:$0xff] %v10986_v7  ;;  %v7618_v57 = vpop.permute.xlu1 %1424 }
 0x578   : > { %2018 = vst [vmem:[#allocation1 + $0x4] ss:$9 sm:$0xff] %v10987_v47  ;;  %v10992_v47 = vld [vmem:[#allocation71_spill] sm:$0xff] }
 0x579   : > { %2019 = vst [vmem:[#allocation1 + $0x5] ss:$9 sm:$0xff] %v10988_v21  ;;  %v7624_v21 = vrot.slane %v2096_v31, 7 }
 0x57a   : > { %2020 = vst [vmem:[#allocation1 + $0x6] ss:$9 sm:$0xff] %v10990_v17  ;;  %v10993_v17 = vld [vmem:[#allocation72_spill] sm:$0xff] }
 0x57b   : > { %2021 = vst [vmem:[#allocation1 + $0x7] ss:$9 sm:$0xff] %v10830_v6  ;;  %v10994_v6 = vld [vmem:[#allocation73_spill] sm:$0xff] }
 0x57f   : > { %v7640_v31 = vpop.permute.xlu1 %1426 }
 0x580   : > { %11000 = vst [vmem:[#allocation74_spill] sm:$0xff] %v7640_v31  ;;  %v11005_v31 = vld [vmem:[#allocation85_spill] sm:$0xff] }
 0x582   : > { %v2022_v48 = vld [vmem:[#allocation1] sm:$0xff] }
 0x583   : > { %v2103_v15 = vshrl.u32 %v2022_v48, 16  ;;  %v2106_v7 = vshll.u32 %v2022_v48, 16  ;;  %2023 = vst [vmem:[#allocation1] ss:$9 sm:$0xff] %v10991_v60  ;;  %v7633_v48 = vpop.permute.xlu0 %1414 }
 0x584   : > { %2024 = vst [vmem:[#allocation1 + $0x1] ss:$9 sm:$0xff] %v10992_v47  ;;  %v10998_v47 = vld [vmem:[#allocation77_spill] sm:$0xff] }
 0x585   : > { %v7626_v59 = vrot.slane %v2103_v15, 7  ;;  %2025 = vst [vmem:[#allocation1 + $0x2] ss:$9 sm:$0xff] %v10993_v17  ;;  %v10999_v15 = vld [vmem:[#allocation75_spill] sm:$0xff] }
 0x586   : > { %2026 = vst [vmem:[#allocation1 + $0x3] ss:$9 sm:$0xff] %v10994_v6  ;;  %v7642_v6 = vpop.permute.xlu2 %1272 }
 0x587   : > { %v2108_v61 = vor.u32 %v2106_v7, %v7626_v59  ;;  %2027 = vst [vmem:[#allocation1 + $0x4] ss:$9 sm:$0xff] %v10995_v34 }
 0x588   : > { %2028 = vst [vmem:[#allocation1 + $0x5] ss:$9 sm:$0xff] %v10996_v33 }
 0x589   : > { %10997 = vst [vmem:[#allocation72_spill] sm:$0xff] %v7633_v48  ;;  %v2109_v60 = vsel %vm594_vm1, %v7624_v21, %v2108_v61  ;;  %v7652_v61 = vpop.permute.xlu1 %1632 }
 0x58a   : > { %2029 = vst [vmem:[#allocation1 + $0x6] ss:$9 sm:$0xff] %v10998_v47  ;;  %2157 = vrot.lane.b32.xlu0 %v2109_v60, %s6236_s17 }
 0x58b   : > { %2030 = vst [vmem:[#allocation1 + $0x7] ss:$9 sm:$0xff] %v10999_v15  ;;  %v7647_v33 = vpop.permute.xlu0 %1416 }
 0x58c   : > { %11001 = vst [vmem:[#allocation77_spill] sm:$0xff] %v7642_v6  ;;  %v11006_v6 = vld [vmem:[#allocation86_spill] sm:$0xff] }
 0x58d   : > { %11002 = vst [vmem:[#allocation75_spill] sm:$0xff] %v7647_v33 }
 0x58e   : > { %11003 = vst [vmem:[#allocation119_spill] sm:$0xff] %v7652_v61  ;;  %v7656_v60 = vpop.permute.xlu2 %1418  ;;  %v11010_v61 = vld [vmem:[#allocation99_spill] sm:$0xff] }
 0x58f   : > { %11004 = vst [vmem:[#allocation120_spill] sm:$0xff] %v7656_v60  ;;  %v11011_v60 = vld [vmem:[#allocation101_spill] sm:$0xff] }
 0x591   : > { %v7662_v33 = vpop.permute.xlu1 %1775 }
 0x592   : > { %v7644_v7 = vld [vmem:[#allocation1] sm:$0xff]  ;;  %11008 = vst [vmem:[#allocation122_spill] sm:$0xff] %v7662_v33  ;;  %v11013_v33 = vld [vmem:[#allocation104_spill] sm:$0xff] }
 0x593   : > { %2032 = vst [vmem:[#allocation1] ss:$9 sm:$0xff] %v10948_v9  ;;  %v7660_v48 = vpop.permute.xlu0 %1634 }
 0x594   : > { %2033 = vst [vmem:[#allocation1 + $0x1] ss:$9 sm:$0xff] %v10877_v22 }
 0x595   : > { %2034 = vst [vmem:[#allocation1 + $0x2] ss:$9 sm:$0xff] %v10949_v20 }
 0x596   : > { %2035 = vst [vmem:[#allocation1 + $0x3] ss:$9 sm:$0xff] %v10950_v54  ;;  %v7667_v54 = vpop.permute.xlu2 %1628 }
 0x597   : > { %2036 = vst [vmem:[#allocation1 + $0x4] ss:$9 sm:$0xff] %v10951_v10 }
 0x598   : > { %2037 = vst [vmem:[#allocation1 + $0x5] ss:$9 sm:$0xff] %v10952_v50 }
 0x599   : > { %2038 = vst [vmem:[#allocation1 + $0x6] ss:$9 sm:$0xff] %v11005_v31  ;;  %v7676_v31 = vpop.permute.xlu1 %1777 }
 0x59a   : > { %2039 = vst [vmem:[#allocation1 + $0x7] ss:$9 sm:$0xff] %v11006_v6 }
 0x59b   : > { %11007 = vst [vmem:[#allocation121_spill] sm:$0xff] %v7660_v48  ;;  %v1641_v6 = vpop.permute.xlu0 %1640  ;;  %v11012_v48 = vld [vmem:[#allocation103_spill] sm:$0xff] }
 0x59c   : > { %11009 = vst [vmem:[#allocation123_spill] sm:$0xff] %v7667_v54 }
 0x5a1   : > { %v7664_v22 = vld [vmem:[#allocation1] sm:$0xff] }
 0x5a2   : > { %2041 = vst [vmem:[#allocation1] ss:$9 sm:$0xff] %v10956_v0  ;;  %v7678_v0 = vpop.permute.xlu2 %1630 }
 0x5a3   : > { %2042 = vst [vmem:[#allocation1 + $0x1] ss:$9 sm:$0xff] %v10957_v37  ;;  %v11015_v37 = vld [vmem:[#allocation105_spill] sm:$0xff] }
 0x5a4   : > { %2043 = vst [vmem:[#allocation1 + $0x2] ss:$9 sm:$0xff] %v11010_v61  ;;  %v11014_v61 = vld [vmem:[#allocation34_spill] sm:$0xff] }
 0x5a5   : > { %2044 = vst [vmem:[#allocation1 + $0x3] ss:$9 sm:$0xff] %v10923_v2  ;;  %v2326_v2 = vsel %vm2316_vm3, %v11014_v61, %v7579_v29 }
 0x5a6   : > { %2045 = vst [vmem:[#allocation1 + $0x4] ss:$9 sm:$0xff] %v11011_v60  ;;  %v7686_v60 = vpop.permute.xlu0 %1642 }
 0x5a7   : > { %2046 = vst [vmem:[#allocation1 + $0x5] ss:$9 sm:$0xff] %v10884_v14  ;;  %v7692_v14 = vpop.permute.xlu1 %1781 }
 0x5a8   : > { %2047 = vst [vmem:[#allocation1 + $0x6] ss:$9 sm:$0xff] %v11012_v48  ;;  %v11016_v48 = vld [vmem:[#allocation32_spill] sm:$0xff] }
 0x5a9   : > { %2048 = vst [vmem:[#allocation1 + $0x7] ss:$9 sm:$0xff] %v11013_v33  ;;  %v2351_v33 = vsel %vm2341_vm4, %v2326_v2, %v1267_v58 }
 0x5aa   : > { %11017 = vst [vmem:[#allocation34_spill] sm:$0xff] %v7692_v14  ;;  %v2376_v29 = vsel %vm2366_vm5, %v2351_v33, %v7609_v40  ;;  %v1637_v61 = vpop.permute.xlu2 %1636 }
 0x5ab   : > { %v2401_v2 = vsel %vm2391_vm6, %v2376_v29, %v1637_v61 }
 0x5ae   : > { %v1784_v58 = vpop.permute.xlu0 %1783 }
 0x5af   : > { %v2426_v14 = vsel %vm2416_vm7, %v2401_v2, %v1784_v58 }
 0x5b0   : > { %v7680_v54 = vld [vmem:[#allocation1] sm:$0xff] }
 0x5b1   : > { %2050 = vst [vmem:[#allocation1] ss:$9 sm:$0xff] %v11015_v37  ;;  %v11018_v37 = vld [vmem:[#allocation84_spill] sm:$0xff] }
 0x5b2   : > { %2051 = vst [vmem:[#allocation1 + $0x1] ss:$9 sm:$0xff] %v7375_v62 }
 0x5b3   : > { %2052 = vst [vmem:[#allocation1 + $0x2] ss:$9 sm:$0xff] %v11016_v48 }
 0x5b4   : > { %2053 = vst [vmem:[#allocation1 + $0x3] ss:$9 sm:$0xff] %v7482_v55  ;;  %v1938_v55 = vpop.permute.xlu1 %1937 }
 0x5b5   : > { %2054 = vst [vmem:[#allocation1 + $0x4] ss:$9 sm:$0xff] %v7486_v46  ;;  %v7709_v40 = vsel %vm2441_vm8, %v2426_v14, %v1938_v55 }
 0x5b6   : > { %2055 = vst [vmem:[#allocation1 + $0x5] ss:$9 sm:$0xff] %v7490_v51  ;;  %v11019_v51 = vld [vmem:[#allocation52_spill] sm:$0xff] }
 0x5b7   : > { %2056 = vst [vmem:[#allocation1 + $0x6] ss:$9 sm:$0xff] %v11018_v37  ;;  %v2330_v33 = vsel %vm2316_vm3, %v11019_v51, %v7566_v1  ;;  %v11020_v51 = vld [vmem:[#allocation10_spill] sm:$0xff]  ;;  %v11021_v1 = vld [vmem:[#allocation11_spill] sm:$0xff] }
 0x5b8   : > { %2057 = vst [vmem:[#allocation1 + $0x7] ss:$9 sm:$0xff] %v7502_v16  ;;  %v7711_v16 = vpop.permute.xlu2 %1779  ;;  %v2355_v29 = vsel %vm2341_vm4, %v2330_v33, %v7621_v30  ;;  %v11022_v30 = vld [vmem:[#allocation12_spill] sm:$0xff]  ;;  %v11025_v33 = vld [vmem:[#allocation14_spill] sm:$0xff] }
 0x5b9   : > { %v2380_v61 = vsel %vm2366_vm5, %v2355_v29, %v7618_v57  ;;  %v2110_v29 = vshrl.u32 %v7644_v7, 16 }
 0x5ba   : > { %v2405_v58 = vsel %vm2391_vm6, %v2380_v61, %v1641_v6  ;;  %v11026_v61 = vld [vmem:[#allocation19_spill] sm:$0xff] }
 0x5bc   : > { %v1942_v57 = vpop.permute.xlu1 %1941 }
 0x5bf   : > { %v7702_v46 = vld [vmem:[#allocation1] sm:$0xff] }
 0x5c0   : > { %2059 = vst [vmem:[#allocation1] ss:$9 sm:$0xff] %v7505_v26  ;;  %v1788_v55 = vpop.permute.xlu2 %1787 }
 0x5c1   : > { %2060 = vst [vmem:[#allocation1 + $0x1] ss:$9 sm:$0xff] %v7510_v42  ;;  %v2430_v14 = vsel %vm2416_vm7, %v2405_v58, %v1788_v55  ;;  %v2113_v58 = vshll.u32 %v7644_v7, 16  ;;  %v11027_v55 = vld [vmem:[#allocation22_spill] sm:$0xff]  ;;  %v11032_v7 = vld [vmem:[#allocation91_spill] sm:$0xff] }
 0x5c2   : > { %v7730_v6 = vsel %vm2441_vm8, %v2430_v14, %v1942_v57  ;;  %v11028_v14 = vld [vmem:[#allocation23_spill] sm:$0xff] }
 0x5c8   : > { %v7718_v2 = vld [vmem:[#allocation1] sm:$0xff] }
 0x5c9   : > { %2169 = vst [vmem:[#allocation1] ss:$9 sm:$0xff] %v10778_v13  ;;  %v11023_v13 = vld [vmem:[#allocation15_spill] sm:$0xff] }
 0x5ca   : > { %2171 = vst [vmem:[#allocation1 + $0x1] ss:$9 sm:$0xff] %v6429_v41 }
 0x5cb   : > { %2173 = vst [vmem:[#allocation1 + $0x2] ss:$9 sm:$0xff] %v6433_v43  ;;  %v11024_v43 = vld [vmem:[#allocation17_spill] sm:$0xff] }
 0x5cc   : > { %2175 = vst [vmem:[#allocation1 + $0x3] ss:$9 sm:$0xff] %v11020_v51  ;;  %v11029_v51 = vld [vmem:[#allocation42_spill] sm:$0xff] }
 0x5cd   : > { %2177 = vst [vmem:[#allocation1 + $0x4] ss:$9 sm:$0xff] %v11021_v1 }
 0x5ce   : > { %2179 = vst [vmem:[#allocation1 + $0x5] ss:$9 sm:$0xff] %v11022_v30 }
 0x5cf   : > { %2181 = vst [vmem:[#allocation1 + $0x6] ss:$9 sm:$0xff] %v10889_v28  ;;  %v7741_v28 = vrot.slane %v2110_v29, 7 }
 0x5d0   : > { %2183 = vst [vmem:[#allocation1 + $0x7] ss:$9 sm:$0xff] %v11023_v13 }
 0x5d1   : > { %v2115_v1 = vor.u32 %v2113_v58, %v7741_v28  ;;  %v11041_v58 = vld [vmem:[#allocation111_spill] sm:$0xff] }
 0x5d7   : > { %v2184_v41 = vld [vmem:[#allocation1] sm:$0xff] }
 0x5d8   : > { %2292 = vrot.lane.b32.xlu1 %v2184_v41, %s6237_s18  ;;  %2186 = vst [vmem:[#allocation1] ss:$9 sm:$0xff] %v11024_v43  ;;  %v11033_v41 = vld [vmem:[#allocation24_spill] sm:$0xff] }
 0x5d9   : > { %2187 = vst [vmem:[#allocation1 + $0x1] ss:$9 sm:$0xff] %v11025_v33  ;;  %v11036_v33 = vld [vmem:[#allocation33_spill] sm:$0xff] }
 0x5da   : > { %2188 = vst [vmem:[#allocation1 + $0x2] ss:$9 sm:$0xff] %v10893_v38  ;;  %v11030_v38 = vld [vmem:[#allocation90_spill] sm:$0xff]  ;;  %v1582_v29 = vshll.u32 %v11036_v33, 16  ;;  %v11055_v33 = vld [vmem:[#allocation56_spill] sm:$0xff] }
 0x5db   : > { %2189 = vst [vmem:[#allocation1 + $0x3] ss:$9 sm:$0xff] %v11026_v61  ;;  %v1065_v30 = vshll.u32 %v11030_v38, 16  ;;  %v11048_v38 = vld [vmem:[#allocation6_spill] sm:$0xff] }
 0x5dc   : > { %2190 = vst [vmem:[#allocation1 + $0x4] ss:$9 sm:$0xff] %v10967_v45  ;;  %v2116_v45 = vsel %vm594_vm1, %v7626_v59, %v2115_v1  ;;  %v11034_v59 = vld [vmem:[#allocation89_spill] sm:$0xff]  ;;  %v11046_v1 = vld [vmem:[#allocation46_spill] sm:$0xff] }
 0x5dd   : > { %2191 = vst [vmem:[#allocation1 + $0x5] ss:$9 sm:$0xff] %v10968_v25  ;;  %v11031_v25 = vld [vmem:[#allocation27_spill] sm:$0xff]  ;;  %v1067_v13 = vor.u32 %v1065_v30, %v11032_v7 }
 0x5de   : > { %2192 = vst [vmem:[#allocation1 + $0x6] ss:$9 sm:$0xff] %v11027_v55 }
 0x5df   : > { %2193 = vst [vmem:[#allocation1 + $0x7] ss:$9 sm:$0xff] %v11028_v14  ;;  %v1068_v43 = vsel %vm594_vm1, %v11034_v59, %v1067_v13  ;;  %v11051_v13 = vld [vmem:[#allocation53_spill] sm:$0xff]  ;;  %v11053_v59 = vld [vmem:[#allocation54_spill] sm:$0xff] }
 0x5e0   : > { %1943 = vrot.lane.b32.xlu1 %v11029_v51, %s6235_s16  ;;  %v7790_v51 = vpop.permute.xlu0 %1929 }
 0x5e6   : > { %v2194_v57 = vld [vmem:[#allocation1] sm:$0xff] }
 0x5e7   : > { %2294 = vrot.lane.b32.xlu0 %v2194_v57, %s6237_s18  ;;  %2196 = vst [vmem:[#allocation1] ss:$9 sm:$0xff] %v10899_v56  ;;  %v11035_v56 = vld [vmem:[#allocation44_spill] sm:$0xff] }
 0x5e8   : > { %2197 = vst [vmem:[#allocation1 + $0x1] ss:$9 sm:$0xff] %v11031_v25  ;;  %2159 = vrot.lane.b32.xlu1 %v2116_v45, %s6236_s17  ;;  %v11049_v45 = vld [vmem:[#allocation108_spill] sm:$0xff]  ;;  %v7814_v57 = vpop.permute.xlu0 %1931 }
 0x5e9   : > { %2198 = vst [vmem:[#allocation1 + $0x2] ss:$9 sm:$0xff] %v11033_v41  ;;  %v11052_v41 = vld [vmem:[#allocation18_spill] sm:$0xff] }
 0x5ea   : > { %2199 = vst [vmem:[#allocation1 + $0x3] ss:$9 sm:$0xff] %v10902_v8  ;;  %v11037_v8 = vld [vmem:[#allocation13_spill] sm:$0xff] }
 0x5eb   : > { %2200 = vst [vmem:[#allocation1 + $0x4] ss:$9 sm:$0xff] %v10932_v24 }
 0x5ec   : > { %2201 = vst [vmem:[#allocation1 + $0x5] ss:$9 sm:$0xff] %v10971_v44  ;;  %v11040_v44 = vld [vmem:[#allocation39_spill] sm:$0xff] }
 0x5ed   : > { %2202 = vst [vmem:[#allocation1 + $0x6] ss:$9 sm:$0xff] %v10972_v3  ;;  %v11038_v3 = vld [vmem:[#allocation35_spill] sm:$0xff] }
 0x5ee   : > { %2203 = vst [vmem:[#allocation1 + $0x7] ss:$9 sm:$0xff] %v10935_v39  ;;  %v1584_v24 = vor.u32 %v1582_v29, %v11038_v3  ;;  %v11039_v39 = vld [vmem:[#allocation37_spill] sm:$0xff]  ;;  %v11058_v3 = vld [vmem:[#allocation47_spill] sm:$0xff] }
 0x5ef   : > { %1121 = vrot.lane.b32.xlu0 %v1068_v43, %s6230_s25 }
 0x5f0   : > { %1422 = vrot.lane.b32.xlu1 %v11035_v56, %s6232_s11  ;;  %v1585_v55 = vsel %vm594_vm1, %v11041_v58, %v1584_v24  ;;  %v11054_v56 = vld [vmem:[#allocation55_spill] sm:$0xff]  ;;  %v7831_v29 = vpop.permute.xlu0 %1933 }
 0x5f5   : > { %v2204_v61 = vld [vmem:[#allocation1] sm:$0xff] }
 0x5f6   : > { %2296 = vrot.lane.b32.xlu2 %v2204_v61, %s6237_s18  ;;  %2206 = vst [vmem:[#allocation1] ss:$9 sm:$0xff] %v10856_v4  ;;  %v2099_v4 = vshll.u32 %v7599_v36, 16  ;;  %v11056_v61 = vld [vmem:[#allocation57_spill] sm:$0xff] }
 0x5f7   : > { %2207 = vst [vmem:[#allocation1 + $0x1] ss:$9 sm:$0xff] %v10936_v18  ;;  %1785 = vrot.lane.b32.xlu0 %v11037_v8, %s6234_s15  ;;  %v11042_v18 = vld [vmem:[#allocation48_spill] sm:$0xff]  ;;  %v11057_v8 = vld [vmem:[#allocation58_spill] sm:$0xff] }
 0x5f8   : > { %2208 = vst [vmem:[#allocation1 + $0x2] ss:$9 sm:$0xff] %v11039_v39  ;;  %v2120_v39 = vshll.u32 %v7664_v22, 16 }
 0x5f9   : > { %2209 = vst [vmem:[#allocation1 + $0x3] ss:$9 sm:$0xff] %v10859_v63  ;;  %v2101_v63 = vor.u32 %v2099_v4, %v7624_v21  ;;  %v11045_v21 = vld [vmem:[#allocation29_spill] sm:$0xff]  ;;  %v7844_v4 = vpop.permute.xlu0 %2151 }
 0x5fa   : > { %2210 = vst [vmem:[#allocation1 + $0x4] ss:$9 sm:$0xff] %v10906_v32 }
 0x5fb   : > { %2211 = vst [vmem:[#allocation1 + $0x5] ss:$9 sm:$0xff] %v11040_v44  ;;  %v2102_v32 = vsel %vm594_vm1, %v7582_v35, %v2101_v63  ;;  %v11059_v44 = vld [vmem:[#allocation59_spill] sm:$0xff] }
 0x5fc   : > { %2212 = vst [vmem:[#allocation1 + $0x6] ss:$9 sm:$0xff] %v10974_v12  ;;  %v11044_v12 = vld [vmem:[#allocation45_spill] sm:$0xff] }
 0x5fd   : > { %2213 = vst [vmem:[#allocation1 + $0x7] ss:$9 sm:$0xff] %v10909_v52  ;;  %v11043_v52 = vld [vmem:[#allocation93_spill] sm:$0xff] }
 0x5fe   : > { %1638 = vrot.lane.b32.xlu2 %v1585_v55, %s6233_s12  ;;  %v1083_v36 = vshrl.u32 %v11043_v52, 16 }
 0x5ff   : > { %1428 = vrot.lane.b32.xlu0 %v11042_v18, %s6232_s11 }
 0x600   : > { %v7803_v35 = vrot.slane %v1083_v36, 7  ;;  %v7854_v36 = vpop.permute.xlu2 %1789 }
 0x604   : > { %v2214_v14 = vld [vmem:[#allocation1] sm:$0xff] }
 0x605   : > { %2298 = vrot.lane.b32.xlu1 %v2214_v14, %s6237_s18  ;;  %2216 = vst [vmem:[#allocation1] ss:$9 sm:$0xff] %v10910_v5  ;;  %v1086_v5 = vshll.u32 %v11043_v52, 16  ;;  %v11061_v14 = vld [vmem:[#allocation62_spill] sm:$0xff]  ;;  %v11063_v52 = vld [vmem:[#allocation64_spill] sm:$0xff] }
 0x606   : > { %2155 = vrot.lane.b32.xlu2 %v2102_v32, %s6236_s17  ;;  %2217 = vst [vmem:[#allocation1 + $0x1] ss:$9 sm:$0xff] %v10822_v53  ;;  %v11047_v53 = vld [vmem:[#allocation41_spill] sm:$0xff]  ;;  %v11060_v32 = vld [vmem:[#allocation60_spill] sm:$0xff] }
 0x607   : > { %2218 = vst [vmem:[#allocation1 + $0x2] ss:$9 sm:$0xff] %v11044_v12  ;;  %1945 = vrot.lane.b32.xlu0 %v11045_v21, %s6235_s16  ;;  %v1088_v30 = vor.u32 %v1086_v5, %v7803_v35  ;;  %v11064_v12 = vld [vmem:[#allocation65_spill] sm:$0xff]  ;;  %v11065_v21 = vld [vmem:[#allocation67_spill] sm:$0xff]  ;;  %v11067_v5 = vld [vmem:[#allocation68_spill] sm:$0xff] }
 0x608   : > { %2219 = vst [vmem:[#allocation1 + $0x3] ss:$9 sm:$0xff] %v11046_v1  ;;  %v2158_v1 = vpop.permute.xlu0 %2157 }
 0x609   : > { %2220 = vst [vmem:[#allocation1 + $0x4] ss:$9 sm:$0xff] %v10863_v49  ;;  %v1600_v49 = vshrl.u32 %v11049_v45, 16 }
 0x60a   : > { %2221 = vst [vmem:[#allocation1 + $0x5] ss:$9 sm:$0xff] %v10826_v11  ;;  %v11050_v11 = vld [vmem:[#allocation92_spill] sm:$0xff] }
 0x60b   : > { %2222 = vst [vmem:[#allocation1 + $0x6] ss:$9 sm:$0xff] %v10977_v27  ;;  %v1089_v25 = vsel %vm594_vm1, %v11050_v11, %v1088_v30  ;;  %v7818_v7 = vrot.slane %v1600_v49, 7  ;;  %v1603_v27 = vshll.u32 %v11049_v45, 16  ;;  %v7866_v30 = vpop.permute.xlu2 %1935  ;;  %v11069_v49 = vld [vmem:[#allocation69_spill] sm:$0xff]  ;;  %v11070_v11 = vld [vmem:[#allocation71_spill] sm:$0xff] }
 0x60c   : > { %2223 = vst [vmem:[#allocation1 + $0x7] ss:$9 sm:$0xff] %v10794_v19 }
 0x60d   : > { %1939 = vrot.lane.b32.xlu1 %v11047_v53, %s6235_s16  ;;  %v1605_v43 = vor.u32 %v1603_v27, %v7818_v7  ;;  %v7862_v53 = vsel %vm10511_vm9, %v7730_v6, %v2158_v1  ;;  %v11072_v27 = vld [vmem:[#allocation25_spill] sm:$0xff]  ;;  %v11073_v6 = vld [vmem:[#allocation76_spill] sm:$0xff]  ;;  %v11089_v1 = vld [vmem:[#allocation123_spill] sm:$0xff] }
 0x60e   : > { %1274 = vrot.lane.b32.xlu2 %v11048_v38, %s6231_s8  ;;  %v11068_v38 = vld [vmem:[#allocation5_spill] sm:$0xff] }
 0x60f   : > { %v1606_v24 = vsel %vm594_vm1, %v11058_v3, %v1605_v43 }
 0x613   : > { %v2224_v19 = vld [vmem:[#allocation1] sm:$0xff] }
 0x614   : > { %2300 = vrot.lane.b32.xlu0 %v2224_v19, %s6237_s18  ;;  %2226 = vst [vmem:[#allocation1] ss:$9 sm:$0xff] %v10795_v23  ;;  %v2117_v23 = vshrl.u32 %v7664_v22, 16  ;;  %v11062_v22 = vld [vmem:[#allocation63_spill] sm:$0xff]  ;;  %v11074_v19 = vld [vmem:[#allocation94_spill] sm:$0xff] }
 0x615   : > { %1127 = vrot.lane.b32.xlu1 %v1089_v25, %s6230_s25  ;;  %2227 = vst [vmem:[#allocation1 + $0x1] ss:$9 sm:$0xff] %v11051_v13  ;;  %v11071_v25 = vld [vmem:[#allocation73_spill] sm:$0xff]  ;;  %v1090_v13 = vshrl.u32 %v11074_v19, 16 }
 0x616   : > { %1791 = vrot.lane.b32.xlu2 %v11052_v41, %s6234_s15  ;;  %2228 = vst [vmem:[#allocation1 + $0x2] ss:$9 sm:$0xff] %v11053_v59  ;;  %v7840_v58 = vrot.slane %v2117_v23, 7  ;;  %v11075_v41 = vld [vmem:[#allocation98_spill] sm:$0xff]  ;;  %v2146_v59 = vpop.permute.xlu2 %2145 }
 0x617   : > { %2229 = vst [vmem:[#allocation1 + $0x3] ss:$9 sm:$0xff] %v11054_v56  ;;  %v7884_v43 = vrot.slane %v1090_v13, 7  ;;  %v1093_v56 = vshll.u32 %v11074_v19, 16  ;;  %v11094_v19 = vld [vmem:[#allocation122_spill] sm:$0xff] }
 0x618   : > { %2230 = vst [vmem:[#allocation1 + $0x4] ss:$9 sm:$0xff] %v11055_v33  ;;  %v2122_v55 = vor.u32 %v2120_v39, %v7840_v58  ;;  %v11077_v33 = vld [vmem:[#allocation30_spill] sm:$0xff]  ;;  %v11082_v39 = vld [vmem:[#allocation4_spill] sm:$0xff] }
 0x619   : > { %2231 = vst [vmem:[#allocation1 + $0x5] ss:$9 sm:$0xff] %v11056_v61  ;;  %v11078_v61 = vld [vmem:[#allocation7_spill] sm:$0xff]  ;;  %v1095_v3 = vor.u32 %v1093_v56, %v7884_v43 }
 0x61a   : > { %2232 = vst [vmem:[#allocation1 + $0x6] ss:$9 sm:$0xff] %v11057_v8  ;;  %v2123_v63 = vsel %vm594_vm1, %v7741_v28, %v2122_v55  ;;  %v11066_v28 = vld [vmem:[#allocation66_spill] sm:$0xff]  ;;  %v11080_v8 = vld [vmem:[#allocation80_spill] sm:$0xff] }
 0x61b   : > { %2233 = vst [vmem:[#allocation1 + $0x7] ss:$9 sm:$0xff] %v11059_v44  ;;  %v11083_v55 = vld [vmem:[#allocation82_spill] sm:$0xff] }
 0x61d   : > { %1644 = vrot.lane.b32.xlu1 %v1606_v24, %s6233_s12  ;;  %v11081_v24 = vld [vmem:[#allocation36_spill] sm:$0xff] }
 0x622   : > { %v2234_v18 = vld [vmem:[#allocation1] sm:$0xff] }
 0x623   : > { %2302 = vrot.lane.b32.xlu0 %v2234_v18, %s6237_s18  ;;  %2236 = vst [vmem:[#allocation1] ss:$9 sm:$0xff] %v11060_v32  ;;  %v7901_v18 = vpop.permute.xlu2 %2147  ;;  %v1096_v32 = vsel %vm594_vm1, %v7803_v35, %v1095_v3 }
 0x624   : > { %2237 = vst [vmem:[#allocation1 + $0x1] ss:$9 sm:$0xff] %v11061_v14  ;;  %v11084_v14 = vld [vmem:[#allocation116_spill] sm:$0xff] }
 0x625   : > { %2238 = vst [vmem:[#allocation1 + $0x2] ss:$9 sm:$0xff] %v11062_v22  ;;  %2161 = vrot.lane.b32.xlu1 %v2123_v63, %s6236_s17  ;;  %v11085_v22 = vld [vmem:[#allocation85_spill] sm:$0xff] }
 0x626   : > { %2239 = vst [vmem:[#allocation1 + $0x3] ss:$9 sm:$0xff] %v11063_v52  ;;  %v11086_v52 = vld [vmem:[#allocation86_spill] sm:$0xff] }
 0x627   : > { %2240 = vst [vmem:[#allocation1 + $0x4] ss:$9 sm:$0xff] %v11064_v12  ;;  %v11087_v12 = vld [vmem:[#allocation20_spill] sm:$0xff] }
 0x628   : > { %2241 = vst [vmem:[#allocation1 + $0x5] ss:$9 sm:$0xff] %v11065_v21  ;;  %v11088_v21 = vld [vmem:[#allocation9_spill] sm:$0xff] }
 0x629   : > { %2242 = vst [vmem:[#allocation1 + $0x6] ss:$9 sm:$0xff] %v11066_v28  ;;  %v7917_v28 = vpop.permute.xlu1 %2149 }
 0x62a   : > { %2243 = vst [vmem:[#allocation1 + $0x7] ss:$9 sm:$0xff] %v11067_v5  ;;  %v2124_v5 = vshrl.u32 %v7680_v54, 16 }
 0x62c   : > { %v7936_v56 = vrot.slane %v2124_v5, 7 }
 0x62d   : > { %1276 = vrot.lane.b32.xlu1 %v11068_v38, %s6231_s8  ;;  %v11090_v38 = vld [vmem:[#allocation117_spill] sm:$0xff] }
 0x631   : > { %v2244_v45 = vld [vmem:[#allocation1] sm:$0xff] }
 0x632   : > { %2304 = vrot.lane.b32.xlu2 %v2244_v45, %s6237_s18  ;;  %2246 = vst [vmem:[#allocation1] ss:$9 sm:$0xff] %v11069_v49  ;;  %v11091_v49 = vld [vmem:[#allocation95_spill] sm:$0xff] }
 0x633   : > { %2247 = vst [vmem:[#allocation1 + $0x1] ss:$9 sm:$0xff] %v11070_v11  ;;  %v1097_v11 = vshrl.u32 %v11091_v49, 16 }
 0x634   : > { %2248 = vst [vmem:[#allocation1 + $0x2] ss:$9 sm:$0xff] %v10993_v17  ;;  %v11076_v17 = vld [vmem:[#allocation106_spill] sm:$0xff] }
 0x635   : > { %2249 = vst [vmem:[#allocation1 + $0x3] ss:$9 sm:$0xff] %v11071_v25  ;;  %1793 = vrot.lane.b32.xlu1 %v11072_v27, %s6234_s15  ;;  %v11092_v25 = vld [vmem:[#allocation49_spill] sm:$0xff] }
 0x636   : > { %2250 = vst [vmem:[#allocation1 + $0x4] ss:$9 sm:$0xff] %v10995_v34  ;;  %v11093_v27 = vld [vmem:[#allocation61_spill] sm:$0xff] }
 0x637   : > { %2251 = vst [vmem:[#allocation1 + $0x5] ss:$9 sm:$0xff] %v11073_v6  ;;  %v2332_v6 = vsel %vm2316_vm3, %v11093_v27, %v11092_v25  ;;  %v11106_v27 = vld [vmem:[#allocation104_spill] sm:$0xff] }
 0x638   : > { %2252 = vst [vmem:[#allocation1 + $0x6] ss:$9 sm:$0xff] %v10998_v47  ;;  %v2318_v47 = vsel %vm2316_vm3, %v11078_v61, %v11077_v33  ;;  %v7939_v33 = vrot.slane %v1097_v11, 7  ;;  %v1100_v61 = vshll.u32 %v11091_v49, 16  ;;  %v11105_v11 = vld [vmem:[#allocation103_spill] sm:$0xff] }
 0x639   : > { %2253 = vst [vmem:[#allocation1 + $0x7] ss:$9 sm:$0xff] %v10999_v15  ;;  %v11079_v15 = vld [vmem:[#allocation109_spill] sm:$0xff]  ;;  %v2343_v44 = vsel %vm2341_vm4, %v2318_v47, %v11082_v39  ;;  %v11095_v47 = vld [vmem:[#allocation72_spill] sm:$0xff] }
 0x63a   : > { %1430 = vrot.lane.b32.xlu2 %v11075_v41, %s6232_s11  ;;  %v1607_v23 = vshrl.u32 %v11079_v15, 16  ;;  %v1610_v63 = vshll.u32 %v11079_v15, 16  ;;  %v7932_v41 = vpop.permute.xlu2 %2153 }
 0x63d   : > { %1432 = vrot.lane.b32.xlu1 %v11076_v17, %s6232_s11 }
 0x640   : > { %v2254_v34 = vld [vmem:[#allocation1] sm:$0xff] }
 0x641   : > { %2306 = vrot.lane.b32.xlu0 %v2254_v34, %s6237_s18  ;;  %2256 = vst [vmem:[#allocation1] ss:$9 sm:$0xff] %v10948_v9  ;;  %v7904_v9 = vrot.slane %v1607_v23, 7  ;;  %v2127_v34 = vshll.u32 %v7680_v54, 16  ;;  %v11098_v54 = vld [vmem:[#allocation97_spill] sm:$0xff] }
 0x642   : > { %2257 = vst [vmem:[#allocation1 + $0x1] ss:$9 sm:$0xff] %v11080_v8  ;;  %1947 = vrot.lane.b32.xlu2 %v11081_v24, %s6235_s16  ;;  %v11096_v8 = vld [vmem:[#allocation77_spill] sm:$0xff]  ;;  %v7970_v5 = vpop.permute.xlu2 %1268 }
 0x643   : > { %2258 = vst [vmem:[#allocation1 + $0x2] ss:$9 sm:$0xff] %v10949_v20  ;;  %v2368_v20 = vsel %vm2366_vm5, %v2343_v44, %v11084_v14  ;;  %v2357_v3 = vsel %vm2341_vm4, %v2332_v6, %v11096_v8  ;;  %v1102_v44 = vor.u32 %v1100_v61, %v7939_v33  ;;  %v11100_v14 = vld [vmem:[#allocation74_spill] sm:$0xff] }
 0x644   : > { %2259 = vst [vmem:[#allocation1 + $0x3] ss:$9 sm:$0xff] %v11083_v55  ;;  %v2393_v35 = vsel %vm2391_vm6, %v2368_v20, %v11089_v1  ;;  %v2520_v55 = vld [vmem:[%s10233_s3 + $0x10] sm:$0x3]  ;;  %v2382_v20 = vsel %vm2366_vm5, %v2357_v3, %v11100_v14  ;;  %v6129_v61 = vld [vmem:[%s10233_s3 + $0x8] sm:$0xff] }
 0x645   : > { %2260 = vst [vmem:[#allocation1 + $0x4] ss:$9 sm:$0xff] %v10951_v10  ;;  %v2320_v10 = vsel %vm2316_vm3, %v11088_v21, %v11087_v12  ;;  %v2418_v13 = vsel %vm2416_vm7, %v2393_v35, %v11094_v19  ;;  %v2618_v12 = vunpack.c.l.b16 %v2520_v55  ;;  %v11102_v21 = vld [vmem:[#allocation101_spill] sm:$0xff]  ;;  %v11104_v35 = vld [vmem:[#allocation102_spill] sm:$0xff] }
 0x646   : > { %2261 = vst [vmem:[#allocation1 + $0x5] ss:$9 sm:$0xff] %v10952_v50  ;;  %v1612_v50 = vor.u32 %v1610_v63, %v7904_v9  ;;  %v2345_v45 = vsel %vm2341_vm4, %v2320_v10, %v11090_v38  ;;  %v2443_v24 = vsel %vm2441_vm8, %v2418_v13, %v7790_v51  ;;  %v2129_v51 = vor.u32 %v2127_v34, %v7936_v56  ;;  %v11107_v13 = vld [vmem:[#allocation21_spill] sm:$0xff] }
 0x647   : > { %2262 = vst [vmem:[#allocation1 + $0x6] ss:$9 sm:$0xff] %v11085_v22  ;;  %v2370_v15 = vsel %vm2366_vm5, %v2345_v45, %v11095_v47  ;;  %v2468_v22 = vsel %vm10511_vm9, %v2443_v24, %v2146_v59  ;;  %v1103_v59 = vsel %vm594_vm1, %v7884_v43, %v1102_v44  ;;  %v2621_v38 = vpack.c.b16 %v2618_v12, %v2618_v12  ;;  %v11108_v43 = vld [vmem:[#allocation16_spill] sm:$0xff] }
 0x648   : > { %2263 = vst [vmem:[#allocation1 + $0x7] ss:$9 sm:$0xff] %v11086_v52  ;;  %v1613_v17 = vsel %vm594_vm1, %v7818_v7, %v1612_v50  ;;  %v11097_v7 = vld [vmem:[#allocation8_spill] sm:$0xff]  ;;  %v2395_v63 = vsel %vm2391_vm6, %v2370_v15, %v7678_v0  ;;  %v11103_v50 = vld [vmem:[#allocation110_spill] sm:$0xff]  ;;  %v2407_v45 = vsel %vm2391_vm6, %v2382_v20, %v7686_v60  ;;  %v2130_v49 = vsel %vm594_vm1, %v7840_v58, %v2129_v51 }
 0x649   : > { %1129 = vrot.lane.b32.xlu0 %v1096_v32, %s6230_s25  ;;  %v11099_v32 = vld [vmem:[#allocation99_spill] sm:$0xff]  ;;  %v11101_v52 = vld [vmem:[#allocation100_spill] sm:$0xff]  ;;  %v1614_v0 = vshrl.u32 %v11103_v50, 16  ;;  %v2420_v1 = vsel %vm2416_vm7, %v2395_v63, %v7676_v31  ;;  %v1617_v31 = vshll.u32 %v11103_v50, 16  ;;  %v2663_v19 = vsel %vm2661_vm11, %v2621_v38, 0 }
 0x64a   : > { %v2293_v39 = vpop.permute.xlu1 %2292  ;;  %v2445_v60 = vsel %vm2441_vm8, %v2420_v1, %v7814_v57  ;;  %2670 = vmatpush.bf16.msra.mxu0 %v2663_v19  ;;  %v2432_v58 = vsel %vm2416_vm7, %v2407_v45, %v7854_v36  ;;  %6132 = vmatpush.bf16.msra.mxu2 %v2663_v19  ;;  %v11109_v36 = vld [vmem:[#allocation118_spill] sm:$0xff]  ;;  %v11110_v63 = vld [vmem:[#allocation75_spill] sm:$0xff]  ;;  %v2134_v20 = vshll.u32 %v7702_v46, 16  ;;  %v11112_v12 = vld [vmem:[#allocation96_spill] sm:$0xff] }
 0x64b   : > { %v2493_v10 = vsel %vm10502_vm10, %v2468_v22, %v2293_v39  ;;  %v7979_v25 = vrot.slane %v1614_v0, 7  ;;  %v2470_v34 = vsel %vm10511_vm9, %v2445_v60, %v7901_v18  ;;  %v11111_v22 = vld [vmem:[#allocation105_spill] sm:$0xff]  ;;  %v11114_v0 = vld [vmem:[#allocation50_spill] sm:$0xff]  ;;  %v11119_v19 = vld [vmem:[#allocation31_spill] sm:$0xff] }
 0x64c   : > { %v2528_v6 = vshll.u32 %v2493_v10, 16  ;;  %v2526_v39 = vshrl.u32 %v2493_v10, 16  ;;  %v11116_v45 = vld [vmem:[#allocation81_spill] sm:$0xff]  ;;  %v11121_v60 = vld [vmem:[#allocation114_spill] sm:$0xff] }
 0x64e   : > { %v2530_v18 = vrot.slane %v2528_v6, 1  ;;  %2671 = vmatpush.bf16.msra.mxu0 %v6129_v61  ;;  %6133 = vmatpush.bf16.msra.mxu2 %v6129_v61  ;;  %v11118_v6 = vld [vmem:[#allocation113_spill] sm:$0xff] }
 0x64f   : > { %v2264_v23 = vld [vmem:[#allocation1] sm:$0xff] }
 0x650   : > { %2308 = vrot.lane.b32.xlu2 %v2264_v23, %s6237_s18  ;;  %2266 = vst [vmem:[#allocation1] ss:$9 sm:$0xff] %v11097_v7  ;;  %v1619_v23 = vor.u32 %v1617_v31, %v7979_v25  ;;  %v6128_v7 = vld [vmem:[%s10233_s3] sm:$0xff]  ;;  %v2531_v10 = vor.u32 %v2530_v18, %v2526_v39  ;;  %v11117_v31 = vld [vmem:[#allocation83_spill] sm:$0xff] }
 0x651   : > { %1646 = vrot.lane.b32.xlu0 %v1613_v17, %s6233_s12  ;;  %2267 = vst [vmem:[#allocation1 + $0x1] ss:$9 sm:$0xff] %v11098_v54  ;;  %v2322_v17 = vsel %vm2316_vm3, %v11108_v43, %v11107_v13  ;;  %v2131_v54 = vshrl.u32 %v7702_v46, 16  ;;  %v11120_v13 = vld [vmem:[#allocation26_spill] sm:$0xff] }
 0x652   : > { %2268 = vst [vmem:[#allocation1 + $0x2] ss:$9 sm:$0xff] %v11099_v32  ;;  %v1944_v47 = vpop.permute.xlu1 %1943  ;;  %v2347_v3 = vsel %vm2341_vm4, %v2322_v17, %v11109_v36  ;;  %v1620_v55 = vsel %vm594_vm1, %v7904_v9, %v1619_v23  ;;  %2672 = vmatpush.bf16.msra.mxu0 %v6128_v7  ;;  %v11113_v9 = vld [vmem:[#allocation119_spill] sm:$0xff]  ;;  %6134 = vmatpush.bf16.msra.mxu2 %v6128_v7 }
 0x653   : > { %2269 = vst [vmem:[#allocation1 + $0x3] ss:$9 sm:$0xff] %v11101_v52  ;;  %v2457_v57 = vsel %vm2441_vm8, %v2432_v58, %v1944_v47  ;;  %v2372_v51 = vsel %vm2366_vm5, %v2347_v3, %v11110_v63  ;;  %v8014_v14 = vrot.slane %v2131_v54, 7  ;;  %v2297_v52 = vpop.permute.xlu2 %2296  ;;  %v2324_v43 = vsel %vm2316_vm3, %v11120_v13, %v11119_v19  ;;  %v11126_v63 = vld [vmem:[#allocation121_spill] sm:$0xff]  ;;  %v11133_v19 = vld [vmem:[#allocation115_spill] sm:$0xff] }
 0x654   : > { %2270 = vst [vmem:[#allocation1 + $0x4] ss:$9 sm:$0xff] %v11102_v21  ;;  %v1104_v21 = vshrl.u32 %v11112_v12, 16  ;;  %v2397_v50 = vsel %vm2391_vm6, %v2372_v51, %v11113_v9 }
 0x655   : > { %2271 = vst [vmem:[#allocation1 + $0x5] ss:$9 sm:$0xff] %v11104_v35 }
 0x656   : > { %2272 = vst [vmem:[#allocation1 + $0x6] ss:$9 sm:$0xff] %v11105_v11  ;;  %v1107_v11 = vshll.u32 %v11112_v12, 16  ;;  %v11130_v12 = vld [vmem:[#allocation34_spill] sm:$0xff] }
 0x657   : > { %2273 = vst [vmem:[#allocation1 + $0x7] ss:$9 sm:$0xff] %v11106_v27 }
 0x658   : > { %1131 = vrot.lane.b32.xlu2 %v1103_v59, %s6230_s25  ;;  %v11115_v59 = vld [vmem:[#allocation78_spill] sm:$0xff] }
 0x659   : > { %2163 = vrot.lane.b32.xlu0 %v2130_v49, %s6236_s17  ;;  %v2295_v15 = vpop.permute.xlu0 %2294  ;;  %v1106_v49 = vrot.slane %v1104_v21, 7 }
 0x65a   : > { %v8001_v8 = vsel %vm10502_vm10, %v2470_v34, %v2295_v15  ;;  %v2160_v1 = vpop.permute.xlu1 %2159 }
 0x65b   : > { %v2532_v24 = vshll.u32 %v8001_v8, 16  ;;  %v8033_v38 = vsel %vm10511_vm9, %v2457_v57, %v2160_v1  ;;  %v8059_v47 = vpop.permute.xlu2 %1638  ;;  %v2536_v18 = vshrl.u32 %v8001_v8, 16  ;;  %v11127_v8 = vld [vmem:[#allocation51_spill] sm:$0xff] }
 0x65d   : > { %v2534_v44 = vrot.slane %v2532_v24, 1  ;;  %v11125_v24 = vld [vmem:[#allocation120_spill] sm:$0xff] }
 0x65e   : > { %v2274_v32 = vld [vmem:[#allocation1] sm:$0xff] }
 0x65f   : > { %2310 = vrot.lane.b32.xlu1 %v2274_v32, %s6237_s18  ;;  %2276 = vst [vmem:[#allocation1] ss:$9 sm:$0xff] %v11111_v22  ;;  %v2535_v46 = vsel %vm10501_vm12, %v2531_v10, %v2534_v44 }
 0x660   : > { %2277 = vst [vmem:[#allocation1 + $0x1] ss:$9 sm:$0xff] %v7375_v62  ;;  %1648 = vrot.lane.b32.xlu2 %v1620_v55, %s6233_s12  ;;  %v2136_v62 = vor.u32 %v2134_v20, %v8014_v14  ;;  %6083 = vmatmul.msk.bf16.vlgmr.msra.gmra.mxu0 %vm10500_vm13, %v2535_v46  ;;  %v2538_v55 = vor.u32 %v2536_v18, %v2534_v44  ;;  %v2138_v20 = vshrl.u32 %v7718_v2, 16  ;;  %v11128_v44 = vld [vmem:[#allocation2_spill] sm:$0xff] }
 0x661   : > { %1278 = vrot.lane.b32.xlu0 %v11114_v0, %s6231_s8  ;;  %2278 = vst [vmem:[#allocation1 + $0x2] ss:$9 sm:$0xff] %v11016_v48  ;;  %v8028_v35 = vpop.permute.xlu0 %1121  ;;  %v2422_v48 = vsel %vm2416_vm7, %v2397_v50, %v7711_v16  ;;  %v1109_v16 = vor.u32 %v1107_v11, %v1106_v49  ;;  %v2141_v0 = vshll.u32 %v7718_v2, 16  ;;  %v11131_v49 = vld [vmem:[#allocation38_spill] sm:$0xff] }
 0x662   : > { %2279 = vst [vmem:[#allocation1 + $0x3] ss:$9 sm:$0xff] %v11115_v59  ;;  %v2137_v27 = vsel %vm594_vm1, %v7936_v56, %v2136_v62  ;;  %v2447_v17 = vsel %vm2441_vm8, %v2422_v48, %v7831_v29  ;;  %v11123_v56 = vld [vmem:[#allocation28_spill] sm:$0xff]  ;;  %v1423_v39 = vpop.permute.xlu1 %1422  ;;  %v2140_v50 = vrot.slane %v2138_v20, 7 }
 0x663   : > { %2280 = vst [vmem:[#allocation1 + $0x4] ss:$9 sm:$0xff] %v11116_v45  ;;  %v2472_v58 = vsel %vm10511_vm9, %v2447_v17, %v7917_v28  ;;  %v11124_v29 = vld [vmem:[#allocation40_spill] sm:$0xff]  ;;  %v1110_v57 = vsel %vm594_vm1, %v7939_v33, %v1109_v16  ;;  %v2156_v10 = vpop.permute.xlu2 %2155  ;;  %v11134_v16 = vld [vmem:[#allocation43_spill] sm:$0xff] }
 0x664   : > { %2281 = vst [vmem:[#allocation1 + $0x5] ss:$9 sm:$0xff] %v11117_v31  ;;  %v2497_v61 = vsel %vm10502_vm10, %v2472_v58, %v2297_v52  ;;  %v2349_v23 = vsel %vm2341_vm4, %v2324_v43, %v11124_v29  ;;  %v608_v52 = vsel %vm6315_vm2, 0, %v11128_v44  ;;  %v2143_v59 = vor.u32 %v2141_v0, %v2140_v50 }
 0x665   : > { %2282 = vst [vmem:[#allocation1 + $0x6] ss:$9 sm:$0xff] %v11018_v37  ;;  %v11122_v37 = vld [vmem:[#allocation112_spill] sm:$0xff]  ;;  %v2539_v28 = vshll.u32 %v2497_v61, 16  ;;  %v2374_v7 = vsel %vm2366_vm5, %v2349_v23, %v11125_v24  ;;  %v2328_v58 = vsel %vm2316_vm3, %v11134_v16, %v8028_v35 }
 0x666   : > { %2283 = vst [vmem:[#allocation1 + $0x7] ss:$9 sm:$0xff] %v11118_v6  ;;  %v1621_v34 = vshrl.u32 %v11122_v37, 16  ;;  %v1624_v3 = vshll.u32 %v11122_v37, 16  ;;  %v2399_v33 = vsel %vm2391_vm6, %v2374_v7, %v11126_v63  ;;  %v2144_v2 = vsel %vm594_vm1, %v8014_v14, %v2143_v59 }
 0x667   : > { %1949 = vrot.lane.b32.xlu1 %v11121_v60, %s6235_s16  ;;  %v2541_v51 = vrot.slane %v2539_v28, 1  ;;  %v2424_v21 = vsel %vm2416_vm7, %v2399_v33, %v11130_v12  ;;  %v2476_v14 = vsel %vm10511_vm9, %v7709_v40, %v7932_v41 }
 0x668   : > { %2165 = vrot.lane.b32.xlu2 %v2137_v27, %s6236_s17  ;;  %v1623_v36 = vrot.slane %v1621_v34, 7  ;;  %v2449_v46 = vsel %vm2441_vm8, %v2424_v21, %v7866_v30  ;;  %v2353_v34 = vsel %vm2341_vm4, %v2328_v58, %v7970_v5 }
 0x669   : > { %1795 = vrot.lane.b32.xlu0 %v11123_v56, %s6234_s15  ;;  %v8061_v15 = vpop.permute.xlu0 %1785  ;;  %v2542_v22 = vsel %vm10501_vm12, %v2538_v55, %v2541_v51  ;;  %v2474_v1 = vsel %vm10511_vm9, %v2449_v46, %v7844_v4  ;;  %v2543_v4 = vshrl.u32 %v2497_v61, 16  ;;  %v2378_v61 = vsel %vm2366_vm5, %v2353_v34, %v1423_v39  ;;  %v11135_v55 = vld [vmem:[#allocation70_spill] sm:$0xff] }
 0x66a   : > { %v1626_v32 = vor.u32 %v1624_v3, %v1623_v36  ;;  %v2403_v40 = vsel %vm2391_vm6, %v2378_v61, %v8059_v47 }
 0x66b   : > { %v1275_v48 = vpop.permute.xlu2 %1274  ;;  %v2545_v6 = vor.u32 %v2543_v4, %v2541_v51  ;;  %v2428_v28 = vsel %vm2416_vm7, %v2403_v40, %v8061_v15 }
 0x66c   : > { %v1627_v9 = vsel %vm594_vm1, %v7979_v25, %v1626_v32  ;;  %v11132_v25 = vld [vmem:[#allocation107_spill] sm:$0xff] }
 0x66d   : > { %v2284_v54 = vld [vmem:[#allocation1] sm:$0xff] }
 0x66e   : > { %2286 = vst [vmem:[#allocation1] ss:$9 sm:$0xff] %v7505_v26 }
 0x66f   : > { %2287 = vst [vmem:[#allocation1 + $0x1] ss:$9 sm:$0xff] %v7510_v42  ;;  %1133 = vrot.lane.b32.xlu1 %v1110_v57, %s6230_s25 }
 0x670   : > { %1280 = vrot.lane.b32.xlu2 %v11127_v8, %s6231_s8  ;;  %6084 = vmatmul.msk.bf16.gmra.mxu0 %vm10500_vm13, %v2542_v22  ;;  %2289 = vst [vmem:[#allocation1 + $0x2] ss:$9 sm:$0xff] %v608_v52 }
 0x671   : > { %2312 = vrot.lane.b32.xlu0 %v2284_v54, %s6237_s18  ;;  %v8081_v26 = vpop.permute.xlu0 %1428 }
 0x673   : > { %v1792_v17 = vpop.permute.xlu2 %1791 }
 0x677   : > { %1650 = vrot.lane.b32.xlu1 %v1627_v9, %s6233_s12  ;;  %v2299_v62 = vpop.permute.xlu1 %2298  ;;  %v2290_v31 = vld [vmem:[#allocation1] sm:$0xff] }
 0x678   : > { %v2499_v45 = vsel %vm10502_vm10, %v2474_v1, %v2299_v62  ;;  %1797 = vrot.lane.b32.xlu2 %v11131_v49, %s6234_s15 }
 0x679   : > { %1434 = vrot.lane.b32.xlu0 %v11132_v25, %s6232_s11  ;;  %v2546_v11 = vshll.u32 %v2499_v45, 16  ;;  %v1946_v30 = vpop.permute.xlu0 %1945  ;;  %v2550_v29 = vshrl.u32 %v2499_v45, 16 }
 0x67b   : > { %v2548_v27 = vrot.slane %v2546_v11, 1 }
 0x67d   : > { %v2549_v13 = vsel %vm10501_vm12, %v2545_v6, %v2548_v27  ;;  %v2552_v41 = vor.u32 %v2550_v29, %v2548_v27 }
 0x67f   : > { %2167 = vrot.lane.b32.xlu1 %v2144_v2, %s6236_s17  ;;  %v1940_v56 = vpop.permute.xlu1 %1939 }
 0x680   : > { %2314 = vrot.lane.b32.xlu2 %v2290_v31, %s6237_s18  ;;  %6085 = vmatmul.msk.bf16.gmra.mxu0 %vm10500_vm13, %v2549_v13  ;;  %v2453_v35 = vsel %vm2441_vm8, %v2428_v28, %v1940_v56 }
 0x681   : > { %1951 = vrot.lane.b32.xlu0 %v11133_v19, %s6235_s16  ;;  %v2478_v18 = vsel %vm10511_vm9, %v2453_v35, %v2156_v10  ;;  %v11137_v35 = vld [vmem:[#allocation87_spill] sm:$0xff] }
 0x686   : > { %v2301_v43 = vpop.permute.xlu0 %2300 }
 0x687   : > { %v2501_v60 = vsel %vm10502_vm10, %v2476_v14, %v2301_v43  ;;  %v1128_v5 = vpop.permute.xlu1 %1127  ;;  %v11136_v14 = vld [vmem:[#allocation79_spill] sm:$0xff] }
 0x688   : > { %v2553_v37 = vshll.u32 %v2501_v60, 16  ;;  %v2557_v47 = vshrl.u32 %v2501_v60, 16  ;;  %v2334_v63 = vsel %vm2316_vm3, %v11135_v55, %v1128_v5 }
 0x689   : > { %v2359_v51 = vsel %vm2341_vm4, %v2334_v63, %v1275_v48 }
 0x68a   : > { %v2555_v23 = vrot.slane %v2553_v37, 1  ;;  %v2384_v8 = vsel %vm2366_vm5, %v2359_v51, %v8081_v26 }
 0x68c   : > { %v2305_v57 = vpop.permute.xlu2 %2304  ;;  %v2556_v36 = vsel %vm10501_vm12, %v2552_v41, %v2555_v23  ;;  %v2559_v33 = vor.u32 %v2557_v47, %v2555_v23 }
 0x68d   : > { %v2505_v44 = vsel %vm10502_vm10, %v7862_v53, %v2305_v57 }
 0x68e   : > { %v2567_v12 = vshll.u32 %v2505_v44, 16  ;;  %v2571_v49 = vshrl.u32 %v2505_v44, 16 }
 0x68f   : > { %v1645_v15 = vpop.permute.xlu1 %1644 }
 0x690   : > { %6086 = vmatmul.msk.bf16.gmra.mxu0 %vm10500_vm13, %v2556_v36  ;;  %v2409_v22 = vsel %vm2391_vm6, %v2384_v8, %v1645_v15  ;;  %v2569_v46 = vrot.slane %v2567_v12, 1  ;;  %v8171_v15 = vld [vmem:[%s10234_s4] ss:$0 sm:$0xff] }
 0x691   : > { %v2434_v42 = vsel %vm2416_vm7, %v2409_v22, %v1792_v17 }
 0x692   : > { %v2459_v10 = vsel %vm2441_vm8, %v2434_v42, %v1946_v30  ;;  %v2573_v11 = vor.u32 %v2571_v49, %v2569_v46 }
 0x694   : > { %v1431_v7 = vpop.permute.xlu2 %1430 }
 0x695   : > { %v2303_v3 = vpop.permute.xlu0 %2302 }
 0x696   : > { %v2503_v24 = vsel %vm10502_vm10, %v2478_v18, %v2303_v3 }
 0x697   : > { %v2560_v54 = vshll.u32 %v2503_v24, 16  ;;  %v2162_v52 = vpop.permute.xlu1 %2161  ;;  %v2564_v21 = vshrl.u32 %v2503_v24, 16 }
 0x698   : > { %v2484_v9 = vsel %vm10511_vm9, %v2459_v10, %v2162_v52 }
 0x699   : > { %v2562_v39 = vrot.slane %v2560_v54, 1 }
 0x69b   : > { %v2563_v32 = vsel %vm10501_vm12, %v2559_v33, %v2562_v39  ;;  %v2566_v0 = vor.u32 %v2564_v21, %v2562_v39 }
 0x69c   : > { %v1948_v20 = vpop.permute.xlu2 %1947 }
 0x69d   : > { %v2570_v26 = vsel %vm10501_vm12, %v2566_v0, %v2569_v46 }
 0x69f   : > { %v1277_v45 = vpop.permute.xlu1 %1276 }
 0x6a0   : > { %6087 = vmatmul.msk.bf16.gmra.mxu0 %vm10500_vm13, %v2563_v32 }
 0x6a7   : > { %v1794_v19 = vpop.permute.xlu1 %1793 }
 0x6aa   : > { %v2309_v50 = vpop.permute.xlu2 %2308 }
 0x6ab   : > { %v2509_v1 = vsel %vm10502_vm10, %v2484_v9, %v2309_v50 }
 0x6ac   : > { %v2581_v59 = vshll.u32 %v2509_v1, 16  ;;  %v2585_v41 = vshrl.u32 %v2509_v1, 16 }
 0x6ae   : > { %v2583_v48 = vrot.slane %v2581_v59, 1 }
 0x6af   : > { %v1433_v60 = vpop.permute.xlu1 %1432 }
 0x6b0   : > { %6088 = vmatmul.msk.bf16.gmra.mxu0 %vm10500_vm13, %v2570_v26  ;;  %v2587_v36 = vor.u32 %v2585_v41, %v2583_v48  ;;  %v11138_v26 = vld [vmem:[#allocation88_spill] sm:$0xff] }
 0x6b2   : > { %v1132_v13 = vpop.permute.xlu2 %1131 }
 0x6b3   : > { %v2307_v62 = vpop.permute.xlu0 %2306  ;;  %v2338_v5 = vsel %vm2316_vm3, %v11137_v35, %v1132_v13 }
 0x6b4   : > { %v2507_v53 = vsel %vm10502_vm10, %v8033_v38, %v2307_v62 }
 0x6b5   : > { %v2574_v25 = vshll.u32 %v2507_v53, 16  ;;  %v2578_v30 = vshrl.u32 %v2507_v53, 16 }
 0x6b7   : > { %v2576_v2 = vrot.slane %v2574_v25, 1 }
 0x6b9   : > { %v2580_v31 = vor.u32 %v2578_v30, %v2576_v2  ;;  %v2577_v4 = vsel %vm10501_vm12, %v2573_v11, %v2576_v2 }
 0x6ba   : > { %6089 = vmatmul.msk.bf16.vlgmr.msra.gmra.mxu2 %vm10500_vm13, %v2577_v4  ;;  %v1649_v34 = vpop.permute.xlu2 %1648 }
 0x6bb   : > { %v1130_v27 = vpop.permute.xlu0 %1129  ;;  %v2584_v6 = vsel %vm10501_vm12, %v2580_v31, %v2583_v48 }
 0x6bc   : > { %v2336_v43 = vsel %vm2316_vm3, %v11136_v14, %v1130_v27 }
 0x6bd   : > { %v2361_v17 = vsel %vm2341_vm4, %v2336_v43, %v1277_v45 }
 0x6be   : > { %v2386_v16 = vsel %vm2366_vm5, %v2361_v17, %v1431_v7 }
 0x6c2   : > { %v2166_v18 = vpop.permute.xlu2 %2165 }
 0x6c3   : > { %v1647_v38 = vpop.permute.xlu0 %1646 }
 0x6c4   : > { %v2411_v58 = vsel %vm2391_vm6, %v2386_v16, %v1647_v38 }
 0x6c5   : > { %v2436_v56 = vsel %vm2416_vm7, %v2411_v58, %v1794_v19 }
 0x6c6   : > { %v2461_v61 = vsel %vm2441_vm8, %v2436_v56, %v1948_v20 }
 0x6ca   : > { %6090 = vmatmul.msk.bf16.gmra.mxu2 %vm10500_vm13, %v2584_v6  ;;  %v1281_v33 = vpop.permute.xlu2 %1280 }
 0x6cb   : > { %v2164_v37 = vpop.permute.xlu0 %2163 }
 0x6cc   : > { %v2486_v29 = vsel %vm10511_vm9, %v2461_v61, %v2164_v37 }
 0x6d1   : > { %v2311_v23 = vpop.permute.xlu1 %2310 }
 0x6d2   : > { %v2511_v40 = vsel %vm10502_vm10, %v2486_v29, %v2311_v23  ;;  %v1798_v53 = vpop.permute.xlu2 %1797 }
 0x6d3   : > { %v1279_v57 = vpop.permute.xlu0 %1278  ;;  %v2588_v28 = vshll.u32 %v2511_v40, 16  ;;  %v2592_v12 = vshrl.u32 %v2511_v40, 16 }
 0x6d4   : > { %v2363_v24 = vsel %vm2341_vm4, %v2338_v5, %v1279_v57 }
 0x6d5   : > { %v2590_v3 = vrot.slane %v2588_v28, 1  ;;  %v2388_v54 = vsel %vm2366_vm5, %v2363_v24, %v1433_v60 }
 0x6d6   : > { %v2413_v55 = vsel %vm2391_vm6, %v2388_v54, %v1649_v34 }
 0x6d7   : > { %v2591_v7 = vsel %vm10501_vm12, %v2587_v36, %v2590_v3  ;;  %v2594_v0 = vor.u32 %v2592_v12, %v2590_v3 }
 0x6d9   : > { %v1950_v47 = vpop.permute.xlu1 %1949 }
 0x6da   : > { %6091 = vmatmul.msk.bf16.gmra.mxu2 %vm10500_vm13, %v2591_v7  ;;  %v2315_v38 = vpop.permute.xlu2 %2314 }
 0x6db   : > { %v1796_v39 = vpop.permute.xlu0 %1795 }
 0x6dc   : > { %v2438_v63 = vsel %vm2416_vm7, %v2413_v55, %v1796_v39 }
 0x6dd   : > { %v2463_v51 = vsel %vm2441_vm8, %v2438_v63, %v1950_v47  ;;  %v2674_v32 = vpop.f32.mrf.mxu0 }
 0x6de   : > { %v2675_v8 = vadd.f32 %v8171_v15, %v2674_v32  ;;  %v2488_v22 = vsel %vm10511_vm9, %v2463_v51, %v2166_v18 }
 0x6e0   : > { %v2733_v42 = vmax.f32 %v2675_v8, 0.0 }
 0x6e1   : > { %v1134_v20 = vpop.permute.xlu1 %1133 }
 0x6e2   : > { %v2779_v10 = vrot.slane %v2733_v42, 2  ;;  %v2780_v9 = vrot.slane %v2733_v42, 4  ;;  %3018 = vst [vmem:[#allocation1] ss:$4 sm:$0xff] %v2733_v42  ;;  %v2781_v50 = vrot.slane %v2733_v42, 6  ;;  %v2340_v62 = vsel %vm2316_vm3, %v11138_v26, %v1134_v20 }
 0x6e3   : > { %v2313_v44 = vpop.permute.xlu0 %2312  ;;  %v2365_v2 = vsel %vm2341_vm4, %v2340_v62, %v1281_v33 }
 0x6e4   : > { %v2513_v52 = vsel %vm10502_vm10, %v2488_v22, %v2313_v44  ;;  %3020 = vst [vmem:[#allocation1 + $0x1] ss:$4 sm:$0xff] %v2779_v10 }
 0x6e5   : > { %v2595_v21 = vshll.u32 %v2513_v52, 16  ;;  %3022 = vst [vmem:[#allocation1 + $0x2] ss:$4 sm:$0xff] %v2780_v9  ;;  %v2676_v1 = vpop.f32.mrf.mxu0  ;;  %v2599_v61 = vshrl.u32 %v2513_v52, 16 }
 0x6e6   : > { %3024 = vst [vmem:[#allocation1 + $0x3] ss:$4 sm:$0xff] %v2781_v50  ;;  %v2677_v49 = vadd.f32 %v8171_v15, %v2676_v1 }
 0x6e7   : > { %v2597_v46 = vrot.slane %v2595_v21, 1 }
 0x6e8   : > { %v2734_v11 = vmax.f32 %v2677_v49, 0.0 }
 0x6e9   : > { %v2598_v59 = vsel %vm10501_vm12, %v2594_v0, %v2597_v46  ;;  %v1651_v45 = vpop.permute.xlu1 %1650  ;;  %v2601_v57 = vor.u32 %v2599_v61, %v2597_v46 }
 0x6ea   : > { %6092 = vmatmul.msk.bf16.gmra.mxu2 %vm10500_vm13, %v2598_v59  ;;  %v2782_v48 = vrot.slane %v2734_v11, 2  ;;  %v2783_v31 = vrot.slane %v2734_v11, 4  ;;  %v2784_v4 = vrot.slane %v2734_v11, 6  ;;  %3026 = vst [vmem:[#allocation1 + $0x20] ss:$4 sm:$0xff] %v2734_v11 }
 0x6eb   : > { %v1435_v25 = vpop.permute.xlu0 %1434 }
 0x6ec   : > { %v2390_v30 = vsel %vm2366_vm5, %v2365_v2, %v1435_v25  ;;  %3028 = vst [vmem:[#allocation1 + $0x21] ss:$4 sm:$0xff] %v2782_v48 }
 0x6ed   : > { %v2415_v27 = vsel %vm2391_vm6, %v2390_v30, %v1651_v45  ;;  %3030 = vst [vmem:[#allocation1 + $0x22] ss:$4 sm:$0xff] %v2783_v31  ;;  %v2679_v6 = vpop.f32.mrf.mxu0  ;;  %v8188_v16 = vld.sshfl [vmem:[#allocation1] sm:$0xff pattern:$0x73625140] }
 0x6ee   : > { %3032 = vst [vmem:[#allocation1 + $0x23] ss:$4 sm:$0xff] %v2784_v4  ;;  %v2680_v19 = vadd.f32 %v8171_v15, %v2679_v6  ;;  %v2440_v14 = vsel %vm2416_vm7, %v2415_v27, %v1798_v53 }
 0x6f0   : > { %v2735_v17 = vmax.f32 %v2680_v19, 0.0 }
 0x6f1   : > { %v2168_v13 = vpop.permute.xlu1 %2167 }
 0x6f2   : > { %v2785_v37 = vrot.slane %v2735_v17, 2  ;;  %3035 = vst [vmem:[#allocation1] ss:$4 sm:$0xff] %v2735_v17  ;;  %v2786_v56 = vrot.slane %v2735_v17, 4  ;;  %v2787_v23 = vrot.slane %v2735_v17, 6 }
 0x6f3   : > { %v1952_v43 = vpop.permute.xlu0 %1951 }
 0x6f4   : > { %v2465_v60 = vsel %vm2441_vm8, %v2440_v14, %v1952_v43 }
 0x6f5   : > { %v2490_v58 = vsel %vm10511_vm9, %v2465_v60, %v2168_v13  ;;  %v8192_v40 = vld.sshfl [vmem:[#allocation1 + $0x20] sm:$0xff pattern:$0x73625140]  ;;  %v2681_v41 = vpop.f32.mrf.mxu0 }
 0x6f6   : > { %v2515_v34 = vsel %vm10502_vm10, %v2490_v58, %v2315_v38  ;;  %3037 = vst [vmem:[#allocation1 + $0x20] ss:$4 sm:$0xff] %v2785_v37  ;;  %v2682_v36 = vadd.f32 %v8171_v15, %v2681_v41 }
 0x6f7   : > { %v2602_v29 = vshll.u32 %v2515_v34, 16  ;;  %3038 = vst [vmem:[#allocation1 + $0x21] ss:$4 sm:$0xff] %v2786_v56  ;;  %v2606_v33 = vshrl.u32 %v2515_v34, 16 }
 0x6f8   : > { %3039 = vst [vmem:[#allocation1 + $0x22] ss:$4 sm:$0xff] %v2787_v23  ;;  %v2736_v5 = vmax.f32 %v2682_v36, 0.0 }
 0x6f9   : > { %v2604_v28 = vrot.slane %v2602_v29, 1  ;;  %v8197_v7 = vld.sshfl [vmem:[#allocation1] sm:$0xff pattern:$0x73625140] }
 0x6fa   : > { %v2788_v3 = vrot.slane %v2736_v5, 2  ;;  %v2789_v18 = vrot.slane %v2736_v5, 4  ;;  %v2790_v24 = vrot.slane %v2736_v5, 6  ;;  %3040 = vst [vmem:[#allocation1 + $0x23] ss:$4 sm:$0xff] %v2736_v5 }
 0x6fb   : > { %v2605_v35 = vsel %vm10501_vm12, %v2601_v57, %v2604_v28  ;;  %v2608_v20 = vor.u32 %v2606_v33, %v2604_v28 }
 0x6fc   : > { %6093 = vmatmul.msk.bf16.gmra.mxu2 %vm10500_vm13, %v2605_v35  ;;  %3042 = vst [vmem:[#allocation1] ss:$4 sm:$0xff] %v2788_v3 }
 0x6fd   : > { %3043 = vst [vmem:[#allocation1 + $0x1] ss:$4 sm:$0xff] %v2789_v18  ;;  %v2684_v54 = vpop.f32.mrf.mxu0 }
 0x6fe   : > { %3044 = vst [vmem:[#allocation1 + $0x2] ss:$4 sm:$0xff] %v2790_v24  ;;  %v2685_v47 = vadd.f32 %v8171_v15, %v2684_v54 }
 0x700   : > { %v2737_v39 = vmax.f32 %v2685_v47, 0.0 }
 0x701   : > { %v8200_v63 = vld.sshfl [vmem:[#allocation1 + $0x20] sm:$0xff pattern:$0x73625140] }
 0x702   : > { %v2791_v55 = vrot.slane %v2737_v39, 2  ;;  %3045 = vst [vmem:[#allocation1 + $0x3] ss:$4 sm:$0xff] %v2737_v39  ;;  %v2792_v8 = vrot.slane %v2737_v39, 4  ;;  %v2793_v44 = vrot.slane %v2737_v39, 6 }
 0x704   : > { %3046 = vst [vmem:[#allocation1 + $0x20] ss:$4 sm:$0xff] %v2791_v55 }
 0x705   : > { %v2686_v51 = vpop.f32.mrf.mxu0 }
 0x706   : > { %v2687_v32 = vadd.f32 %v8171_v15, %v2686_v51 }
 0x708   : > { %v2738_v22 = vmax.f32 %v2687_v32, 0.0 }
 0x709   : > { %v8204_v42 = vld.sshfl [vmem:[#allocation1] sm:$0xff pattern:$0x73625140] }
 0x70a   : > { %3049 = vst [vmem:[#allocation1] ss:$4 sm:$0xff] %v2792_v8  ;;  %v2794_v52 = vrot.slane %v2738_v22, 2  ;;  %v2795_v12 = vrot.slane %v2738_v22, 4  ;;  %v2796_v10 = vrot.slane %v2738_v22, 6 }
 0x70b   : > { %v8206_v21 = vld.sshfl [vmem:[#allocation1 + $0x20] sm:$0xff pattern:$0x73625140]  ;;  %3050 = vst [vmem:[#allocation1 + $0x1] ss:$4 sm:$0xff] %v2793_v44 }
 0x70c   : > { %6094 = vmatmul.msk.bf16.gmra.mxu2 %vm10500_vm13, %v2608_v20  ;;  %3051 = vst [vmem:[#allocation1 + $0x2] ss:$4 sm:$0xff] %v2738_v22 }
 0x70d   : > { %3052 = vst [vmem:[#allocation1 + $0x3] ss:$4 sm:$0xff] %v2794_v52  ;;  %v2689_v9 = vpop.f32.mrf.mxu0 }
 0x70e   : > { %3053 = vst [vmem:[#allocation1 + $0x20] ss:$4 sm:$0xff] %v2795_v12  ;;  %v2690_v50 = vadd.f32 %v8171_v15, %v2689_v9 }
 0x70f   : > { %3054 = vst [vmem:[#allocation1 + $0x21] ss:$4 sm:$0xff] %v2796_v10 }
 0x710   : > { %v2739_v0 = vmax.f32 %v2690_v50, 0.0 }
 0x712   : > { %v2797_v46 = vrot.slane %v2739_v0, 2  ;;  %v2798_v1 = vrot.slane %v2739_v0, 4  ;;  %3055 = vst [vmem:[#allocation1 + $0x22] ss:$4 sm:$0xff] %v2739_v0  ;;  %v2799_v53 = vrot.slane %v2739_v0, 6 }
 0x714   : > { %v8209_v26 = vld.sshfl [vmem:[#allocation1] sm:$0xff pattern:$0x73625140]  ;;  %3056 = vst [vmem:[#allocation1 + $0x23] ss:$4 sm:$0xff] %v2797_v46 }
 0x715   : > { %3059 = vst [vmem:[#allocation1] ss:$4 sm:$0xff] %v2798_v1  ;;  %v2691_v62 = vpop.f32.mrf.mxu0 }
 0x716   : > { %v2692_v59 = vadd.f32 %v8171_v15, %v2691_v62 }
 0x718   : > { %v2740_v45 = vmax.f32 %v2692_v59, 0.0 }
 0x71a   : > { %v2800_v49 = vrot.slane %v2740_v45, 2  ;;  %v2801_v11 = vrot.slane %v2740_v45, 4  ;;  %v2802_v2 = vrot.slane %v2740_v45, 6 }
 0x71b   : > { %v8212_v25 = vld.sshfl [vmem:[#allocation1 + $0x20] sm:$0xff pattern:$0x73625140] }
 0x71c   : > { %3061 = vst [vmem:[#allocation1 + $0x20] ss:$4 sm:$0xff] %v2799_v53  ;;  %v8214_v30 = vld.sshfl [vmem:[#allocation1] sm:$0xff pattern:$0x73625140] }
 0x71d   : > { %3062 = vst [vmem:[#allocation1 + $0x21] ss:$4 sm:$0xff] %v2740_v45  ;;  %v2694_v48 = vpop.f32.mrf.mxu0 }
 0x71e   : > { %3063 = vst [vmem:[#allocation1 + $0x22] ss:$4 sm:$0xff] %v2800_v49  ;;  %v2695_v31 = vadd.f32 %v8171_v15, %v2694_v48 }
 0x71f   : > { %3064 = vst [vmem:[#allocation1 + $0x23] ss:$4 sm:$0xff] %v2801_v11 }
 0x720   : > { %3066 = vst [vmem:[#allocation1] ss:$4 sm:$0xff] %v2802_v2  ;;  %v2741_v4 = vmax.f32 %v2695_v31, 0.0 }
 0x722   : > { %v2803_v27 = vrot.slane %v2741_v4, 2  ;;  %v2804_v6 = vrot.slane %v2741_v4, 4  ;;  %3067 = vst [vmem:[#allocation1 + $0x1] ss:$4 sm:$0xff] %v2741_v4  ;;  %v2805_v19 = vrot.slane %v2741_v4, 6 }
 0x724   : > { %3068 = vst [vmem:[#allocation1 + $0x2] ss:$4 sm:$0xff] %v2803_v27 }
 0x725   : > { %3069 = vst [vmem:[#allocation1 + $0x3] ss:$4 sm:$0xff] %v2804_v6  ;;  %v2696_v13 = vpop.f32.mrf.mxu0 }
 0x726   : > { %v8217_v14 = vld.sshfl [vmem:[#allocation1 + $0x20] sm:$0xff pattern:$0x73625140]  ;;  %v2697_v43 = vadd.f32 %v8171_v15, %v2696_v13 }
 0x727   : > { %3070 = vst [vmem:[#allocation1 + $0x20] ss:$4 sm:$0xff] %v2805_v19 }
 0x728   : > { %v2742_v38 = vmax.f32 %v2697_v43, 0.0 }
 0x72a   : > { %v2806_v17 = vrot.slane %v2742_v38, 2  ;;  %v2807_v60 = vrot.slane %v2742_v38, 4  ;;  %v2808_v37 = vrot.slane %v2742_v38, 6 }
 0x72c   : > { %v8220_v58 = vld.sshfl [vmem:[#allocation1] sm:$0xff pattern:$0x73625140] }
 0x72d   : > { %3073 = vst [vmem:[#allocation1] ss:$4 sm:$0xff] %v2742_v38  ;;  %v2699_v34 = vpop.f32.mrf.mxu0 }
 0x72e   : > { %3074 = vst [vmem:[#allocation1 + $0x1] ss:$4 sm:$0xff] %v2806_v17  ;;  %v2700_v56 = vadd.f32 %v8171_v15, %v2699_v34  ;;  %v8223_v29 = vld.sshfl [vmem:[#allocation1 + $0x20] sm:$0xff pattern:$0x73625140] }
 0x72f   : > { %3075 = vst [vmem:[#allocation1 + $0x2] ss:$4 sm:$0xff] %v2807_v60 }
 0x730   : > { %3076 = vst [vmem:[#allocation1 + $0x3] ss:$4 sm:$0xff] %v2808_v37  ;;  %v2743_v61 = vmax.f32 %v2700_v56, 0.0 }
 0x732   : > { %v2809_v23 = vrot.slane %v2743_v61, 2  ;;  %v2810_v41 = vrot.slane %v2743_v61, 4  ;;  %v2811_v57 = vrot.slane %v2743_v61, 6  ;;  %3077 = vst [vmem:[#allocation1 + $0x20] ss:$4 sm:$0xff] %v2743_v61 }
 0x734   : > { %3078 = vst [vmem:[#allocation1 + $0x21] ss:$4 sm:$0xff] %v2809_v23 }
 0x735   : > { %3079 = vst [vmem:[#allocation1 + $0x22] ss:$4 sm:$0xff] %v2810_v41  ;;  %v2701_v28 = vpop.f32.mrf.mxu0 }
 0x736   : > { %3080 = vst [vmem:[#allocation1 + $0x23] ss:$4 sm:$0xff] %v2811_v57  ;;  %v2702_v36 = vadd.f32 %v8171_v15, %v2701_v28 }
 0x737   : > { %v8226_v5 = vld.sshfl [vmem:[#allocation1] sm:$0xff pattern:$0x73625140] }
 0x738   : > { %v2744_v35 = vmax.f32 %v2702_v36, 0.0 }
 0x73a   : > { %v2812_v18 = vrot.slane %v2744_v35, 2  ;;  %3083 = vst [vmem:[#allocation1] ss:$4 sm:$0xff] %v2744_v35  ;;  %v2813_v54 = vrot.slane %v2744_v35, 4  ;;  %v2814_v55 = vrot.slane %v2744_v35, 6 }
 0x73d   : > { %v2704_v3 = vpop.f32.mrf.mxu2  ;;  %v8229_v39 = vld.sshfl [vmem:[#allocation1 + $0x20] sm:$0xff pattern:$0x73625140] }
 0x73e   : > { %v2705_v24 = vadd.f32 %v8171_v15, %v2704_v3  ;;  %3085 = vst [vmem:[#allocation1 + $0x20] ss:$4 sm:$0xff] %v2812_v18 }
 0x73f   : > { %3086 = vst [vmem:[#allocation1 + $0x21] ss:$4 sm:$0xff] %v2813_v54 }
 0x740   : > { %v2745_v47 = vmax.f32 %v2705_v24, 0.0  ;;  %3087 = vst [vmem:[#allocation1 + $0x22] ss:$4 sm:$0xff] %v2814_v55 }
 0x741   : > { %v8231_v32 = vld.sshfl [vmem:[#allocation1] sm:$0xff pattern:$0x73625140] }
 0x742   : > { %3088 = vst [vmem:[#allocation1 + $0x23] ss:$4 sm:$0xff] %v2745_v47  ;;  %v2815_v33 = vrot.slane %v2745_v47, 2  ;;  %v2816_v51 = vrot.slane %v2745_v47, 4  ;;  %v2817_v20 = vrot.slane %v2745_v47, 6 }
 0x744   : > { %3090 = vst [vmem:[#allocation1] ss:$4 sm:$0xff] %v2815_v33 }
 0x745   : > { %v2706_v8 = vpop.f32.mrf.mxu2  ;;  %3091 = vst [vmem:[#allocation1 + $0x1] ss:$4 sm:$0xff] %v2816_v51 }
 0x746   : > { %v2707_v22 = vadd.f32 %v8171_v15, %v2706_v8  ;;  %3092 = vst [vmem:[#allocation1 + $0x2] ss:$4 sm:$0xff] %v2817_v20 }
 0x748   : > { %v2746_v44 = vmax.f32 %v2707_v22, 0.0 }
 0x749   : > { %v8234_v12 = vld.sshfl [vmem:[#allocation1 + $0x20] sm:$0xff pattern:$0x73625140] }
 0x74a   : > { %v2818_v52 = vrot.slane %v2746_v44, 2  ;;  %3093 = vst [vmem:[#allocation1 + $0x3] ss:$4 sm:$0xff] %v2746_v44  ;;  %v2819_v50 = vrot.slane %v2746_v44, 4  ;;  %v2820_v46 = vrot.slane %v2746_v44, 6 }
 0x74c   : > { %3094 = vst [vmem:[#allocation1 + $0x20] ss:$4 sm:$0xff] %v2818_v52 }
 0x74d   : > { %v2709_v10 = vpop.f32.mrf.mxu2 }
 0x74e   : > { %v2710_v9 = vadd.f32 %v8171_v15, %v2709_v10  ;;  %v2846_v10 = vlaneseq }
 0x750   : > { %v2747_v0 = vmax.f32 %v2710_v9, 0.0 }
 0x751   : > { %v8237_v1 = vld.sshfl [vmem:[#allocation1] sm:$0xff pattern:$0x73625140] }
 0x752   : > { %v2822_v62 = vrot.slane %v2747_v0, 4  ;;  %3097 = vst [vmem:[#allocation1] ss:$4 sm:$0xff] %v2819_v50  ;;  %v2823_v59 = vrot.slane %v2747_v0, 6  ;;  %v2821_v53 = vrot.slane %v2747_v0, 2 }
 0x753   : > { %v8239_v45 = vld.sshfl [vmem:[#allocation1 + $0x20] sm:$0xff pattern:$0x73625140]  ;;  %3098 = vst [vmem:[#allocation1 + $0x1] ss:$4 sm:$0xff] %v2820_v46 }
 0x754   : > { %3101 = vst [vmem:[#allocation1 + $0x20] ss:$4 sm:$0xff] %v2822_v62  ;;  %v8264_v62 = vshrl.u32 %v2846_v10, 7 }
 0x755   : > { %v2711_v49 = vpop.f32.mrf.mxu2  ;;  %3102 = vst [vmem:[#allocation1 + $0x21] ss:$4 sm:$0xff] %v2823_v59 }
 0x756   : > { %v2712_v11 = vadd.f32 %v8171_v15, %v2711_v49  ;;  %3099 = vst [vmem:[#allocation1 + $0x2] ss:$4 sm:$0xff] %v2747_v0  ;;  %v8262_v0 = vstv %s6096_s21  ;;  %vm2892_vm0 = vcmp.ge.s32.totalorder %v8264_v62, 1 }
 0x757   : > { %3100 = vst [vmem:[#allocation1 + $0x3] ss:$4 sm:$0xff] %v2821_v53  ;;  %vm2862_vm14 = vcmp.ge.s32.totalorder %v8262_v0, 0  ;;  %vm2872_vm15 = vcmp.lt.s32.totalorder %v8262_v0, 16 }
 0x758   : > { %v2748_v2 = vmax.f32 %v2712_v11, 0.0  ;;  %11140 = vst [vmem:[#allocation84_spill] sm:$0xff] %v8262_v0  ;;  %vm8270_vm2 = vmand %vm2862_vm14, %vm2872_vm15 }
 0x759   : > { %11141 = vst [vmem:[#allocation52_spill] sm:$0xff] %v8264_v62  ;;  %vm2895_vm13 = vmand %vm8270_vm2, %vm2892_vm0 }
 0x75a   : > { %v2824_v48 = vrot.slane %v2748_v2, 2  ;;  %3103 = vst [vmem:[#allocation1 + $0x22] ss:$4 sm:$0xff] %v2748_v2  ;;  %v2825_v31 = vrot.slane %v2748_v2, 4  ;;  %v2826_v13 = vrot.slane %v2748_v2, 6 }
 0x75c   : > { %3104 = vst [vmem:[#allocation1 + $0x23] ss:$4 sm:$0xff] %v2824_v48 }
 0x75d   : > { %v2714_v4 = vpop.f32.mrf.mxu2 }
 0x75e   : > { %v2715_v27 = vadd.f32 %v8171_v15, %v2714_v4  ;;  %v8243_v6 = vld.sshfl [vmem:[#allocation1] sm:$0xff pattern:$0x73625140] }
 0x75f   : > { %3107 = vst [vmem:[#allocation1] ss:$4 sm:$0xff] %v2825_v31 }
 0x760   : > { %v2749_v19 = vmax.f32 %v2715_v27, 0.0 }
 0x762   : > { %v2827_v38 = vrot.slane %v2749_v19, 2  ;;  %v2828_v17 = vrot.slane %v2749_v19, 4  ;;  %v2829_v37 = vrot.slane %v2749_v19, 6 }
 0x763   : > { %v8245_v43 = vld.sshfl [vmem:[#allocation1 + $0x20] sm:$0xff pattern:$0x73625140] }
 0x764   : > { %3109 = vst [vmem:[#allocation1 + $0x20] ss:$4 sm:$0xff] %v2826_v13 }
 0x765   : > { %3110 = vst [vmem:[#allocation1 + $0x21] ss:$4 sm:$0xff] %v2749_v19  ;;  %v2716_v60 = vpop.f32.mrf.mxu2  ;;  %v3176_v19 = vsel %vm8270_vm2, %v8192_v40, 0.0  ;;  %v2853_v40 = vadd.s32 1, %v8262_v0 }
 0x766   : > { %v8247_v34 = vld.sshfl [vmem:[#allocation1] sm:$0xff pattern:$0x73625140]  ;;  %3111 = vst [vmem:[#allocation1 + $0x22] ss:$4 sm:$0xff] %v2827_v38  ;;  %v2717_v56 = vadd.f32 %v8171_v15, %v2716_v60 }
 0x767   : > { %3112 = vst [vmem:[#allocation1 + $0x23] ss:$4 sm:$0xff] %v2828_v17  ;;  %v3175_v17 = vsel %vm2895_vm13, %v8188_v16, 0.0  ;;  %v8291_v16 = vadd.s32 16, %v8264_v62  ;;  %vm2863_vm13 = vcmp.ge.s32.totalorder %v2853_v40, 0  ;;  %vm2873_vm14 = vcmp.lt.s32.totalorder %v2853_v40, 16 }
 0x768   : > { %3114 = vst [vmem:[#allocation1] ss:$4 sm:$0xff] %v2829_v37  ;;  %v2750_v61 = vmax.f32 %v2717_v56, 0.0  ;;  %v3206_v37 = vpack.c.bf16 %v3176_v19, %v3176_v19  ;;  %vm8296_vm12 = vmand %vm2863_vm13, %vm2873_vm14  ;;  %v2855_v40 = vadd.s32 3, %v8262_v0 }
 0x769   : > { %11147 = vst [vmem:[#allocation15_spill] sm:$0xff] %v8291_v16  ;;  %vm2927_vm15 = vcmp.le.s32.totalorder %v8291_v16, 16  ;;  %vm2898_vm13 = vmand %vm8296_vm12, %vm2892_vm0 }
 0x76a   : > { %v2830_v23 = vrot.slane %v2750_v61, 2  ;;  %3115 = vst [vmem:[#allocation1 + $0x1] ss:$4 sm:$0xff] %v2750_v61  ;;  %v2831_v41 = vrot.slane %v2750_v61, 4  ;;  %v2832_v57 = vrot.slane %v2750_v61, 6  ;;  %vm2930_vm10 = vmand %vm8270_vm2, %vm2927_vm15  ;;  %v3178_v10 = vsel %vm2898_vm13, %v8200_v63, 0.0 }
 0x76b   : > { %v3208_v63 = vpack.c.bf16 %v3178_v10, %v3178_v10  ;;  %vm2933_vm13 = vmand %vm8296_vm12, %vm2927_vm15 }
 0x76c   : > { %3116 = vst [vmem:[#allocation1 + $0x2] ss:$4 sm:$0xff] %v2830_v23  ;;  %v3205_v23 = vpack.c.bf16 %v3175_v17, %v3175_v17 }
 0x76d   : > { %3117 = vst [vmem:[#allocation1 + $0x3] ss:$4 sm:$0xff] %v2831_v41  ;;  %v2719_v28 = vpop.f32.mrf.mxu2  ;;  %v3268_v48 = vunpack.c.l.b16 %v3208_v63 }
 0x76e   : > { %v8250_v36 = vld.sshfl [vmem:[#allocation1 + $0x20] sm:$0xff pattern:$0x73625140]  ;;  %v2720_v35 = vadd.f32 %v8171_v15, %v2719_v28 }
 0x76f   : > { %3118 = vst [vmem:[#allocation1 + $0x20] ss:$4 sm:$0xff] %v2832_v57  ;;  %v3266_v57 = vunpack.c.l.b16 %v3206_v37 }
 0x770   : > { %v2751_v3 = vmax.f32 %v2720_v35, 0.0 }
 0x772   : > { %v2833_v24 = vrot.slane %v2751_v3, 2  ;;  %v2834_v54 = vrot.slane %v2751_v3, 4  ;;  %v2835_v55 = vrot.slane %v2751_v3, 6 }
 0x774   : > { %v8253_v18 = vld.sshfl [vmem:[#allocation1] sm:$0xff pattern:$0x73625140] }
 0x775   : > { %3121 = vst [vmem:[#allocation1] ss:$4 sm:$0xff] %v2751_v3  ;;  %v2721_v47 = vpop.f32.mrf.mxu2  ;;  %v3265_v3 = vunpack.c.l.b16 %v3205_v23 }
 0x776   : > { %3122 = vst [vmem:[#allocation1 + $0x1] ss:$4 sm:$0xff] %v2833_v24  ;;  %v2722_v33 = vadd.f32 %v8171_v15, %v2721_v47  ;;  %v8256_v51 = vld.sshfl [vmem:[#allocation1 + $0x20] sm:$0xff pattern:$0x73625140] }
 0x777   : > { %3123 = vst [vmem:[#allocation1 + $0x2] ss:$4 sm:$0xff] %v2834_v54  ;;  %v8293_v24 = vpack.c.b16 %v3266_v57, %v3265_v3 }
 0x778   : > { %3124 = vst [vmem:[#allocation1 + $0x3] ss:$4 sm:$0xff] %v2835_v55  ;;  %v2752_v20 = vmax.f32 %v2722_v33, 0.0 }
 0x779   : > { %v8301_v47 = vrot.slane %v8293_v24, 3  ;;  %v8351_v19 = vrot.slane %v8293_v24, 7 }
 0x77a   : > { %v2836_v8 = vrot.slane %v2752_v20, 2  ;;  %3125 = vst [vmem:[#allocation1 + $0x20] ss:$4 sm:$0xff] %v2752_v20  ;;  %v2837_v22 = vrot.slane %v2752_v20, 4  ;;  %v2838_v44 = vrot.slane %v2752_v20, 6  ;;  %v3179_v20 = vsel %vm8296_vm12, %v8204_v42, 0.0 }
 0x77b   : > { %v3209_v42 = vpack.c.bf16 %v3179_v20, %v3179_v20  ;;  %vm2865_vm12 = vcmp.ge.s32.totalorder %v2855_v40, 0 }
 0x77c   : > { %3126 = vst [vmem:[#allocation1 + $0x21] ss:$4 sm:$0xff] %v2836_v8  ;;  %v8320_v8 = vrot.slane %v8293_v24, 1 }
 0x77d   : > { %3127 = vst [vmem:[#allocation1 + $0x22] ss:$4 sm:$0xff] %v2837_v22  ;;  %v11152_v22 = vmov 0  }
 0x77e   : > { %3128 = vst [vmem:[#allocation1 + $0x23] ss:$4 sm:$0xff] %v2838_v44  ;;  %v8324_v44 = vrot.slane %v8293_v24, 2 }
 0x77f   : > { %v2724_v52 = vpop.f32.mrf.mxu2  ;;  %v8260_v50 = vld.sshfl [vmem:[#allocation1] sm:$0xff pattern:$0x73625140] }
 0x780   : > { %v2725_v9 = vadd.f32 %v8171_v15, %v2724_v52  ;;  %11139 = vst [vmem:[#allocation32_spill] sm:$0xff] %v8260_v50  ;;  %v3177_v52 = vsel %vm2930_vm10, %v8197_v7, 0.0  ;;  %v2854_v7 = vadd.s32 2, %v8262_v0 }
 0x782   : > { %v2753_v46 = vmax.f32 %v2725_v9, 0.0  ;;  %v8330_v9 = vrot.slane %v8293_v24, 4  ;;  %vm2864_vm10 = vcmp.ge.s32.totalorder %v2854_v7, 0  ;;  %vm2874_vm2 = vcmp.lt.s32.totalorder %v2854_v7, 16 }
 0x783   : > { %vm8346_vm14 = vmand %vm2864_vm10, %vm2874_vm2  ;;  %vm2875_vm2 = vcmp.lt.s32.totalorder %v2855_v40, 16 }
 0x784   : > { %v2839_v59 = vrot.slane %v2753_v46, 2  ;;  %3131 = vst [vmem:[#allocation1] ss:$4 sm:$0xff] %v2753_v46  ;;  %v2840_v49 = vrot.slane %v2753_v46, 4  ;;  %v2841_v11 = vrot.slane %v2753_v46, 6  ;;  %v8334_v46 = vrot.slane %v8293_v24, 5  ;;  %vm2901_vm10 = vmand %vm8346_vm14, %vm2892_vm0 }
 0x785   : > { %v8268_v53 = vld.sshfl [vmem:[#allocation1 + $0x20] sm:$0xff pattern:$0x73625140]  ;;  %v3181_v23 = vsel %vm2901_vm10, %v8209_v26, 0.0  ;;  %vm2936_vm10 = vmand %vm8346_vm14, %vm2927_vm15 }
 0x786   : > { %11142 = vst [vmem:[#allocation10_spill] sm:$0xff] %v8268_v53  ;;  %v3211_v3 = vpack.c.bf16 %v3181_v23, %v3181_v23 }
 0x787   : > { %3133 = vst [vmem:[#allocation1 + $0x20] ss:$4 sm:$0xff] %v2839_v59  ;;  %v2726_v2 = vpop.f32.mrf.mxu2  ;;  %v8338_v59 = vrot.slane %v8293_v24, 6 }
 0x788   : > { %3134 = vst [vmem:[#allocation1 + $0x21] ss:$4 sm:$0xff] %v2840_v49  ;;  %v2727_v31 = vadd.f32 %v8171_v15, %v2726_v2  ;;  %v3207_v49 = vpack.c.bf16 %v3177_v52, %v3177_v52 }
 0x789   : > { %3135 = vst [vmem:[#allocation1 + $0x22] ss:$4 sm:$0xff] %v2841_v11  ;;  %v3269_v11 = vunpack.c.l.b16 %v3209_v42 }
 0x78a   : > { %v2754_v4 = vmax.f32 %v2727_v31, 0.0  ;;  %v3267_v2 = vunpack.c.l.b16 %v3207_v49 }
 0x78b   : > { %v8280_v27 = vld.sshfl [vmem:[#allocation1] sm:$0xff pattern:$0x73625140]  ;;  %v8344_v31 = vpack.c.b16 %v3269_v11, %v3268_v48  ;;  %v3183_v48 = vsel %vm2936_vm10, %v8214_v30, 0.0 }
 0x78c   : > { %11145 = vst [vmem:[#allocation11_spill] sm:$0xff] %v8280_v27  ;;  %v2842_v13 = vrot.slane %v2754_v4, 2  ;;  %v2843_v38 = vrot.slane %v2754_v4, 4  ;;  %v2844_v60 = vrot.slane %v2754_v4, 6  ;;  %v3213_v23 = vpack.c.bf16 %v3183_v48, %v3183_v48 }
 0x78d   : > { %3136 = vst [vmem:[#allocation1 + $0x23] ss:$4 sm:$0xff] %v2754_v4  ;;  %v8367_v17 = vrot.slane %v8344_v31, 1  ;;  %v8374_v37 = vrot.slane %v8344_v31, 2  ;;  %v8388_v57 = vrot.slane %v8344_v31, 5  ;;  %v8397_v20 = vrot.slane %v8344_v31, 6 }
 0x78e   : > { %3138 = vst [vmem:[#allocation1] ss:$4 sm:$0xff] %v2842_v13  ;;  %v8353_v13 = vpack.c.b16 %v3267_v2, %v3267_v2  ;;  %v8404_v10 = vrot.slane %v8344_v31, 7  ;;  %v3273_v30 = vunpack.c.l.b16 %v3213_v23 }
 0x78f   : > { %3139 = vst [vmem:[#allocation1 + $0x1] ss:$4 sm:$0xff] %v2843_v38  ;;  %v2729_v56 = vpop.f32.mrf.mxu2 }
 0x790   : > { %3140 = vst [vmem:[#allocation1 + $0x2] ss:$4 sm:$0xff] %v2844_v60  ;;  %v2730_v61 = vadd.f32 %v8171_v15, %v2729_v56  ;;  %v3182_v60 = vsel %vm8346_vm14, %v8212_v25, 0.0  ;;  %v8378_v56 = vrot.slane %v8344_v31, 3  ;;  %v8462_v48 = vpack.c.b16 %v3273_v30, %v3273_v30 }
 0x791   : > { %v3212_v25 = vpack.c.bf16 %v3182_v60, %v3182_v60  ;;  %v2857_v30 = vadd.s32 5, %v8262_v0 }
 0x792   : > { %v2755_v41 = vmax.f32 %v2730_v61, 0.0  ;;  %v3180_v61 = vsel %vm2933_vm13, %v8206_v21, 0.0  ;;  %vm8399_vm13 = vmand %vm2865_vm12, %vm2875_vm2 }
 0x793   : > { %v3272_v21 = vunpack.c.l.b16 %v3212_v25  ;;  %vm2904_vm12 = vmand %vm8399_vm13, %vm2892_vm0  ;;  %v3185_v63 = vsel %vm8399_vm13, %v8220_v58, 0.0 }
 0x794   : > { %v8287_v28 = vld.sshfl [vmem:[#allocation1 + $0x20] sm:$0xff pattern:$0x73625140]  ;;  %v2845_v35 = vrot.slane %v2755_v41, 2  ;;  %3141 = vst [vmem:[#allocation1 + $0x3] ss:$4 sm:$0xff] %v2755_v41  ;;  %v3215_v58 = vpack.c.bf16 %v3185_v63, %v3185_v63 }
 0x795   : > { %11146 = vst [vmem:[#allocation12_spill] sm:$0xff] %v8287_v28  ;;  %v8384_v41 = vrot.slane %v8344_v31, 4  ;;  %v3184_v4 = vsel %vm2904_vm12, %v8217_v14, 0.0  ;;  %vm2939_vm12 = vmand %vm8399_vm13, %vm2927_vm15  ;;  %vm2867_vm13 = vcmp.ge.s32.totalorder %v2857_v30, 0 }
 0x796   : > { %3142 = vst [vmem:[#allocation1 + $0x20] ss:$4 sm:$0xff] %v2845_v35  ;;  %v3210_v35 = vpack.c.bf16 %v3180_v61, %v3180_v61  ;;  %v2856_v61 = vadd.s32 4, %v8262_v0  ;;  %v3214_v25 = vpack.c.bf16 %v3184_v4, %v3184_v4  ;;  %v3275_v40 = vunpack.c.l.b16 %v3215_v58 }
 0x797   : > { %v2731_v54 = vpop.f32.mrf.mxu2  ;;  %v3186_v52 = vsel %vm2939_vm12, %v8223_v29, 0.0 }
 0x798   : > { %v3270_v26 = vunpack.c.l.b16 %v3210_v35  ;;  %v3271_v54 = vunpack.c.l.b16 %v3211_v3  ;;  %vm2866_vm14 = vcmp.ge.s32.totalorder %v2856_v61, 0  ;;  %vm2876_vm2 = vcmp.lt.s32.totalorder %v2856_v61, 16 }
 0x799   : > { %v3274_v35 = vunpack.c.l.b16 %v3214_v25  ;;  %vm8454_vm10 = vmand %vm2866_vm14, %vm2876_vm2  ;;  %vm2877_vm2 = vcmp.lt.s32.totalorder %v2857_v30, 16 }
 0x79a   : > { %v8394_v15 = vpack.c.b16 %v3272_v21, %v3271_v54  ;;  %v8408_v7 = vpack.c.b16 %v3270_v26, %v3270_v26  ;;  %vm2907_vm14 = vmand %vm8454_vm10, %vm2892_vm0  ;;  %v3188_v58 = vsel %vm8454_vm10, %v8229_v39, 0.0  ;;  %v3216_v39 = vpack.c.bf16 %v3186_v52, %v3186_v52 }
 0x79b   : > { %v8303_v55 = vld.sshfl [vmem:[#allocation1] sm:$0xff pattern:$0x73625140]  ;;  %v8447_v3 = vpack.c.b16 %v3275_v40, %v3274_v35  ;;  %v3187_v25 = vsel %vm2907_vm14, %v8226_v5, 0.0  ;;  %v3218_v40 = vpack.c.bf16 %v3188_v58, %v3188_v58  ;;  %vm8508_vm12 = vmand %vm2867_vm13, %vm2877_vm2 }
 0x79c   : > { %11150 = vst [vmem:[#allocation17_spill] sm:$0xff] %v8303_v55  ;;  %v8421_v49 = vrot.slane %v8394_v15, 1  ;;  %v8428_v11 = vrot.slane %v8394_v15, 2  ;;  %v8432_v2 = vrot.slane %v8394_v15, 3  ;;  %v8438_v60 = vrot.slane %v8394_v15, 4  ;;  %vm2942_vm14 = vmand %vm8454_vm10, %vm2927_vm15 }
 0x79d   : > { %3397 = vst [vmem:[#allocation1 + $0x4] ss:$9 sm:$0xff] %v8301_v47  ;;  %v8314_v33 = vld.sshfl [vmem:[#allocation1 + $0x20] sm:$0xff pattern:$0x73625140]  ;;  %v8445_v14 = vrot.slane %v8394_v15, 5  ;;  %v3217_v35 = vpack.c.bf16 %v3187_v25, %v3187_v25  ;;  %vm2910_vm13 = vmand %vm8508_vm12, %vm2892_vm0 }
 0x79e   : > { %11151 = vst [vmem:[#allocation14_spill] sm:$0xff] %v8314_v33  ;;  %v8450_v21 = vrot.slane %v8394_v15, 6  ;;  %v8459_v63 = vrot.slane %v8394_v15, 7  ;;  %v8475_v4 = vrot.slane %v8447_v3, 1  ;;  %v8482_v61 = vrot.slane %v8447_v3, 2 }
 0x79f   : > { %3385 = vst [vmem:[#allocation1] ss:$9 sm:$0xff] %v11152_v22  ;;  %v8487_v23 = vrot.slane %v8447_v3, 3  ;;  %v3278_v22 = vunpack.c.l.b16 %v3218_v40  ;;  %v3276_v33 = vunpack.c.l.b16 %v3216_v39  ;;  %v3277_v29 = vunpack.c.l.b16 %v3217_v35 }
 0x7a0   : > { %3388 = vst [vmem:[#allocation1 + $0x1] ss:$9 sm:$0xff] %v8293_v24  ;;  %v8495_v28 = vrot.slane %v8447_v3, 4  ;;  %v8498_v55 = vrot.slane %v8447_v3, 5  ;;  %v8505_v52 = vrot.slane %v8447_v3, 6  ;;  %v8513_v40 = vrot.slane %v8447_v3, 7 }
 0x7a1   : > { %3391 = vst [vmem:[#allocation1 + $0x2] ss:$9 sm:$0xff] %v8320_v8  ;;  %v8502_v58 = vpack.c.b16 %v3278_v22, %v3277_v29  ;;  %v8516_v39 = vpack.c.b16 %v3276_v33, %v3276_v33  ;;  %v3191_v33 = vsel %vm8508_vm12, %v8237_v1, 0.0  ;;  %v3189_v54 = vsel %vm2942_vm14, %v8231_v32, 0.0  ;;  %vm2945_vm14 = vmand %vm8508_vm12, %vm2927_vm15 }
 0x7a2   : > { %3394 = vst [vmem:[#allocation1 + $0x3] ss:$9 sm:$0xff] %v8324_v44  ;;  %v3190_v35 = vsel %vm2910_vm13, %v8234_v12, 0.0  ;;  %v3221_v29 = vpack.c.bf16 %v3191_v33, %v3191_v33 }
 0x7a3   : > { %3400 = vst [vmem:[#allocation1 + $0x5] ss:$9 sm:$0xff] %v8330_v9  ;;  %v8529_v22 = vrot.slane %v8502_v58, 1  ;;  %v8536_v30 = vrot.slane %v8502_v58, 2  ;;  %v8545_v1 = vrot.slane %v8502_v58, 3  ;;  %v8548_v53 = vrot.slane %v8502_v58, 4 }
 0x7a4   : > { %3403 = vst [vmem:[#allocation1 + $0x6] ss:$9 sm:$0xff] %v8334_v46  ;;  %v8553_v32 = vrot.slane %v8502_v58, 5  ;;  %v8559_v33 = vrot.slane %v8502_v58, 6 }
 0x7a5   : > { %3406 = vst [vmem:[#allocation1 + $0x7] ss:$9 sm:$0xff] %v8338_v59 }
 0x7a6   : > { %11159 = vst [vmem:[#allocation23_spill] sm:$0xff] %v8428_v11 }
 0x7a7   : > { %11160 = vst [vmem:[#allocation42_spill] sm:$0xff] %v8445_v14 }
 0x7a8   : > { %11161 = vst [vmem:[#allocation90_spill] sm:$0xff] %v8447_v3 }
 0x7a9   : > { %11165 = vst [vmem:[#allocation91_spill] sm:$0xff] %v8487_v23 }
 0x7aa   : > { %11166 = vst [vmem:[#allocation24_spill] sm:$0xff] %v8495_v28 }
 0x7ab   : > { %11170 = vst [vmem:[#allocation44_spill] sm:$0xff] %v8529_v22 }
 0x7ac   : > { %v8355_v38 = vld [vmem:[#allocation1] sm:$0xff]  ;;  %11171 = vst [vmem:[#allocation33_spill] sm:$0xff] %v8536_v30 }
 0x7ad   : > { %11155 = vst [vmem:[#allocation19_spill] sm:$0xff] %v8355_v38  ;;  %v3281_v38 = vunpack.c.l.b16 %v3221_v29 }
 0x7ae   : > { %3409 = vst [vmem:[#allocation1] ss:$9 sm:$0xff] %v8351_v19 }
 0x7af   : > { %3411 = vst [vmem:[#allocation1 + $0x1] ss:$9 sm:$0xff] %v8353_v13 }
 0x7b0   : > { %3413 = vst [vmem:[#allocation1 + $0x2] ss:$9 sm:$0xff] %v8344_v31 }
 0x7b1   : > { %3415 = vst [vmem:[#allocation1 + $0x3] ss:$9 sm:$0xff] %v8367_v17 }
 0x7b2   : > { %3417 = vst [vmem:[#allocation1 + $0x4] ss:$9 sm:$0xff] %v8374_v37 }
 0x7b3   : > { %3419 = vst [vmem:[#allocation1 + $0x5] ss:$9 sm:$0xff] %v8378_v56 }
 0x7b4   : > { %3421 = vst [vmem:[#allocation1 + $0x6] ss:$9 sm:$0xff] %v8384_v41 }
 0x7b5   : > { %3423 = vst [vmem:[#allocation1 + $0x7] ss:$9 sm:$0xff] %v8388_v57 }
 0x7b6   : > { %11172 = vst [vmem:[#allocation13_spill] sm:$0xff] %v8545_v1 }
 0x7b7   : > { %11173 = vst [vmem:[#allocation35_spill] sm:$0xff] %v8548_v53 }
 0x7b8   : > { %11175 = vst [vmem:[#allocation39_spill] sm:$0xff] %v8553_v32 }
 0x7b9   : > { %11177 = vst [vmem:[#allocation48_spill] sm:$0xff] %v8559_v33 }
 0x7bc   : > { %v8406_v42 = vld [vmem:[#allocation1] sm:$0xff] }
 0x7bd   : > { %11158 = vst [vmem:[#allocation22_spill] sm:$0xff] %v8406_v42  ;;  %v3220_v42 = vpack.c.bf16 %v3190_v35, %v3190_v35 }
 0x7be   : > { %3426 = vst [vmem:[#allocation1] ss:$9 sm:$0xff] %v8397_v20 }
 0x7bf   : > { %3428 = vst [vmem:[#allocation1 + $0x1] ss:$9 sm:$0xff] %v8404_v10  ;;  %v3280_v50 = vunpack.c.l.b16 %v3220_v42  ;;  %v8563_v42 = vrot.slane %v8502_v58, 7 }
 0x7c0   : > { %3430 = vst [vmem:[#allocation1 + $0x2] ss:$9 sm:$0xff] %v8408_v7 }
 0x7c1   : > { %3432 = vst [vmem:[#allocation1 + $0x3] ss:$9 sm:$0xff] %v8394_v15  ;;  %v8556_v12 = vpack.c.b16 %v3281_v38, %v3280_v50 }
 0x7c2   : > { %3434 = vst [vmem:[#allocation1 + $0x4] ss:$9 sm:$0xff] %v8421_v49 }
 0x7c3   : > { %3436 = vst [vmem:[#allocation1 + $0x5] ss:$9 sm:$0xff] %v8428_v11  ;;  %v8579_v38 = vrot.slane %v8556_v12, 1  ;;  %v8594_v29 = vrot.slane %v8556_v12, 2 }
 0x7c4   : > { %3438 = vst [vmem:[#allocation1 + $0x6] ss:$9 sm:$0xff] %v8432_v2 }
 0x7c5   : > { %3440 = vst [vmem:[#allocation1 + $0x7] ss:$9 sm:$0xff] %v8438_v60 }
 0x7c6   : > { %11176 = vst [vmem:[#allocation111_spill] sm:$0xff] %v8556_v12 }
 0x7c7   : > { %11178 = vst [vmem:[#allocation93_spill] sm:$0xff] %v8563_v42 }
 0x7c8   : > { %11182 = vst [vmem:[#allocation29_spill] sm:$0xff] %v8579_v38 }
 0x7c9   : > { %11183 = vst [vmem:[#allocation46_spill] sm:$0xff] %v8594_v29 }
 0x7cc   : > { %v8452_v26 = vld [vmem:[#allocation1] sm:$0xff] }
 0x7cd   : > { %11162 = vst [vmem:[#allocation27_spill] sm:$0xff] %v8452_v26  ;;  %v2858_v26 = vadd.s32 6, %v8262_v0 }
 0x7ce   : > { %3443 = vst [vmem:[#allocation1] ss:$9 sm:$0xff] %v8445_v14 }
 0x7cf   : > { %3445 = vst [vmem:[#allocation1 + $0x1] ss:$9 sm:$0xff] %v8450_v21  ;;  %vm2868_vm10 = vcmp.ge.s32.totalorder %v2858_v26, 0  ;;  %vm2878_vm2 = vcmp.lt.s32.totalorder %v2858_v26, 16 }
 0x7d0   : > { %3447 = vst [vmem:[#allocation1 + $0x2] ss:$9 sm:$0xff] %v8459_v63  ;;  %vm8574_vm13 = vmand %vm2868_vm10, %vm2878_vm2 }
 0x7d1   : > { %3449 = vst [vmem:[#allocation1 + $0x3] ss:$9 sm:$0xff] %v8462_v48  ;;  %vm2913_vm12 = vmand %vm8574_vm13, %vm2892_vm0  ;;  %v3194_v26 = vsel %vm8574_vm13, %v8245_v43, 0.0 }
 0x7d2   : > { %3451 = vst [vmem:[#allocation1 + $0x4] ss:$9 sm:$0xff] %v8447_v3  ;;  %v3193_v25 = vsel %vm2913_vm12, %v8243_v6, 0.0  ;;  %v3224_v35 = vpack.c.bf16 %v3194_v26, %v3194_v26  ;;  %v8606_v6 = vrot.slane %v8556_v12, 5  ;;  %v2859_v26 = vadd.s32 7, %v8262_v0  ;;  %vm2948_vm10 = vmand %vm8574_vm13, %vm2927_vm15 }
 0x7d3   : > { %3453 = vst [vmem:[#allocation1 + $0x5] ss:$9 sm:$0xff] %v8475_v4 }
 0x7d4   : > { %3455 = vst [vmem:[#allocation1 + $0x6] ss:$9 sm:$0xff] %v8482_v61  ;;  %v3284_v43 = vunpack.c.l.b16 %v3224_v35  ;;  %vm2869_vm2 = vcmp.ge.s32.totalorder %v2859_v26, 0 }
 0x7d5   : > { %3457 = vst [vmem:[#allocation1 + $0x7] ss:$9 sm:$0xff] %v8487_v23 }
 0x7d6   : > { %11187 = vst [vmem:[#allocation92_spill] sm:$0xff] %v8606_v6 }
 0x7dc   : > { %v8500_v5 = vld [vmem:[#allocation1] sm:$0xff] }
 0x7dd   : > { %11167 = vst [vmem:[#allocation89_spill] sm:$0xff] %v8500_v5  ;;  %v3219_v5 = vpack.c.bf16 %v3189_v54, %v3189_v54 }
 0x7de   : > { %3460 = vst [vmem:[#allocation1] ss:$9 sm:$0xff] %v8495_v28 }
 0x7df   : > { %3462 = vst [vmem:[#allocation1 + $0x1] ss:$9 sm:$0xff] %v8498_v55  ;;  %v3279_v27 = vunpack.c.l.b16 %v3219_v5 }
 0x7e0   : > { %3464 = vst [vmem:[#allocation1 + $0x2] ss:$9 sm:$0xff] %v8505_v52 }
 0x7e1   : > { %3466 = vst [vmem:[#allocation1 + $0x3] ss:$9 sm:$0xff] %v8513_v40  ;;  %v8566_v5 = vpack.c.b16 %v3279_v27, %v3279_v27  ;;  %v3192_v27 = vsel %vm2945_vm14, %v8239_v45, 0.0  ;;  %v8602_v45 = vrot.slane %v8556_v12, 4  ;;  %vm2879_vm14 = vcmp.lt.s32.totalorder %v2859_v26, 16 }
 0x7e2   : > { %3468 = vst [vmem:[#allocation1 + $0x4] ss:$9 sm:$0xff] %v8516_v39  ;;  %v3222_v54 = vpack.c.bf16 %v3192_v27, %v3192_v27  ;;  %v8610_v27 = vrot.slane %v8556_v12, 6  ;;  %vm8631_vm12 = vmand %vm2869_vm2, %vm2879_vm14 }
 0x7e3   : > { %3470 = vst [vmem:[#allocation1 + $0x5] ss:$9 sm:$0xff] %v8502_v58  ;;  %vm2916_vm9 = vmand %vm8631_vm12, %vm2892_vm0  ;;  %v3197_v26 = vsel %vm8631_vm12, %v8253_v18, 0.0 }
 0x7e4   : > { %3472 = vst [vmem:[#allocation1 + $0x6] ss:$9 sm:$0xff] %v8529_v22 }
 0x7e5   : > { %3474 = vst [vmem:[#allocation1 + $0x7] ss:$9 sm:$0xff] %v8536_v30 }
 0x7e6   : > { %11179 = vst [vmem:[#allocation45_spill] sm:$0xff] %v8566_v5 }
 0x7e7   : > { %11186 = vst [vmem:[#allocation108_spill] sm:$0xff] %v8602_v45 }
 0x7ec   : > { %v8550_v22 = vld [vmem:[#allocation1] sm:$0xff] }
 0x7ed   : > { %11174 = vst [vmem:[#allocation37_spill] sm:$0xff] %v8550_v22  ;;  %v3223_v22 = vpack.c.bf16 %v3193_v25, %v3193_v25 }
 0x7ee   : > { %3477 = vst [vmem:[#allocation1] ss:$9 sm:$0xff] %v8545_v1 }
 0x7ef   : > { %3479 = vst [vmem:[#allocation1 + $0x1] ss:$9 sm:$0xff] %v8548_v53  ;;  %v3283_v25 = vunpack.c.l.b16 %v3223_v22  ;;  %v3195_v22 = vsel %vm2948_vm10, %v8247_v34, 0.0 }
 0x7f0   : > { %3481 = vst [vmem:[#allocation1 + $0x2] ss:$9 sm:$0xff] %v8553_v32 }
 0x7f1   : > { %3483 = vst [vmem:[#allocation1 + $0x3] ss:$9 sm:$0xff] %v8559_v33  ;;  %v8621_v35 = vpack.c.b16 %v3284_v43, %v3283_v25  ;;  %v3225_v43 = vpack.c.bf16 %v3195_v22, %v3195_v22  ;;  %v3196_v22 = vsel %vm2916_vm9, %v8250_v36, 0.0  ;;  %vm2951_vm9 = vmand %vm8631_vm12, %vm2927_vm15 }
 0x7f2   : > { %3485 = vst [vmem:[#allocation1 + $0x4] ss:$9 sm:$0xff] %v8563_v42  ;;  %v3282_v42 = vunpack.c.l.b16 %v3222_v54  ;;  %v8615_v54 = vrot.slane %v8556_v12, 7 }
 0x7f3   : > { %3487 = vst [vmem:[#allocation1 + $0x5] ss:$9 sm:$0xff] %v8566_v5  ;;  %v8640_v50 = vrot.slane %v8621_v35, 1  ;;  %v8646_v25 = vrot.slane %v8621_v35, 2  ;;  %v8651_v0 = vrot.slane %v8621_v35, 3  ;;  %v3285_v62 = vunpack.c.l.b16 %v3225_v43 }
 0x7f4   : > { %3489 = vst [vmem:[#allocation1 + $0x6] ss:$9 sm:$0xff] %v8556_v12  ;;  %v8660_v18 = vrot.slane %v8621_v35, 5  ;;  %v8668_v36 = vrot.slane %v8621_v35, 7 }
 0x7f5   : > { %3491 = vst [vmem:[#allocation1 + $0x7] ss:$9 sm:$0xff] %v8579_v38  ;;  %v8597_v38 = vrot.slane %v8556_v12, 3  ;;  %v8671_v43 = vpack.c.b16 %v3285_v62, %v3285_v62 }
 0x7f6   : > { %11188 = vst [vmem:[#allocation53_spill] sm:$0xff] %v8615_v54 }
 0x7f7   : > { %11184 = vst [vmem:[#allocation41_spill] sm:$0xff] %v8597_v38 }
 0x7f8   : > { %11190 = vst [vmem:[#allocation54_spill] sm:$0xff] %v8621_v35 }
 0x7f9   : > { %11193 = vst [vmem:[#allocation55_spill] sm:$0xff] %v8640_v50 }
 0x7fa   : > { %11194 = vst [vmem:[#allocation56_spill] sm:$0xff] %v8646_v25 }
 0x7fb   : > { %11196 = vst [vmem:[#allocation58_spill] sm:$0xff] %v8651_v0 }
 0x7fc   : > { %v8599_v5 = vld [vmem:[#allocation1] sm:$0xff]  ;;  %11198 = vst [vmem:[#allocation59_spill] sm:$0xff] %v8660_v18 }
 0x7fd   : > { %11185 = vst [vmem:[#allocation6_spill] sm:$0xff] %v8599_v5  ;;  %v8618_v5 = vpack.c.b16 %v3282_v42, %v3282_v42 }
 0x7fe   : > { %3494 = vst [vmem:[#allocation1] ss:$9 sm:$0xff] %v8594_v29 }
 0x7ff   : > { %3496 = vst [vmem:[#allocation1 + $0x1] ss:$9 sm:$0xff] %v8597_v38 }
 0x800   : > { %3498 = vst [vmem:[#allocation1 + $0x2] ss:$9 sm:$0xff] %v8602_v45 }
 0x801   : > { %3500 = vst [vmem:[#allocation1 + $0x3] ss:$9 sm:$0xff] %v8606_v6 }
 0x802   : > { %11189 = vst [vmem:[#allocation18_spill] sm:$0xff] %v8618_v5 }
 0x803   : > { %3502 = vst [vmem:[#allocation1 + $0x4] ss:$9 sm:$0xff] %v8610_v27 }
 0x804   : > { %3504 = vst [vmem:[#allocation1 + $0x5] ss:$9 sm:$0xff] %v8615_v54  ;;  %v3227_v54 = vpack.c.bf16 %v3197_v26, %v3197_v26 }
 0x805   : > { %3506 = vst [vmem:[#allocation1 + $0x6] ss:$9 sm:$0xff] %v8618_v5  ;;  %v8656_v5 = vrot.slane %v8621_v35, 4 }
 0x806   : > { %3508 = vst [vmem:[#allocation1 + $0x7] ss:$9 sm:$0xff] %v8621_v35  ;;  %v3287_v26 = vunpack.c.l.b16 %v3227_v54 }
 0x807   : > { %11197 = vst [vmem:[#allocation47_spill] sm:$0xff] %v8656_v5 }
 0x808   : > { %11200 = vst [vmem:[#allocation62_spill] sm:$0xff] %v8668_v36 }
 0x809   : > { %11201 = vst [vmem:[#allocation63_spill] sm:$0xff] %v8671_v43 }
 0x80d   : > { %v8648_v34 = vld [vmem:[#allocation1] sm:$0xff] }
 0x80e   : > { %11195 = vst [vmem:[#allocation57_spill] sm:$0xff] %v8648_v34  ;;  %v8664_v34 = vrot.slane %v8621_v35, 6 }
 0x80f   : > { %3511 = vst [vmem:[#allocation1] ss:$9 sm:$0xff] %v8640_v50  ;;  %v3226_v50 = vpack.c.bf16 %v3196_v22, %v3196_v22 }
 0x810   : > { %3513 = vst [vmem:[#allocation1 + $0x1] ss:$9 sm:$0xff] %v8646_v25 }
 0x811   : > { %3515 = vst [vmem:[#allocation1 + $0x2] ss:$9 sm:$0xff] %v8651_v0  ;;  %v3286_v0 = vunpack.c.l.b16 %v3226_v50 }
 0x812   : > { %11199 = vst [vmem:[#allocation60_spill] sm:$0xff] %v8664_v34 }
 0x813   : > { %3517 = vst [vmem:[#allocation1 + $0x3] ss:$9 sm:$0xff] %v8656_v5  ;;  %v8676_v25 = vpack.c.b16 %v3287_v26, %v3286_v0  ;;  %v3198_v0 = vsel %vm2951_vm9, %v8256_v51, 0.0 }
 0x814   : > { %3519 = vst [vmem:[#allocation1 + $0x4] ss:$9 sm:$0xff] %v8660_v18 }
 0x815   : > { %3521 = vst [vmem:[#allocation1 + $0x5] ss:$9 sm:$0xff] %v8664_v34  ;;  %v8683_v22 = vrot.slane %v8676_v25, 1  ;;  %v8688_v34 = vrot.slane %v8676_v25, 2  ;;  %v8692_v54 = vrot.slane %v8676_v25, 3  ;;  %v8697_v42 = vrot.slane %v8676_v25, 4 }
 0x816   : > { %3523 = vst [vmem:[#allocation1 + $0x6] ss:$9 sm:$0xff] %v8668_v36  ;;  %v8701_v50 = vrot.slane %v8676_v25, 5  ;;  %v8705_v26 = vrot.slane %v8676_v25, 6  ;;  %v8709_v16 = vrot.slane %v8676_v25, 7 }
 0x817   : > { %3525 = vst [vmem:[#allocation1 + $0x7] ss:$9 sm:$0xff] %v8671_v43 }
 0x818   : > { %11202 = vst [vmem:[#allocation64_spill] sm:$0xff] %v8676_v25 }
 0x819   : > { %11203 = vst [vmem:[#allocation65_spill] sm:$0xff] %v8683_v22 }
 0x81a   : > { %11205 = vst [vmem:[#allocation66_spill] sm:$0xff] %v8688_v34 }
 0x81b   : > { %11206 = vst [vmem:[#allocation68_spill] sm:$0xff] %v8692_v54 }
 0x81c   : > { %11207 = vst [vmem:[#allocation5_spill] sm:$0xff] %v8697_v42 }
 0x81d   : > { %11208 = vst [vmem:[#allocation69_spill] sm:$0xff] %v8701_v50 }
 0x81e   : > { %v8685_v62 = vld [vmem:[#allocation1] sm:$0xff]  ;;  %11209 = vst [vmem:[#allocation71_spill] sm:$0xff] %v8705_v26 }
 0x81f   : > { %11204 = vst [vmem:[#allocation67_spill] sm:$0xff] %v8685_v62  ;;  %v3228_v62 = vpack.c.bf16 %v3198_v0, %v3198_v0 }
 0x820   : > { %3528 = vst [vmem:[#allocation1] ss:$9 sm:$0xff] %v8676_v25 }
 0x821   : > { %3530 = vst [vmem:[#allocation1 + $0x1] ss:$9 sm:$0xff] %v8683_v22  ;;  %v3288_v51 = vunpack.c.l.b16 %v3228_v62 }
 0x822   : > { %3532 = vst [vmem:[#allocation1 + $0x2] ss:$9 sm:$0xff] %v8688_v34 }
 0x823   : > { %3534 = vst [vmem:[#allocation1 + $0x3] ss:$9 sm:$0xff] %v8692_v54  ;;  %v8714_v34 = vpack.c.b16 %v3288_v51, %v3288_v51 }
 0x824   : > { %3536 = vst [vmem:[#allocation1 + $0x4] ss:$9 sm:$0xff] %v8697_v42 }
 0x825   : > { %11210 = vst [vmem:[#allocation73_spill] sm:$0xff] %v8709_v16 }
 0x826   : > { %3538 = vst [vmem:[#allocation1 + $0x5] ss:$9 sm:$0xff] %v8701_v50 }
 0x827   : > { %3540 = vst [vmem:[#allocation1 + $0x6] ss:$9 sm:$0xff] %v8705_v26 }
 0x828   : > { %3542 = vst [vmem:[#allocation1 + $0x7] ss:$9 sm:$0xff] %v8709_v16 }
 0x829   : > { %11211 = vst [vmem:[#allocation25_spill] sm:$0xff] %v8714_v34 }
 0x82f   : > { %v8716_v22 = vld [vmem:[#allocation1] sm:$0xff] }
 0x830   : > { %11212 = vst [vmem:[#allocation76_spill] sm:$0xff] %v8716_v22  ;;  %v11218_v22 = vld [vmem:[#allocation44_spill] sm:$0xff] }
 0x831   : > { %3545 = vst [vmem:[#allocation1] ss:$9 sm:$0xff] %v8714_v34 }
 0x838   : > { %v8719_v54 = vld [vmem:[#allocation1] sm:$0xff] }
 0x839   : > { %11213 = vst [vmem:[#allocation94_spill] sm:$0xff] %v8719_v54 }
 0x83a   : > { %3547 = vst [vmem:[#allocation1] ss:$9 sm:$0xff] %v8293_v24 }
 0x83b   : > { %3549 = vst [vmem:[#allocation1 + $0x1] ss:$9 sm:$0xff] %v8320_v8 }
 0x83c   : > { %3551 = vst [vmem:[#allocation1 + $0x2] ss:$9 sm:$0xff] %v8324_v44 }
 0x83d   : > { %3553 = vst [vmem:[#allocation1 + $0x3] ss:$9 sm:$0xff] %v8301_v47 }
 0x83e   : > { %3555 = vst [vmem:[#allocation1 + $0x4] ss:$9 sm:$0xff] %v8330_v9 }
 0x83f   : > { %3557 = vst [vmem:[#allocation1 + $0x5] ss:$9 sm:$0xff] %v8334_v46 }
 0x840   : > { %3559 = vst [vmem:[#allocation1 + $0x6] ss:$9 sm:$0xff] %v8338_v59 }
 0x841   : > { %3561 = vst [vmem:[#allocation1 + $0x7] ss:$9 sm:$0xff] %v8351_v19 }
 0x848   : > { %v8729_v62 = vld [vmem:[#allocation1] sm:$0xff] }
 0x849   : > { %11214 = vst [vmem:[#allocation98_spill] sm:$0xff] %v8729_v62  ;;  %v11222_v62 = vld [vmem:[#allocation29_spill] sm:$0xff] }
 0x84a   : > { %3563 = vst [vmem:[#allocation1] ss:$9 sm:$0xff] %v8353_v13 }
 0x84b   : > { %3564 = vst [vmem:[#allocation1 + $0x1] ss:$9 sm:$0xff] %v8344_v31 }
 0x84c   : > { %3565 = vst [vmem:[#allocation1 + $0x2] ss:$9 sm:$0xff] %v8367_v17 }
 0x84d   : > { %3566 = vst [vmem:[#allocation1 + $0x3] ss:$9 sm:$0xff] %v8374_v37 }
 0x84e   : > { %3567 = vst [vmem:[#allocation1 + $0x4] ss:$9 sm:$0xff] %v8378_v56 }
 0x84f   : > { %3568 = vst [vmem:[#allocation1 + $0x5] ss:$9 sm:$0xff] %v8384_v41 }
 0x850   : > { %3569 = vst [vmem:[#allocation1 + $0x6] ss:$9 sm:$0xff] %v8388_v57 }
 0x851   : > { %3570 = vst [vmem:[#allocation1 + $0x7] ss:$9 sm:$0xff] %v8397_v20 }
 0x858   : > { %v8739_v0 = vld [vmem:[#allocation1] sm:$0xff] }
 0x859   : > { %11215 = vst [vmem:[#allocation106_spill] sm:$0xff] %v8739_v0  ;;  %v11221_v0 = vld [vmem:[#allocation45_spill] sm:$0xff] }
 0x85a   : > { %3572 = vst [vmem:[#allocation1] ss:$9 sm:$0xff] %v8404_v10 }
 0x85b   : > { %3573 = vst [vmem:[#allocation1 + $0x1] ss:$9 sm:$0xff] %v8408_v7 }
 0x85c   : > { %3574 = vst [vmem:[#allocation1 + $0x2] ss:$9 sm:$0xff] %v8394_v15 }
 0x85d   : > { %3575 = vst [vmem:[#allocation1 + $0x3] ss:$9 sm:$0xff] %v8421_v49 }
 0x85e   : > { %3576 = vst [vmem:[#allocation1 + $0x4] ss:$9 sm:$0xff] %v8428_v11 }
 0x85f   : > { %3577 = vst [vmem:[#allocation1 + $0x5] ss:$9 sm:$0xff] %v8432_v2 }
 0x860   : > { %3578 = vst [vmem:[#allocation1 + $0x6] ss:$9 sm:$0xff] %v8438_v60 }
 0x861   : > { %3579 = vst [vmem:[#allocation1 + $0x7] ss:$9 sm:$0xff] %v8445_v14 }
 0x868   : > { %v8749_v51 = vld [vmem:[#allocation1] sm:$0xff] }
 0x869   : > { %11216 = vst [vmem:[#allocation30_spill] sm:$0xff] %v8749_v51 }
 0x86a   : > { %3581 = vst [vmem:[#allocation1] ss:$9 sm:$0xff] %v8450_v21 }
 0x86b   : > { %3582 = vst [vmem:[#allocation1 + $0x1] ss:$9 sm:$0xff] %v8459_v63 }
 0x86c   : > { %3583 = vst [vmem:[#allocation1 + $0x2] ss:$9 sm:$0xff] %v8462_v48 }
 0x86d   : > { %3584 = vst [vmem:[#allocation1 + $0x3] ss:$9 sm:$0xff] %v8447_v3 }
 0x86e   : > { %3585 = vst [vmem:[#allocation1 + $0x4] ss:$9 sm:$0xff] %v8475_v4 }
 0x86f   : > { %3586 = vst [vmem:[#allocation1 + $0x5] ss:$9 sm:$0xff] %v8482_v61 }
 0x870   : > { %3587 = vst [vmem:[#allocation1 + $0x6] ss:$9 sm:$0xff] %v8487_v23 }
 0x871   : > { %3588 = vst [vmem:[#allocation1 + $0x7] ss:$9 sm:$0xff] %v8495_v28 }
 0x878   : > { %v8759_v54 = vld [vmem:[#allocation1] sm:$0xff] }
 0x879   : > { %11217 = vst [vmem:[#allocation7_spill] sm:$0xff] %v8759_v54  ;;  %v11220_v54 = vld [vmem:[#allocation93_spill] sm:$0xff] }
 0x87a   : > { %3590 = vst [vmem:[#allocation1] ss:$9 sm:$0xff] %v8498_v55 }
 0x87b   : > { %3591 = vst [vmem:[#allocation1 + $0x1] ss:$9 sm:$0xff] %v8505_v52 }
 0x87c   : > { %3592 = vst [vmem:[#allocation1 + $0x2] ss:$9 sm:$0xff] %v8513_v40 }
 0x87d   : > { %3593 = vst [vmem:[#allocation1 + $0x3] ss:$9 sm:$0xff] %v8516_v39 }
 0x87e   : > { %3594 = vst [vmem:[#allocation1 + $0x4] ss:$9 sm:$0xff] %v8502_v58 }
 0x87f   : > { %3595 = vst [vmem:[#allocation1 + $0x5] ss:$9 sm:$0xff] %v11218_v22 }
 0x880   : > { %3596 = vst [vmem:[#allocation1 + $0x6] ss:$9 sm:$0xff] %v8536_v30 }
 0x881   : > { %3597 = vst [vmem:[#allocation1 + $0x7] ss:$9 sm:$0xff] %v8545_v1 }
 0x888   : > { %v8769_v51 = vld [vmem:[#allocation1] sm:$0xff] }
 0x889   : > { %11219 = vst [vmem:[#allocation109_spill] sm:$0xff] %v8769_v51  ;;  %v11224_v51 = vld [vmem:[#allocation53_spill] sm:$0xff] }
 0x88a   : > { %3599 = vst [vmem:[#allocation1] ss:$9 sm:$0xff] %v8548_v53 }
 0x88b   : > { %3600 = vst [vmem:[#allocation1 + $0x1] ss:$9 sm:$0xff] %v8553_v32 }
 0x88c   : > { %3601 = vst [vmem:[#allocation1 + $0x2] ss:$9 sm:$0xff] %v8559_v33 }
 0x88d   : > { %3602 = vst [vmem:[#allocation1 + $0x3] ss:$9 sm:$0xff] %v11220_v54  ;;  %v11225_v54 = vld [vmem:[#allocation18_spill] sm:$0xff] }
 0x88e   : > { %3603 = vst [vmem:[#allocation1 + $0x4] ss:$9 sm:$0xff] %v11221_v0 }
 0x88f   : > { %3604 = vst [vmem:[#allocation1 + $0x5] ss:$9 sm:$0xff] %v8556_v12  ;;  %v11226_v12 = vld [vmem:[#allocation55_spill] sm:$0xff] }
 0x890   : > { %3605 = vst [vmem:[#allocation1 + $0x6] ss:$9 sm:$0xff] %v11222_v62 }
 0x891   : > { %3606 = vst [vmem:[#allocation1 + $0x7] ss:$9 sm:$0xff] %v8594_v29  ;;  %v11228_v29 = vld [vmem:[#allocation56_spill] sm:$0xff] }
 0x898   : > { %v8779_v30 = vld [vmem:[#allocation1] sm:$0xff] }
 0x899   : > { %11223 = vst [vmem:[#allocation80_spill] sm:$0xff] %v8779_v30  ;;  %v11229_v30 = vld [vmem:[#allocation58_spill] sm:$0xff] }
 0x89a   : > { %3608 = vst [vmem:[#allocation1] ss:$9 sm:$0xff] %v8597_v38 }
 0x89b   : > { %3609 = vst [vmem:[#allocation1 + $0x1] ss:$9 sm:$0xff] %v8602_v45 }
 0x89c   : > { %3610 = vst [vmem:[#allocation1 + $0x2] ss:$9 sm:$0xff] %v8606_v6  ;;  %v11230_v6 = vld [vmem:[#allocation60_spill] sm:$0xff] }
 0x89d   : > { %3611 = vst [vmem:[#allocation1 + $0x3] ss:$9 sm:$0xff] %v8610_v27 }
 0x89e   : > { %3612 = vst [vmem:[#allocation1 + $0x4] ss:$9 sm:$0xff] %v11224_v51 }
 0x89f   : > { %3613 = vst [vmem:[#allocation1 + $0x5] ss:$9 sm:$0xff] %v11225_v54 }
 0x8a0   : > { %3614 = vst [vmem:[#allocation1 + $0x6] ss:$9 sm:$0xff] %v8621_v35 }
 0x8a1   : > { %3615 = vst [vmem:[#allocation1 + $0x7] ss:$9 sm:$0xff] %v11226_v12  ;;  %v11232_v12 = vld [vmem:[#allocation65_spill] sm:$0xff] }
 0x8a8   : > { %v8789_v62 = vld [vmem:[#allocation1] sm:$0xff] }
 0x8a9   : > { %11227 = vst [vmem:[#allocation36_spill] sm:$0xff] %v8789_v62  ;;  %v11233_v62 = vld [vmem:[#allocation66_spill] sm:$0xff] }
 0x8aa   : > { %3617 = vst [vmem:[#allocation1] ss:$9 sm:$0xff] %v11228_v29  ;;  %v11234_v29 = vld [vmem:[#allocation68_spill] sm:$0xff] }
 0x8ab   : > { %3618 = vst [vmem:[#allocation1 + $0x1] ss:$9 sm:$0xff] %v11229_v30 }
 0x8ac   : > { %3619 = vst [vmem:[#allocation1 + $0x2] ss:$9 sm:$0xff] %v8656_v5 }
 0x8ad   : > { %3620 = vst [vmem:[#allocation1 + $0x3] ss:$9 sm:$0xff] %v8660_v18 }
 0x8ae   : > { %3621 = vst [vmem:[#allocation1 + $0x4] ss:$9 sm:$0xff] %v11230_v6 }
 0x8af   : > { %3622 = vst [vmem:[#allocation1 + $0x5] ss:$9 sm:$0xff] %v8668_v36 }
 0x8b0   : > { %3623 = vst [vmem:[#allocation1 + $0x6] ss:$9 sm:$0xff] %v8671_v43 }
 0x8b1   : > { %3624 = vst [vmem:[#allocation1 + $0x7] ss:$9 sm:$0xff] %v8676_v25 }
 0x8b8   : > { %v8799_v35 = vld [vmem:[#allocation1] sm:$0xff] }
 0x8b9   : > { %11231 = vst [vmem:[#allocation4_spill] sm:$0xff] %v8799_v35 }
 0x8ba   : > { %3626 = vst [vmem:[#allocation1] ss:$9 sm:$0xff] %v11232_v12 }
 0x8bb   : > { %3627 = vst [vmem:[#allocation1 + $0x1] ss:$9 sm:$0xff] %v11233_v62 }
 0x8bc   : > { %3628 = vst [vmem:[#allocation1 + $0x2] ss:$9 sm:$0xff] %v11234_v29 }
 0x8bd   : > { %3629 = vst [vmem:[#allocation1 + $0x3] ss:$9 sm:$0xff] %v8697_v42 }
 0x8be   : > { %3630 = vst [vmem:[#allocation1 + $0x4] ss:$9 sm:$0xff] %v8701_v50 }
 0x8bf   : > { %3631 = vst [vmem:[#allocation1 + $0x5] ss:$9 sm:$0xff] %v8705_v26 }
 0x8c0   : > { %3632 = vst [vmem:[#allocation1 + $0x6] ss:$9 sm:$0xff] %v8709_v16 }
 0x8c1   : > { %3633 = vst [vmem:[#allocation1 + $0x7] ss:$9 sm:$0xff] %v8714_v34 }
 0x8c8   : > { %v8809_v43 = vld [vmem:[#allocation1] sm:$0xff] }
 0x8c9   : > { %11235 = vst [vmem:[#allocation82_spill] sm:$0xff] %v8809_v43  ;;  %v11240_v43 = vld [vmem:[#allocation46_spill] sm:$0xff] }
 0x8ca   : > { %3717 = vst [vmem:[#allocation1] ss:$9 sm:$0xff] %v8293_v24 }
 0x8cb   : > { %3719 = vst [vmem:[#allocation1 + $0x1] ss:$9 sm:$0xff] %v8320_v8 }
 0x8cc   : > { %3721 = vst [vmem:[#allocation1 + $0x2] ss:$9 sm:$0xff] %v8324_v44  ;;  %v11236_v44 = vld [vmem:[#allocation33_spill] sm:$0xff] }
 0x8cd   : > { %3723 = vst [vmem:[#allocation1 + $0x3] ss:$9 sm:$0xff] %v8301_v47 }
 0x8ce   : > { %3725 = vst [vmem:[#allocation1 + $0x4] ss:$9 sm:$0xff] %v8330_v9 }
 0x8cf   : > { %3727 = vst [vmem:[#allocation1 + $0x5] ss:$9 sm:$0xff] %v8334_v46  ;;  %v11237_v46 = vld [vmem:[#allocation93_spill] sm:$0xff] }
 0x8d0   : > { %3729 = vst [vmem:[#allocation1 + $0x6] ss:$9 sm:$0xff] %v8338_v59  ;;  %v11238_v59 = vld [vmem:[#allocation111_spill] sm:$0xff] }
 0x8d1   : > { %3731 = vst [vmem:[#allocation1 + $0x7] ss:$9 sm:$0xff] %v8351_v19  ;;  %v11239_v19 = vld [vmem:[#allocation29_spill] sm:$0xff] }
 0x8d8   : > { %v8819_v35 = vld [vmem:[#allocation1] sm:$0xff] }
 0x8d9   : > { %3734 = vst [vmem:[#allocation1] ss:$9 sm:$0xff] %v8353_v13 }
 0x8da   : > { %3735 = vst [vmem:[#allocation1 + $0x1] ss:$9 sm:$0xff] %v8344_v31 }
 0x8db   : > { %3736 = vst [vmem:[#allocation1 + $0x2] ss:$9 sm:$0xff] %v8367_v17 }
 0x8dc   : > { %3737 = vst [vmem:[#allocation1 + $0x3] ss:$9 sm:$0xff] %v8374_v37 }
 0x8dd   : > { %3738 = vst [vmem:[#allocation1 + $0x4] ss:$9 sm:$0xff] %v8378_v56 }
 0x8de   : > { %3739 = vst [vmem:[#allocation1 + $0x5] ss:$9 sm:$0xff] %v8384_v41 }
 0x8df   : > { %3740 = vst [vmem:[#allocation1 + $0x6] ss:$9 sm:$0xff] %v8388_v57 }
 0x8e0   : > { %3741 = vst [vmem:[#allocation1 + $0x7] ss:$9 sm:$0xff] %v8397_v20 }
 0x8e7   : > { %v8829_v24 = vld [vmem:[#allocation1] sm:$0xff] }
 0x8e8   : > { %3744 = vst [vmem:[#allocation1] ss:$9 sm:$0xff] %v8404_v10 }
 0x8e9   : > { %3745 = vst [vmem:[#allocation1 + $0x1] ss:$9 sm:$0xff] %v8408_v7 }
 0x8ea   : > { %3746 = vst [vmem:[#allocation1 + $0x2] ss:$9 sm:$0xff] %v8394_v15 }
 0x8eb   : > { %3747 = vst [vmem:[#allocation1 + $0x3] ss:$9 sm:$0xff] %v8421_v49 }
 0x8ec   : > { %3748 = vst [vmem:[#allocation1 + $0x4] ss:$9 sm:$0xff] %v8428_v11 }
 0x8ed   : > { %3749 = vst [vmem:[#allocation1 + $0x5] ss:$9 sm:$0xff] %v8432_v2 }
 0x8ee   : > { %3750 = vst [vmem:[#allocation1 + $0x6] ss:$9 sm:$0xff] %v8438_v60 }
 0x8ef   : > { %3751 = vst [vmem:[#allocation1 + $0x7] ss:$9 sm:$0xff] %v8445_v14 }
 0x8f6   : > { %v8839_v47 = vld [vmem:[#allocation1] sm:$0xff] }
 0x8f7   : > { %3754 = vst [vmem:[#allocation1] ss:$9 sm:$0xff] %v8450_v21 }
 0x8f8   : > { %3755 = vst [vmem:[#allocation1 + $0x1] ss:$9 sm:$0xff] %v8459_v63 }
 0x8f9   : > { %3756 = vst [vmem:[#allocation1 + $0x2] ss:$9 sm:$0xff] %v8462_v48 }
 0x8fa   : > { %3757 = vst [vmem:[#allocation1 + $0x3] ss:$9 sm:$0xff] %v8447_v3 }
 0x8fb   : > { %3758 = vst [vmem:[#allocation1 + $0x4] ss:$9 sm:$0xff] %v8475_v4 }
 0x8fc   : > { %3759 = vst [vmem:[#allocation1 + $0x5] ss:$9 sm:$0xff] %v8482_v61 }
 0x8fd   : > { %3760 = vst [vmem:[#allocation1 + $0x6] ss:$9 sm:$0xff] %v8487_v23 }
 0x8fe   : > { %3761 = vst [vmem:[#allocation1 + $0x7] ss:$9 sm:$0xff] %v8495_v28 }
 0x905   : > { %v8849_v8 = vld [vmem:[#allocation1] sm:$0xff] }
 0x906   : > { %3764 = vst [vmem:[#allocation1] ss:$9 sm:$0xff] %v8498_v55 }
 0x907   : > { %3765 = vst [vmem:[#allocation1 + $0x1] ss:$9 sm:$0xff] %v8505_v52 }
 0x908   : > { %3766 = vst [vmem:[#allocation1 + $0x2] ss:$9 sm:$0xff] %v8513_v40 }
 0x909   : > { %3767 = vst [vmem:[#allocation1 + $0x3] ss:$9 sm:$0xff] %v8516_v39 }
 0x90a   : > { %3768 = vst [vmem:[#allocation1 + $0x4] ss:$9 sm:$0xff] %v8502_v58 }
 0x90b   : > { %3769 = vst [vmem:[#allocation1 + $0x5] ss:$9 sm:$0xff] %v11218_v22 }
 0x90c   : > { %3770 = vst [vmem:[#allocation1 + $0x6] ss:$9 sm:$0xff] %v11236_v44 }
 0x90d   : > { %3771 = vst [vmem:[#allocation1 + $0x7] ss:$9 sm:$0xff] %v8545_v1 }
 0x914   : > { %v8859_v9 = vld [vmem:[#allocation1] sm:$0xff] }
 0x915   : > { %3774 = vst [vmem:[#allocation1] ss:$9 sm:$0xff] %v8548_v53  ;;  %v11241_v53 = vld [vmem:[#allocation92_spill] sm:$0xff] }
 0x916   : > { %3775 = vst [vmem:[#allocation1 + $0x1] ss:$9 sm:$0xff] %v8553_v32  ;;  %v11246_v32 = vld [vmem:[#allocation56_spill] sm:$0xff] }
 0x917   : > { %3776 = vst [vmem:[#allocation1 + $0x2] ss:$9 sm:$0xff] %v8559_v33 }
 0x918   : > { %3777 = vst [vmem:[#allocation1 + $0x3] ss:$9 sm:$0xff] %v11237_v46 }
 0x919   : > { %3778 = vst [vmem:[#allocation1 + $0x4] ss:$9 sm:$0xff] %v11221_v0  ;;  %v11242_v0 = vld [vmem:[#allocation54_spill] sm:$0xff] }
 0x91a   : > { %3779 = vst [vmem:[#allocation1 + $0x5] ss:$9 sm:$0xff] %v11238_v59  ;;  %v11243_v59 = vld [vmem:[#allocation55_spill] sm:$0xff] }
 0x91b   : > { %3780 = vst [vmem:[#allocation1 + $0x6] ss:$9 sm:$0xff] %v11239_v19  ;;  %v11244_v19 = vld [vmem:[#allocation98_spill] sm:$0xff] }
 0x91c   : > { %3781 = vst [vmem:[#allocation1 + $0x7] ss:$9 sm:$0xff] %v11240_v43  ;;  %v3635_v43 = vshrl.u32 %v11244_v19, 16  ;;  %v3638_v33 = vshll.u32 %v11244_v19, 16 }
 0x91e   : > { %v3637_v46 = vrot.slane %v3635_v43, 7 }
 0x923   : > { %v8869_v44 = vld [vmem:[#allocation1] sm:$0xff] }
 0x924   : > { %3784 = vst [vmem:[#allocation1] ss:$9 sm:$0xff] %v8597_v38 }
 0x925   : > { %3785 = vst [vmem:[#allocation1 + $0x1] ss:$9 sm:$0xff] %v8602_v45  ;;  %v3640_v45 = vor.u32 %v3638_v33, %v3637_v46  ;;  %v11248_v33 = vld [vmem:[#allocation84_spill] sm:$0xff] }
 0x926   : > { %3786 = vst [vmem:[#allocation1 + $0x2] ss:$9 sm:$0xff] %v11241_v53 }
 0x927   : > { %3787 = vst [vmem:[#allocation1 + $0x3] ss:$9 sm:$0xff] %v8610_v27  ;;  %3697 = vrot.lane.b32.xlu0 %v3640_v45, %s6230_s25 }
 0x928   : > { %3788 = vst [vmem:[#allocation1 + $0x4] ss:$9 sm:$0xff] %v11224_v51 }
 0x929   : > { %3789 = vst [vmem:[#allocation1 + $0x5] ss:$9 sm:$0xff] %v11225_v54 }
 0x92a   : > { %3790 = vst [vmem:[#allocation1 + $0x6] ss:$9 sm:$0xff] %v11242_v0  ;;  %v11247_v0 = vld [vmem:[#allocation106_spill] sm:$0xff] }
 0x92b   : > { %3791 = vst [vmem:[#allocation1 + $0x7] ss:$9 sm:$0xff] %v11243_v59  ;;  %v3641_v59 = vshrl.u32 %v11247_v0, 16  ;;  %v3644_v19 = vshll.u32 %v11247_v0, 16 }
 0x92d   : > { %v3643_v43 = vrot.slane %v3641_v59, 7 }
 0x92f   : > { %v3646_v45 = vor.u32 %v3644_v19, %v3643_v43 }
 0x932   : > { %v8881_v38 = vld [vmem:[#allocation1] sm:$0xff] }
 0x933   : > { %11245 = vst [vmem:[#allocation116_spill] sm:$0xff] %v8881_v38  ;;  %v2860_v38 = vadd.s32 8, %v11248_v33 }
 0x934   : > { %3794 = vst [vmem:[#allocation1] ss:$9 sm:$0xff] %v11246_v32  ;;  %v11249_v32 = vld [vmem:[#allocation63_spill] sm:$0xff] }
 0x935   : > { %3795 = vst [vmem:[#allocation1 + $0x1] ss:$9 sm:$0xff] %v11229_v30  ;;  %vm2870_vm13 = vcmp.ge.s32.totalorder %v2860_v38, 0  ;;  %vm2880_vm10 = vcmp.lt.s32.totalorder %v2860_v38, 16 }
 0x936   : > { %3796 = vst [vmem:[#allocation1 + $0x2] ss:$9 sm:$0xff] %v8656_v5  ;;  %v3647_v5 = vsel %vm594_vm1, %v3637_v46, %v3646_v45  ;;  %vm8898_vm2 = vmand %vm2870_vm13, %vm2880_vm10  ;;  %v11258_v45 = vld [vmem:[#allocation7_spill] sm:$0xff] }
 0x937   : > { %3797 = vst [vmem:[#allocation1 + $0x3] ss:$9 sm:$0xff] %v8660_v18  ;;  %3699 = vrot.lane.b32.xlu2 %v3647_v5, %s6230_s25  ;;  %v11250_v18 = vld [vmem:[#allocation30_spill] sm:$0xff]  ;;  %vm2919_vm14 = vmand %vm8898_vm2, %vm2892_vm0 }
 0x938   : > { %3798 = vst [vmem:[#allocation1 + $0x4] ss:$9 sm:$0xff] %v11230_v6  ;;  %v3648_v6 = vshrl.u32 %v11250_v18, 16  ;;  %v3651_v59 = vshll.u32 %v11250_v18, 16  ;;  %v11256_v5 = vld [vmem:[#allocation10_spill] sm:$0xff]  ;;  %v11257_v18 = vld [vmem:[#allocation32_spill] sm:$0xff]  ;;  %vm2954_vm12 = vmand %vm8898_vm2, %vm2927_vm15 }
 0x939   : > { %3799 = vst [vmem:[#allocation1 + $0x5] ss:$9 sm:$0xff] %v8668_v36  ;;  %v11251_v36 = vmov 0  ;;  %v3200_v38 = vsel %vm8898_vm2, %v11256_v5, 0.0  ;;  %v3199_v46 = vsel %vm2919_vm14, %v11257_v18, 0.0 }
 0x93a   : > { %3800 = vst [vmem:[#allocation1 + $0x6] ss:$9 sm:$0xff] %v11249_v32  ;;  %v11252_v36 = vsel %vm8898_vm2, 4294967295, %v11251_v36  ;;  %v3650_v0 = vrot.slane %v3648_v6, 7 }
 0x93b   : > { %3801 = vst [vmem:[#allocation1 + $0x7] ss:$9 sm:$0xff] %v8676_v25  ;;  %v3658_v25 = vshll.u32 %v11258_v45, 16 }
 0x93c   : > { %11253 = vst [vmem:[#allocation85_spill] sm:$0xff] %v11252_v36  ;;  %v3653_v19 = vor.u32 %v3651_v59, %v3650_v0  ;;  %v3655_v59 = vshrl.u32 %v11258_v45, 16  ;;  %v3229_v36 = vpack.c.bf16 %v3199_v46, %v3199_v46 }
 0x93e   : > { %v3654_v6 = vsel %vm594_vm1, %v3643_v43, %v3653_v19  ;;  %v3657_v5 = vrot.slane %v3655_v59, 7  ;;  %v3289_v18 = vunpack.c.l.b16 %v3229_v36  ;;  %v11262_v36 = vld [vmem:[#allocation80_spill] sm:$0xff] }
 0x93f   : > { %3701 = vrot.lane.b32.xlu1 %v3654_v6, %s6230_s25 }
 0x940   : > { %v3660_v43 = vor.u32 %v3658_v25, %v3657_v5 }
 0x942   : > { %v8903_v33 = vld [vmem:[#allocation1] sm:$0xff]  ;;  %v3661_v6 = vsel %vm594_vm1, %v3650_v0, %v3660_v43 }
 0x943   : > { %11254 = vst [vmem:[#allocation86_spill] sm:$0xff] %v8903_v33  ;;  %v3230_v33 = vpack.c.bf16 %v3200_v38, %v3200_v38  ;;  %3703 = vrot.lane.b32.xlu0 %v3661_v6, %s6230_s25  ;;  %v11269_v43 = vld [vmem:[#allocation93_spill] sm:$0xff]  ;;  %v11271_v6 = vld [vmem:[#allocation111_spill] sm:$0xff] }
 0x944   : > { %3804 = vst [vmem:[#allocation1] ss:$9 sm:$0xff] %v11232_v12 }
 0x945   : > { %3805 = vst [vmem:[#allocation1 + $0x1] ss:$9 sm:$0xff] %v11233_v62  ;;  %v3290_v19 = vunpack.c.l.b16 %v3230_v33  ;;  %v3669_v33 = vshrl.u32 %v11262_v36, 16 }
 0x946   : > { %3806 = vst [vmem:[#allocation1 + $0x2] ss:$9 sm:$0xff] %v11234_v29 }
 0x947   : > { %3807 = vst [vmem:[#allocation1 + $0x3] ss:$9 sm:$0xff] %v8697_v42  ;;  %v8928_v38 = vpack.c.b16 %v3290_v19, %v3289_v18  ;;  %v8941_v45 = vrot.slane %v3669_v33, 7  ;;  %v11270_v19 = vld [vmem:[#allocation45_spill] sm:$0xff]  ;;  %v11276_v33 = vld [vmem:[#allocation54_spill] sm:$0xff] }
 0x948   : > { %3808 = vst [vmem:[#allocation1 + $0x4] ss:$9 sm:$0xff] %v8701_v50  ;;  %v11259_v50 = vld [vmem:[#allocation109_spill] sm:$0xff] }
 0x949   : > { %3809 = vst [vmem:[#allocation1 + $0x5] ss:$9 sm:$0xff] %v8705_v26  ;;  %v3662_v42 = vshrl.u32 %v11259_v50, 16  ;;  %v3665_v59 = vshll.u32 %v11259_v50, 16  ;;  %v11272_v18 = vld [vmem:[#allocation29_spill] sm:$0xff] }
 0x94a   : > { %3810 = vst [vmem:[#allocation1 + $0x6] ss:$9 sm:$0xff] %v8709_v16 }
 0x94b   : > { %3811 = vst [vmem:[#allocation1 + $0x7] ss:$9 sm:$0xff] %v8714_v34  ;;  %v3664_v16 = vrot.slane %v3662_v42, 7  ;;  %3826 = vrot.lane.b32.xlu0 %v8859_v9, %s6231_s8  ;;  %v3672_v42 = vshll.u32 %v11262_v36, 16  ;;  %v11275_v36 = vld [vmem:[#allocation108_spill] sm:$0xff] }
 0x94c   : > { %11260 = vst [vmem:[#allocation20_spill] sm:$0xff] %v8928_v38 }
 0x94d   : > { %v3667_v46 = vor.u32 %v3665_v59, %v3664_v16  ;;  %11264 = vst [vmem:[#allocation117_spill] sm:$0xff] %v8941_v45  ;;  %v3674_v50 = vor.u32 %v3672_v42, %v8941_v45  ;;  %v11273_v59 = vld [vmem:[#allocation46_spill] sm:$0xff]  ;;  %v11277_v42 = vld [vmem:[#allocation55_spill] sm:$0xff]  ;;  %v11287_v45 = vld [vmem:[#allocation69_spill] sm:$0xff] }
 0x94f   : > { %v3668_v25 = vsel %vm594_vm1, %v3657_v5, %v3667_v46  ;;  %v3675_v9 = vsel %vm594_vm1, %v3664_v16, %v3674_v50  ;;  %v11268_v5 = vld [vmem:[#allocation48_spill] sm:$0xff] }
 0x950   : > { %3705 = vrot.lane.b32.xlu2 %v3668_v25, %s6230_s25  ;;  %3707 = vrot.lane.b32.xlu1 %v3675_v9, %s6230_s25  ;;  %v11274_v25 = vld [vmem:[#allocation41_spill] sm:$0xff]  ;;  %v11279_v9 = vld [vmem:[#allocation56_spill] sm:$0xff] }
 0x952   : > { %v8930_v26 = vld [vmem:[#allocation1] sm:$0xff] }
 0x953   : > { %11261 = vst [vmem:[#allocation9_spill] sm:$0xff] %v8930_v26  ;;  %v11286_v26 = vld [vmem:[#allocation5_spill] sm:$0xff] }
 0x954   : > { %3815 = vst [vmem:[#allocation1] ss:$9 sm:$0xff] %v8928_v38 }
 0x958   : > { %3822 = vrot.lane.b32.xlu2 %v8839_v47, %s6231_s8  ;;  %3818 = vrot.lane.b32.xlu1 %v8819_v35, %s6231_s8 }
 0x95b   : > { %v8939_v0 = vld [vmem:[#allocation1] sm:$0xff] }
 0x95c   : > { %11263 = vst [vmem:[#allocation123_spill] sm:$0xff] %v8939_v0 }
 0x95d   : > { %3838 = vst [vmem:[#allocation1] ss:$9 sm:$0xff] %v8353_v13 }
 0x95e   : > { %3840 = vst [vmem:[#allocation1 + $0x1] ss:$9 sm:$0xff] %v8344_v31 }
 0x95f   : > { %3842 = vst [vmem:[#allocation1 + $0x2] ss:$9 sm:$0xff] %v8367_v17 }
 0x960   : > { %3844 = vst [vmem:[#allocation1 + $0x3] ss:$9 sm:$0xff] %v8374_v37  ;;  %3828 = vrot.lane.b32.xlu2 %v8869_v44, %s6231_s8  ;;  %3820 = vrot.lane.b32.xlu1 %v8829_v24, %s6231_s8  ;;  %v11265_v24 = vld [vmem:[#allocation33_spill] sm:$0xff]  ;;  %v11267_v44 = vld [vmem:[#allocation39_spill] sm:$0xff] }
 0x961   : > { %3846 = vst [vmem:[#allocation1 + $0x4] ss:$9 sm:$0xff] %v8378_v56 }
 0x962   : > { %3848 = vst [vmem:[#allocation1 + $0x5] ss:$9 sm:$0xff] %v8384_v41 }
 0x963   : > { %3850 = vst [vmem:[#allocation1 + $0x6] ss:$9 sm:$0xff] %v8388_v57 }
 0x964   : > { %3852 = vst [vmem:[#allocation1 + $0x7] ss:$9 sm:$0xff] %v8397_v20 }
 0x968   : > { %3824 = vrot.lane.b32.xlu1 %v8849_v8, %s6231_s8  ;;  %v11266_v8 = vld [vmem:[#allocation35_spill] sm:$0xff] }
 0x96b   : > { %v3853_v16 = vld [vmem:[#allocation1] sm:$0xff] }
 0x96c   : > { %3855 = vst [vmem:[#allocation1] ss:$9 sm:$0xff] %v8404_v10  ;;  %3946 = vrot.lane.b32.xlu0 %v3853_v16, %s6232_s11  ;;  %v11280_v16 = vld [vmem:[#allocation47_spill] sm:$0xff] }
 0x96d   : > { %3856 = vst [vmem:[#allocation1 + $0x1] ss:$9 sm:$0xff] %v8408_v7 }
 0x96e   : > { %3857 = vst [vmem:[#allocation1 + $0x2] ss:$9 sm:$0xff] %v8394_v15 }
 0x96f   : > { %3858 = vst [vmem:[#allocation1 + $0x3] ss:$9 sm:$0xff] %v8421_v49 }
 0x970   : > { %3859 = vst [vmem:[#allocation1 + $0x4] ss:$9 sm:$0xff] %v8428_v11 }
 0x971   : > { %3860 = vst [vmem:[#allocation1 + $0x5] ss:$9 sm:$0xff] %v8432_v2 }
 0x972   : > { %3861 = vst [vmem:[#allocation1 + $0x6] ss:$9 sm:$0xff] %v8438_v60 }
 0x973   : > { %3862 = vst [vmem:[#allocation1 + $0x7] ss:$9 sm:$0xff] %v8445_v14 }
 0x97a   : > { %v3863_v13 = vld [vmem:[#allocation1] sm:$0xff] }
 0x97b   : > { %3865 = vst [vmem:[#allocation1] ss:$9 sm:$0xff] %v8450_v21  ;;  %3948 = vrot.lane.b32.xlu0 %v3863_v13, %s6232_s11  ;;  %v11281_v13 = vld [vmem:[#allocation59_spill] sm:$0xff] }
 0x97c   : > { %3866 = vst [vmem:[#allocation1 + $0x1] ss:$9 sm:$0xff] %v8459_v63 }
 0x97d   : > { %3867 = vst [vmem:[#allocation1 + $0x2] ss:$9 sm:$0xff] %v8462_v48 }
 0x97e   : > { %3868 = vst [vmem:[#allocation1 + $0x3] ss:$9 sm:$0xff] %v8447_v3 }
 0x97f   : > { %3869 = vst [vmem:[#allocation1 + $0x4] ss:$9 sm:$0xff] %v8475_v4 }
 0x980   : > { %3870 = vst [vmem:[#allocation1 + $0x5] ss:$9 sm:$0xff] %v8482_v61 }
 0x981   : > { %3871 = vst [vmem:[#allocation1 + $0x6] ss:$9 sm:$0xff] %v8487_v23 }
 0x982   : > { %3872 = vst [vmem:[#allocation1 + $0x7] ss:$9 sm:$0xff] %v8495_v28 }
 0x989   : > { %v3873_v35 = vld [vmem:[#allocation1] sm:$0xff] }
 0x98a   : > { %3875 = vst [vmem:[#allocation1] ss:$9 sm:$0xff] %v8498_v55  ;;  %3950 = vrot.lane.b32.xlu0 %v3873_v35, %s6232_s11  ;;  %v11282_v35 = vld [vmem:[#allocation60_spill] sm:$0xff] }
 0x98b   : > { %3876 = vst [vmem:[#allocation1 + $0x1] ss:$9 sm:$0xff] %v8505_v52 }
 0x98c   : > { %3877 = vst [vmem:[#allocation1 + $0x2] ss:$9 sm:$0xff] %v8513_v40 }
 0x98d   : > { %3878 = vst [vmem:[#allocation1 + $0x3] ss:$9 sm:$0xff] %v8516_v39 }
 0x98e   : > { %3879 = vst [vmem:[#allocation1 + $0x4] ss:$9 sm:$0xff] %v8502_v58 }
 0x98f   : > { %3880 = vst [vmem:[#allocation1 + $0x5] ss:$9 sm:$0xff] %v11218_v22 }
 0x990   : > { %3881 = vst [vmem:[#allocation1 + $0x6] ss:$9 sm:$0xff] %v11265_v24 }
 0x991   : > { %3882 = vst [vmem:[#allocation1 + $0x7] ss:$9 sm:$0xff] %v8545_v1 }
 0x998   : > { %v3883_v47 = vld [vmem:[#allocation1] sm:$0xff] }
 0x999   : > { %3885 = vst [vmem:[#allocation1] ss:$9 sm:$0xff] %v11266_v8  ;;  %3952 = vrot.lane.b32.xlu2 %v3883_v47, %s6232_s11  ;;  %v11283_v47 = vld [vmem:[#allocation62_spill] sm:$0xff] }
 0x99a   : > { %3886 = vst [vmem:[#allocation1 + $0x1] ss:$9 sm:$0xff] %v11267_v44 }
 0x99b   : > { %3887 = vst [vmem:[#allocation1 + $0x2] ss:$9 sm:$0xff] %v11268_v5 }
 0x99c   : > { %3888 = vst [vmem:[#allocation1 + $0x3] ss:$9 sm:$0xff] %v11269_v43 }
 0x99d   : > { %3889 = vst [vmem:[#allocation1 + $0x4] ss:$9 sm:$0xff] %v11270_v19 }
 0x99e   : > { %3890 = vst [vmem:[#allocation1 + $0x5] ss:$9 sm:$0xff] %v11271_v6 }
 0x99f   : > { %3891 = vst [vmem:[#allocation1 + $0x6] ss:$9 sm:$0xff] %v11272_v18 }
 0x9a0   : > { %3892 = vst [vmem:[#allocation1 + $0x7] ss:$9 sm:$0xff] %v11273_v59 }
 0x9a7   : > { %v3893_v46 = vld [vmem:[#allocation1] sm:$0xff] }
 0x9a8   : > { %3895 = vst [vmem:[#allocation1] ss:$9 sm:$0xff] %v11274_v25  ;;  %3954 = vrot.lane.b32.xlu1 %v3893_v46, %s6232_s11  ;;  %v11284_v46 = vld [vmem:[#allocation64_spill] sm:$0xff] }
 0x9a9   : > { %3896 = vst [vmem:[#allocation1 + $0x1] ss:$9 sm:$0xff] %v11275_v36 }
 0x9aa   : > { %3897 = vst [vmem:[#allocation1 + $0x2] ss:$9 sm:$0xff] %v11241_v53 }
 0x9ab   : > { %3898 = vst [vmem:[#allocation1 + $0x3] ss:$9 sm:$0xff] %v8610_v27 }
 0x9ac   : > { %3899 = vst [vmem:[#allocation1 + $0x4] ss:$9 sm:$0xff] %v11224_v51 }
 0x9ad   : > { %3900 = vst [vmem:[#allocation1 + $0x5] ss:$9 sm:$0xff] %v11225_v54 }
 0x9ae   : > { %3901 = vst [vmem:[#allocation1 + $0x6] ss:$9 sm:$0xff] %v11276_v33 }
 0x9af   : > { %3902 = vst [vmem:[#allocation1 + $0x7] ss:$9 sm:$0xff] %v11277_v42 }
 0x9b6   : > { %v9010_v50 = vld [vmem:[#allocation1] sm:$0xff] }
 0x9b7   : > { %11278 = vst [vmem:[#allocation95_spill] sm:$0xff] %v9010_v50  ;;  %v11288_v50 = vld [vmem:[#allocation71_spill] sm:$0xff] }
 0x9b8   : > { %3905 = vst [vmem:[#allocation1] ss:$9 sm:$0xff] %v11279_v9 }
 0x9b9   : > { %3906 = vst [vmem:[#allocation1 + $0x1] ss:$9 sm:$0xff] %v11229_v30 }
 0x9ba   : > { %3907 = vst [vmem:[#allocation1 + $0x2] ss:$9 sm:$0xff] %v11280_v16 }
 0x9bb   : > { %3908 = vst [vmem:[#allocation1 + $0x3] ss:$9 sm:$0xff] %v11281_v13 }
 0x9bc   : > { %3909 = vst [vmem:[#allocation1 + $0x4] ss:$9 sm:$0xff] %v11282_v35  ;;  %v11289_v35 = vld [vmem:[#allocation73_spill] sm:$0xff] }
 0x9bd   : > { %3910 = vst [vmem:[#allocation1 + $0x5] ss:$9 sm:$0xff] %v11283_v47 }
 0x9be   : > { %3911 = vst [vmem:[#allocation1 + $0x6] ss:$9 sm:$0xff] %v11249_v32  ;;  %v11296_v32 = vld [vmem:[#allocation11_spill] sm:$0xff] }
 0x9bf   : > { %3912 = vst [vmem:[#allocation1 + $0x7] ss:$9 sm:$0xff] %v11284_v46  ;;  %v9049_v46 = vrot.slane %v8928_v38, 4 }
 0x9c1   : > { %11297 = vst [vmem:[#allocation8_spill] sm:$0xff] %v9049_v46 }
 0x9c6   : > { %v9020_v0 = vld [vmem:[#allocation1] sm:$0xff] }
 0x9c7   : > { %11285 = vst [vmem:[#allocation49_spill] sm:$0xff] %v9020_v0  ;;  %v9035_v0 = vrot.slane %v8928_v38, 1 }
 0x9c8   : > { %3915 = vst [vmem:[#allocation1] ss:$9 sm:$0xff] %v11232_v12 }
 0x9c9   : > { %3916 = vst [vmem:[#allocation1 + $0x1] ss:$9 sm:$0xff] %v11233_v62 }
 0x9ca   : > { %3917 = vst [vmem:[#allocation1 + $0x2] ss:$9 sm:$0xff] %v11234_v29  ;;  %v3700_v29 = vpop.permute.xlu2 %3699 }
 0x9cb   : > { %3918 = vst [vmem:[#allocation1 + $0x3] ss:$9 sm:$0xff] %v11286_v26  ;;  %v9040_v26 = vrot.slane %v8928_v38, 2 }
 0x9cc   : > { %3919 = vst [vmem:[#allocation1 + $0x4] ss:$9 sm:$0xff] %v11287_v45 }
 0x9cd   : > { %3920 = vst [vmem:[#allocation1 + $0x5] ss:$9 sm:$0xff] %v11288_v50  ;;  %v9057_v50 = vrot.slane %v8928_v38, 6 }
 0x9ce   : > { %3921 = vst [vmem:[#allocation1 + $0x6] ss:$9 sm:$0xff] %v11289_v35  ;;  %v9044_v35 = vrot.slane %v8928_v38, 3 }
 0x9cf   : > { %3922 = vst [vmem:[#allocation1 + $0x7] ss:$9 sm:$0xff] %v8714_v34  ;;  %v3201_v34 = vsel %vm2954_vm12, %v11296_v32, 0.0 }
 0x9d0   : > { %11292 = vst [vmem:[#allocation61_spill] sm:$0xff] %v9035_v0  ;;  %v3231_v45 = vpack.c.bf16 %v3201_v34, %v3201_v34 }
 0x9d1   : > { %11294 = vst [vmem:[#allocation72_spill] sm:$0xff] %v9040_v26 }
 0x9d2   : > { %11295 = vst [vmem:[#allocation77_spill] sm:$0xff] %v9044_v35  ;;  %v3706_v32 = vpop.permute.xlu2 %3705  ;;  %v3291_v12 = vunpack.c.l.b16 %v3231_v45  ;;  %v11305_v45 = vld [vmem:[#allocation19_spill] sm:$0xff] }
 0x9d3   : > { %11299 = vst [vmem:[#allocation99_spill] sm:$0xff] %v9057_v50 }
 0x9d4   : > { %v9066_v47 = vpack.c.b16 %v3291_v12, %v3291_v12 }
 0x9d6   : > { %v9037_v62 = vld [vmem:[#allocation1] sm:$0xff]  ;;  %11301 = vst [vmem:[#allocation100_spill] sm:$0xff] %v9066_v47 }
 0x9d7   : > { %11293 = vst [vmem:[#allocation122_spill] sm:$0xff] %v9037_v62  ;;  %v9053_v62 = vrot.slane %v8928_v38, 5 }
 0x9d8   : > { %3925 = vst [vmem:[#allocation1] ss:$9 sm:$0xff] %v8928_v38 }
 0x9d9   : > { %3927 = vst [vmem:[#allocation1 + $0x1] ss:$9 sm:$0xff] %v9035_v0  ;;  %v9061_v0 = vrot.slane %v8928_v38, 7 }
 0x9da   : > { %3929 = vst [vmem:[#allocation1 + $0x2] ss:$9 sm:$0xff] %v9040_v26  ;;  %v3702_v26 = vpop.permute.xlu1 %3701  ;;  %v3823_v13 = vpop.permute.xlu2 %3822 }
 0x9db   : > { %11298 = vst [vmem:[#allocation97_spill] sm:$0xff] %v9053_v62 }
 0x9dc   : > { %3931 = vst [vmem:[#allocation1 + $0x3] ss:$9 sm:$0xff] %v9044_v35 }
 0x9dd   : > { %3933 = vst [vmem:[#allocation1 + $0x4] ss:$9 sm:$0xff] %v9049_v46  ;;  %v11303_v46 = vld [vmem:[#allocation27_spill] sm:$0xff] }
 0x9de   : > { %11300 = vst [vmem:[#allocation74_spill] sm:$0xff] %v9061_v0  ;;  %v4680_v34 = vsel %vm2316_vm3, %v11303_v46, %v3702_v26  ;;  %v11306_v26 = vld [vmem:[#allocation22_spill] sm:$0xff] }
 0x9df   : > { %3935 = vst [vmem:[#allocation1 + $0x5] ss:$9 sm:$0xff] %v9053_v62  ;;  %v9074_v62 = vsel %vm2341_vm4, %v4680_v34, %v3823_v13  ;;  %v11308_v34 = vld [vmem:[#allocation6_spill] sm:$0xff] }
 0x9e0   : > { %3937 = vst [vmem:[#allocation1 + $0x6] ss:$9 sm:$0xff] %v9057_v50  ;;  %v3698_v50 = vpop.permute.xlu0 %3697 }
 0x9e1   : > { %3939 = vst [vmem:[#allocation1 + $0x7] ss:$9 sm:$0xff] %v9061_v0  ;;  %v4676_v12 = vsel %vm2316_vm3, %v11305_v45, %v3698_v50  ;;  %v4678_v50 = vsel %vm2316_vm3, %v11306_v26, %v3700_v29 }
 0x9e2   : > { %v3708_v38 = vpop.permute.xlu1 %3707 }
 0x9e3   : > { %v4686_v45 = vsel %vm2316_vm3, %v11308_v34, %v3708_v38  ;;  %v11311_v38 = vld [vmem:[#allocation37_spill] sm:$0xff] }
 0x9e8   : > { %v9068_v35 = vld [vmem:[#allocation1] sm:$0xff]  ;;  %v9109_v29 = vpop.permute.xlu0 %3703 }
 0x9e9   : > { %11302 = vst [vmem:[#allocation101_spill] sm:$0xff] %v9068_v35 }
 0x9ea   : > { %3943 = vst [vmem:[#allocation1] ss:$9 sm:$0xff] %v9066_v47  ;;  %v3819_v0 = vpop.permute.xlu1 %3818 }
 0x9eb   : > { %v9083_v35 = vsel %vm2341_vm4, %v4676_v12, %v3819_v0  ;;  %v3829_v12 = vpop.permute.xlu2 %3828  ;;  %11310 = vst [vmem:[#allocation104_spill] sm:$0xff] %v9109_v29 }
 0x9f1   : > { %v9076_v16 = vld [vmem:[#allocation1] sm:$0xff] }
 0x9f2   : > { %11304 = vst [vmem:[#allocation110_spill] sm:$0xff] %v9076_v16  ;;  %v3821_v13 = vpop.permute.xlu1 %3820  ;;  %v9102_v16 = vsel %vm2341_vm4, %v4686_v45, %v3829_v12 }
 0x9f3   : > { %3966 = vst [vmem:[#allocation1] ss:$9 sm:$0xff] %v8344_v31  ;;  %v9094_v46 = vsel %vm2341_vm4, %v4678_v50, %v3821_v13  ;;  %v4684_v50 = vsel %vm2316_vm3, %v11311_v38, %v3706_v32  ;;  %v3827_v13 = vpop.permute.xlu0 %3826 }
 0x9f4   : > { %3968 = vst [vmem:[#allocation1 + $0x1] ss:$9 sm:$0xff] %v8367_v17  ;;  %v9118_v34 = vsel %vm2341_vm4, %v4684_v50, %v3827_v13 }
 0x9f5   : > { %3970 = vst [vmem:[#allocation1 + $0x2] ss:$9 sm:$0xff] %v8374_v37 }
 0x9f6   : > { %3972 = vst [vmem:[#allocation1 + $0x3] ss:$9 sm:$0xff] %v8378_v56 }
 0x9f7   : > { %3974 = vst [vmem:[#allocation1 + $0x4] ss:$9 sm:$0xff] %v8384_v41 }
 0x9f8   : > { %3976 = vst [vmem:[#allocation1 + $0x5] ss:$9 sm:$0xff] %v8388_v57 }
 0x9f9   : > { %3978 = vst [vmem:[#allocation1 + $0x6] ss:$9 sm:$0xff] %v8397_v20 }
 0x9fa   : > { %3980 = vst [vmem:[#allocation1 + $0x7] ss:$9 sm:$0xff] %v8404_v10 }
 0x9fb   : > { %11307 = vst [vmem:[#allocation102_spill] sm:$0xff] %v9094_v46 }
 0x9fc   : > { %11309 = vst [vmem:[#allocation103_spill] sm:$0xff] %v9102_v16 }
 0x9fd   : > { %11312 = vst [vmem:[#allocation21_spill] sm:$0xff] %v9118_v34 }
 0xa01   : > { %v3981_v0 = vld [vmem:[#allocation1] sm:$0xff] }
 0xa02   : > { %3982 = vst [vmem:[#allocation1] ss:$9 sm:$0xff] %v8408_v7  ;;  %v4054_v32 = vshrl.u32 %v3981_v0, 16  ;;  %v4057_v38 = vshll.u32 %v3981_v0, 16 }
 0xa03   : > { %3983 = vst [vmem:[#allocation1 + $0x1] ss:$9 sm:$0xff] %v8394_v15 }
 0xa04   : > { %3984 = vst [vmem:[#allocation1 + $0x2] ss:$9 sm:$0xff] %v8421_v49  ;;  %v4056_v12 = vrot.slane %v4054_v32, 7 }
 0xa05   : > { %3985 = vst [vmem:[#allocation1 + $0x3] ss:$9 sm:$0xff] %v8428_v11 }
 0xa06   : > { %3986 = vst [vmem:[#allocation1 + $0x4] ss:$9 sm:$0xff] %v8432_v2  ;;  %v4059_v50 = vor.u32 %v4057_v38, %v4056_v12 }
 0xa07   : > { %3987 = vst [vmem:[#allocation1 + $0x5] ss:$9 sm:$0xff] %v8438_v60 }
 0xa08   : > { %3988 = vst [vmem:[#allocation1 + $0x6] ss:$9 sm:$0xff] %v8445_v14  ;;  %4116 = vrot.lane.b32.xlu2 %v4059_v50, %s6233_s12 }
 0xa09   : > { %3989 = vst [vmem:[#allocation1 + $0x7] ss:$9 sm:$0xff] %v8450_v21 }
 0xa10   : > { %v3990_v26 = vld [vmem:[#allocation1] sm:$0xff] }
 0xa11   : > { %3991 = vst [vmem:[#allocation1] ss:$9 sm:$0xff] %v8459_v63  ;;  %v4060_v13 = vshrl.u32 %v3990_v26, 16  ;;  %v4063_v29 = vshll.u32 %v3990_v26, 16 }
 0xa12   : > { %3992 = vst [vmem:[#allocation1 + $0x1] ss:$9 sm:$0xff] %v8462_v48 }
 0xa13   : > { %3993 = vst [vmem:[#allocation1 + $0x2] ss:$9 sm:$0xff] %v8447_v3  ;;  %v4062_v16 = vrot.slane %v4060_v13, 7 }
 0xa14   : > { %3994 = vst [vmem:[#allocation1 + $0x3] ss:$9 sm:$0xff] %v8475_v4 }
 0xa15   : > { %3995 = vst [vmem:[#allocation1 + $0x4] ss:$9 sm:$0xff] %v8482_v61  ;;  %v4065_v46 = vor.u32 %v4063_v29, %v4062_v16 }
 0xa16   : > { %3996 = vst [vmem:[#allocation1 + $0x5] ss:$9 sm:$0xff] %v8487_v23 }
 0xa17   : > { %3997 = vst [vmem:[#allocation1 + $0x6] ss:$9 sm:$0xff] %v8495_v28  ;;  %v4066_v0 = vsel %vm594_vm1, %v4056_v12, %v4065_v46 }
 0xa18   : > { %3998 = vst [vmem:[#allocation1 + $0x7] ss:$9 sm:$0xff] %v8498_v55  ;;  %4118 = vrot.lane.b32.xlu2 %v4066_v0, %s6233_s12 }
 0xa1f   : > { %v3999_v45 = vld [vmem:[#allocation1] sm:$0xff] }
 0xa20   : > { %4000 = vst [vmem:[#allocation1] ss:$9 sm:$0xff] %v8505_v52  ;;  %v4067_v32 = vshrl.u32 %v3999_v45, 16  ;;  %v4070_v50 = vshll.u32 %v3999_v45, 16 }
 0xa21   : > { %4001 = vst [vmem:[#allocation1 + $0x1] ss:$9 sm:$0xff] %v8513_v40 }
 0xa22   : > { %4002 = vst [vmem:[#allocation1 + $0x2] ss:$9 sm:$0xff] %v8516_v39  ;;  %v4069_v38 = vrot.slane %v4067_v32, 7 }
 0xa23   : > { %4003 = vst [vmem:[#allocation1 + $0x3] ss:$9 sm:$0xff] %v8502_v58 }
 0xa24   : > { %4004 = vst [vmem:[#allocation1 + $0x4] ss:$9 sm:$0xff] %v11218_v22  ;;  %v4072_v29 = vor.u32 %v4070_v50, %v4069_v38 }
 0xa25   : > { %4005 = vst [vmem:[#allocation1 + $0x5] ss:$9 sm:$0xff] %v11265_v24 }
 0xa26   : > { %4006 = vst [vmem:[#allocation1 + $0x6] ss:$9 sm:$0xff] %v8545_v1  ;;  %v4073_v46 = vsel %vm594_vm1, %v4062_v16, %v4072_v29 }
 0xa27   : > { %4007 = vst [vmem:[#allocation1 + $0x7] ss:$9 sm:$0xff] %v11266_v8  ;;  %4120 = vrot.lane.b32.xlu1 %v4073_v46, %s6233_s12 }
 0xa2e   : > { %v4008_v34 = vld [vmem:[#allocation1] sm:$0xff] }
 0xa2f   : > { %4009 = vst [vmem:[#allocation1] ss:$9 sm:$0xff] %v11267_v44  ;;  %v4074_v26 = vshrl.u32 %v4008_v34, 16  ;;  %v4077_v13 = vshll.u32 %v4008_v34, 16  ;;  %v3947_v34 = vpop.permute.xlu0 %3946 }
 0xa30   : > { %4010 = vst [vmem:[#allocation1 + $0x1] ss:$9 sm:$0xff] %v11268_v5 }
 0xa31   : > { %4011 = vst [vmem:[#allocation1 + $0x2] ss:$9 sm:$0xff] %v11269_v43  ;;  %v4076_v12 = vrot.slane %v4074_v26, 7 }
 0xa32   : > { %4012 = vst [vmem:[#allocation1 + $0x3] ss:$9 sm:$0xff] %v11270_v19 }
 0xa33   : > { %4013 = vst [vmem:[#allocation1 + $0x4] ss:$9 sm:$0xff] %v11271_v6  ;;  %v4079_v19 = vor.u32 %v4077_v13, %v4076_v12  ;;  %v11317_v13 = vld [vmem:[#allocation47_spill] sm:$0xff] }
 0xa34   : > { %4014 = vst [vmem:[#allocation1 + $0x5] ss:$9 sm:$0xff] %v11272_v18 }
 0xa35   : > { %4015 = vst [vmem:[#allocation1 + $0x6] ss:$9 sm:$0xff] %v11273_v59  ;;  %v4080_v45 = vsel %vm594_vm1, %v4069_v38, %v4079_v19  ;;  %v9158_v19 = vsel %vm2366_vm5, %v9083_v35, %v3947_v34  ;;  %v11319_v35 = vld [vmem:[#allocation60_spill] sm:$0xff] }
 0xa36   : > { %4016 = vst [vmem:[#allocation1 + $0x7] ss:$9 sm:$0xff] %v11274_v25  ;;  %4122 = vrot.lane.b32.xlu0 %v4080_v45, %s6233_s12  ;;  %v11320_v45 = vld [vmem:[#allocation62_spill] sm:$0xff]  ;;  %v11322_v34 = vld [vmem:[#allocation64_spill] sm:$0xff] }
 0xa37   : > { %11314 = vst [vmem:[#allocation118_spill] sm:$0xff] %v9158_v19  ;;  %v9164_v46 = vpop.permute.xlu0 %3948  ;;  %v11327_v19 = vld [vmem:[#allocation68_spill] sm:$0xff] }
 0xa38   : > { %11315 = vst [vmem:[#allocation75_spill] sm:$0xff] %v9164_v46  ;;  %v11326_v46 = vld [vmem:[#allocation66_spill] sm:$0xff] }
 0xa3d   : > { %v4017_v0 = vld [vmem:[#allocation1] sm:$0xff] }
 0xa3e   : > { %4018 = vst [vmem:[#allocation1] ss:$9 sm:$0xff] %v11275_v36  ;;  %v4081_v16 = vshrl.u32 %v4017_v0, 16  ;;  %v4084_v50 = vshll.u32 %v4017_v0, 16  ;;  %v11318_v0 = vld [vmem:[#allocation59_spill] sm:$0xff] }
 0xa3f   : > { %4019 = vst [vmem:[#allocation1 + $0x1] ss:$9 sm:$0xff] %v11241_v53 }
 0xa40   : > { %4020 = vst [vmem:[#allocation1 + $0x2] ss:$9 sm:$0xff] %v8610_v27  ;;  %v9153_v32 = vrot.slane %v4081_v16, 7  ;;  %v11321_v16 = vld [vmem:[#allocation63_spill] sm:$0xff] }
 0xa41   : > { %4021 = vst [vmem:[#allocation1 + $0x3] ss:$9 sm:$0xff] %v11224_v51 }
 0xa42   : > { %4022 = vst [vmem:[#allocation1 + $0x4] ss:$9 sm:$0xff] %v11225_v54  ;;  %v4086_v38 = vor.u32 %v4084_v50, %v9153_v32  ;;  %v11323_v50 = vld [vmem:[#allocation65_spill] sm:$0xff] }
 0xa43   : > { %4023 = vst [vmem:[#allocation1 + $0x5] ss:$9 sm:$0xff] %v11276_v33 }
 0xa44   : > { %11313 = vst [vmem:[#allocation16_spill] sm:$0xff] %v9153_v32  ;;  %v4087_v29 = vsel %vm594_vm1, %v4076_v12, %v4086_v38  ;;  %v3951_v12 = vpop.permute.xlu0 %3950  ;;  %v11328_v32 = vld [vmem:[#allocation5_spill] sm:$0xff] }
 0xa45   : > { %4024 = vst [vmem:[#allocation1 + $0x6] ss:$9 sm:$0xff] %v11277_v42  ;;  %4124 = vrot.lane.b32.xlu2 %v4087_v29, %s6233_s12  ;;  %v9178_v38 = vsel %vm2366_vm5, %v9074_v62, %v3951_v12  ;;  %v11335_v12 = vld [vmem:[#allocation61_spill] sm:$0xff] }
 0xa46   : > { %4025 = vst [vmem:[#allocation1 + $0x7] ss:$9 sm:$0xff] %v11279_v9 }
 0xa47   : > { %11324 = vst [vmem:[#allocation96_spill] sm:$0xff] %v9178_v38  ;;  %v11336_v38 = vld [vmem:[#allocation72_spill] sm:$0xff] }
 0xa4d   : > { %v9166_v26 = vld [vmem:[#allocation1] sm:$0xff] }
 0xa4e   : > { %11316 = vst [vmem:[#allocation105_spill] sm:$0xff] %v9166_v26  ;;  %v11329_v26 = vld [vmem:[#allocation69_spill] sm:$0xff] }
 0xa4f   : > { %4027 = vst [vmem:[#allocation1] ss:$9 sm:$0xff] %v11229_v30 }
 0xa50   : > { %4028 = vst [vmem:[#allocation1 + $0x1] ss:$9 sm:$0xff] %v11317_v13 }
 0xa51   : > { %4029 = vst [vmem:[#allocation1 + $0x2] ss:$9 sm:$0xff] %v11318_v0 }
 0xa52   : > { %4030 = vst [vmem:[#allocation1 + $0x3] ss:$9 sm:$0xff] %v11319_v35 }
 0xa53   : > { %4031 = vst [vmem:[#allocation1 + $0x4] ss:$9 sm:$0xff] %v11320_v45  ;;  %v11332_v45 = vld [vmem:[#allocation25_spill] sm:$0xff] }
 0xa54   : > { %4032 = vst [vmem:[#allocation1 + $0x5] ss:$9 sm:$0xff] %v11321_v16  ;;  %v11330_v16 = vld [vmem:[#allocation71_spill] sm:$0xff] }
 0xa55   : > { %4033 = vst [vmem:[#allocation1 + $0x6] ss:$9 sm:$0xff] %v11322_v34  ;;  %v11331_v34 = vld [vmem:[#allocation73_spill] sm:$0xff] }
 0xa56   : > { %4034 = vst [vmem:[#allocation1 + $0x7] ss:$9 sm:$0xff] %v11323_v50  ;;  %v11333_v50 = vld [vmem:[#allocation20_spill] sm:$0xff] }
 0xa5d   : > { %v9180_v29 = vld [vmem:[#allocation1] sm:$0xff] }
 0xa5e   : > { %11325 = vst [vmem:[#allocation119_spill] sm:$0xff] %v9180_v29  ;;  %v11337_v29 = vld [vmem:[#allocation77_spill] sm:$0xff] }
 0xa5f   : > { %4036 = vst [vmem:[#allocation1] ss:$9 sm:$0xff] %v11326_v46 }
 0xa60   : > { %4037 = vst [vmem:[#allocation1 + $0x1] ss:$9 sm:$0xff] %v11327_v19  ;;  %v11338_v19 = vld [vmem:[#allocation8_spill] sm:$0xff] }
 0xa61   : > { %4038 = vst [vmem:[#allocation1 + $0x2] ss:$9 sm:$0xff] %v11328_v32  ;;  %v11339_v32 = vld [vmem:[#allocation97_spill] sm:$0xff] }
 0xa62   : > { %4039 = vst [vmem:[#allocation1 + $0x3] ss:$9 sm:$0xff] %v11329_v26  ;;  %v11340_v26 = vld [vmem:[#allocation99_spill] sm:$0xff] }
 0xa63   : > { %4040 = vst [vmem:[#allocation1 + $0x4] ss:$9 sm:$0xff] %v11330_v16  ;;  %v11341_v16 = vld [vmem:[#allocation74_spill] sm:$0xff] }
 0xa64   : > { %4041 = vst [vmem:[#allocation1 + $0x5] ss:$9 sm:$0xff] %v11331_v34 }
 0xa65   : > { %4042 = vst [vmem:[#allocation1 + $0x6] ss:$9 sm:$0xff] %v11332_v45 }
 0xa66   : > { %4043 = vst [vmem:[#allocation1 + $0x7] ss:$9 sm:$0xff] %v11333_v50 }
 0xa6d   : > { %v9190_v62 = vld [vmem:[#allocation1] sm:$0xff] }
 0xa6e   : > { %11334 = vst [vmem:[#allocation50_spill] sm:$0xff] %v9190_v62 }
 0xa6f   : > { %4045 = vst [vmem:[#allocation1] ss:$9 sm:$0xff] %v11335_v12 }
 0xa70   : > { %4046 = vst [vmem:[#allocation1 + $0x1] ss:$9 sm:$0xff] %v11336_v38 }
 0xa71   : > { %4047 = vst [vmem:[#allocation1 + $0x2] ss:$9 sm:$0xff] %v11337_v29 }
 0xa72   : > { %4048 = vst [vmem:[#allocation1 + $0x3] ss:$9 sm:$0xff] %v11338_v19 }
 0xa73   : > { %4049 = vst [vmem:[#allocation1 + $0x4] ss:$9 sm:$0xff] %v11339_v32 }
 0xa74   : > { %4050 = vst [vmem:[#allocation1 + $0x5] ss:$9 sm:$0xff] %v11340_v26 }
 0xa75   : > { %4051 = vst [vmem:[#allocation1 + $0x6] ss:$9 sm:$0xff] %v11341_v16 }
 0xa76   : > { %4052 = vst [vmem:[#allocation1 + $0x7] ss:$9 sm:$0xff] %v9066_v47 }
 0xa7d   : > { %v9200_v45 = vld [vmem:[#allocation1] sm:$0xff] }
 0xa7e   : > { %11342 = vst [vmem:[#allocation78_spill] sm:$0xff] %v9200_v45  ;;  %v11352_v45 = vld [vmem:[#allocation69_spill] sm:$0xff] }
 0xa7f   : > { %4136 = vst [vmem:[#allocation1] ss:$9 sm:$0xff] %v8344_v31 }
 0xa80   : > { %4138 = vst [vmem:[#allocation1 + $0x1] ss:$9 sm:$0xff] %v8367_v17 }
 0xa81   : > { %4140 = vst [vmem:[#allocation1 + $0x2] ss:$9 sm:$0xff] %v8374_v37 }
 0xa82   : > { %4142 = vst [vmem:[#allocation1 + $0x3] ss:$9 sm:$0xff] %v8378_v56  ;;  %v11343_v56 = vld [vmem:[#allocation45_spill] sm:$0xff] }
 0xa83   : > { %4144 = vst [vmem:[#allocation1 + $0x4] ss:$9 sm:$0xff] %v8384_v41 }
 0xa84   : > { %4146 = vst [vmem:[#allocation1 + $0x5] ss:$9 sm:$0xff] %v8388_v57 }
 0xa85   : > { %4148 = vst [vmem:[#allocation1 + $0x6] ss:$9 sm:$0xff] %v8397_v20  ;;  %v11345_v20 = vld [vmem:[#allocation62_spill] sm:$0xff] }
 0xa86   : > { %4150 = vst [vmem:[#allocation1 + $0x7] ss:$9 sm:$0xff] %v8404_v10  ;;  %v11346_v10 = vld [vmem:[#allocation63_spill] sm:$0xff] }
 0xa8d   : > { %v4151_v62 = vld [vmem:[#allocation1] sm:$0xff] }
 0xa8e   : > { %4237 = vrot.lane.b32.xlu1 %v4151_v62, %s6234_s15  ;;  %4153 = vst [vmem:[#allocation1] ss:$9 sm:$0xff] %v8408_v7  ;;  %v11347_v62 = vld [vmem:[#allocation64_spill] sm:$0xff] }
 0xa8f   : > { %4154 = vst [vmem:[#allocation1 + $0x1] ss:$9 sm:$0xff] %v8394_v15 }
 0xa90   : > { %4155 = vst [vmem:[#allocation1 + $0x2] ss:$9 sm:$0xff] %v8421_v49 }
 0xa91   : > { %4156 = vst [vmem:[#allocation1 + $0x3] ss:$9 sm:$0xff] %v8428_v11 }
 0xa92   : > { %4157 = vst [vmem:[#allocation1 + $0x4] ss:$9 sm:$0xff] %v8432_v2 }
 0xa93   : > { %4158 = vst [vmem:[#allocation1 + $0x5] ss:$9 sm:$0xff] %v8438_v60 }
 0xa94   : > { %4159 = vst [vmem:[#allocation1 + $0x6] ss:$9 sm:$0xff] %v8445_v14 }
 0xa95   : > { %4160 = vst [vmem:[#allocation1 + $0x7] ss:$9 sm:$0xff] %v8450_v21 }
 0xa9c   : > { %v4161_v31 = vld [vmem:[#allocation1] sm:$0xff] }
 0xa9d   : > { %4239 = vrot.lane.b32.xlu1 %v4161_v31, %s6234_s15  ;;  %4163 = vst [vmem:[#allocation1] ss:$9 sm:$0xff] %v8459_v63  ;;  %v11348_v31 = vld [vmem:[#allocation65_spill] sm:$0xff] }
 0xa9e   : > { %4164 = vst [vmem:[#allocation1 + $0x1] ss:$9 sm:$0xff] %v8462_v48 }
 0xa9f   : > { %4165 = vst [vmem:[#allocation1 + $0x2] ss:$9 sm:$0xff] %v8447_v3 }
 0xaa0   : > { %4166 = vst [vmem:[#allocation1 + $0x3] ss:$9 sm:$0xff] %v8475_v4 }
 0xaa1   : > { %4167 = vst [vmem:[#allocation1 + $0x4] ss:$9 sm:$0xff] %v8482_v61 }
 0xaa2   : > { %4168 = vst [vmem:[#allocation1 + $0x5] ss:$9 sm:$0xff] %v8487_v23 }
 0xaa3   : > { %4169 = vst [vmem:[#allocation1 + $0x6] ss:$9 sm:$0xff] %v8495_v28 }
 0xaa4   : > { %4170 = vst [vmem:[#allocation1 + $0x7] ss:$9 sm:$0xff] %v8498_v55 }
 0xaab   : > { %v4171_v17 = vld [vmem:[#allocation1] sm:$0xff] }
 0xaac   : > { %4241 = vrot.lane.b32.xlu2 %v4171_v17, %s6234_s15  ;;  %4173 = vst [vmem:[#allocation1] ss:$9 sm:$0xff] %v8505_v52 }
 0xaad   : > { %4174 = vst [vmem:[#allocation1 + $0x1] ss:$9 sm:$0xff] %v8513_v40 }
 0xaae   : > { %4175 = vst [vmem:[#allocation1 + $0x2] ss:$9 sm:$0xff] %v8516_v39 }
 0xaaf   : > { %4176 = vst [vmem:[#allocation1 + $0x3] ss:$9 sm:$0xff] %v8502_v58 }
 0xab0   : > { %4177 = vst [vmem:[#allocation1 + $0x4] ss:$9 sm:$0xff] %v11218_v22 }
 0xab1   : > { %4178 = vst [vmem:[#allocation1 + $0x5] ss:$9 sm:$0xff] %v11265_v24 }
 0xab2   : > { %4179 = vst [vmem:[#allocation1 + $0x6] ss:$9 sm:$0xff] %v8545_v1 }
 0xab3   : > { %4180 = vst [vmem:[#allocation1 + $0x7] ss:$9 sm:$0xff] %v11266_v8 }
 0xaba   : > { %v4181_v37 = vld [vmem:[#allocation1] sm:$0xff] }
 0xabb   : > { %4243 = vrot.lane.b32.xlu1 %v4181_v37, %s6234_s15  ;;  %4183 = vst [vmem:[#allocation1] ss:$9 sm:$0xff] %v11267_v44  ;;  %v11350_v37 = vld [vmem:[#allocation68_spill] sm:$0xff] }
 0xabc   : > { %4184 = vst [vmem:[#allocation1 + $0x1] ss:$9 sm:$0xff] %v11268_v5 }
 0xabd   : > { %4185 = vst [vmem:[#allocation1 + $0x2] ss:$9 sm:$0xff] %v11269_v43 }
 0xabe   : > { %4186 = vst [vmem:[#allocation1 + $0x3] ss:$9 sm:$0xff] %v11343_v56 }
 0xabf   : > { %4187 = vst [vmem:[#allocation1 + $0x4] ss:$9 sm:$0xff] %v11271_v6 }
 0xac0   : > { %4188 = vst [vmem:[#allocation1 + $0x5] ss:$9 sm:$0xff] %v11272_v18 }
 0xac1   : > { %4189 = vst [vmem:[#allocation1 + $0x6] ss:$9 sm:$0xff] %v11273_v59 }
 0xac2   : > { %4190 = vst [vmem:[#allocation1 + $0x7] ss:$9 sm:$0xff] %v11274_v25 }
 0xac9   : > { %v4191_v41 = vld [vmem:[#allocation1] sm:$0xff] }
 0xaca   : > { %4245 = vrot.lane.b32.xlu0 %v4191_v41, %s6234_s15  ;;  %4193 = vst [vmem:[#allocation1] ss:$9 sm:$0xff] %v11275_v36  ;;  %v11351_v41 = vld [vmem:[#allocation5_spill] sm:$0xff] }
 0xacb   : > { %4194 = vst [vmem:[#allocation1 + $0x1] ss:$9 sm:$0xff] %v11241_v53 }
 0xacc   : > { %4195 = vst [vmem:[#allocation1 + $0x2] ss:$9 sm:$0xff] %v8610_v27 }
 0xacd   : > { %4196 = vst [vmem:[#allocation1 + $0x3] ss:$9 sm:$0xff] %v11224_v51 }
 0xace   : > { %4197 = vst [vmem:[#allocation1 + $0x4] ss:$9 sm:$0xff] %v11225_v54 }
 0xacf   : > { %4198 = vst [vmem:[#allocation1 + $0x5] ss:$9 sm:$0xff] %v11276_v33 }
 0xad0   : > { %4199 = vst [vmem:[#allocation1 + $0x6] ss:$9 sm:$0xff] %v11277_v42 }
 0xad1   : > { %4200 = vst [vmem:[#allocation1 + $0x7] ss:$9 sm:$0xff] %v11279_v9 }
 0xad8   : > { %v9255_v57 = vld [vmem:[#allocation1] sm:$0xff] }
 0xad9   : > { %11344 = vst [vmem:[#allocation81_spill] sm:$0xff] %v9255_v57  ;;  %v11353_v57 = vld [vmem:[#allocation71_spill] sm:$0xff] }
 0xada   : > { %4203 = vst [vmem:[#allocation1] ss:$9 sm:$0xff] %v11229_v30 }
 0xadb   : > { %4204 = vst [vmem:[#allocation1 + $0x1] ss:$9 sm:$0xff] %v11317_v13 }
 0xadc   : > { %4205 = vst [vmem:[#allocation1 + $0x2] ss:$9 sm:$0xff] %v11318_v0 }
 0xadd   : > { %4206 = vst [vmem:[#allocation1 + $0x3] ss:$9 sm:$0xff] %v11319_v35  ;;  %v11355_v35 = vld [vmem:[#allocation25_spill] sm:$0xff] }
 0xade   : > { %4207 = vst [vmem:[#allocation1 + $0x4] ss:$9 sm:$0xff] %v11345_v20  ;;  %v11354_v20 = vld [vmem:[#allocation84_spill] sm:$0xff] }
 0xadf   : > { %4208 = vst [vmem:[#allocation1 + $0x5] ss:$9 sm:$0xff] %v11346_v10  ;;  %v2861_v10 = vadd.s32 9, %v11354_v20  ;;  %v11361_v20 = vld [vmem:[#allocation17_spill] sm:$0xff] }
 0xae0   : > { %4209 = vst [vmem:[#allocation1 + $0x6] ss:$9 sm:$0xff] %v11347_v62 }
 0xae1   : > { %4210 = vst [vmem:[#allocation1 + $0x7] ss:$9 sm:$0xff] %v11348_v31  ;;  %vm2871_vm9 = vcmp.ge.s32.totalorder %v2861_v10, 0  ;;  %vm2881_vm13 = vcmp.lt.s32.totalorder %v2861_v10, 16  ;;  %v11362_v10 = vld [vmem:[#allocation12_spill] sm:$0xff] }
 0xae2   : > { %vm9276_vm10 = vmand %vm2871_vm9, %vm2881_vm13  ;;  %vm11477_vm13 = vsmask.f32 7424 }
 0xae3   : > { %vm2922_vm2 = vmand %vm9276_vm10, %vm2892_vm0 }
 0xae4   : > { %vm2957_vm0 = vmand %vm9276_vm10, %vm2927_vm15 }
 0xae8   : > { %v9265_v17 = vld [vmem:[#allocation1] sm:$0xff] }
 0xae9   : > { %11349 = vst [vmem:[#allocation83_spill] sm:$0xff] %v9265_v17  ;;  %v11356_v17 = vmov 0 }
 0xaea   : > { %4213 = vst [vmem:[#allocation1] ss:$9 sm:$0xff] %v11326_v46  ;;  %v11357_v17 = vsel %vm9276_vm10, 4294967295, %v11356_v17 }
 0xaeb   : > { %4214 = vst [vmem:[#allocation1 + $0x1] ss:$9 sm:$0xff] %v11350_v37 }
 0xaec   : > { %4215 = vst [vmem:[#allocation1 + $0x2] ss:$9 sm:$0xff] %v11351_v41 }
 0xaed   : > { %4216 = vst [vmem:[#allocation1 + $0x3] ss:$9 sm:$0xff] %v11352_v45 }
 0xaee   : > { %4217 = vst [vmem:[#allocation1 + $0x4] ss:$9 sm:$0xff] %v11353_v57 }
 0xaef   : > { %4218 = vst [vmem:[#allocation1 + $0x5] ss:$9 sm:$0xff] %v11331_v34 }
 0xaf0   : > { %4219 = vst [vmem:[#allocation1 + $0x6] ss:$9 sm:$0xff] %v11355_v35  ;;  %v3202_v35 = vsel %vm2922_vm2, %v11362_v10, 0.0  ;;  %v11366_v10 = vld [vmem:[#allocation62_spill] sm:$0xff]  ;;  %vm11480_vm2 = vmmov %vm11477_vm13 }
 0xaf1   : > { %4220 = vst [vmem:[#allocation1 + $0x7] ss:$9 sm:$0xff] %v11333_v50  ;;  %v3203_v50 = vsel %vm9276_vm10, %v11361_v20, 0.0  ;;  %v3232_v45 = vpack.c.bf16 %v3202_v35, %v3202_v35  ;;  %vm11479_vm10 = vcmask 293888  }
 0xaf2   : > { %11358 = vst [vmem:[#allocation113_spill] sm:$0xff] %v11357_v17 }
 0xaf8   : > { %v9280_v37 = vld [vmem:[#allocation1] sm:$0xff] }
 0xaf9   : > { %11359 = vst [vmem:[#allocation31_spill] sm:$0xff] %v9280_v37  ;;  %v3233_v37 = vpack.c.bf16 %v3203_v50, %v3203_v50 }
 0xafa   : > { %4223 = vst [vmem:[#allocation1] ss:$9 sm:$0xff] %v11335_v12  ;;  %v3292_v12 = vunpack.c.l.b16 %v3232_v45  ;;  %v11367_v45 = vld [vmem:[#allocation63_spill] sm:$0xff] }
 0xafb   : > { %4224 = vst [vmem:[#allocation1 + $0x1] ss:$9 sm:$0xff] %v11336_v38  ;;  %v3293_v38 = vunpack.c.l.b16 %v3233_v37  ;;  %v11365_v37 = vld [vmem:[#allocation60_spill] sm:$0xff] }
 0xafc   : > { %4225 = vst [vmem:[#allocation1 + $0x2] ss:$9 sm:$0xff] %v11337_v29 }
 0xafd   : > { %4226 = vst [vmem:[#allocation1 + $0x3] ss:$9 sm:$0xff] %v11338_v19  ;;  %v9298_v17 = vpack.c.b16 %v3293_v38, %v3292_v12 }
 0xafe   : > { %4227 = vst [vmem:[#allocation1 + $0x4] ss:$9 sm:$0xff] %v11339_v32 }
 0xaff   : > { %4228 = vst [vmem:[#allocation1 + $0x5] ss:$9 sm:$0xff] %v11340_v26 }
 0xb00   : > { %4229 = vst [vmem:[#allocation1 + $0x6] ss:$9 sm:$0xff] %v11341_v16 }
 0xb01   : > { %4230 = vst [vmem:[#allocation1 + $0x7] ss:$9 sm:$0xff] %v9066_v47 }
 0xb08   : > { %v9300_v20 = vld [vmem:[#allocation1] sm:$0xff] }
 0xb09   : > { %11363 = vst [vmem:[#allocation26_spill] sm:$0xff] %v9300_v20  ;;  %v11374_v20 = vld [vmem:[#allocation61_spill] sm:$0xff] }
 0xb0a   : > { %4234 = vst [vmem:[#allocation1] ss:$9 sm:$0xff] %v9298_v17 }
 0xb11   : > { %v9303_v19 = vld [vmem:[#allocation1] sm:$0xff] }
 0xb12   : > { %11364 = vst [vmem:[#allocation114_spill] sm:$0xff] %v9303_v19 }
 0xb13   : > { %4257 = vst [vmem:[#allocation1] ss:$9 sm:$0xff] %v8408_v7 }
 0xb14   : > { %4259 = vst [vmem:[#allocation1 + $0x1] ss:$9 sm:$0xff] %v8394_v15 }
 0xb15   : > { %4261 = vst [vmem:[#allocation1 + $0x2] ss:$9 sm:$0xff] %v8421_v49 }
 0xb16   : > { %4263 = vst [vmem:[#allocation1 + $0x3] ss:$9 sm:$0xff] %v8428_v11 }
 0xb17   : > { %4265 = vst [vmem:[#allocation1 + $0x4] ss:$9 sm:$0xff] %v8432_v2 }
 0xb18   : > { %4267 = vst [vmem:[#allocation1 + $0x5] ss:$9 sm:$0xff] %v8438_v60 }
 0xb19   : > { %4269 = vst [vmem:[#allocation1 + $0x6] ss:$9 sm:$0xff] %v8445_v14 }
 0xb1a   : > { %4271 = vst [vmem:[#allocation1 + $0x7] ss:$9 sm:$0xff] %v8450_v21 }
 0xb21   : > { %v4272_v35 = vld [vmem:[#allocation1] sm:$0xff] }
 0xb22   : > { %4365 = vrot.lane.b32.xlu0 %v4272_v35, %s6235_s16  ;;  %4274 = vst [vmem:[#allocation1] ss:$9 sm:$0xff] %v8459_v63 }
 0xb23   : > { %4275 = vst [vmem:[#allocation1 + $0x1] ss:$9 sm:$0xff] %v8462_v48 }
 0xb24   : > { %4276 = vst [vmem:[#allocation1 + $0x2] ss:$9 sm:$0xff] %v8447_v3 }
 0xb25   : > { %4277 = vst [vmem:[#allocation1 + $0x3] ss:$9 sm:$0xff] %v8475_v4 }
 0xb26   : > { %4278 = vst [vmem:[#allocation1 + $0x4] ss:$9 sm:$0xff] %v8482_v61 }
 0xb27   : > { %4279 = vst [vmem:[#allocation1 + $0x5] ss:$9 sm:$0xff] %v8487_v23 }
 0xb28   : > { %4280 = vst [vmem:[#allocation1 + $0x6] ss:$9 sm:$0xff] %v8495_v28 }
 0xb29   : > { %4281 = vst [vmem:[#allocation1 + $0x7] ss:$9 sm:$0xff] %v8498_v55 }
 0xb30   : > { %v4282_v7 = vld [vmem:[#allocation1] sm:$0xff] }
 0xb31   : > { %4367 = vrot.lane.b32.xlu0 %v4282_v7, %s6235_s16  ;;  %4284 = vst [vmem:[#allocation1] ss:$9 sm:$0xff] %v8505_v52  ;;  %v11369_v7 = vld [vmem:[#allocation68_spill] sm:$0xff] }
 0xb32   : > { %4285 = vst [vmem:[#allocation1 + $0x1] ss:$9 sm:$0xff] %v8513_v40 }
 0xb33   : > { %4286 = vst [vmem:[#allocation1 + $0x2] ss:$9 sm:$0xff] %v8516_v39 }
 0xb34   : > { %4287 = vst [vmem:[#allocation1 + $0x3] ss:$9 sm:$0xff] %v8502_v58 }
 0xb35   : > { %4288 = vst [vmem:[#allocation1 + $0x4] ss:$9 sm:$0xff] %v11218_v22 }
 0xb36   : > { %4289 = vst [vmem:[#allocation1 + $0x5] ss:$9 sm:$0xff] %v11265_v24 }
 0xb37   : > { %4290 = vst [vmem:[#allocation1 + $0x6] ss:$9 sm:$0xff] %v8545_v1 }
 0xb38   : > { %4291 = vst [vmem:[#allocation1 + $0x7] ss:$9 sm:$0xff] %v11266_v8 }
 0xb3f   : > { %v4292_v50 = vld [vmem:[#allocation1] sm:$0xff] }
 0xb40   : > { %4369 = vrot.lane.b32.xlu0 %v4292_v50, %s6235_s16  ;;  %4294 = vst [vmem:[#allocation1] ss:$9 sm:$0xff] %v11267_v44  ;;  %v11370_v50 = vld [vmem:[#allocation69_spill] sm:$0xff] }
 0xb41   : > { %4295 = vst [vmem:[#allocation1 + $0x1] ss:$9 sm:$0xff] %v11268_v5 }
 0xb42   : > { %4296 = vst [vmem:[#allocation1 + $0x2] ss:$9 sm:$0xff] %v11269_v43 }
 0xb43   : > { %4297 = vst [vmem:[#allocation1 + $0x3] ss:$9 sm:$0xff] %v11343_v56 }
 0xb44   : > { %4298 = vst [vmem:[#allocation1 + $0x4] ss:$9 sm:$0xff] %v11271_v6 }
 0xb45   : > { %4299 = vst [vmem:[#allocation1 + $0x5] ss:$9 sm:$0xff] %v11272_v18 }
 0xb46   : > { %4300 = vst [vmem:[#allocation1 + $0x6] ss:$9 sm:$0xff] %v11273_v59 }
 0xb47   : > { %4301 = vst [vmem:[#allocation1 + $0x7] ss:$9 sm:$0xff] %v11274_v25 }
 0xb4e   : > { %v4302_v38 = vld [vmem:[#allocation1] sm:$0xff] }
 0xb4f   : > { %4371 = vrot.lane.b32.xlu2 %v4302_v38, %s6235_s16  ;;  %4304 = vst [vmem:[#allocation1] ss:$9 sm:$0xff] %v11275_v36  ;;  %v11371_v38 = vld [vmem:[#allocation25_spill] sm:$0xff] }
 0xb50   : > { %4305 = vst [vmem:[#allocation1 + $0x1] ss:$9 sm:$0xff] %v11241_v53 }
 0xb51   : > { %4306 = vst [vmem:[#allocation1 + $0x2] ss:$9 sm:$0xff] %v8610_v27 }
 0xb52   : > { %4307 = vst [vmem:[#allocation1 + $0x3] ss:$9 sm:$0xff] %v11224_v51 }
 0xb53   : > { %4308 = vst [vmem:[#allocation1 + $0x4] ss:$9 sm:$0xff] %v11225_v54 }
 0xb54   : > { %4309 = vst [vmem:[#allocation1 + $0x5] ss:$9 sm:$0xff] %v11276_v33 }
 0xb55   : > { %4310 = vst [vmem:[#allocation1 + $0x6] ss:$9 sm:$0xff] %v11277_v42 }
 0xb56   : > { %4311 = vst [vmem:[#allocation1 + $0x7] ss:$9 sm:$0xff] %v11279_v9 }
 0xb5d   : > { %v4312_v12 = vld [vmem:[#allocation1] sm:$0xff] }
 0xb5e   : > { %4373 = vrot.lane.b32.xlu1 %v4312_v12, %s6235_s16  ;;  %4314 = vst [vmem:[#allocation1] ss:$9 sm:$0xff] %v11229_v30  ;;  %v11372_v12 = vld [vmem:[#allocation20_spill] sm:$0xff] }
 0xb5f   : > { %4315 = vst [vmem:[#allocation1 + $0x1] ss:$9 sm:$0xff] %v11317_v13 }
 0xb60   : > { %4316 = vst [vmem:[#allocation1 + $0x2] ss:$9 sm:$0xff] %v11318_v0 }
 0xb61   : > { %4317 = vst [vmem:[#allocation1 + $0x3] ss:$9 sm:$0xff] %v11365_v37 }
 0xb62   : > { %4318 = vst [vmem:[#allocation1 + $0x4] ss:$9 sm:$0xff] %v11366_v10 }
 0xb63   : > { %4319 = vst [vmem:[#allocation1 + $0x5] ss:$9 sm:$0xff] %v11367_v45 }
 0xb64   : > { %4320 = vst [vmem:[#allocation1 + $0x6] ss:$9 sm:$0xff] %v11347_v62 }
 0xb65   : > { %4321 = vst [vmem:[#allocation1 + $0x7] ss:$9 sm:$0xff] %v11348_v31 }
 0xb6c   : > { %v9358_v35 = vld [vmem:[#allocation1] sm:$0xff] }
 0xb6d   : > { %11368 = vst [vmem:[#allocation112_spill] sm:$0xff] %v9358_v35  ;;  %v11375_v35 = vld [vmem:[#allocation72_spill] sm:$0xff] }
 0xb6e   : > { %4324 = vst [vmem:[#allocation1] ss:$9 sm:$0xff] %v11326_v46 }
 0xb6f   : > { %4325 = vst [vmem:[#allocation1 + $0x1] ss:$9 sm:$0xff] %v11369_v7  ;;  %v11376_v7 = vld [vmem:[#allocation8_spill] sm:$0xff] }
 0xb70   : > { %4326 = vst [vmem:[#allocation1 + $0x2] ss:$9 sm:$0xff] %v11351_v41 }
 0xb71   : > { %4327 = vst [vmem:[#allocation1 + $0x3] ss:$9 sm:$0xff] %v11370_v50 }
 0xb72   : > { %4328 = vst [vmem:[#allocation1 + $0x4] ss:$9 sm:$0xff] %v11353_v57 }
 0xb73   : > { %4329 = vst [vmem:[#allocation1 + $0x5] ss:$9 sm:$0xff] %v11331_v34 }
 0xb74   : > { %4330 = vst [vmem:[#allocation1 + $0x6] ss:$9 sm:$0xff] %v11371_v38 }
 0xb75   : > { %4331 = vst [vmem:[#allocation1 + $0x7] ss:$9 sm:$0xff] %v11372_v12  ;;  %v9397_v12 = vrot.slane %v9298_v17, 4 }
 0xb77   : > { %11384 = vst [vmem:[#allocation2_spill] sm:$0xff] %v9397_v12 }
 0xb7c   : > { %v9368_v19 = vld [vmem:[#allocation1] sm:$0xff] }
 0xb7d   : > { %11373 = vst [vmem:[#allocation28_spill] sm:$0xff] %v9368_v19  ;;  %v9383_v19 = vrot.slane %v9298_v17, 1 }
 0xb7e   : > { %4334 = vst [vmem:[#allocation1] ss:$9 sm:$0xff] %v11374_v20 }
 0xb7f   : > { %4335 = vst [vmem:[#allocation1 + $0x1] ss:$9 sm:$0xff] %v11375_v35 }
 0xb80   : > { %4336 = vst [vmem:[#allocation1 + $0x2] ss:$9 sm:$0xff] %v11337_v29 }
 0xb81   : > { %4337 = vst [vmem:[#allocation1 + $0x3] ss:$9 sm:$0xff] %v11376_v7  ;;  %v9388_v7 = vrot.slane %v9298_v17, 2 }
 0xb82   : > { %4338 = vst [vmem:[#allocation1 + $0x4] ss:$9 sm:$0xff] %v11339_v32 }
 0xb83   : > { %4339 = vst [vmem:[#allocation1 + $0x5] ss:$9 sm:$0xff] %v11340_v26  ;;  %v9392_v26 = vrot.slane %v9298_v17, 3 }
 0xb84   : > { %4340 = vst [vmem:[#allocation1 + $0x6] ss:$9 sm:$0xff] %v11341_v16  ;;  %v9401_v16 = vrot.slane %v9298_v17, 5 }
 0xb85   : > { %4341 = vst [vmem:[#allocation1 + $0x7] ss:$9 sm:$0xff] %v9066_v47  ;;  %v11383_v47 = vld [vmem:[#allocation14_spill] sm:$0xff] }
 0xb86   : > { %11379 = vst [vmem:[#allocation40_spill] sm:$0xff] %v9383_v19  ;;  %v3204_v38 = vsel %vm2957_vm0, %v11383_v47, 0.0  ;;  %vm11481_vm0 = vmmov %vm11479_vm10 }
 0xb87   : > { %11381 = vst [vmem:[#allocation121_spill] sm:$0xff] %v9388_v7  ;;  %v3234_v32 = vpack.c.bf16 %v3204_v38, %v3204_v38 }
 0xb88   : > { %11382 = vst [vmem:[#allocation51_spill] sm:$0xff] %v9392_v26 }
 0xb89   : > { %11385 = vst [vmem:[#allocation3_spill] sm:$0xff] %v9401_v16  ;;  %v3294_v47 = vunpack.c.l.b16 %v3234_v32  ;;  %v9429_v32 = vpop.permute.xlu1 %3824 }
 0xb8a   : > { %11391 = vst [vmem:[#allocation70_spill] sm:$0xff] %v9429_v32 }
 0xb8c   : > { %v9385_v35 = vld [vmem:[#allocation1] sm:$0xff] }
 0xb8d   : > { %11380 = vst [vmem:[#allocation120_spill] sm:$0xff] %v9385_v35  ;;  %v9405_v35 = vrot.slane %v9298_v17, 6 }
 0xb8e   : > { %4344 = vst [vmem:[#allocation1] ss:$9 sm:$0xff] %v9298_v17 }
 0xb8f   : > { %4346 = vst [vmem:[#allocation1 + $0x1] ss:$9 sm:$0xff] %v9383_v19  ;;  %v9409_v19 = vrot.slane %v9298_v17, 7 }
 0xb90   : > { %4348 = vst [vmem:[#allocation1 + $0x2] ss:$9 sm:$0xff] %v9388_v7  ;;  %v9414_v7 = vpack.c.b16 %v3294_v47, %v3294_v47 }
 0xb91   : > { %4350 = vst [vmem:[#allocation1 + $0x3] ss:$9 sm:$0xff] %v9392_v26 }
 0xb92   : > { %11386 = vst [vmem:[#allocation34_spill] sm:$0xff] %v9405_v35 }
 0xb93   : > { %4352 = vst [vmem:[#allocation1 + $0x4] ss:$9 sm:$0xff] %v9397_v12 }
 0xb94   : > { %11387 = vst [vmem:[#allocation38_spill] sm:$0xff] %v9409_v19 }
 0xb95   : > { %4354 = vst [vmem:[#allocation1 + $0x5] ss:$9 sm:$0xff] %v9401_v16 }
 0xb96   : > { %4356 = vst [vmem:[#allocation1 + $0x6] ss:$9 sm:$0xff] %v9405_v35 }
 0xb97   : > { %4358 = vst [vmem:[#allocation1 + $0x7] ss:$9 sm:$0xff] %v9409_v19 }
 0xb98   : > { %11388 = vst [vmem:[#allocation107_spill] sm:$0xff] %v9414_v7 }
 0xb9e   : > { %v9416_v29 = vld [vmem:[#allocation1] sm:$0xff] }
 0xb9f   : > { %11389 = vst [vmem:[#allocation115_spill] sm:$0xff] %v9416_v29 }
 0xba0   : > { %4362 = vst [vmem:[#allocation1] ss:$9 sm:$0xff] %v9414_v7 }
 0xba7   : > { %v9419_v26 = vld [vmem:[#allocation1] sm:$0xff] }
 0xba8   : > { %11390 = vst [vmem:[#allocation43_spill] sm:$0xff] %v9419_v26  ;;  %v3955_v26 = vpop.permute.xlu1 %3954 }
 0xba9   : > { %4385 = vst [vmem:[#allocation1] ss:$9 sm:$0xff] %v8394_v15 }
 0xbaa   : > { %4387 = vst [vmem:[#allocation1 + $0x1] ss:$9 sm:$0xff] %v8421_v49 }
 0xbab   : > { %4389 = vst [vmem:[#allocation1 + $0x2] ss:$9 sm:$0xff] %v8428_v11 }
 0xbac   : > { %4391 = vst [vmem:[#allocation1 + $0x3] ss:$9 sm:$0xff] %v8432_v2 }
 0xbad   : > { %4393 = vst [vmem:[#allocation1 + $0x4] ss:$9 sm:$0xff] %v8438_v60 }
 0xbae   : > { %4395 = vst [vmem:[#allocation1 + $0x5] ss:$9 sm:$0xff] %v8445_v14 }
 0xbaf   : > { %4397 = vst [vmem:[#allocation1 + $0x6] ss:$9 sm:$0xff] %v8450_v21 }
 0xbb0   : > { %4399 = vst [vmem:[#allocation1 + $0x7] ss:$9 sm:$0xff] %v8459_v63  ;;  %v9440_v32 = vpop.permute.xlu1 %4120 }
 0xbb1   : > { %11392 = vst [vmem:[#allocation79_spill] sm:$0xff] %v9440_v32 }
 0xbb7   : > { %v4400_v38 = vld [vmem:[#allocation1] sm:$0xff] }
 0xbb8   : > { %v4473_v47 = vshrl.u32 %v4400_v38, 16  ;;  %4401 = vst [vmem:[#allocation1] ss:$9 sm:$0xff] %v8462_v48  ;;  %v4476_v11 = vshll.u32 %v4400_v38, 16 }
 0xbb9   : > { %4402 = vst [vmem:[#allocation1 + $0x1] ss:$9 sm:$0xff] %v8447_v3  ;;  %v9442_v3 = vpop.permute.xlu2 %3952 }
 0xbba   : > { %v4475_v29 = vrot.slane %v4473_v47, 7  ;;  %4403 = vst [vmem:[#allocation1 + $0x2] ss:$9 sm:$0xff] %v8475_v4 }
 0xbbb   : > { %4404 = vst [vmem:[#allocation1 + $0x3] ss:$9 sm:$0xff] %v8482_v61 }
 0xbbc   : > { %v4478_v14 = vor.u32 %v4476_v11, %v4475_v29  ;;  %4405 = vst [vmem:[#allocation1 + $0x4] ss:$9 sm:$0xff] %v8487_v23  ;;  %v9446_v11 = vpop.permute.xlu1 %4237 }
 0xbbd   : > { %4406 = vst [vmem:[#allocation1 + $0x5] ss:$9 sm:$0xff] %v8495_v28 }
 0xbbe   : > { %4535 = vrot.lane.b32.xlu2 %v4478_v14, %s6236_s17  ;;  %4407 = vst [vmem:[#allocation1 + $0x6] ss:$9 sm:$0xff] %v8498_v55 }
 0xbbf   : > { %4408 = vst [vmem:[#allocation1 + $0x7] ss:$9 sm:$0xff] %v8505_v52 }
 0xbc0   : > { %11393 = vst [vmem:[#allocation87_spill] sm:$0xff] %v9442_v3 }
 0xbc1   : > { %11394 = vst [vmem:[#allocation88_spill] sm:$0xff] %v9446_v11  ;;  %v9452_v3 = vpop.permute.xlu2 %4116 }
 0xbc2   : > { %11395 = vst [vmem:[#allocation44_spill] sm:$0xff] %v9452_v3 }
 0xbc6   : > { %v4409_v38 = vld [vmem:[#allocation1] sm:$0xff] }
 0xbc7   : > { %v4479_v47 = vshrl.u32 %v4409_v38, 16  ;;  %4410 = vst [vmem:[#allocation1] ss:$9 sm:$0xff] %v8513_v40  ;;  %v4482_v28 = vshll.u32 %v4409_v38, 16  ;;  %v9458_v38 = vpop.permute.xlu1 %4239 }
 0xbc8   : > { %4411 = vst [vmem:[#allocation1 + $0x1] ss:$9 sm:$0xff] %v8516_v39 }
 0xbc9   : > { %v4481_v23 = vrot.slane %v4479_v47, 7  ;;  %4412 = vst [vmem:[#allocation1 + $0x2] ss:$9 sm:$0xff] %v8502_v58 }
 0xbca   : > { %4413 = vst [vmem:[#allocation1 + $0x3] ss:$9 sm:$0xff] %v11218_v22 }
 0xbcb   : > { %v4484_v14 = vor.u32 %v4482_v28, %v4481_v23  ;;  %4414 = vst [vmem:[#allocation1 + $0x4] ss:$9 sm:$0xff] %v11265_v24  ;;  %v9461_v28 = vpop.permute.xlu2 %4118 }
 0xbcc   : > { %4415 = vst [vmem:[#allocation1 + $0x5] ss:$9 sm:$0xff] %v8545_v1  ;;  %v9464_v1 = vpop.permute.xlu0 %4122 }
 0xbcd   : > { %v4485_v32 = vsel %vm594_vm1, %v4475_v29, %v4484_v14  ;;  %4416 = vst [vmem:[#allocation1 + $0x6] ss:$9 sm:$0xff] %v11266_v8 }
 0xbce   : > { %4537 = vrot.lane.b32.xlu2 %v4485_v32, %s6236_s17  ;;  %4417 = vst [vmem:[#allocation1 + $0x7] ss:$9 sm:$0xff] %v11267_v44 }
 0xbcf   : > { %11396 = vst [vmem:[#allocation53_spill] sm:$0xff] %v9458_v38  ;;  %v9469_v14 = vpop.permute.xlu1 %4243 }
 0xbd0   : > { %11397 = vst [vmem:[#allocation18_spill] sm:$0xff] %v9461_v28 }
 0xbd1   : > { %11398 = vst [vmem:[#allocation58_spill] sm:$0xff] %v9464_v1  ;;  %v11400_v1 = vld [vmem:[#allocation21_spill] sm:$0xff] }
 0xbd2   : > { %11399 = vst [vmem:[#allocation92_spill] sm:$0xff] %v9469_v14  ;;  %v4724_v28 = vsel %vm2366_vm5, %v11400_v1, %v3955_v26 }
 0xbd5   : > { %v4418_v47 = vld [vmem:[#allocation1] sm:$0xff] }
 0xbd6   : > { %v4486_v11 = vshrl.u32 %v4418_v47, 16  ;;  %4419 = vst [vmem:[#allocation1] ss:$9 sm:$0xff] %v11268_v5  ;;  %v4489_v29 = vshll.u32 %v4418_v47, 16  ;;  %v4246_v47 = vpop.permute.xlu0 %4245 }
 0xbd7   : > { %4420 = vst [vmem:[#allocation1 + $0x1] ss:$9 sm:$0xff] %v11269_v43  ;;  %v4374_v14 = vpop.permute.xlu1 %4373 }
 0xbd8   : > { %v4488_v3 = vrot.slane %v4486_v11, 7  ;;  %4421 = vst [vmem:[#allocation1 + $0x2] ss:$9 sm:$0xff] %v11343_v56  ;;  %v4125_v11 = vpop.permute.xlu2 %4124 }
 0xbd9   : > { %4422 = vst [vmem:[#allocation1 + $0x3] ss:$9 sm:$0xff] %v11271_v6 }
 0xbda   : > { %v4491_v32 = vor.u32 %v4489_v29, %v4488_v3  ;;  %4423 = vst [vmem:[#allocation1 + $0x4] ss:$9 sm:$0xff] %v11272_v18  ;;  %v4744_v29 = vsel %vm2391_vm6, %v4724_v28, %v4125_v11 }
 0xbdb   : > { %4424 = vst [vmem:[#allocation1 + $0x5] ss:$9 sm:$0xff] %v11273_v59  ;;  %v4764_v18 = vsel %vm2416_vm7, %v4744_v29, %v4246_v47  ;;  %v11402_v29 = vld [vmem:[#allocation81_spill] sm:$0xff] }
 0xbdc   : > { %v4492_v38 = vsel %vm594_vm1, %v4481_v23, %v4491_v32  ;;  %4425 = vst [vmem:[#allocation1 + $0x6] ss:$9 sm:$0xff] %v11274_v25  ;;  %v9481_v59 = vsel %vm2441_vm8, %v4764_v18, %v4374_v14 }
 0xbdd   : > { %4539 = vrot.lane.b32.xlu1 %v4492_v38, %s6236_s17  ;;  %4426 = vst [vmem:[#allocation1 + $0x7] ss:$9 sm:$0xff] %v11275_v36 }
 0xbde   : > { %11401 = vst [vmem:[#allocation98_spill] sm:$0xff] %v9481_v59 }
 0xbe4   : > { %v4427_v6 = vld [vmem:[#allocation1] sm:$0xff] }
 0xbe5   : > { %v4493_v23 = vshrl.u32 %v4427_v6, 16  ;;  %4428 = vst [vmem:[#allocation1] ss:$9 sm:$0xff] %v11241_v53  ;;  %v4496_v32 = vshll.u32 %v4427_v6, 16 }
 0xbe6   : > { %4429 = vst [vmem:[#allocation1 + $0x1] ss:$9 sm:$0xff] %v8610_v27 }
 0xbe7   : > { %v4495_v38 = vrot.slane %v4493_v23, 7  ;;  %4430 = vst [vmem:[#allocation1 + $0x2] ss:$9 sm:$0xff] %v11224_v51  ;;  %v11403_v23 = vld [vmem:[#allocation68_spill] sm:$0xff] }
 0xbe8   : > { %4431 = vst [vmem:[#allocation1 + $0x3] ss:$9 sm:$0xff] %v11225_v54 }
 0xbe9   : > { %v4498_v1 = vor.u32 %v4496_v32, %v4495_v38  ;;  %4432 = vst [vmem:[#allocation1 + $0x4] ss:$9 sm:$0xff] %v11276_v33  ;;  %v11405_v32 = vld [vmem:[#allocation20_spill] sm:$0xff] }
 0xbea   : > { %4433 = vst [vmem:[#allocation1 + $0x5] ss:$9 sm:$0xff] %v11277_v42 }
 0xbeb   : > { %v4499_v26 = vsel %vm594_vm1, %v4488_v3, %v4498_v1  ;;  %4434 = vst [vmem:[#allocation1 + $0x6] ss:$9 sm:$0xff] %v11279_v9 }
 0xbec   : > { %4541 = vrot.lane.b32.xlu0 %v4499_v26, %s6236_s17  ;;  %4435 = vst [vmem:[#allocation1 + $0x7] ss:$9 sm:$0xff] %v11229_v30  ;;  %v11406_v26 = vld [vmem:[#allocation72_spill] sm:$0xff] }
 0xbf3   : > { %v4436_v18 = vld [vmem:[#allocation1] sm:$0xff] }
 0xbf4   : > { %v4500_v28 = vshrl.u32 %v4436_v18, 16  ;;  %4437 = vst [vmem:[#allocation1] ss:$9 sm:$0xff] %v11317_v13  ;;  %v4503_v14 = vshll.u32 %v4436_v18, 16  ;;  %v11407_v18 = vld [vmem:[#allocation77_spill] sm:$0xff] }
 0xbf5   : > { %4438 = vst [vmem:[#allocation1 + $0x1] ss:$9 sm:$0xff] %v11318_v0 }
 0xbf6   : > { %v9495_v6 = vrot.slane %v4500_v28, 7  ;;  %4439 = vst [vmem:[#allocation1 + $0x2] ss:$9 sm:$0xff] %v11365_v37  ;;  %v11408_v28 = vld [vmem:[#allocation8_spill] sm:$0xff] }
 0xbf7   : > { %4440 = vst [vmem:[#allocation1 + $0x3] ss:$9 sm:$0xff] %v11366_v10 }
 0xbf8   : > { %v4505_v3 = vor.u32 %v4503_v14, %v9495_v6  ;;  %4441 = vst [vmem:[#allocation1 + $0x4] ss:$9 sm:$0xff] %v11367_v45  ;;  %v11409_v14 = vld [vmem:[#allocation97_spill] sm:$0xff] }
 0xbf9   : > { %4442 = vst [vmem:[#allocation1 + $0x5] ss:$9 sm:$0xff] %v11347_v62 }
 0xbfa   : > { %v4506_v11 = vsel %vm594_vm1, %v4495_v38, %v4505_v3  ;;  %4443 = vst [vmem:[#allocation1 + $0x6] ss:$9 sm:$0xff] %v11348_v31  ;;  %v11404_v38 = vld [vmem:[#allocation25_spill] sm:$0xff]  ;;  %v11410_v3 = vld [vmem:[#allocation99_spill] sm:$0xff] }
 0xbfb   : > { %4543 = vrot.lane.b32.xlu2 %v4506_v11, %s6236_s17  ;;  %4444 = vst [vmem:[#allocation1 + $0x7] ss:$9 sm:$0xff] %v11326_v46  ;;  %v11411_v11 = vld [vmem:[#allocation74_spill] sm:$0xff] }
 0xc02   : > { %v4445_v47 = vld [vmem:[#allocation1] sm:$0xff] }
 0xc03   : > { %4247 = vrot.lane.b32.xlu2 %v11402_v29, %s6234_s15  ;;  %4446 = vst [vmem:[#allocation1] ss:$9 sm:$0xff] %v11403_v23  ;;  %v11412_v29 = vld [vmem:[#allocation100_spill] sm:$0xff] }
 0xc04   : > { %4447 = vst [vmem:[#allocation1 + $0x1] ss:$9 sm:$0xff] %v11351_v41 }
 0xc05   : > { %4448 = vst [vmem:[#allocation1 + $0x2] ss:$9 sm:$0xff] %v11370_v50 }
 0xc06   : > { %4449 = vst [vmem:[#allocation1 + $0x3] ss:$9 sm:$0xff] %v11353_v57 }
 0xc07   : > { %4450 = vst [vmem:[#allocation1 + $0x4] ss:$9 sm:$0xff] %v11331_v34 }
 0xc08   : > { %4451 = vst [vmem:[#allocation1 + $0x5] ss:$9 sm:$0xff] %v11404_v38 }
 0xc09   : > { %4452 = vst [vmem:[#allocation1 + $0x6] ss:$9 sm:$0xff] %v11405_v32  ;;  %v11414_v32 = vld [vmem:[#allocation121_spill] sm:$0xff] }
 0xc0a   : > { %4453 = vst [vmem:[#allocation1 + $0x7] ss:$9 sm:$0xff] %v11374_v20  ;;  %v11413_v20 = vld [vmem:[#allocation40_spill] sm:$0xff] }
 0xc11   : > { %v9516_v1 = vld [vmem:[#allocation1] sm:$0xff] }
 0xc12   : > { %4455 = vst [vmem:[#allocation1] ss:$9 sm:$0xff] %v11406_v26  ;;  %v11415_v26 = vld [vmem:[#allocation51_spill] sm:$0xff] }
 0xc13   : > { %4456 = vst [vmem:[#allocation1 + $0x1] ss:$9 sm:$0xff] %v11407_v18 }
 0xc14   : > { %4457 = vst [vmem:[#allocation1 + $0x2] ss:$9 sm:$0xff] %v11408_v28 }
 0xc15   : > { %4458 = vst [vmem:[#allocation1 + $0x3] ss:$9 sm:$0xff] %v11409_v14 }
 0xc16   : > { %4459 = vst [vmem:[#allocation1 + $0x4] ss:$9 sm:$0xff] %v11410_v3 }
 0xc17   : > { %4460 = vst [vmem:[#allocation1 + $0x5] ss:$9 sm:$0xff] %v11411_v11 }
 0xc18   : > { %4461 = vst [vmem:[#allocation1 + $0x6] ss:$9 sm:$0xff] %v11412_v29 }
 0xc19   : > { %4462 = vst [vmem:[#allocation1 + $0x7] ss:$9 sm:$0xff] %v9298_v17 }
 0xc20   : > { %v9526_v59 = vld [vmem:[#allocation1] sm:$0xff] }
 0xc21   : > { %4464 = vst [vmem:[#allocation1] ss:$9 sm:$0xff] %v11413_v20  ;;  %v11416_v20 = vld [vmem:[#allocation23_spill] sm:$0xff] }
 0xc22   : > { %4465 = vst [vmem:[#allocation1 + $0x1] ss:$9 sm:$0xff] %v11414_v32 }
 0xc23   : > { %4466 = vst [vmem:[#allocation1 + $0x2] ss:$9 sm:$0xff] %v11415_v26 }
 0xc24   : > { %4467 = vst [vmem:[#allocation1 + $0x3] ss:$9 sm:$0xff] %v9397_v12  ;;  %v11417_v12 = vld [vmem:[#allocation42_spill] sm:$0xff] }
 0xc25   : > { %4468 = vst [vmem:[#allocation1 + $0x4] ss:$9 sm:$0xff] %v9401_v16 }
 0xc26   : > { %4469 = vst [vmem:[#allocation1 + $0x5] ss:$9 sm:$0xff] %v9405_v35 }
 0xc27   : > { %4470 = vst [vmem:[#allocation1 + $0x6] ss:$9 sm:$0xff] %v9409_v19  ;;  %v11418_v19 = vld [vmem:[#allocation105_spill] sm:$0xff] }
 0xc28   : > { %4471 = vst [vmem:[#allocation1 + $0x7] ss:$9 sm:$0xff] %v9414_v7  ;;  %v4088_v7 = vshrl.u32 %v11418_v19, 16 }
 0xc2a   : > { %v4090_v16 = vrot.slane %v4088_v7, 7  ;;  %v11425_v7 = vld [vmem:[#allocation116_spill] sm:$0xff] }
 0xc2f   : > { %v9536_v29 = vld [vmem:[#allocation1] sm:$0xff] }
 0xc30   : > { %4555 = vst [vmem:[#allocation1] ss:$9 sm:$0xff] %v8394_v15  ;;  %v11419_v15 = vld [vmem:[#allocation90_spill] sm:$0xff] }
 0xc31   : > { %4557 = vst [vmem:[#allocation1 + $0x1] ss:$9 sm:$0xff] %v8421_v49  ;;  %v4091_v49 = vshll.u32 %v11418_v19, 16 }
 0xc32   : > { %4559 = vst [vmem:[#allocation1 + $0x2] ss:$9 sm:$0xff] %v11416_v20  ;;  %v11422_v20 = vld [vmem:[#allocation16_spill] sm:$0xff] }
 0xc33   : > { %4561 = vst [vmem:[#allocation1 + $0x3] ss:$9 sm:$0xff] %v8432_v2  ;;  %v4093_v2 = vor.u32 %v4091_v49, %v4090_v16  ;;  %v11429_v49 = vld [vmem:[#allocation111_spill] sm:$0xff] }
 0xc34   : > { %4563 = vst [vmem:[#allocation1 + $0x4] ss:$9 sm:$0xff] %v8438_v60  ;;  %v4507_v60 = vshrl.u32 %v4445_v47, 16 }
 0xc35   : > { %4565 = vst [vmem:[#allocation1 + $0x5] ss:$9 sm:$0xff] %v11417_v12 }
 0xc36   : > { %4567 = vst [vmem:[#allocation1 + $0x6] ss:$9 sm:$0xff] %v8450_v21  ;;  %v11420_v21 = vld [vmem:[#allocation91_spill] sm:$0xff] }
 0xc37   : > { %4569 = vst [vmem:[#allocation1 + $0x7] ss:$9 sm:$0xff] %v8459_v63  ;;  %v11421_v63 = vld [vmem:[#allocation24_spill] sm:$0xff] }
 0xc3e   : > { %v4570_v35 = vld [vmem:[#allocation1] sm:$0xff] }
 0xc3f   : > { %4655 = vrot.lane.b32.xlu1 %v4570_v35, %s6237_s18  ;;  %4572 = vst [vmem:[#allocation1] ss:$9 sm:$0xff] %v8462_v48  ;;  %v4094_v48 = vsel %vm594_vm1, %v11422_v20, %v4093_v2  ;;  %v9559_v35 = vrot.slane %v4507_v60, 7  ;;  %v11430_v60 = vld [vmem:[#allocation119_spill] sm:$0xff]  ;;  %v11432_v20 = vld [vmem:[#allocation46_spill] sm:$0xff] }
 0xc40   : > { %4573 = vst [vmem:[#allocation1 + $0x1] ss:$9 sm:$0xff] %v11419_v15 }
 0xc41   : > { %4574 = vst [vmem:[#allocation1 + $0x2] ss:$9 sm:$0xff] %v8475_v4  ;;  %v4510_v4 = vshll.u32 %v4445_v47, 16 }
 0xc42   : > { %4575 = vst [vmem:[#allocation1 + $0x3] ss:$9 sm:$0xff] %v8482_v61 }
 0xc43   : > { %4576 = vst [vmem:[#allocation1 + $0x4] ss:$9 sm:$0xff] %v11420_v21  ;;  %v4512_v61 = vor.u32 %v4510_v4, %v9559_v35  ;;  %v4095_v21 = vshrl.u32 %v11430_v60, 16 }
 0xc44   : > { %4577 = vst [vmem:[#allocation1 + $0x5] ss:$9 sm:$0xff] %v11421_v63  ;;  %v11431_v63 = vld [vmem:[#allocation29_spill] sm:$0xff] }
 0xc45   : > { %4578 = vst [vmem:[#allocation1 + $0x6] ss:$9 sm:$0xff] %v8498_v55  ;;  %v4513_v55 = vsel %vm594_vm1, %v9495_v6, %v4512_v61  ;;  %v11427_v6 = vld [vmem:[#allocation36_spill] sm:$0xff]  ;;  %v4098_v61 = vshll.u32 %v11430_v60, 16 }
 0xc46   : > { %4579 = vst [vmem:[#allocation1 + $0x7] ss:$9 sm:$0xff] %v8505_v52  ;;  %v11423_v52 = vld [vmem:[#allocation13_spill] sm:$0xff]  ;;  %v3679_v15 = vshll.u32 %v11427_v6, 16 }
 0xc47   : > { %4126 = vrot.lane.b32.xlu1 %v4094_v48, %s6233_s12  ;;  %v11433_v48 = vld [vmem:[#allocation117_spill] sm:$0xff] }
 0xc4d   : > { %v4580_v19 = vld [vmem:[#allocation1] sm:$0xff] }
 0xc4e   : > { %4657 = vrot.lane.b32.xlu0 %v4580_v19, %s6237_s18  ;;  %4582 = vst [vmem:[#allocation1] ss:$9 sm:$0xff] %v8513_v40  ;;  %v11424_v40 = vld [vmem:[#allocation95_spill] sm:$0xff] }
 0xc4f   : > { %4583 = vst [vmem:[#allocation1 + $0x1] ss:$9 sm:$0xff] %v8516_v39  ;;  %4545 = vrot.lane.b32.xlu1 %v4513_v55, %s6236_s17  ;;  %v11426_v39 = vld [vmem:[#allocation4_spill] sm:$0xff]  ;;  %v11434_v55 = vld [vmem:[#allocation50_spill] sm:$0xff] }
 0xc50   : > { %4584 = vst [vmem:[#allocation1 + $0x2] ss:$9 sm:$0xff] %v8502_v58  ;;  %v3683_v12 = vshrl.u32 %v11426_v39, 16  ;;  %v3676_v58 = vshrl.u32 %v11427_v6, 16 }
 0xc51   : > { %4585 = vst [vmem:[#allocation1 + $0x3] ss:$9 sm:$0xff] %v11218_v22 }
 0xc52   : > { %4586 = vst [vmem:[#allocation1 + $0x4] ss:$9 sm:$0xff] %v11265_v24  ;;  %v9581_v22 = vrot.slane %v3683_v12, 7  ;;  %v3678_v24 = vrot.slane %v3676_v58, 7 }
 0xc53   : > { %4587 = vst [vmem:[#allocation1 + $0x5] ss:$9 sm:$0xff] %v11423_v52  ;;  %v4102_v52 = vshrl.u32 %v11434_v55, 16 }
 0xc54   : > { %4588 = vst [vmem:[#allocation1 + $0x6] ss:$9 sm:$0xff] %v11266_v8  ;;  %v11428_v8 = vld [vmem:[#allocation112_spill] sm:$0xff] }
 0xc55   : > { %4589 = vst [vmem:[#allocation1 + $0x7] ss:$9 sm:$0xff] %v11267_v44  ;;  %v3686_v44 = vshll.u32 %v11426_v39, 16  ;;  %v4105_v39 = vshll.u32 %v11434_v55, 16 }
 0xc56   : > { %3956 = vrot.lane.b32.xlu0 %v11424_v40, %s6232_s11 }
 0xc57   : > { %3830 = vrot.lane.b32.xlu1 %v11425_v7, %s6231_s8  ;;  %v3688_v2 = vor.u32 %v3686_v44, %v9581_v22  ;;  %v11435_v7 = vld [vmem:[#allocation49_spill] sm:$0xff] }
 0xc5c   : > { %v4590_v47 = vld [vmem:[#allocation1] sm:$0xff] }
 0xc5d   : > { %4659 = vrot.lane.b32.xlu2 %v4590_v47, %s6237_s18  ;;  %4592 = vst [vmem:[#allocation1] ss:$9 sm:$0xff] %v11268_v5  ;;  %v3681_v5 = vor.u32 %v3679_v15, %v3678_v24  ;;  %v11442_v15 = vld [vmem:[#allocation120_spill] sm:$0xff] }
 0xc5e   : > { %4593 = vst [vmem:[#allocation1 + $0x1] ss:$9 sm:$0xff] %v11269_v43  ;;  %4375 = vrot.lane.b32.xlu0 %v11428_v8, %s6235_s16  ;;  %v3689_v43 = vsel %vm594_vm1, %v3678_v24, %v3688_v2  ;;  %v11441_v8 = vld [vmem:[#allocation28_spill] sm:$0xff] }
 0xc5f   : > { %4594 = vst [vmem:[#allocation1 + $0x2] ss:$9 sm:$0xff] %v11343_v56  ;;  %v4097_v56 = vrot.slane %v4095_v21, 7  ;;  %v3682_v4 = vsel %vm594_vm1, %v11433_v48, %v3681_v5  ;;  %v4531_v48 = vshll.u32 %v9536_v29, 16 }
 0xc60   : > { %4595 = vst [vmem:[#allocation1 + $0x3] ss:$9 sm:$0xff] %v11429_v49  ;;  %v11445_v49 = vld [vmem:[#allocation78_spill] sm:$0xff] }
 0xc61   : > { %4596 = vst [vmem:[#allocation1 + $0x4] ss:$9 sm:$0xff] %v11431_v63  ;;  %v4100_v19 = vor.u32 %v4098_v61, %v4097_v56  ;;  %v4109_v2 = vshrl.u32 %v11445_v49, 16  ;;  %v4112_v21 = vshll.u32 %v11445_v49, 16  ;;  %v4366_v63 = vpop.permute.xlu0 %4365  ;;  %v11470_v49 = vld [vmem:[#allocation18_spill] sm:$0xff] }
 0xc62   : > { %4597 = vst [vmem:[#allocation1 + $0x5] ss:$9 sm:$0xff] %v11432_v20  ;;  %v4528_v20 = vshrl.u32 %v9536_v29, 16 }
 0xc63   : > { %4598 = vst [vmem:[#allocation1 + $0x6] ss:$9 sm:$0xff] %v11274_v25  ;;  %v4101_v25 = vsel %vm594_vm1, %v4090_v16, %v4100_v19  ;;  %v9685_v60 = vrot.slane %v4109_v2, 7 }
 0xc64   : > { %4599 = vst [vmem:[#allocation1 + $0x7] ss:$9 sm:$0xff] %v11275_v36  ;;  %v9608_v36 = vrot.slane %v4102_v52, 7 }
 0xc65   : > { %3711 = vrot.lane.b32.xlu2 %v3689_v43, %s6230_s25  ;;  %v4114_v5 = vor.u32 %v4112_v21, %v9685_v60  ;;  %v11473_v21 = vld [vmem:[#allocation110_spill] sm:$0xff] }
 0xc66   : > { %3709 = vrot.lane.b32.xlu0 %v3682_v4, %s6230_s25  ;;  %v4107_v16 = vor.u32 %v4105_v39, %v9608_v36  ;;  %v6131_v39 = vld [vmem:[%s10235_s5 + $0x8] sm:$0xff] }
 0xc69   : > { %v4368_v61 = vpop.permute.xlu0 %4367 }
 0xc6b   : > { %v4600_v40 = vld [vmem:[#allocation1] sm:$0xff] }
 0xc6c   : > { %4661 = vrot.lane.b32.xlu1 %v4600_v40, %s6237_s18  ;;  %4602 = vst [vmem:[#allocation1] ss:$9 sm:$0xff] %v11241_v53  ;;  %v4514_v53 = vshrl.u32 %v9516_v1, 16  ;;  %v11452_v40 = vld [vmem:[#allocation2_spill] sm:$0xff] }
 0xc6d   : > { %4128 = vrot.lane.b32.xlu2 %v4101_v25, %s6233_s12  ;;  %4603 = vst [vmem:[#allocation1 + $0x1] ss:$9 sm:$0xff] %v8610_v27  ;;  %v4108_v27 = vsel %vm594_vm1, %v4097_v56, %v4107_v16  ;;  %v11449_v56 = vld [vmem:[#allocation26_spill] sm:$0xff]  ;;  %v11453_v25 = vld [vmem:[#allocation3_spill] sm:$0xff] }
 0xc6e   : > { %4604 = vst [vmem:[#allocation1 + $0x2] ss:$9 sm:$0xff] %v11224_v51  ;;  %3958 = vrot.lane.b32.xlu0 %v11435_v7, %s6232_s11  ;;  %v11436_v51 = vld [vmem:[#allocation86_spill] sm:$0xff]  ;;  %v4516_v12 = vrot.slane %v4514_v53, 7 }
 0xc6f   : > { %4605 = vst [vmem:[#allocation1 + $0x3] ss:$9 sm:$0xff] %v11225_v54  ;;  %v11437_v54 = vld [vmem:[#allocation122_spill] sm:$0xff] }
 0xc70   : > { %4606 = vst [vmem:[#allocation1 + $0x4] ss:$9 sm:$0xff] %v11276_v33  ;;  %v4517_v33 = vshll.u32 %v9516_v1, 16  ;;  %v4524_v1 = vshll.u32 %v9526_v59, 16  ;;  %v11454_v7 = vld [vmem:[#allocation34_spill] sm:$0xff] }
 0xc71   : > { %4607 = vst [vmem:[#allocation1 + $0x5] ss:$9 sm:$0xff] %v11277_v42  ;;  %v4521_v42 = vshrl.u32 %v9526_v59, 16  ;;  %v11455_v16 = vld [vmem:[#allocation38_spill] sm:$0xff] }
 0xc72   : > { %4608 = vst [vmem:[#allocation1 + $0x6] ss:$9 sm:$0xff] %v11279_v9  ;;  %v4519_v6 = vor.u32 %v4517_v33, %v4516_v12  ;;  %v11438_v9 = vld [vmem:[#allocation83_spill] sm:$0xff]  ;;  %v11459_v33 = vld [vmem:[#allocation44_spill] sm:$0xff] }
 0xc73   : > { %4609 = vst [vmem:[#allocation1 + $0x7] ss:$9 sm:$0xff] %v11229_v30  ;;  %v9636_v47 = vrot.slane %v4521_v42, 7 }
 0xc74   : > { %3832 = vrot.lane.b32.xlu1 %v11436_v51, %s6231_s8  ;;  %v4520_v30 = vsel %vm594_vm1, %v9559_v35, %v4519_v6  ;;  %v11457_v51 = vld [vmem:[#allocation115_spill] sm:$0xff]  ;;  %v11460_v6 = vld [vmem:[#allocation118_spill] sm:$0xff] }
 0xc75   : > { %4130 = vrot.lane.b32.xlu2 %v4108_v27, %s6233_s12  ;;  %v4526_v24 = vor.u32 %v4524_v1, %v9636_v47  ;;  %v4370_v27 = vpop.permute.xlu0 %4369  ;;  %v4736_v42 = vsel %vm2391_vm6, %v11460_v6, %v11459_v33 }
 0xc76   : > { %3960 = vrot.lane.b32.xlu0 %v11437_v54, %s6232_s11  ;;  %v6130_v54 = vld [vmem:[%s10235_s5] sm:$0xff] }
 0xc77   : > { %v4527_v59 = vsel %vm594_vm1, %v4516_v12, %v4526_v24  ;;  %v11458_v12 = vld [vmem:[#allocation123_spill] sm:$0xff] }
 0xc7a   : > { %v4610_v58 = vld [vmem:[#allocation1] sm:$0xff] }
 0xc7b   : > { %4612 = vst [vmem:[#allocation1] ss:$9 sm:$0xff] %v11317_v13  ;;  %v11439_v13 = vld [vmem:[#allocation82_spill] sm:$0xff] }
 0xc7c   : > { %4249 = vrot.lane.b32.xlu1 %v11438_v9, %s6234_s15  ;;  %4613 = vst [vmem:[#allocation1 + $0x1] ss:$9 sm:$0xff] %v11318_v0  ;;  %v3690_v35 = vshrl.u32 %v11439_v13, 16  ;;  %v9650_v0 = vpop.permute.xlu2 %4241 }
 0xc7d   : > { %4547 = vrot.lane.b32.xlu2 %v4520_v30, %s6236_s17  ;;  %4614 = vst [vmem:[#allocation1 + $0x2] ss:$9 sm:$0xff] %v11365_v37 }
 0xc7e   : > { %4663 = vrot.lane.b32.xlu0 %v4610_v58, %s6237_s18  ;;  %4615 = vst [vmem:[#allocation1 + $0x3] ss:$9 sm:$0xff] %v11366_v10  ;;  %v9652_v37 = vrot.slane %v3690_v35, 7  ;;  %v11440_v10 = vld [vmem:[#allocation31_spill] sm:$0xff]  ;;  %v11461_v58 = vld [vmem:[#allocation88_spill] sm:$0xff] }
 0xc7f   : > { %4616 = vst [vmem:[#allocation1 + $0x4] ss:$9 sm:$0xff] %v11367_v45  ;;  %v3693_v45 = vshll.u32 %v11439_v13, 16  ;;  %v4756_v30 = vsel %vm2416_vm7, %v4736_v42, %v11461_v58  ;;  %v11462_v13 = vmov 0   ;;  %v11486_v58 = vld [vmem:[#allocation58_spill] sm:$0xff] }
 0xc80   : > { %4617 = vst [vmem:[#allocation1 + $0x5] ss:$9 sm:$0xff] %v11347_v62  ;;  %v4776_v1 = vsel %vm2441_vm8, %v4756_v30, %v4366_v63 }
 0xc81   : > { %4618 = vst [vmem:[#allocation1 + $0x6] ss:$9 sm:$0xff] %v11348_v31  ;;  %v3695_v62 = vor.u32 %v3693_v45, %v9652_v37 }
 0xc82   : > { %4619 = vst [vmem:[#allocation1 + $0x7] ss:$9 sm:$0xff] %v11326_v46 }
 0xc83   : > { %v3696_v44 = vsel %vm594_vm1, %v9581_v22, %v3695_v62  ;;  %v11444_v22 = vld [vmem:[#allocation61_spill] sm:$0xff]  ;;  %v11467_v62 = vld [vmem:[#allocation96_spill] sm:$0xff] }
 0xc84   : > { %4251 = vrot.lane.b32.xlu1 %v11440_v10, %s6234_s15  ;;  %v9663_v46 = vpop.permute.xlu2 %4371  ;;  %v11464_v10 = vld [vmem:[#allocation114_spill] sm:$0xff] }
 0xc85   : > { %4549 = vrot.lane.b32.xlu2 %v4527_v59, %s6236_s17  ;;  %v4542_v59 = vpop.permute.xlu0 %4541 }
 0xc86   : > { %4377 = vrot.lane.b32.xlu0 %v11441_v8, %s6235_s16  ;;  %v11466_v8 = vld [vmem:[#allocation79_spill] sm:$0xff] }
 0xc89   : > { %v4620_v31 = vld [vmem:[#allocation1] sm:$0xff] }
 0xc8a   : > { %4622 = vst [vmem:[#allocation1] ss:$9 sm:$0xff] %v11403_v23  ;;  %v11443_v23 = vld [vmem:[#allocation20_spill] sm:$0xff] }
 0xc8b   : > { %4623 = vst [vmem:[#allocation1 + $0x1] ss:$9 sm:$0xff] %v11351_v41 }
 0xc8c   : > { %3713 = vrot.lane.b32.xlu1 %v3696_v44, %s6230_s25  ;;  %4624 = vst [vmem:[#allocation1 + $0x2] ss:$9 sm:$0xff] %v11370_v50  ;;  %v9678_v41 = vpop.permute.xlu2 %4535  ;;  %v11446_v50 = vld [vmem:[#allocation9_spill] sm:$0xff]  ;;  %v11468_v44 = vld [vmem:[#allocation75_spill] sm:$0xff] }
 0xc8d   : > { %4665 = vrot.lane.b32.xlu2 %v4620_v31, %s6237_s18  ;;  %4625 = vst [vmem:[#allocation1 + $0x3] ss:$9 sm:$0xff] %v11353_v57  ;;  %v11447_v57 = vld [vmem:[#allocation101_spill] sm:$0xff]  ;;  %v4740_v31 = vsel %vm2391_vm6, %v11467_v62, %v11466_v8 }
 0xc8e   : > { %4626 = vst [vmem:[#allocation1 + $0x4] ss:$9 sm:$0xff] %v11331_v34  ;;  %4379 = vrot.lane.b32.xlu0 %v11442_v15, %s6235_s16  ;;  %v11469_v15 = vld [vmem:[#allocation102_spill] sm:$0xff] }
 0xc8f   : > { %4627 = vst [vmem:[#allocation1 + $0x5] ss:$9 sm:$0xff] %v11404_v38  ;;  %v11448_v38 = vld [vmem:[#allocation72_spill] sm:$0xff] }
 0xc90   : > { %4628 = vst [vmem:[#allocation1 + $0x6] ss:$9 sm:$0xff] %v11443_v23  ;;  %v4718_v23 = vsel %vm2366_vm5, %v11469_v15, %v11468_v44  ;;  %v11489_v15 = vld [vmem:[#allocation103_spill] sm:$0xff] }
 0xc91   : > { %4629 = vst [vmem:[#allocation1 + $0x7] ss:$9 sm:$0xff] %v11444_v22  ;;  %v4760_v22 = vsel %vm2416_vm7, %v4740_v31, %v9650_v0 }
 0xc92   : > { %v4780_v2 = vsel %vm2441_vm8, %v4760_v22, %v4370_v27  ;;  %v11483_v27 = vld [vmem:[#allocation89_spill] sm:$0xff] }
 0xc94   : > { %v9695_v43 = vpop.permute.xlu2 %4537 }
 0xc95   : > { %3834 = vrot.lane.b32.xlu2 %v11446_v50, %s6231_s8  ;;  %v11471_v50 = vld [vmem:[#allocation53_spill] sm:$0xff] }
 0xc96   : > { %3962 = vrot.lane.b32.xlu0 %v11447_v57, %s6232_s11 }
 0xc98   : > { %v4630_v34 = vld [vmem:[#allocation1] sm:$0xff] }
 0xc99   : > { %4667 = vrot.lane.b32.xlu1 %v4630_v34, %s6237_s18  ;;  %4632 = vst [vmem:[#allocation1] ss:$9 sm:$0xff] %v11448_v38 }
 0xc9a   : > { %4633 = vst [vmem:[#allocation1 + $0x1] ss:$9 sm:$0xff] %v11407_v18  ;;  %v11450_v18 = vld [vmem:[#allocation100_spill] sm:$0xff] }
 0xc9b   : > { %4634 = vst [vmem:[#allocation1 + $0x2] ss:$9 sm:$0xff] %v11408_v28  ;;  %v4115_v28 = vsel %vm594_vm1, %v9608_v36, %v4114_v5 }
 0xc9c   : > { %4635 = vst [vmem:[#allocation1 + $0x3] ss:$9 sm:$0xff] %v11409_v14  ;;  %v9705_v14 = vrot.slane %v4528_v20, 7  ;;  %v9710_v4 = vpop.permute.xlu2 %4543 }
 0xc9d   : > { %4636 = vst [vmem:[#allocation1 + $0x4] ss:$9 sm:$0xff] %v11410_v3  ;;  %4253 = vrot.lane.b32.xlu2 %v11449_v56, %s6234_s15 }
 0xc9e   : > { %4637 = vst [vmem:[#allocation1 + $0x5] ss:$9 sm:$0xff] %v11411_v11  ;;  %v4533_v3 = vor.u32 %v4531_v48, %v9705_v14  ;;  %v4839_v11 = vld [vmem:[%s10235_s5 + $0x10] sm:$0x3] }
 0xc9f   : > { %4638 = vst [vmem:[#allocation1 + $0x6] ss:$9 sm:$0xff] %v11450_v18  ;;  %v4915_v52 = vunpack.c.l.b16 %v4839_v11 }
 0xca0   : > { %4639 = vst [vmem:[#allocation1 + $0x7] ss:$9 sm:$0xff] %v9298_v17  ;;  %v11451_v17 = vld [vmem:[#allocation40_spill] sm:$0xff]  ;;  %v4534_v55 = vsel %vm594_vm1, %v9636_v47, %v4533_v3  ;;  %vm11463_vm1 = vcmask 228352  }
 0xca1   : > { %4132 = vrot.lane.b32.xlu1 %v4115_v28, %s6233_s12  ;;  %v4918_v29 = vpack.c.b16 %v4915_v52, %v4915_v52  ;;  %v4796_v24 = vsel %vm11463_vm1, %v4776_v1, %v9678_v41  ;;  %vm11472_vm15 = vmmov %vm11463_vm1 }
 0xca2   : > { %vm11475_vm12 = vmmov %vm11463_vm1 }
 0xca3   : > { %v4949_v36 = vsel %vm2661_vm11, %v4918_v29, 0  ;;  %vm11465_vm11 = vcmask 261120  }
 0xca4   : > { %4956 = vmatpush.bf16.msra.mxu1 %v4949_v36  ;;  %6135 = vmatpush.bf16.msra.mxu3 %v4949_v36  ;;  %v9730_v53 = vpop.permute.xlu2 %4247  ;;  %vm11474_vm14 = vmmov %vm11465_vm11 }
 0xca5   : > { %vm11476_vm9 = vmmov %vm11465_vm11 }
 0xca7   : > { %v4640_v19 = vld [vmem:[#allocation1] sm:$0xff] }
 0xca8   : > { %4669 = vrot.lane.b32.xlu0 %v4640_v19, %s6237_s18  ;;  %4642 = vst [vmem:[#allocation1] ss:$9 sm:$0xff] %v11451_v17  ;;  %4957 = vmatpush.bf16.msra.mxu1 %v6131_v39 }
 0xca9   : > { %4643 = vst [vmem:[#allocation1 + $0x1] ss:$9 sm:$0xff] %v11414_v32  ;;  %4551 = vrot.lane.b32.xlu1 %v4534_v55, %s6236_s17  ;;  %v4540_v32 = vpop.permute.xlu1 %4539  ;;  %6136 = vmatpush.bf16.msra.mxu3 %v6131_v39 }
 0xcaa   : > { %4644 = vst [vmem:[#allocation1 + $0x2] ss:$9 sm:$0xff] %v11415_v26  ;;  %v11456_v26 = vld [vmem:[#allocation107_spill] sm:$0xff]  ;;  %v4800_v34 = vsel %vm11472_vm15, %v4780_v2, %v4540_v32  ;;  %vm11490_vm15 = vmmov %vm11480_vm2 }
 0xcab   : > { %4645 = vst [vmem:[#allocation1 + $0x3] ss:$9 sm:$0xff] %v11452_v40 }
 0xcac   : > { %4646 = vst [vmem:[#allocation1 + $0x4] ss:$9 sm:$0xff] %v11453_v25  ;;  %4958 = vmatpush.bf16.msra.mxu1 %v6130_v54 }
 0xcad   : > { %4647 = vst [vmem:[#allocation1 + $0x5] ss:$9 sm:$0xff] %v11454_v7  ;;  %6137 = vmatpush.bf16.msra.mxu3 %v6130_v54  ;;  %v11484_v54 = vld [vmem:[#allocation70_spill] sm:$0xff] }
 0xcae   : > { %4648 = vst [vmem:[#allocation1 + $0x6] ss:$9 sm:$0xff] %v11455_v16 }
 0xcaf   : > { %4649 = vst [vmem:[#allocation1 + $0x7] ss:$9 sm:$0xff] %v11456_v26  ;;  %v11482_v26 = vld [vmem:[#allocation104_spill] sm:$0xff] }
 0xcb0   : > { %4381 = vrot.lane.b32.xlu0 %v11457_v51, %s6235_s16  ;;  %v4682_v51 = vsel %vm2316_vm3, %v11483_v27, %v11482_v26 }
 0xcb1   : > { %3836 = vrot.lane.b32.xlu1 %v11458_v12, %s6231_s8  ;;  %v4656_v47 = vpop.permute.xlu1 %4655  ;;  %v4702_v33 = vsel %vm2341_vm4, %v4682_v51, %v11484_v54  ;;  %v11502_v54 = vld [vmem:[#allocation67_spill] sm:$0xff] }
 0xcb2   : > { %v4816_v45 = vsel %vm11465_vm11, %v4796_v24, %v4656_v47  ;;  %vm11488_vm11 = vmmov %vm11476_vm9 }
 0xcb3   : > { %v4842_v41 = vshll.u32 %v4816_v45, 16 }
 0xcb5   : > { %v4844_v56 = vrot.slane %v4842_v41, 1 }
 0xcb6   : > { %v4650_v9 = vld [vmem:[#allocation1] sm:$0xff] }
 0xcb7   : > { %4671 = vrot.lane.b32.xlu2 %v4650_v9, %s6237_s18  ;;  %4652 = vst [vmem:[#allocation1] ss:$9 sm:$0xff] %v11462_v13  ;;  %v4660_v35 = vpop.permute.xlu2 %4659  ;;  %v11487_v9 = vld [vmem:[#allocation92_spill] sm:$0xff] }
 0xcb8   : > { %3715 = vrot.lane.b32.xlu0 %v9652_v37, %s6230_s25  ;;  %v4738_v37 = vsel %vm2391_vm6, %v4718_v23, %v11470_v49  ;;  %v4820_v63 = vsel %vm11474_vm14, %v4800_v34, %v4660_v35  ;;  %vm11491_vm14 = vmmov %vm11481_vm0  ;;  %v11493_v34 = vld [vmem:[#allocation98_spill] sm:$0xff] }
 0xcb9   : > { %4255 = vrot.lane.b32.xlu1 %v11464_v10, %s6234_s15  ;;  %v4758_v57 = vsel %vm2416_vm7, %v4738_v37, %v11471_v50  ;;  %v4127_v18 = vpop.permute.xlu1 %4126  ;;  %v4853_v3 = vshll.u32 %v4820_v63, 16  ;;  %v4857_v8 = vshrl.u32 %v4820_v63, 16 }
 0xcba   : > { %v4778_v38 = vsel %vm2441_vm8, %v4758_v57, %v4368_v61  ;;  %v4840_v61 = vshrl.u32 %v4816_v45, 16 }
 0xcbb   : > { %v4798_v0 = vsel %vm11475_vm12, %v4778_v38, %v9695_v43  ;;  %v4855_v52 = vrot.slane %v4853_v3, 1  ;;  %vm11492_vm12 = vmmov %vm11463_vm1 }
 0xcbc   : > { %v4845_v11 = vor.u32 %v4844_v56, %v4840_v61 }
 0xcbd   : > { %v4859_v44 = vor.u32 %v4857_v8, %v4855_v52 }
 0xcbe   : > { %v4653_v20 = vld [vmem:[#allocation1] sm:$0xff] }
 0xcbf   : > { %3964 = vrot.lane.b32.xlu2 %v11473_v21, %s6232_s11  ;;  %v9773_v5 = vpop.permute.xlu2 %3711  ;;  %s6026_s11 = sshll.u32 %s6354_s20, 3 }
 0xcc0   : > { %4134 = vrot.lane.b32.xlu0 %v9685_v60, %s6233_s12  ;;  %v4658_v28 = vpop.permute.xlu0 %4657  ;;  %v11478_v60 = vld [vmem:[#allocation43_spill] sm:$0xff] }
 0xcc1   : > { %4673 = vrot.lane.b32.xlu1 %v4653_v20, %s6237_s18  ;;  %v4818_v48 = vsel %vm11476_vm9, %v4798_v0, %v4658_v28  ;;  %v4546_v7 = vpop.permute.xlu1 %4545  ;;  %vm11494_vm9 = vmmov %vm11463_vm1 }
 0xcc2   : > { %v4846_v19 = vshll.u32 %v4818_v48, 16  ;;  %v4850_v55 = vshrl.u32 %v4818_v48, 16  ;;  %v4804_v38 = vsel %vm11494_vm9, %v11493_v34, %v9710_v4 }
 0xcc4   : > { %v4848_v17 = vrot.slane %v4846_v19, 1 }
 0xcc6   : > { %v4852_v29 = vor.u32 %v4850_v55, %v4848_v17  ;;  %v4849_v43 = vsel %vm11477_vm13, %v4845_v11, %v4848_v17  ;;  %vm11495_vm13 = vmmov %vm11488_vm11  ;;  %v11498_v55 = vld [vmem:[#allocation57_spill] sm:$0xff] }
 0xcc7   : > { %4383 = vrot.lane.b32.xlu2 %v11478_v60, %s6235_s16  ;;  %v4129_v40 = vpop.permute.xlu2 %4128  ;;  %6105 = vmatmul.msk.bf16.vlgmr.msra.gmra.mxu1 %vm11479_vm10, %v4849_v43  ;;  %vm11496_vm10 = vmmov %vm11488_vm11  ;;  %s9953_s16 = scalar_lea.vmem %s10237_s7, %s6026_s11 }
 0xcc8   : > { %4553 = vrot.lane.b32.xlu0 %v9705_v14, %s6236_s17  ;;  %v3957_v25 = vpop.permute.xlu0 %3956  ;;  %v4856_v36 = vsel %vm11480_vm2, %v4852_v29, %v4855_v52  ;;  %v11485_v14 = vld [vmem:[#allocation87_spill] sm:$0xff] }
 0xcc9   : > { %v3831_v16 = vpop.permute.xlu1 %3830  ;;  %v4722_v42 = vsel %vm2366_vm5, %v4702_v33, %v11485_v14  ;;  %v4726_v23 = vsel %vm2366_vm5, %v11489_v15, %v3957_v25 }
 0xcca   : > { %v4742_v30 = vsel %vm2391_vm6, %v4722_v42, %v11486_v58 }
 0xccb   : > { %v4762_v47 = vsel %vm2416_vm7, %v4742_v30, %v11487_v9 }
 0xccc   : > { %v4782_v1 = vsel %vm2441_vm8, %v4762_v47, %v9663_v46  ;;  %v4746_v46 = vsel %vm2391_vm6, %v4726_v23, %v4127_v18 }
 0xccd   : > { %v4802_v13 = vsel %vm11463_vm1, %v4782_v1, %v4542_v59  ;;  %v4766_v49 = vsel %vm2416_vm7, %v4746_v46, %v9730_v53  ;;  %vm11497_vm1 = vmmov %vm11480_vm2 }
 0xccf   : > { %v9788_v39 = vpop.permute.xlu2 %4130 }
 0xcd0   : > { %v4376_v32 = vpop.permute.xlu0 %4375 }
 0xcd1   : > { %v4786_v37 = vsel %vm2441_vm8, %v4766_v49, %v4376_v32 }
 0xcd2   : > { %v4806_v57 = vsel %vm11492_vm12, %v4786_v37, %v4546_v7  ;;  %vm11503_vm12 = vmmov %vm11497_vm1 }
 0xcd7   : > { %6106 = vmatmul.msk.bf16.gmra.mxu1 %vm11481_vm0, %v4856_v36  ;;  %v4548_v6 = vpop.permute.xlu2 %4547 }
 0xcd8   : > { %v3710_v12 = vpop.permute.xlu0 %3709 }
 0xcd9   : > { %v4688_v52 = vsel %vm2316_vm3, %v11498_v55, %v3710_v12 }
 0xcda   : > { %v4708_v43 = vsel %vm2341_vm4, %v4688_v52, %v3831_v16  ;;  %v4690_v16 = vsel %vm2316_vm3, %v11502_v54, %v9773_v5  ;;  %v11505_v5 = vld [vmem:[#allocation76_spill] sm:$0xff] }
 0xcde   : > { %v4662_v35 = vpop.permute.xlu1 %4661 }
 0xcdf   : > { %v4822_v24 = vsel %vm11488_vm11, %v4802_v13, %v4662_v35  ;;  %v4550_v31 = vpop.permute.xlu2 %4549  ;;  %vm11499_vm11 = vmmov %vm11481_vm0 }
 0xce0   : > { %v4860_v10 = vshll.u32 %v4822_v24, 16  ;;  %v3959_v45 = vpop.permute.xlu0 %3958  ;;  %v4864_v20 = vshrl.u32 %v4822_v24, 16 }
 0xce1   : > { %v4728_v60 = vsel %vm2366_vm5, %v4708_v43, %v3959_v45 }
 0xce2   : > { %v4862_v62 = vrot.slane %v4860_v10, 1  ;;  %v4748_v25 = vsel %vm2391_vm6, %v4728_v60, %v4129_v40 }
 0xce4   : > { %v4863_v41 = vsel %vm11490_vm15, %v4859_v44, %v4862_v62  ;;  %v4866_v28 = vor.u32 %v4864_v20, %v4862_v62  ;;  %vm11500_vm15 = vmmov %vm11494_vm9 }
 0xce5   : > { %vm11504_vm9 = vmmov %vm11481_vm0 }
 0xce6   : > { %v3833_v22 = vpop.permute.xlu1 %3832 }
 0xce7   : > { %6107 = vmatmul.msk.bf16.gmra.mxu1 %vm11491_vm14, %v4863_v41  ;;  %v4666_v2 = vpop.permute.xlu2 %4665  ;;  %vm11501_vm14 = vmmov %vm11496_vm10  ;;  %v4710_v40 = vsel %vm2341_vm4, %v4690_v16, %v3833_v22 }
 0xce8   : > { %v3961_v59 = vpop.permute.xlu0 %3960  ;;  %v4826_v21 = vsel %vm11495_vm13, %v4806_v57, %v4666_v2  ;;  %vm11506_vm13 = vmmov %vm11500_vm15 }
 0xce9   : > { %v4874_v18 = vshll.u32 %v4826_v21, 16  ;;  %v4878_v42 = vshrl.u32 %v4826_v21, 16  ;;  %v4730_v58 = vsel %vm2366_vm5, %v4710_v40, %v3961_v59 }
 0xceb   : > { %v4876_v19 = vrot.slane %v4874_v18, 1 }
 0xced   : > { %v4880_v47 = vor.u32 %v4878_v42, %v4876_v19 }
 0xcee   : > { %v4250_v50 = vpop.permute.xlu1 %4249 }
 0xcef   : > { %v4768_v7 = vsel %vm2416_vm7, %v4748_v25, %v4250_v50  ;;  %v3835_v33 = vpop.permute.xlu2 %3834 }
 0xcf0   : > { %v4664_v63 = vpop.permute.xlu0 %4663 }
 0xcf1   : > { %v4824_v0 = vsel %vm11496_vm10, %v4804_v38, %v4664_v63 }
 0xcf2   : > { %v4867_v56 = vshll.u32 %v4824_v0, 16  ;;  %v4871_v48 = vshrl.u32 %v4824_v0, 16 }
 0xcf4   : > { %v4869_v53 = vrot.slane %v4867_v56, 1  ;;  %v11510_v56 = vld [vmem:[#allocation94_spill] sm:$0xff] }
 0xcf6   : > { %v4873_v3 = vor.u32 %v4871_v48, %v4869_v53  ;;  %v4870_v61 = vsel %vm11480_vm2, %v4866_v28, %v4869_v53  ;;  %v4252_v11 = vpop.permute.xlu1 %4251  ;;  %vm11507_vm2 = vmmov %vm11497_vm1 }
 0xcf7   : > { %6108 = vmatmul.msk.bf16.gmra.mxu1 %vm11481_vm0, %v4870_v61  ;;  %v4254_v10 = vpop.permute.xlu2 %4253 }
 0xcf8   : > { %v4877_v4 = vsel %vm11497_vm1, %v4873_v3, %v4876_v19  ;;  %v4378_v17 = vpop.permute.xlu0 %4377  ;;  %vm11508_vm1 = vmmov %vm11506_vm13  ;;  %v396_v19 = vld [vmem:[%s6372_s24] sm:$0xff]  }
 0xcf9   : > { %v4788_v32 = vsel %vm2441_vm8, %v4768_v7, %v4378_v17  ;;  %v6188_v17 = vld [vmem:[%s10236_s6] ss:$0 sm:$0xff]  ;;  %v9868_v52 = vunpack.c.l.bf16 %v396_v19 }
 0xcfa   : > { %v4808_v26 = vsel %vm11500_vm15, %v4788_v32, %v4548_v6  ;;  %v4750_v6 = vsel %vm2391_vm6, %v4730_v58, %v9788_v39  ;;  %vm11511_vm15 = vmmov %vm11507_vm2  ;;  %v5134_v43 = vrot.slane %v6188_v17, 2  ;;  %v5135_v60 = vrot.slane %v6188_v17, 4 }
 0xcfb   : > { %v4770_v1 = vsel %vm2416_vm7, %v4750_v6, %v4252_v11  ;;  %v5266_v25 = vrot.slane %v9868_v52, 2  ;;  %v5314_v42 = vrot.slane %v9868_v52, 7 }
 0xcfc   : > { %v5146_v16 = vrot.slane %v5134_v43, 7 }
 0xcfd   : > { %v5316_v58 = vrot.slane %v5266_v25, 7 }
 0xcfe   : > { %v3714_v29 = vpop.permute.xlu1 %3713 }
 0xcff   : > { %v4692_v24 = vsel %vm2316_vm3, %v11505_v5, %v3714_v29 }
 0xd00   : > { %v4380_v36 = vpop.permute.xlu0 %4379  ;;  %v4712_v62 = vsel %vm2341_vm4, %v4692_v24, %v3835_v33  ;;  %v5149_v33 = vrot.slane %v5135_v60, 7  ;;  %v5148_v24 = vrot.slane %v5146_v16, 2 }
 0xd01   : > { %v4790_v35 = vsel %vm2441_vm8, %v4770_v1, %v4380_v36  ;;  %v5267_v36 = vrot.slane %v9868_v52, 4 }
 0xd02   : > { %v4810_v45 = vsel %vm11506_vm13, %v4790_v35, %v4550_v31  ;;  %vm5142_vm13 = vcmask 1046534  }
 0xd07   : > { %6109 = vmatmul.msk.bf16.gmra.mxu1 %vm11499_vm11, %v4877_v4  ;;  %vm11509_vm11 = vmmov %vm11496_vm10 }
 0xd08   : > { %v3963_v14 = vpop.permute.xlu0 %3962 }
 0xd09   : > { %v4732_v15 = vsel %vm2366_vm5, %v4712_v62, %v3963_v14  ;;  %v5268_v14 = vrot.slane %v9868_v52, 6  ;;  %v5318_v62 = vrot.slane %v5316_v58, 2 }
 0xd0b   : > { %v4668_v27 = vpop.permute.xlu1 %4667 }
 0xd0c   : > { %v4828_v51 = vsel %vm11501_vm14, %v4808_v26, %v4668_v27  ;;  %vm11512_vm14 = vmmov %vm11481_vm0  ;;  %v5136_v27 = vrot.slane %v6188_v17, 6 }
 0xd0d   : > { %v4881_v12 = vshll.u32 %v4828_v51, 16  ;;  %v4885_v39 = vshrl.u32 %v4828_v51, 16  ;;  %v9875_v51 = vrot.slane %v6188_v17, 7 }
 0xd0e   : > { %v5152_v1 = vrot.slane %v5136_v27, 7 }
 0xd0f   : > { %v4883_v30 = vrot.slane %v4881_v12, 1  ;;  %v5145_v6 = vrot.slane %v9875_v51, 2 }
 0xd11   : > { %v4884_v13 = vsel %vm11503_vm12, %v4880_v47, %v4883_v30  ;;  %v4887_v41 = vor.u32 %v4885_v39, %v4883_v30  ;;  %v4672_v50 = vpop.permute.xlu2 %4671  ;;  %v5319_v30 = vrot.slane %v5267_v36, 7  ;;  %v5322_v39 = vrot.slane %v5268_v14, 7 }
 0xd13   : > { %v4133_v9 = vpop.permute.xlu1 %4132 }
 0xd14   : > { %v4752_v59 = vsel %vm2391_vm6, %v4732_v15, %v4133_v9 }
 0xd15   : > { %v4772_v31 = vsel %vm2416_vm7, %v4752_v59, %v4254_v10  ;;  %v5151_v10 = vrot.slane %v5149_v33, 2 }
 0xd17   : > { %6110 = vmatmul.msk.bf16.gmra.mxu1 %vm11504_vm9, %v4884_v13  ;;  %vm5140_vm9 = vcmask 1044484   ;;  %v5235_v13 = vunpack.c.h.bf16 %v396_v19 }
 0xd19   : > { %v3965_v53 = vpop.permute.xlu2 %3964 }
 0xd1a   : > { %v4670_v8 = vpop.permute.xlu0 %4669 }
 0xd1b   : > { %v4830_v44 = vsel %vm11496_vm10, %v4810_v45, %v4670_v8  ;;  %v4552_v22 = vpop.permute.xlu1 %4551  ;;  %v5315_v8 = vrot.slane %v5314_v42, 2 }
 0xd1c   : > { %v4888_v23 = vshll.u32 %v4830_v44, 16  ;;  %v4892_v0 = vshrl.u32 %v4830_v44, 16  ;;  %v5321_v44 = vrot.slane %v5319_v30, 2 }
 0xd1e   : > { %v4890_v46 = vrot.slane %v4888_v23, 1  ;;  %v5269_v23 = vrot.slane %v5235_v13, 2 }
 0xd20   : > { %v4891_v49 = vsel %vm11507_vm2, %v4887_v41, %v4890_v46  ;;  %v4894_v28 = vor.u32 %v4892_v0, %v4890_v46  ;;  %v5271_v0 = vrot.slane %v5235_v13, 6 }
 0xd21   : > { %6111 = vmatmul.msk.bf16.vlgmr.msra.gmra.mxu3 %vm11481_vm0, %v4891_v49  ;;  %v4384_v7 = vpop.permute.xlu2 %4383 }
 0xd22   : > { %v4382_v37 = vpop.permute.xlu0 %4381  ;;  %v9919_v60 = vrot.slane %v5271_v0, 7 }
 0xd23   : > { %v4792_v2 = vsel %vm2441_vm8, %v4772_v31, %v4382_v37  ;;  %v3837_v38 = vpop.permute.xlu1 %3836 }
 0xd24   : > { %v4812_v57 = vsel %vm11508_vm1, %v4792_v2, %v4552_v22  ;;  %v5270_v22 = vrot.slane %v5235_v13, 4 }
 0xd25   : > { %v4832_v34 = vsel %vm11509_vm11, %v4812_v57, %v4672_v50  ;;  %v9906_v50 = vrot.slane %v5152_v1, 2  ;;  %vm5844_vm11 = vcmask 24576  }
 0xd26   : > { %v4895_v21 = vshll.u32 %v4832_v34, 16  ;;  %v4899_v9 = vshrl.u32 %v4832_v34, 16 }
 0xd28   : > { %v4897_v20 = vrot.slane %v4895_v21, 1 }
 0xd2a   : > { %v3716_v63 = vpop.permute.xlu0 %3715  ;;  %v4898_v3 = vsel %vm11511_vm15, %v4894_v28, %v4897_v20  ;;  %v4901_v5 = vor.u32 %v4899_v9, %v4897_v20  ;;  %v5325_v20 = vrot.slane %v5235_v13, 7 }
 0xd2b   : > { %v4694_v18 = vsel %vm2316_vm3, %v11510_v56, %v3716_v63  ;;  %v4256_v61 = vpop.permute.xlu1 %4255  ;;  %v398_v63 = vld [vmem:[%s6372_s24 + $0x8] sm:$0xff]   ;;  %v5328_v56 = vrot.slane %v5269_v23, 7 }
 0xd2c   : > { %v4714_v48 = vsel %vm2341_vm4, %v4694_v18, %v3837_v38  ;;  %vm5138_vm4 = vcmask 1042434   ;;  %v5331_v18 = vrot.slane %v5270_v22, 7  ;;  %v5236_v19 = vunpack.c.l.bf16 %v398_v63 }
 0xd2d   : > { %v4734_v4 = vsel %vm2366_vm5, %v4714_v48, %v3965_v53  ;;  %vm11513_vm5 = vcmask 1040384   ;;  %v5327_v52 = vrot.slane %v5325_v20, 2 }
 0xd2e   : > { %vm5139_vm12 = vmor %vm11513_vm5, %vm5138_vm4  ;;  %v5333_v43 = vrot.slane %v5331_v18, 2  ;;  %v5337_v14 = vrot.slane %v5236_v19, 7  ;;  %v5273_v9 = vrot.slane %v5236_v19, 4 }
 0xd31   : > { %6112 = vmatmul.msk.bf16.gmra.mxu3 %vm11512_vm14, %v4898_v3 }
 0xd32   : > { %v4135_v11 = vpop.permute.xlu0 %4134 }
 0xd33   : > { %v4754_v55 = vsel %vm2391_vm6, %v4734_v4, %v4135_v11  ;;  %v4674_v12 = vpop.permute.xlu1 %4673  ;;  %vm11514_vm6 = vmmov %vm11508_vm1  ;;  %vm5841_vm1 = vcmask 31745  }
 0xd34   : > { %v4774_v29 = vsel %vm2416_vm7, %v4754_v55, %v4256_v61  ;;  %vm11515_vm7 = vmmov %vm11496_vm10  ;;  %v5324_v61 = vrot.slane %v5322_v39, 2 }
 0xd35   : > { %v4794_v26 = vsel %vm2441_vm8, %v4774_v29, %v4384_v7  ;;  %vm5141_vm8 = vmor %vm5139_vm12, %vm5140_vm9  ;;  %v5330_v29 = vrot.slane %v5328_v56, 2  ;;  %v5272_v7 = vrot.slane %v5236_v19, 2 }
 0xd36   : > { %vm9882_vm10 = vmor %vm5141_vm8, %vm5142_vm13 }
 0xd37   : > { %v9890_v41 = vsel %vm9882_vm10, %v5145_v6, %v5146_v16  ;;  %v9894_v46 = vsel %vm9882_vm10, %v5148_v24, %v5149_v33  ;;  %v9898_v59 = vsel %vm9882_vm10, %v5151_v10, %v5152_v1  ;;  %v5317_v31 = vsel %vm9882_vm10, %v5315_v8, %v5316_v58 }
 0xd38   : > { %v5320_v37 = vsel %vm9882_vm10, %v5318_v62, %v5319_v30  ;;  %v5323_v2 = vsel %vm9882_vm10, %v5321_v44, %v5322_v39  ;;  %v9917_v55 = vsel %vm9882_vm10, %v9906_v50, %v9875_v51  ;;  %v5326_v36 = vsel %vm9882_vm10, %v5324_v61, %v5325_v20 }
 0xd39   : > { %v5332_v16 = vsel %vm9882_vm10, %v5330_v29, %v5331_v18  ;;  %v5335_v33 = vsel %vm9882_vm10, %v5333_v43, %v9919_v60  ;;  %v5342_v10 = vrot.slane %v5273_v9, 7  ;;  %v5274_v8 = vrot.slane %v5236_v19, 6 }
 0xd3a   : > { %v4554_v32 = vpop.permute.xlu0 %4553 }
 0xd3b   : > { %v4814_v54 = vsel %vm11514_vm6, %v4794_v26, %v4554_v32 }
 0xd3c   : > { %v4834_v40 = vsel %vm11515_vm7, %v4814_v54, %v4674_v12  ;;  %v5329_v54 = vsel %vm9882_vm10, %v5327_v52, %v5328_v56  ;;  %v5336_v56 = vrot.slane %v9919_v60, 2 }
 0xd3d   : > { %v4902_v47 = vshll.u32 %v4834_v40, 16 }
 0xd3f   : > { %v4904_v35 = vrot.slane %v4902_v47, 1  ;;  %v5339_v47 = vrot.slane %v5272_v7, 7 }
 0xd41   : > { %v4905_v15 = vsel %vm11507_vm2, %v4901_v5, %v4904_v35  ;;  %v5338_v35 = vrot.slane %v5337_v14, 2  ;;  %v5341_v24 = vrot.slane %v5339_v47, 2 }
 0xd42   : > { %6113 = vmatmul.msk.bf16.gmra.mxu3 %vm11481_vm0, %v4905_v15 }
 0xd43   : > { %v5340_v15 = vsel %vm9882_vm10, %v5338_v35, %v5339_v47 }
 0xd44   : > { %v4960_v49 = vpop.f32.mrf.mxu1 }
 0xd45   : > { %v5023_v57 = vrot.slane %v4960_v49, 2  ;;  %v5024_v34 = vrot.slane %v4960_v49, 4  ;;  %v5025_v38 = vrot.slane %v4960_v49, 6  ;;  %v5162_v21 = vadd.f32 %v9875_v51, %v4960_v49 }
 0xd47   : > { %v5163_v28 = vadd.f32 %v9890_v41, %v5023_v57  ;;  %v5164_v53 = vadd.f32 %v9894_v46, %v5024_v34  ;;  %v5165_v48 = vadd.f32 %v9898_v59, %v5025_v38  ;;  %v5570_v3 = vadd.f32 %v5314_v42, %v5162_v21 }
 0xd48   : > { %v5345_v57 = vrot.slane %v5274_v8, 7 }
 0xd49   : > { %v5571_v11 = vadd.f32 %v5317_v31, %v5163_v28  ;;  %v5572_v4 = vadd.f32 %v5320_v37, %v5164_v53  ;;  %v5573_v17 = vadd.f32 %v5323_v2, %v5165_v48  ;;  %5714 = vst [vmem:[#allocation1] ss:$4 sm:$0xff] %v5570_v3  ;;  %v5237_v31 = vunpack.c.h.bf16 %v398_v63  ;;  %v400_v48 = vld [vmem:[%s6372_s24 + $0x10] sm:$0xff]  }
 0xd4a   : > { %v5343_v37 = vsel %vm9882_vm10, %v5341_v24, %v5342_v10  ;;  %v5344_v2 = vrot.slane %v5342_v10, 2  ;;  %v5347_v43 = vrot.slane %v5345_v57, 2 }
 0xd4b   : > { %5716 = vst [vmem:[#allocation1 + $0x1] ss:$4 sm:$0xff] %v5571_v11  ;;  %v5275_v0 = vrot.slane %v5237_v31, 2  ;;  %v5277_v3 = vrot.slane %v5237_v31, 6  ;;  %v5276_v61 = vrot.slane %v5237_v31, 4  ;;  %v5348_v19 = vrot.slane %v5237_v31, 7 }
 0xd4c   : > { %5718 = vst [vmem:[#allocation1 + $0x2] ss:$4 sm:$0xff] %v5572_v4  ;;  %v4962_v25 = vpop.f32.mrf.mxu1  ;;  %v5346_v53 = vsel %vm9882_vm10, %v5344_v2, %v5345_v57 }
 0xd4d   : > { %5720 = vst [vmem:[#allocation1 + $0x3] ss:$4 sm:$0xff] %v5573_v17  ;;  %v5026_v32 = vrot.slane %v4962_v25, 2  ;;  %v5027_v26 = vrot.slane %v4962_v25, 4  ;;  %v5028_v27 = vrot.slane %v4962_v25, 6  ;;  %v5166_v12 = vadd.f32 %v9917_v55, %v4962_v25 }
 0xd4e   : > { %v5351_v11 = vrot.slane %v5275_v0, 7  ;;  %v9948_v17 = vunpack.c.l.bf16 %v400_v48  ;;  %v5357_v25 = vrot.slane %v5277_v3, 7 }
 0xd4f   : > { %v5167_v40 = vadd.f32 %v9890_v41, %v5026_v32  ;;  %v5168_v42 = vadd.f32 %v9894_v46, %v5027_v26  ;;  %v5169_v58 = vadd.f32 %v9898_v59, %v5028_v27  ;;  %v5574_v30 = vadd.f32 %v5326_v36, %v5166_v12 }
 0xd50   : > { %v5280_v36 = vrot.slane %v9948_v17, 6  ;;  %v5350_v32 = vrot.slane %v5348_v19, 2  ;;  %v5354_v26 = vrot.slane %v5276_v61, 7  ;;  %v9958_v27 = vunpack.c.h.bf16 %v400_v48 }
 0xd51   : > { %v5575_v6 = vadd.f32 %v5329_v54, %v5167_v40  ;;  %v5576_v1 = vadd.f32 %v5332_v16, %v5168_v42  ;;  %v5577_v13 = vadd.f32 %v5335_v33, %v5169_v58  ;;  %5722 = vst [vmem:[#allocation1 + $0x20] ss:$4 sm:$0xff] %v5574_v30  ;;  %v5353_v12 = vrot.slane %v5351_v11, 2 }
 0xd52   : > { %v5349_v33 = vsel %vm9882_vm10, %v5347_v43, %v5348_v19  ;;  %v5356_v40 = vrot.slane %v5354_v26, 2  ;;  %v5359_v30 = vrot.slane %v5357_v25, 2  ;;  %v9964_v9 = vrot.slane %v5280_v36, 7 }
 0xd53   : > { %5728 = vst [vmem:[#allocation1 + $0x23] ss:$4 sm:$0xff] %v5577_v13  ;;  %v5371_v13 = vrot.slane %v9958_v27, 7  ;;  %v5355_v35 = vsel %vm9882_vm10, %v5353_v12, %v5354_v26  ;;  %v5282_v2 = vrot.slane %v9958_v27, 4  ;;  %v5360_v57 = vrot.slane %v9948_v17, 7 }
 0xd54   : > { %5724 = vst [vmem:[#allocation1 + $0x21] ss:$4 sm:$0xff] %v5575_v6  ;;  %v4965_v5 = vpop.f32.mrf.mxu1  ;;  %v5729_v54 = vld.sshfl [vmem:[#allocation1] sm:$0xff pattern:$0x73625140]  ;;  %v5352_v6 = vsel %vm9882_vm10, %v5350_v32, %v5351_v11  ;;  %v5283_v48 = vrot.slane %v9958_v27, 6 }
 0xd55   : > { %5726 = vst [vmem:[#allocation1 + $0x22] ss:$4 sm:$0xff] %v5576_v1  ;;  %v5029_v62 = vrot.slane %v4965_v5, 2  ;;  %v5030_v44 = vrot.slane %v4965_v5, 4  ;;  %v5031_v39 = vrot.slane %v4965_v5, 6  ;;  %v5170_v20 = vadd.f32 %v9906_v50, %v4965_v5 }
 0xd56   : > { %5842 = vst.msk [vmem:[%s9953_s16 - $0x1] sm:$0xfe] %vm5841_vm1, %v5729_v54  ;;  %v5281_v1 = vrot.slane %v9958_v27, 2  ;;  %v5373_v31 = vrot.slane %v5371_v13, 2  ;;  %v5377_v19 = vrot.slane %v5282_v2, 7  ;;  %v5361_v11 = vrot.slane %v5360_v57, 2 }
 0xd57   : > { %v5171_v23 = vadd.f32 %v9875_v51, %v5029_v62  ;;  %v5172_v22 = vadd.f32 %v9890_v41, %v5030_v44  ;;  %v5173_v49 = vadd.f32 %v9894_v46, %v5031_v39  ;;  %v5578_v52 = vadd.f32 %v5336_v56, %v5170_v20  ;;  %v9987_v56 = vld [vmem:[%s6372_s24 + $0x18] sm:$0xff]  }
 0xd58   : > { %v5278_v62 = vrot.slane %v9948_v17, 2  ;;  %v5358_v44 = vsel %vm9882_vm10, %v5356_v40, %v5357_v25  ;;  %v5279_v39 = vrot.slane %v9948_v17, 4  ;;  %v10000_v26 = vrot.slane %v5283_v48, 7 }
 0xd59   : > { %v5579_v34 = vadd.f32 %v5337_v14, %v5171_v23  ;;  %v5580_v38 = vadd.f32 %v5340_v15, %v5172_v22  ;;  %v5581_v21 = vadd.f32 %v5343_v37, %v5173_v49  ;;  %5731 = vst [vmem:[#allocation1] ss:$4 sm:$0xff] %v5578_v52  ;;  %v5370_v22 = vrot.slane %v9964_v9, 2 }
 0xd5a   : > { %v5374_v37 = vrot.slane %v5281_v1, 7  ;;  %v5365_v20 = vrot.slane %v5279_v39, 7 }
 0xd5b   : > { %v5372_v3 = vsel %vm9882_vm10, %v5370_v22, %v5371_v13 }
 0xd5c   : > { %v5730_v18 = vld.sshfl [vmem:[#allocation1 + $0x20] sm:$0xff pattern:$0x73625140]  ;;  %v4967_v28 = vpop.f32.mrf.mxu1  ;;  %v5375_v61 = vsel %vm9882_vm10, %v5373_v31, %v5374_v37  ;;  %v5367_v43 = vrot.slane %v5365_v20, 2  ;;  %v5376_v25 = vrot.slane %v5374_v37, 2 }
 0xd5d   : > { %5733 = vst [vmem:[#allocation1 + $0x20] ss:$4 sm:$0xff] %v5579_v34  ;;  %v5174_v63 = vadd.f32 %v9898_v59, %v4967_v28  ;;  %v5032_v29 = vrot.slane %v4967_v28, 2  ;;  %v5033_v60 = vrot.slane %v4967_v28, 4  ;;  %v5034_v7 = vrot.slane %v4967_v28, 6 }
 0xd5e   : > { %5734 = vst [vmem:[#allocation1 + $0x21] ss:$4 sm:$0xff] %v5580_v38  ;;  %v5369_v1 = vsel %vm9882_vm10, %v5367_v43, %v9964_v9 }
 0xd5f   : > { %5735 = vst [vmem:[#allocation1 + $0x22] ss:$4 sm:$0xff] %v5581_v21  ;;  %v5582_v4 = vadd.f32 %v5346_v53, %v5174_v63  ;;  %v5175_v16 = vadd.f32 %v9917_v55, %v5032_v29  ;;  %v5176_v42 = vadd.f32 %v9890_v41, %v5033_v60  ;;  %v5177_v47 = vadd.f32 %v9894_v46, %v5034_v7 }
 0xd60   : > { %5843 = vst.msk [vmem:[%s9953_s16 + $0x7] sm:$0xff] %vm2316_vm3, %v5730_v18  ;;  %v5732_v38 = vld.sshfl [vmem:[#allocation1] sm:$0xff pattern:$0x73625140]  ;;  %v5362_v21 = vrot.slane %v5278_v62, 7  ;;  %v9997_v60 = vunpack.c.l.bf16 %v9987_v56 }
 0xd61   : > { %5736 = vst [vmem:[#allocation1 + $0x23] ss:$4 sm:$0xff] %v5582_v4  ;;  %v5583_v10 = vadd.f32 %v5349_v33, %v5175_v16  ;;  %v5584_v15 = vadd.f32 %v5352_v6, %v5176_v42  ;;  %v5585_v49 = vadd.f32 %v5355_v35, %v5177_v47  ;;  %v5379_v16 = vrot.slane %v5377_v19, 2 }
 0xd62   : > { %v5364_v52 = vrot.slane %v5362_v21, 2  ;;  %v5363_v33 = vsel %vm9882_vm10, %v5361_v11, %v5362_v21  ;;  %v5284_v40 = vrot.slane %v9997_v60, 2  ;;  %v5285_v47 = vrot.slane %v9997_v60, 4  ;;  %5845 = vst.msk [vmem:[%s9953_s16 + $0xf] sm:$0x1] %vm5844_vm11, %v5732_v38 }
 0xd63   : > { %5738 = vst [vmem:[#allocation1] ss:$4 sm:$0xff] %v5583_v10  ;;  %v5381_v10 = vsel %vm9882_vm10, %v5379_v16, %v10000_v26  ;;  %v5286_v31 = vrot.slane %v9997_v60, 6 }
 0xd64   : > { %v4970_v14 = vpop.f32.mrf.mxu1  ;;  %5739 = vst [vmem:[#allocation1 + $0x1] ss:$4 sm:$0xff] %v5584_v15  ;;  %v5385_v39 = vrot.slane %v5284_v40, 7  ;;  %v5383_v15 = vrot.slane %v9997_v60, 7 }
 0xd65   : > { %v5035_v58 = vrot.slane %v4970_v14, 2  ;;  %v5178_v5 = vadd.f32 %v9898_v59, %v4970_v14  ;;  %v5036_v18 = vrot.slane %v4970_v14, 4  ;;  %v5037_v63 = vrot.slane %v4970_v14, 6  ;;  %5740 = vst [vmem:[#allocation1 + $0x2] ss:$4 sm:$0xff] %v5585_v49 }
 0xd66   : > { %v5366_v14 = vsel %vm9882_vm10, %v5364_v52, %v5365_v20  ;;  %v5384_v37 = vrot.slane %v5383_v15, 2  ;;  %v5387_v2 = vrot.slane %v5385_v39, 2  ;;  %v5382_v52 = vrot.slane %v10000_v26, 2 }
 0xd67   : > { %v5179_v24 = vadd.f32 %v9906_v50, %v5035_v58  ;;  %v5586_v34 = vadd.f32 %v5358_v44, %v5178_v5  ;;  %v5180_v36 = vadd.f32 %v9875_v51, %v5036_v18  ;;  %v5181_v27 = vadd.f32 %v9890_v41, %v5037_v63 }
 0xd68   : > { %v5737_v8 = vld.sshfl [vmem:[#allocation1 + $0x20] sm:$0xff pattern:$0x73625140]  ;;  %v5241_v18 = vunpack.c.h.bf16 %v9987_v56 }
 0xd69   : > { %v5587_v23 = vadd.f32 %v5359_v30, %v5179_v24  ;;  %5846 = vst.msk [vmem:[%s9953_s16 + $0xf] sm:$0xfe] %vm5841_vm1, %v5737_v8  ;;  %v5378_v30 = vsel %vm9882_vm10, %v5376_v25, %v5377_v19  ;;  %v5588_v6 = vadd.f32 %v5360_v57, %v5180_v36  ;;  %v5589_v5 = vadd.f32 %v5363_v33, %v5181_v27  ;;  %v404_v33 = vld [vmem:[%s6372_s24 + $0x20] sm:$0xff]  }
 0xd6a   : > { %5741 = vst [vmem:[#allocation1 + $0x3] ss:$4 sm:$0xff] %v5586_v34  ;;  %v5287_v11 = vrot.slane %v5241_v18, 2  ;;  %v5289_v56 = vrot.slane %v5241_v18, 6  ;;  %v5394_v25 = vrot.slane %v5241_v18, 7 }
 0xd6b   : > { %5742 = vst [vmem:[#allocation1 + $0x20] ss:$4 sm:$0xff] %v5587_v23  ;;  %v5388_v23 = vrot.slane %v5285_v47, 7  ;;  %v10045_v47 = vunpack.c.l.bf16 %v404_v33 }
 0xd6c   : > { %v4972_v0 = vpop.f32.mrf.mxu1  ;;  %v5403_v16 = vrot.slane %v5289_v56, 7  ;;  %v406_v56 = vld [vmem:[%s6372_s24 + $0x28] sm:$0xff]  }
 0xd6d   : > { %v5039_v28 = vrot.slane %v4972_v0, 4  ;;  %v5040_v53 = vrot.slane %v4972_v0, 6  ;;  %v5038_v29 = vrot.slane %v4972_v0, 2  ;;  %v5182_v54 = vadd.f32 %v9894_v46, %v4972_v0 }
 0xd6e   : > { %v5390_v34 = vrot.slane %v5388_v23, 2 }
 0xd6f   : > { %v5184_v4 = vadd.f32 %v9917_v55, %v5039_v28  ;;  %v5185_v17 = vadd.f32 %v9890_v41, %v5040_v53  ;;  %v5183_v42 = vadd.f32 %v9898_v59, %v5038_v29  ;;  %v5590_v24 = vadd.f32 %v5366_v14, %v5182_v54 }
 0xd70   : > { %v5386_v28 = vsel %vm9882_vm10, %v5384_v37, %v5385_v39  ;;  %v5391_v53 = vrot.slane %v5286_v31, 7  ;;  %v5243_v39 = vunpack.c.h.bf16 %v404_v33 }
 0xd71   : > { %v5592_v7 = vadd.f32 %v5372_v3, %v5184_v4  ;;  %v5593_v32 = vadd.f32 %v5375_v61, %v5185_v17  ;;  %v5743_v8 = vld.sshfl [vmem:[#allocation1] sm:$0xff pattern:$0x73625140]  ;;  %v5591_v9 = vadd.f32 %v5369_v1, %v5183_v42  ;;  %v5389_v61 = vsel %vm9882_vm10, %v5387_v2, %v5388_v23 }
 0xd72   : > { %v5744_v12 = vld.sshfl [vmem:[#allocation1 + $0x20] sm:$0xff pattern:$0x73625140]  ;;  %5745 = vst [vmem:[#allocation1] ss:$4 sm:$0xff] %v5588_v6  ;;  %v5392_v19 = vsel %vm9882_vm10, %v5390_v34, %v5391_v53  ;;  %v5288_v4 = vrot.slane %v5241_v18, 4 }
 0xd73   : > { %5749 = vst [vmem:[#allocation1 + $0x20] ss:$4 sm:$0xff] %v5592_v7  ;;  %v5393_v42 = vrot.slane %v5391_v53, 2  ;;  %v5290_v23 = vrot.slane %v10045_v47, 2  ;;  %v5294_v53 = vrot.slane %v5243_v39, 4 }
 0xd74   : > { %5750 = vst [vmem:[#allocation1 + $0x21] ss:$4 sm:$0xff] %v5593_v32  ;;  %v4975_v58 = vpop.f32.mrf.mxu1  ;;  %v5400_v54 = vrot.slane %v5288_v4, 7 }
 0xd75   : > { %v5041_v13 = vrot.slane %v4975_v58, 2  ;;  %v5186_v35 = vadd.f32 %v9894_v46, %v4975_v58  ;;  %5848 = vst.msk [vmem:[%s9953_s16 + $0x1f] sm:$0x1] %vm5844_vm11, %v5744_v12  ;;  %v5043_v22 = vrot.slane %v4975_v58, 6  ;;  %v5042_v38 = vrot.slane %v4975_v58, 4 }
 0xd76   : > { %5746 = vst [vmem:[#allocation1 + $0x1] ss:$4 sm:$0xff] %v5589_v5  ;;  %v5397_v12 = vrot.slane %v5287_v11, 7 }
 0xd77   : > { %v5187_v62 = vadd.f32 %v9898_v59, %v5041_v13  ;;  %v5594_v44 = vadd.f32 %v5378_v30, %v5186_v35  ;;  %5747 = vst [vmem:[#allocation1 + $0x2] ss:$4 sm:$0xff] %v5590_v24  ;;  %v5189_v21 = vadd.f32 %v9875_v51, %v5043_v22  ;;  %v5188_v17 = vadd.f32 %v9906_v50, %v5042_v38 }
 0xd78   : > { %5748 = vst [vmem:[#allocation1 + $0x3] ss:$4 sm:$0xff] %v5591_v9  ;;  %v5396_v30 = vrot.slane %v5394_v25, 2  ;;  %v5399_v13 = vrot.slane %v5397_v12, 2  ;;  %v5405_v35 = vrot.slane %v5403_v16, 2  ;;  %v5402_v24 = vrot.slane %v5400_v54, 2 }
 0xd79   : > { %v5595_v49 = vadd.f32 %v5381_v10, %v5187_v62  ;;  %5751 = vst [vmem:[#allocation1 + $0x22] ss:$4 sm:$0xff] %v5594_v44  ;;  %v5597_v29 = vadd.f32 %v5383_v15, %v5189_v21  ;;  %v5596_v14 = vadd.f32 %v5382_v52, %v5188_v17  ;;  %v5406_v10 = vrot.slane %v10045_v47, 7 }
 0xd7a   : > { %5847 = vst.msk [vmem:[%s9953_s16 + $0x17] sm:$0xff] %vm2316_vm3, %v5743_v8  ;;  %v5395_v8 = vsel %vm9882_vm10, %v5393_v42, %v5394_v25  ;;  %v5292_v44 = vrot.slane %v10045_v47, 6  ;;  %v5398_v15 = vsel %vm9882_vm10, %v5396_v30, %v5397_v12  ;;  %v5291_v22 = vrot.slane %v10045_v47, 4 }
 0xd7b   : > { %5752 = vst [vmem:[#allocation1 + $0x23] ss:$4 sm:$0xff] %v5595_v49  ;;  %v5401_v31 = vsel %vm9882_vm10, %v5399_v13, %v5400_v54  ;;  %v5404_v34 = vsel %vm9882_vm10, %v5402_v24, %v5403_v16  ;;  %v5407_v38 = vrot.slane %v5406_v10, 2  ;;  %v5417_v21 = vrot.slane %v5243_v39, 7 }
 0xd7c   : > { %v4977_v57 = vpop.f32.mrf.mxu1  ;;  %v5414_v18 = vrot.slane %v5292_v44, 7  ;;  %v10076_v16 = vunpack.c.l.bf16 %v406_v56 }
 0xd7d   : > { %v5044_v0 = vrot.slane %v4977_v57, 2  ;;  %v5045_v20 = vrot.slane %v4977_v57, 4  ;;  %v5190_v48 = vadd.f32 %v9890_v41, %v4977_v57  ;;  %v5046_v32 = vrot.slane %v4977_v57, 6 }
 0xd7e   : > { %v5416_v11 = vrot.slane %v5414_v18, 2  ;;  %v5419_v4 = vrot.slane %v5417_v21, 2 }
 0xd7f   : > { %v5191_v63 = vadd.f32 %v9894_v46, %v5044_v0  ;;  %v5192_v3 = vadd.f32 %v9898_v59, %v5045_v20  ;;  %v5598_v36 = vadd.f32 %v5386_v28, %v5190_v48  ;;  %v5753_v40 = vld.sshfl [vmem:[#allocation1] sm:$0xff pattern:$0x73625140]  ;;  %v5193_v5 = vadd.f32 %v9917_v55, %v5046_v32 }
 0xd80   : > { %5849 = vst.msk [vmem:[%s9953_s16 + $0x1f] sm:$0xfe] %vm5841_vm1, %v5753_v40  ;;  %v5293_v28 = vrot.slane %v5243_v39, 2  ;;  %v5418_v54 = vsel %vm9882_vm10, %v5416_v11, %v5417_v21 }
 0xd81   : > { %v5599_v60 = vadd.f32 %v5389_v61, %v5191_v63  ;;  %v5600_v7 = vadd.f32 %v5392_v19, %v5192_v3  ;;  %5755 = vst [vmem:[#allocation1] ss:$4 sm:$0xff] %v5596_v14  ;;  %v5601_v57 = vadd.f32 %v5395_v8, %v5193_v5  ;;  %v5408_v63 = vrot.slane %v5290_v23, 7 }
 0xd82   : > { %v5754_v43 = vld.sshfl [vmem:[#allocation1 + $0x20] sm:$0xff pattern:$0x73625140]  ;;  %v5411_v3 = vrot.slane %v5291_v22, 7 }
 0xd83   : > { %5757 = vst [vmem:[#allocation1 + $0x20] ss:$4 sm:$0xff] %v5597_v29  ;;  %v5409_v52 = vsel %vm9882_vm10, %v5407_v38, %v5408_v63  ;;  %v5420_v29 = vrot.slane %v5293_v28, 7  ;;  %v5410_v25 = vrot.slane %v5408_v63, 2  ;;  %v5297_v38 = vrot.slane %v10076_v16, 4 }
 0xd84   : > { %5850 = vst.msk [vmem:[%s9953_s16 + $0x27] sm:$0xff] %vm2316_vm3, %v5754_v43  ;;  %v4980_v27 = vpop.f32.mrf.mxu1  ;;  %v5423_v43 = vrot.slane %v5294_v53, 7  ;;  %v5298_v53 = vrot.slane %v10076_v16, 6 }
 0xd85   : > { %5758 = vst [vmem:[#allocation1 + $0x21] ss:$4 sm:$0xff] %v5598_v36  ;;  %v5049_v26 = vrot.slane %v4980_v27, 6  ;;  %v5047_v58 = vrot.slane %v4980_v27, 2  ;;  %v5048_v6 = vrot.slane %v4980_v27, 4  ;;  %v5194_v62 = vadd.f32 %v9890_v41, %v4980_v27 }
 0xd86   : > { %5759 = vst [vmem:[#allocation1 + $0x22] ss:$4 sm:$0xff] %v5599_v60  ;;  %v5413_v36 = vrot.slane %v5411_v3, 2  ;;  %v5422_v30 = vrot.slane %v5420_v29, 2  ;;  %v5434_v63 = vrot.slane %v5297_v38, 7 }
 0xd87   : > { %5760 = vst [vmem:[#allocation1 + $0x23] ss:$4 sm:$0xff] %v5600_v7  ;;  %v5197_v1 = vadd.f32 %v9906_v50, %v5049_v26  ;;  %v5195_v9 = vadd.f32 %v9894_v46, %v5047_v58  ;;  %v5196_v49 = vadd.f32 %v9898_v59, %v5048_v6  ;;  %v5602_v20 = vadd.f32 %v5398_v15, %v5194_v62 }
 0xd88   : > { %v5756_v19 = vld.sshfl [vmem:[#allocation1] sm:$0xff pattern:$0x73625140]  ;;  %v5295_v7 = vrot.slane %v5243_v39, 6  ;;  %v5421_v26 = vsel %vm9882_vm10, %v5419_v4, %v5420_v29  ;;  %v5425_v6 = vrot.slane %v5423_v43, 2  ;;  %v5412_v62 = vsel %vm9882_vm10, %v5410_v25, %v5411_v3 }
 0xd89   : > { %v5605_v37 = vadd.f32 %v5405_v35, %v5197_v1  ;;  %v5603_v48 = vadd.f32 %v5401_v31, %v5195_v9  ;;  %v5604_v61 = vadd.f32 %v5404_v34, %v5196_v49  ;;  %5762 = vst [vmem:[#allocation1] ss:$4 sm:$0xff] %v5601_v57  ;;  %v5415_v44 = vsel %vm9882_vm10, %v5413_v36, %v5414_v18 }
 0xd8a   : > { %5763 = vst [vmem:[#allocation1 + $0x1] ss:$4 sm:$0xff] %v5602_v20  ;;  %v5426_v24 = vrot.slane %v5295_v7, 7  ;;  %v5296_v15 = vrot.slane %v10076_v16, 2  ;;  %v5424_v49 = vsel %vm9882_vm10, %v5422_v30, %v5423_v43  ;;  %v5437_v29 = vrot.slane %v5298_v53, 7 }
 0xd8b   : > { %5764 = vst [vmem:[#allocation1 + $0x2] ss:$4 sm:$0xff] %v5603_v48 }
 0xd8c   : > { %v4982_v2 = vpop.f32.mrf.mxu1  ;;  %5765 = vst [vmem:[#allocation1 + $0x3] ss:$4 sm:$0xff] %v5604_v61  ;;  %v5427_v57 = vsel %vm9882_vm10, %v5425_v6, %v5426_v24  ;;  %v5431_v18 = vrot.slane %v5296_v15, 7  ;;  %v5428_v11 = vrot.slane %v5426_v24, 2  ;;  %v408_v6 = vld [vmem:[%s6372_s24 + $0x30] sm:$0xff]  }
 0xd8d   : > { %v5050_v17 = vrot.slane %v4982_v2, 2  ;;  %v5051_v60 = vrot.slane %v4982_v2, 4  ;;  %v5052_v32 = vrot.slane %v4982_v2, 6  ;;  %v5198_v27 = vadd.f32 %v9875_v51, %v4982_v2  ;;  %5851 = vst.msk [vmem:[%s9953_s16 + $0x2f] sm:$0x1] %vm5844_vm11, %v5756_v19 }
 0xd8e   : > { %v5761_v0 = vld.sshfl [vmem:[#allocation1 + $0x20] sm:$0xff pattern:$0x73625140]  ;;  %v5433_v4 = vrot.slane %v5431_v18, 2 }
 0xd8f   : > { %5852 = vst.msk [vmem:[%s9953_s16 + $0x2f] sm:$0xfe] %vm5841_vm1, %v5761_v0  ;;  %v5199_v42 = vadd.f32 %v9890_v41, %v5050_v17  ;;  %v5200_v13 = vadd.f32 %v9894_v46, %v5051_v60  ;;  %v5201_v8 = vadd.f32 %v9898_v59, %v5052_v32  ;;  %v5429_v0 = vrot.slane %v10076_v16, 7 }
 0xd90   : > { %5766 = vst [vmem:[#allocation1 + $0x20] ss:$4 sm:$0xff] %v5605_v37  ;;  %v5606_v37 = vadd.f32 %v5406_v10, %v5198_v27  ;;  %v5245_v10 = vunpack.c.h.bf16 %v406_v56  ;;  %v5436_v60 = vrot.slane %v5434_v63, 2  ;;  %v5435_v7 = vsel %vm9882_vm10, %v5433_v4, %v5434_v63 }
 0xd91   : > { %v5607_v23 = vadd.f32 %v5409_v52, %v5199_v42  ;;  %v5608_v2 = vadd.f32 %v5412_v62, %v5200_v13  ;;  %v5609_v34 = vadd.f32 %v5415_v44, %v5201_v8  ;;  %v5430_v61 = vrot.slane %v5429_v0, 2 }
 0xd92   : > { %v5299_v52 = vrot.slane %v5245_v10, 2  ;;  %v5300_v27 = vrot.slane %v5245_v10, 4 }
 0xd93   : > { %v5767_v31 = vld.sshfl [vmem:[#allocation1] sm:$0xff pattern:$0x73625140]  ;;  %v5432_v36 = vsel %vm9882_vm10, %v5430_v61, %v5431_v18 }
 0xd94   : > { %v4985_v12 = vpop.f32.mrf.mxu1  ;;  %5853 = vst.msk [vmem:[%s9953_s16 + $0x37] sm:$0xff] %vm2316_vm3, %v5767_v31  ;;  %v5446_v8 = vrot.slane %v5300_v27, 7 }
 0xd95   : > { %v5053_v33 = vrot.slane %v4985_v12, 2  ;;  %v5054_v14 = vrot.slane %v4985_v12, 4  ;;  %v5202_v40 = vadd.f32 %v9917_v55, %v4985_v12  ;;  %v5055_v58 = vrot.slane %v4985_v12, 6  ;;  %5769 = vst [vmem:[#allocation1] ss:$4 sm:$0xff] %v5606_v37 }
 0xd96   : > { %5770 = vst [vmem:[#allocation1 + $0x1] ss:$4 sm:$0xff] %v5607_v23  ;;  %v5440_v12 = vrot.slane %v5245_v10, 7  ;;  %v5448_v23 = vrot.slane %v5446_v8, 2 }
 0xd97   : > { %v5768_v1 = vld.sshfl [vmem:[#allocation1 + $0x20] sm:$0xff pattern:$0x73625140]  ;;  %v5203_v35 = vadd.f32 %v9890_v41, %v5053_v33  ;;  %v5610_v5 = vadd.f32 %v5418_v54, %v5202_v40  ;;  %v5204_v39 = vadd.f32 %v9894_v46, %v5054_v14  ;;  %v5205_v22 = vadd.f32 %v9898_v59, %v5055_v58  ;;  %5771 = vst [vmem:[#allocation1 + $0x2] ss:$4 sm:$0xff] %v5608_v2 }
 0xd98   : > { %5854 = vst.msk [vmem:[%s9953_s16 + $0x3f] sm:$0x1] %vm5844_vm11, %v5768_v1  ;;  %v5439_v14 = vrot.slane %v5437_v29, 2  ;;  %v5443_v40 = vrot.slane %v5299_v52, 7  ;;  %v5438_v58 = vsel %vm9882_vm10, %v5436_v60, %v5437_v29  ;;  %v5301_v1 = vrot.slane %v5245_v10, 6 }
 0xd99   : > { %v5611_v9 = vadd.f32 %v5421_v26, %v5203_v35  ;;  %5773 = vst [vmem:[#allocation1 + $0x20] ss:$4 sm:$0xff] %v5610_v5  ;;  %v5612_v20 = vadd.f32 %v5424_v49, %v5204_v39  ;;  %v5613_v47 = vadd.f32 %v5427_v57, %v5205_v22  ;;  %v5442_v24 = vrot.slane %v5440_v12, 2 }
 0xd9a   : > { %5772 = vst [vmem:[#allocation1 + $0x3] ss:$4 sm:$0xff] %v5609_v34  ;;  %v5445_v62 = vrot.slane %v5443_v40, 2  ;;  %v10121_v39 = vunpack.c.l.bf16 %v408_v6  ;;  %v5449_v22 = vrot.slane %v5301_v1, 7  ;;  %v5441_v31 = vsel %vm9882_vm10, %v5439_v14, %v5440_v12  ;;  %v410_v14 = vld [vmem:[%s6372_s24 + $0x38] sm:$0xff]  }
 0xd9b   : > { %5774 = vst [vmem:[#allocation1 + $0x21] ss:$4 sm:$0xff] %v5611_v9  ;;  %v5444_v57 = vsel %vm9882_vm10, %v5442_v24, %v5443_v40 }
 0xd9c   : > { %v4987_v21 = vpop.f32.mrf.mxu1  ;;  %5775 = vst [vmem:[#allocation1 + $0x22] ss:$4 sm:$0xff] %v5612_v20  ;;  %v5447_v34 = vsel %vm9882_vm10, %v5445_v62, %v5446_v8  ;;  %v5302_v38 = vrot.slane %v10121_v39, 2  ;;  %v5304_v63 = vrot.slane %v10121_v39, 6  ;;  %v5452_v61 = vrot.slane %v10121_v39, 7 }
 0xd9d   : > { %v5056_v28 = vrot.slane %v4987_v21, 2  ;;  %v5057_v48 = vrot.slane %v4987_v21, 4  ;;  %v5058_v3 = vrot.slane %v4987_v21, 6  ;;  %v5206_v19 = vadd.f32 %v9906_v50, %v4987_v21  ;;  %5776 = vst [vmem:[#allocation1 + $0x23] ss:$4 sm:$0xff] %v5613_v47 }
 0xd9e   : > { %v5247_v21 = vunpack.c.h.bf16 %v408_v6  ;;  %v5450_v47 = vsel %vm9882_vm10, %v5448_v23, %v5449_v22  ;;  %v10156_v62 = vunpack.c.l.bf16 %v410_v14 }
 0xd9f   : > { %v5207_v17 = vadd.f32 %v9875_v51, %v5056_v28  ;;  %v5208_v56 = vadd.f32 %v9890_v41, %v5057_v48  ;;  %v5209_v25 = vadd.f32 %v9894_v46, %v5058_v3  ;;  %v5614_v32 = vadd.f32 %v5428_v11, %v5206_v19 }
 0xda0   : > { %v5451_v48 = vrot.slane %v5449_v22, 2  ;;  %v5454_v19 = vrot.slane %v5302_v38, 7  ;;  %v5305_v11 = vrot.slane %v5247_v21, 2  ;;  %v5307_v40 = vrot.slane %v5247_v21, 6 }
 0xda1   : > { %v5615_v54 = vadd.f32 %v5429_v0, %v5207_v17  ;;  %v5777_v16 = vld.sshfl [vmem:[#allocation1] sm:$0xff pattern:$0x73625140]  ;;  %v5616_v26 = vadd.f32 %v5432_v36, %v5208_v56  ;;  %v5617_v30 = vadd.f32 %v5435_v7, %v5209_v25  ;;  %v5303_v0 = vrot.slane %v10121_v39, 4 }
 0xda2   : > { %5855 = vst.msk [vmem:[%s9953_s16 + $0x3f] sm:$0xfe] %vm5841_vm1, %v5777_v16  ;;  %v5306_v17 = vrot.slane %v5247_v21, 4  ;;  %v5460_v36 = vrot.slane %v5304_v63, 7  ;;  %v5463_v7 = vrot.slane %v5247_v21, 7  ;;  %v5456_v27 = vrot.slane %v5454_v19, 2 }
 0xda3   : > { %5779 = vst [vmem:[#allocation1] ss:$4 sm:$0xff] %v5614_v32  ;;  %v5457_v4 = vrot.slane %v5303_v0, 7  ;;  %v5453_v32 = vrot.slane %v5452_v61, 2  ;;  %v5472_v23 = vrot.slane %v5307_v40, 7  ;;  %v5308_v0 = vrot.slane %v10156_v62, 2 }
 0xda4   : > { %v4990_v43 = vpop.f32.mrf.mxu3  ;;  %v5778_v35 = vld.sshfl [vmem:[#allocation1 + $0x20] sm:$0xff pattern:$0x73625140]  ;;  %v5310_v63 = vrot.slane %v10156_v62, 6 }
 0xda5   : > { %v5210_v33 = vadd.f32 %v9898_v59, %v4990_v43  ;;  %v5059_v42 = vrot.slane %v4990_v43, 2  ;;  %v5060_v13 = vrot.slane %v4990_v43, 4  ;;  %v5061_v5 = vrot.slane %v4990_v43, 6  ;;  %5781 = vst [vmem:[#allocation1 + $0x20] ss:$4 sm:$0xff] %v5615_v54 }
 0xda6   : > { %5782 = vst [vmem:[#allocation1 + $0x21] ss:$4 sm:$0xff] %v5616_v26  ;;  %v5459_v54 = vrot.slane %v5457_v4, 2  ;;  %v5469_v26 = vrot.slane %v5306_v17, 7  ;;  %v5455_v6 = vsel %vm9882_vm10, %v5453_v32, %v5454_v19 }
 0xda7   : > { %v5618_v44 = vadd.f32 %v5438_v58, %v5210_v33  ;;  %v5211_v9 = vadd.f32 %v9917_v55, %v5059_v42  ;;  %5783 = vst [vmem:[#allocation1 + $0x22] ss:$4 sm:$0xff] %v5617_v30  ;;  %v5212_v49 = vadd.f32 %v9890_v41, %v5060_v13  ;;  %v5213_v2 = vadd.f32 %v9894_v46, %v5061_v5 }
 0xda8   : > { %5856 = vst.msk [vmem:[%s9953_s16 + $0x47] sm:$0xff] %vm2316_vm3, %v5778_v35  ;;  %v5466_v33 = vrot.slane %v5305_v11, 7  ;;  %v5462_v58 = vrot.slane %v5460_v36, 2  ;;  %v5465_v30 = vrot.slane %v5463_v7, 2  ;;  %v5458_v13 = vsel %vm9882_vm10, %v5456_v27, %v5457_v4 }
 0xda9   : > { %5784 = vst [vmem:[#allocation1 + $0x23] ss:$4 sm:$0xff] %v5618_v44  ;;  %v5619_v20 = vadd.f32 %v5441_v31, %v5211_v9  ;;  %v5620_v10 = vadd.f32 %v5444_v57, %v5212_v49  ;;  %v5621_v3 = vadd.f32 %v5447_v34, %v5213_v2  ;;  %v5461_v8 = vsel %vm9882_vm10, %v5459_v54, %v5460_v36 }
 0xdaa   : > { %v5780_v18 = vld.sshfl [vmem:[#allocation1] sm:$0xff pattern:$0x73625140]  ;;  %v5468_v35 = vrot.slane %v5466_v33, 2  ;;  %v5464_v31 = vsel %vm9882_vm10, %v5462_v58, %v5463_v7  ;;  %v5249_v11 = vunpack.c.h.bf16 %v410_v14 }
 0xdab   : > { %5857 = vst.msk [vmem:[%s9953_s16 + $0x4f] sm:$0x1] %vm5844_vm11, %v5780_v18 }
 0xdac   : > { %v4992_v15 = vpop.f32.mrf.mxu3  ;;  %5786 = vst [vmem:[#allocation1] ss:$4 sm:$0xff] %v5619_v20  ;;  %v5470_v21 = vsel %vm9882_vm10, %v5468_v35, %v5469_v26  ;;  %v5312_v32 = vrot.slane %v5249_v11, 4  ;;  %v5486_v14 = vrot.slane %v5249_v11, 7 }
 0xdad   : > { %v5062_v37 = vrot.slane %v4992_v15, 2  ;;  %v5214_v28 = vadd.f32 %v9898_v59, %v4992_v15  ;;  %5787 = vst [vmem:[#allocation1 + $0x1] ss:$4 sm:$0xff] %v5620_v10  ;;  %v5063_v29 = vrot.slane %v4992_v15, 4  ;;  %v5064_v60 = vrot.slane %v4992_v15, 6 }
 0xdae   : > { %5788 = vst [vmem:[#allocation1 + $0x2] ss:$4 sm:$0xff] %v5621_v3  ;;  %v5471_v15 = vrot.slane %v5469_v26, 2 }
 0xdaf   : > { %v5215_v53 = vadd.f32 %v9906_v50, %v5062_v37  ;;  %v5622_v56 = vadd.f32 %v5450_v47, %v5214_v28  ;;  %v5216_v16 = vadd.f32 %v9875_v51, %v5063_v29  ;;  %v5217_v42 = vadd.f32 %v9890_v41, %v5064_v60 }
 0xdb0   : > { %v5785_v52 = vld.sshfl [vmem:[#allocation1 + $0x20] sm:$0xff pattern:$0x73625140]  ;;  %v5467_v37 = vsel %vm9882_vm10, %v5465_v30, %v5466_v33  ;;  %v5309_v47 = vrot.slane %v10156_v62, 4  ;;  %v5483_v60 = vrot.slane %v5310_v63, 7 }
 0xdb1   : > { %5858 = vst.msk [vmem:[%s9953_s16 + $0x4f] sm:$0xfe] %vm5841_vm1, %v5785_v52  ;;  %v5623_v25 = vadd.f32 %v5451_v48, %v5215_v53  ;;  %v5624_v44 = vadd.f32 %v5452_v61, %v5216_v16  ;;  %v5625_v22 = vadd.f32 %v5455_v6, %v5217_v42  ;;  %v5473_v48 = vsel %vm9882_vm10, %v5471_v15, %v5472_v23 }
 0xdb2   : > { %5789 = vst [vmem:[#allocation1 + $0x3] ss:$4 sm:$0xff] %v5622_v56  ;;  %v5475_v61 = vrot.slane %v10156_v62, 7  ;;  %v5477_v52 = vrot.slane %v5308_v0, 7  ;;  %v5480_v29 = vrot.slane %v5309_v47, 7  ;;  %v5485_v26 = vrot.slane %v5483_v60, 2 }
 0xdb3   : > { %5790 = vst [vmem:[#allocation1 + $0x20] ss:$4 sm:$0xff] %v5623_v25  ;;  %v5311_v25 = vrot.slane %v5249_v11, 2  ;;  %v5313_v42 = vrot.slane %v5249_v11, 6 }
 0xdb4   : > { %v4995_v43 = vpop.f32.mrf.mxu3  ;;  %v5479_v16 = vrot.slane %v5477_v52, 2  ;;  %v5482_v33 = vrot.slane %v5480_v29, 2 }
 0xdb5   : > { %v5065_v12 = vrot.slane %v4995_v43, 2  ;;  %v5066_v1 = vrot.slane %v4995_v43, 4  ;;  %v5067_v5 = vrot.slane %v4995_v43, 6  ;;  %v5218_v39 = vadd.f32 %v9894_v46, %v4995_v43 }
 0xdb6   : > { %v5474_v43 = vrot.slane %v5472_v23, 2  ;;  %v5489_v58 = vrot.slane %v5311_v25, 7  ;;  %v5481_v62 = vsel %vm9882_vm10, %v5479_v16, %v5480_v29  ;;  %v5495_v15 = vrot.slane %v5313_v42, 7 }
 0xdb7   : > { %v5219_v24 = vadd.f32 %v9898_v59, %v5065_v12  ;;  %v5220_v34 = vadd.f32 %v9917_v55, %v5066_v1  ;;  %v5221_v20 = vadd.f32 %v9890_v41, %v5067_v5  ;;  %v5626_v10 = vadd.f32 %v5458_v13, %v5218_v39 }
 0xdb8   : > { %v5476_v12 = vrot.slane %v5475_v61, 2  ;;  %v5492_v13 = vrot.slane %v5312_v32, 7  ;;  %v5487_v39 = vsel %vm9882_vm10, %v5485_v26, %v5486_v14 }
 0xdb9   : > { %v5791_v49 = vld.sshfl [vmem:[#allocation1] sm:$0xff pattern:$0x73625140]  ;;  %v5627_v18 = vadd.f32 %v5461_v8, %v5219_v24  ;;  %v5628_v3 = vadd.f32 %v5464_v31, %v5220_v34  ;;  %v5629_v4 = vadd.f32 %v5467_v37, %v5221_v20 }
 0xdba   : > { %v5792_v57 = vld.sshfl [vmem:[#allocation1 + $0x20] sm:$0xff pattern:$0x73625140]  ;;  %5793 = vst [vmem:[#allocation1] ss:$4 sm:$0xff] %v5624_v44  ;;  %v5478_v24 = vsel %vm9882_vm10, %v5476_v12, %v5477_v52  ;;  %v5488_v44 = vrot.slane %v5486_v14, 2 }
 0xdbb   : > { %5794 = vst [vmem:[#allocation1 + $0x1] ss:$4 sm:$0xff] %v5625_v22  ;;  %v5494_v37 = vrot.slane %v5492_v13, 2 }
 0xdbc   : > { %v4997_v9 = vpop.f32.mrf.mxu3  ;;  %5859 = vst.msk [vmem:[%s9953_s16 + $0x57] sm:$0xff] %vm2316_vm3, %v5791_v49  ;;  %v5490_v20 = vsel %vm9882_vm10, %v5488_v44, %v5489_v58 }
 0xdbd   : > { %v5068_v2 = vrot.slane %v4997_v9, 2  ;;  %v5222_v38 = vadd.f32 %v9894_v46, %v4997_v9  ;;  %v5069_v53 = vrot.slane %v4997_v9, 4  ;;  %5860 = vst.msk [vmem:[%s9953_s16 + $0x5f] sm:$0x1] %vm5844_vm11, %v5792_v57  ;;  %v5070_v36 = vrot.slane %v4997_v9, 6 }
 0xdbe   : > { %5795 = vst [vmem:[#allocation1 + $0x2] ss:$4 sm:$0xff] %v5626_v10  ;;  %v5491_v9 = vrot.slane %v5489_v58, 2 }
 0xdbf   : > { %v5223_v28 = vadd.f32 %v9898_v59, %v5068_v2  ;;  %v5630_v19 = vadd.f32 %v5470_v21, %v5222_v38  ;;  %5796 = vst [vmem:[#allocation1 + $0x3] ss:$4 sm:$0xff] %v5627_v18  ;;  %v5224_v56 = vadd.f32 %v9906_v50, %v5069_v53  ;;  %v5225_v30 = vadd.f32 %v9875_v51, %v5070_v36 }
 0xdc0   : > { %5797 = vst [vmem:[#allocation1 + $0x20] ss:$4 sm:$0xff] %v5628_v3  ;;  %v5484_v51 = vsel %vm9882_vm10, %v5482_v33, %v5483_v60  ;;  %v5493_v47 = vsel %vm9882_vm10, %v5491_v9, %v5492_v13 }
 0xdc1   : > { %v5631_v17 = vadd.f32 %v5473_v48, %v5223_v28  ;;  %5798 = vst [vmem:[#allocation1 + $0x21] ss:$4 sm:$0xff] %v5629_v4  ;;  %v5632_v40 = vadd.f32 %v5474_v43, %v5224_v56  ;;  %v5633_v23 = vadd.f32 %v5475_v61, %v5225_v30 }
 0xdc2   : > { %5799 = vst [vmem:[#allocation1 + $0x22] ss:$4 sm:$0xff] %v5630_v19 }
 0xdc3   : > { %5800 = vst [vmem:[#allocation1 + $0x23] ss:$4 sm:$0xff] %v5631_v17 }
 0xdc5   : > { %v5000_v7 = vpop.f32.mrf.mxu3 }
 0xdc6   : > { %v5071_v27 = vrot.slane %v5000_v7, 2  ;;  %v5072_v54 = vrot.slane %v5000_v7, 4  ;;  %v5073_v6 = vrot.slane %v5000_v7, 6  ;;  %v5226_v1 = vadd.f32 %v9890_v41, %v5000_v7  ;;  %v5801_v35 = vld.sshfl [vmem:[#allocation1] sm:$0xff pattern:$0x73625140] }
 0xdc7   : > { %5861 = vst.msk [vmem:[%s9953_s16 + $0x5f] sm:$0xfe] %vm5841_vm1, %v5801_v35 }
 0xdc8   : > { %v5227_v5 = vadd.f32 %v9894_v46, %v5071_v27  ;;  %v5228_v8 = vadd.f32 %v9898_v59, %v5072_v54  ;;  %5803 = vst [vmem:[#allocation1] ss:$4 sm:$0xff] %v5632_v40  ;;  %v5229_v22 = vadd.f32 %v9917_v55, %v5073_v6  ;;  %v5634_v49 = vadd.f32 %v5478_v24, %v5226_v1 }
 0xdca   : > { %v5802_v2 = vld.sshfl [vmem:[#allocation1 + $0x20] sm:$0xff pattern:$0x73625140]  ;;  %v5635_v57 = vadd.f32 %v5481_v62, %v5227_v5  ;;  %v5636_v0 = vadd.f32 %v5484_v51, %v5228_v8  ;;  %v5637_v10 = vadd.f32 %v5487_v39, %v5229_v22 }
 0xdcb   : > { %5805 = vst [vmem:[#allocation1 + $0x20] ss:$4 sm:$0xff] %v5633_v23 }
 0xdcc   : > { %5862 = vst.msk [vmem:[%s9953_s16 + $0x67] sm:$0xff] %vm2316_vm3, %v5802_v2 }
 0xdcd   : > { %v5002_v31 = vpop.f32.mrf.mxu3  ;;  %5806 = vst [vmem:[#allocation1 + $0x21] ss:$4 sm:$0xff] %v5634_v49 }
 0xdce   : > { %v5074_v34 = vrot.slane %v5002_v31, 2  ;;  %v5075_v38 = vrot.slane %v5002_v31, 4  ;;  %v5230_v21 = vadd.f32 %v9890_v41, %v5002_v31  ;;  %v5076_v18 = vrot.slane %v5002_v31, 6  ;;  %5807 = vst [vmem:[#allocation1 + $0x22] ss:$4 sm:$0xff] %v5635_v57 }
 0xdcf   : > { %v5496_v41 = vsel %vm9882_vm10, %v5494_v37, %v5495_v15  ;;  %v5804_v48 = vld.sshfl [vmem:[#allocation1] sm:$0xff pattern:$0x73625140]  ;;  %5808 = vst [vmem:[#allocation1 + $0x23] ss:$4 sm:$0xff] %v5636_v0 }
 0xdd0   : > { %v5231_v55 = vadd.f32 %v9894_v46, %v5074_v34  ;;  %v5232_v28 = vadd.f32 %v9898_v59, %v5075_v38  ;;  %v5638_v53 = vadd.f32 %v5490_v20, %v5230_v21  ;;  %5863 = vst.msk [vmem:[%s9953_s16 + $0x6f] sm:$0x1] %vm5844_vm11, %v5804_v48  ;;  %v5233_v46 = vadd.f32 %v9906_v50, %v5076_v18 }
 0xdd1   : > { %v5497_v59 = vrot.slane %v5495_v15, 2  ;;  %5810 = vst [vmem:[#allocation1] ss:$4 sm:$0xff] %v5637_v10 }
 0xdd2   : > { %v5639_v63 = vadd.f32 %v5493_v47, %v5231_v55  ;;  %v5640_v3 = vadd.f32 %v5496_v41, %v5232_v28  ;;  %5811 = vst [vmem:[#allocation1 + $0x1] ss:$4 sm:$0xff] %v5638_v53 }
 0xdd3   : > { %v5641_v61 = vadd.f32 %v5497_v59, %v5233_v46 }
 0xdd4   : > { %5812 = vst [vmem:[#allocation1 + $0x2] ss:$4 sm:$0xff] %v5639_v63 }
 0xdd5   : > { %5813 = vst [vmem:[#allocation1 + $0x3] ss:$4 sm:$0xff] %v5640_v3 }
 0xdd6   : > { %v5809_v45 = vld.sshfl [vmem:[#allocation1 + $0x20] sm:$0xff pattern:$0x73625140] }
 0xdd7   : > { %5864 = vst.msk [vmem:[%s9953_s16 + $0x6f] sm:$0xfe] %vm5841_vm1, %v5809_v45 }
 0xdd8   : > { %5814 = vst [vmem:[#allocation1 + $0x20] ss:$4 sm:$0xff] %v5641_v61 }
 0xddc   : > { %v5815_v19 = vld.sshfl [vmem:[#allocation1] sm:$0xff pattern:$0x73625140] }
 0xddd   : > { %5865 = vst.msk [vmem:[%s9953_s16 + $0x77] sm:$0xff] %vm2316_vm3, %v5815_v19 }
 0xddf   : > { %v5816_v11 = vld.sshfl [vmem:[#allocation1 + $0x20] sm:$0xff pattern:$0x73625140] }
 0xde0   : > { %5866 = vst.msk [vmem:[%s9953_s16 + $0x7f] sm:$0x1] %vm5844_vm11, %v5816_v11 }
 0xde1 PF: > { %s17_s28 = sadd.s32 1, %s6227_s28   ;;  %s11518_s24 = smov %s6219_s26 }
 0xde2   : > { %p14_p8 = scmp.ge.s32.totalorder %s17_s28, 6   ;;  %s11519_s25 = smov %s6223_s27 }
 0xde3   : > { %s11520_s26 = smov %s11523_s29  ;;  %s11521_s27 = smov %s11527_s30 }
 0xde4   :  { %16 = sbr.rel (!%p14_p8) target bundleno = 3 (0x3), region = 224 }

</bundles_post_ra>
